<compile_context>
chip_gen: v7x
topology: tpu7x:2x2x1
jax: 0.10.0
libtpu: 0.0.40
codegen_flags: <defaults>
</compile_context>

<pallas_src>
import jax
import jax.numpy as jnp
import numpy as np
from jax.experimental import pallas as pl
from jax.experimental.pallas import tpu as pltpu


def _round_up(x, m):
    return ((x + m - 1) // m) * m


def _make_lstm_tagger_kernel(seq_len, nlayers, hp):
    """Builds a Pallas kernel closed over static sizes (all dims pre-padded).

    Ref order:
      inputs : emb (SP, EP), h0 (L, HP), c0 (L, HP),
               w_ih0 (EP, 4HP), w_hh0 (HP, 4HP),
               w_cat[1..L-1] (2HP, 4HP), b[0..L-1] (1, 4HP),
               w_dec (HP, NP), b_dec (1, NP)
      outputs: decoded (SP, NP), h_n (L, HP), c_n (L, HP)
      scratch: h_s (L, HP), c_s (L, HP), out_s (SP, HP), x0 (SP, 4HP)
    """
    n_cat = nlayers - 1
    HP = hp

    def kernel(*args):
        emb_ref, h0_ref, c0_ref, w_ih0_ref, w_hh0_ref = args[:5]
        base = 5
        w_cat_refs = args[base:base + n_cat]
        base += n_cat
        b_refs = args[base:base + nlayers]
        base += nlayers
        w_dec_ref, b_dec_ref = args[base], args[base + 1]
        base += 2
        decoded_ref, hn_ref, cn_ref = args[base], args[base + 1], args[base + 2]
        base += 3
        h_s, c_s, out_s, x0_s = args[base], args[base + 1], args[base + 2], args[base + 3]

        # Initialize recurrent state; zero the per-step output buffer so padded
        # sequence rows are deterministic (they are sliced off in the wrapper).
        h_s[...] = h0_ref[...]
        c_s[...] = c0_ref[...]
        out_s[...] = jnp.zeros_like(out_s)

        # Hoisted layer-0 input projection: one M=S matmul instead of S tiny M=1
        # matmuls on the serial critical path (bias for layer 0 folded in here).
        x0_s[...] = (
            jnp.dot(emb_ref[...], w_ih0_ref[...], preferred_element_type=jnp.float32)
            + b_refs[0][...]
        )

        def lstm_cell(gates, c_prev):
            # Gate slabs are 128-lane aligned -> whole-vreg slices.
            i_g = jax.nn.sigmoid(gates[:, 0 * HP:1 * HP])
            f_g = jax.nn.sigmoid(gates[:, 1 * HP:2 * HP])
            g_g = jnp.tanh(gates[:, 2 * HP:3 * HP])
            o_g = jax.nn.sigmoid(gates[:, 3 * HP:4 * HP])
            c_new = f_g * c_prev + i_g * g_g
            h_new = o_g * jnp.tanh(c_new)
            return h_new, c_new

        def timestep(t):
            # Layer 0: input projection precomputed; only the recurrent matmul here.
            h_prev = h_s[0:1, :]
            c_prev = c_s[0:1, :]
            gates = x0_s[pl.ds(t, 1), :] + jnp.dot(
                h_prev, w_hh0_ref[...], preferred_element_type=jnp.float32)
            h_new, c_new = lstm_cell(gates, c_prev)
            h_s[0:1, :] = h_new
            c_s[0:1, :] = c_new
            x = h_new
            # Layers >= 1: single fused matmul per (layer, step) on concat([x, h]).
            for l in range(1, nlayers):
                h_prev = h_s[l:l + 1, :]
                c_prev = c_s[l:l + 1, :]
                xh = jnp.concatenate([x, h_prev], axis=1)              # (1, 2HP)
                gates = jnp.dot(xh, w_cat_refs[l - 1][...],
                                preferred_element_type=jnp.float32) + b_refs[l][...]
                h_new, c_new = lstm_cell(gates, c_prev)
                h_s[l:l + 1, :] = h_new
                c_s[l:l + 1, :] = c_new
                x = h_new
            out_s[pl.ds(t, 1), :] = x

        if seq_len <= 32:
            # Fully unroll short static sequences (static indices, cross-step overlap).
            for t in range(seq_len):
                timestep(t)
        else:
            pl.loop(0, seq_len)(timestep)

        # Lane-dense decoder: (SP, HP) @ (HP, NP) + (1, NP)  -> unmasked stores.
        decoded_ref[...] = (
            jnp.dot(out_s[...], w_dec_ref[...], preferred_element_type=jnp.float32)
            + b_dec_ref[...]
        )
        hn_ref[...] = h_s[...]
        cn_ref[...] = c_s[...]

    return kernel


def _pad_gate_cols(w, h, hp):
    """(in_dim, 4h) -> (in_dim, 4hp): place gate k's columns at [k*hp, k*hp+h)."""
    in_dim = w.shape[0]
    out = jnp.zeros((in_dim, 4 * hp), w.dtype)
    for k in range(4):
        out = out.at[:, k * hp:k * hp + h].set(w[:, k * h:(k + 1) * h])
    return out


def _pad_rows(w, rows):
    out = jnp.zeros((rows,) + w.shape[1:], w.dtype)
    return out.at[:w.shape[0]].set(w)


def rnn_tagger_forward(input_ids, hidden, params):
    """Mirrors RNNTagger.forward(input, hidden) for the unidirectional case (bi=False).

    input_ids: int32 (seq,)
    hidden:    tuple (h0, c0), each float32 (nlayers, 1, nhid)
    returns:   decoded float32 (seq*1, ntag), (h_n, c_n) each (nlayers, 1, nhid)
    """
    emb_table = params["emb_table"]
    w_ih_list = params["w_ih"]     # list of (in_dim, 4H) (pre-transposed)
    w_hh_list = params["w_hh"]     # list of (H, 4H)
    b_list = params["b"]           # list of (1, 4H)  (b_ih + b_hh combined)
    w_dec = params["w_dec"]        # (H, ntag)
    b_dec = params["b_dec"]        # (1, ntag)

    seq_len = int(input_ids.shape[0])
    nlayers = len(w_ih_list)
    nemd = emb_table.shape[1]
    nhid = w_hh_list[0].shape[0]
    ntag = w_dec.shape[1]

    HP = _round_up(nhid, 128)
    EP = _round_up(nemd, 128)
    NP = _round_up(ntag, 128)
    SP = _round_up(seq_len, 8)
    f32 = jnp.float32

    # Glue: embedding gather (nn.Embedding lookup) stays in plain JAX; pad for lanes.
    emb = jnp.take(emb_table, input_ids, axis=0).astype(f32)               # (S, E)
    emb_pad = jnp.zeros((SP, EP), f32).at[:seq_len, :nemd].set(emb)

    h0, c0 = hidden
    h0_pad = jnp.zeros((nlayers, HP), f32).at[:, :nhid].set(h0[:, 0, :].astype(f32))
    c0_pad = jnp.zeros((nlayers, HP), f32).at[:, :nhid].set(c0[:, 0, :].astype(f32))

    # TODO(synk): cache this padded-parameter re-layout outside the per-call path.
    w_ih0 = _pad_rows(_pad_gate_cols(w_ih_list[0].astype(f32), nhid, HP), EP)   # (EP,4HP)
    w_hh0 = _pad_rows(_pad_gate_cols(w_hh_list[0].astype(f32), nhid, HP), HP)   # (HP,4HP)
    w_cat = []
    for l in range(1, nlayers):
        wi = _pad_rows(_pad_gate_cols(w_ih_list[l].astype(f32), nhid, HP), HP)
        wh = _pad_rows(_pad_gate_cols(w_hh_list[l].astype(f32), nhid, HP), HP)
        w_cat.append(jnp.concatenate([wi, wh], axis=0))                          # (2HP,4HP)
    b_pad = [_pad_gate_cols(b.astype(f32), nhid, HP) for b in b_list]            # (1,4HP)

    w_dec_pad = jnp.zeros((HP, NP), f32).at[:nhid, :ntag].set(w_dec.astype(f32))
    b_dec_pad = jnp.zeros((1, NP), f32).at[:, :ntag].set(b_dec.astype(f32))

    kernel = _make_lstm_tagger_kernel(seq_len, nlayers, HP)

    args = ([emb_pad, h0_pad, c0_pad, w_ih0, w_hh0] + w_cat + b_pad
            + [w_dec_pad, b_dec_pad])

    vmem = pl.BlockSpec(memory_space=pltpu.MemorySpace.VMEM)

    decoded_pad, h_n_pad, c_n_pad = pl.pallas_call(
        kernel,
        out_shape=(
            jax.ShapeDtypeStruct((SP, NP), f32),
            jax.ShapeDtypeStruct((nlayers, HP), f32),
            jax.ShapeDtypeStruct((nlayers, HP), f32),
        ),
        in_specs=[vmem] * len(args),
        out_specs=(vmem, vmem, vmem),
        scratch_shapes=[
            pltpu.VMEM((nlayers, HP), f32),     # h state
            pltpu.VMEM((nlayers, HP), f32),     # c state
            pltpu.VMEM((SP, HP), f32),          # per-step top-layer outputs
            pltpu.VMEM((SP, 4 * HP), f32),      # hoisted layer-0 input projection
        ],
    )(*args)

    decoded = decoded_pad[:seq_len, :ntag]
    h_n = h_n_pad[:, :nhid][:, None, :]
    c_n = c_n_pad[:, :nhid][:, None, :]
    return decoded, (h_n, c_n)


def _reference_forward(input_ids, hidden, params):
    """Pure-JAX f32 reference matching PyTorch LSTM/Linear semantics."""
    emb = jnp.take(params["emb_table"], input_ids, axis=0)
    h = hidden[0][:, 0, :]
    c = hidden[1][:, 0, :]
    L = h.shape[0]
    H = h.shape[1]
    outs = []
    for t in range(emb.shape[0]):
        x = emb[t:t + 1]
        new_h, new_c = [], []
        for l in range(L):
            gates = (x @ params["w_ih"][l]
                     + h[l:l + 1] @ params["w_hh"][l]
                     + params["b"][l])
            i_g = jax.nn.sigmoid(gates[:, 0 * H:1 * H])
            f_g = jax.nn.sigmoid(gates[:, 1 * H:2 * H])
            g_g = jnp.tanh(gates[:, 2 * H:3 * H])
            o_g = jax.nn.sigmoid(gates[:, 3 * H:4 * H])
            cl = f_g * c[l:l + 1] + i_g * g_g
            hl = o_g * jnp.tanh(cl)
            new_h.append(hl)
            new_c.append(cl)
            x = hl
        h = jnp.concatenate(new_h, axis=0)
        c = jnp.concatenate(new_c, axis=0)
        outs.append(x)
    out = jnp.concatenate(outs, axis=0)
    decoded = out @ params["w_dec"] + params["b_dec"]
    return decoded, (h[:, None, :], c[:, None, :])


def init_params(key, ntoken, nemd, nhid, nlayers, ntag):
    """Deterministic parameter init mirroring RNNTagger.__init__ shapes (bi=False)."""
    keys = jax.random.split(key, 2 + 4 * nlayers + 1)
    ki = iter(keys)

    initrange = 0.1
    emb_table = jax.random.uniform(next(ki), (ntoken, nemd), jnp.float32,
                                   -initrange, initrange)

    k = 1.0 / np.sqrt(nhid)
    w_ih, w_hh, b = [], [], []
    for l in range(nlayers):
        in_dim = nemd if l == 0 else nhid
        # stored pre-transposed: (in_dim, 4H) and (H, 4H); gate order [i, f, g, o]
        w_ih.append(jax.random.uniform(next(ki), (in_dim, 4 * nhid), jnp.float32, -k, k))
        w_hh.append(jax.random.uniform(next(ki), (nhid, 4 * nhid), jnp.float32, -k, k))
        b_ih = jax.random.uniform(next(ki), (4 * nhid,), jnp.float32, -k, k)
        b_hh = jax.random.uniform(next(ki), (4 * nhid,), jnp.float32, -k, k)
        b.append((b_ih + b_hh)[None, :])  # (1, 4H)

    w_dec = jax.random.uniform(next(ki), (nhid, ntag), jnp.float32,
                               -initrange, initrange)  # decoder weight (transposed)
    b_dec = jnp.zeros((1, ntag), jnp.float32)           # decoder.bias.fill_(0)

    return {"emb_table": emb_table, "w_ih": w_ih, "w_hh": w_hh, "b": b,
            "w_dec": w_dec, "b_dec": b_dec}


if __name__ == "__main__":
    # Small shapes consistent with the module's forward (batch is always 1).
    ntoken, nemd, nhid, nlayers, ntag = 50, 32, 32, 2, 8
    seq_len = 8

    key = jax.random.PRNGKey(0)
    pkey, ikey = jax.random.split(key)
    params = init_params(pkey, ntoken, nemd, nhid, nlayers, ntag)

    input_ids = jax.random.randint(ikey, (seq_len,), 0, ntoken, dtype=jnp.int32)

    # init_hidden(): zeros of shape (nlayers * ndir, 1, nhid), ndir = 1
    h0 = jnp.zeros((nlayers, 1, nhid), jnp.float32)
    c0 = jnp.zeros((nlayers, 1, nhid), jnp.float32)

    decoded, (h_n, c_n) = rnn_tagger_forward(input_ids, (h0, c0), params)
    jax.block_until_ready((decoded, h_n, c_n))

    # Sanity check against a pure-JAX reference (tolerance for default MXU precision).
    ref_dec, (ref_h, ref_c) = _reference_forward(input_ids, (h0, c0), params)
    np.testing.assert_allclose(np.asarray(decoded), np.asarray(ref_dec), atol=2e-2, rtol=2e-2)
    np.testing.assert_allclose(np.asarray(h_n), np.asarray(ref_h), atol=2e-2, rtol=2e-2)
    np.testing.assert_allclose(np.asarray(c_n), np.asarray(ref_c), atol=2e-2, rtol=2e-2)

    assert decoded.shape == (seq_len * 1, ntag)
    assert h_n.shape == (nlayers, 1, nhid) and c_n.shape == (nlayers, 1, nhid)

    print("KERNEL_OK")
</pallas_src>

<mosaic_0001>
module attributes {stable_mosaic.version = 11 : i64} {
  func.func @kernel(%arg0: memref<8x128xf32, #tpu.memory_space<vmem>>, %arg1: memref<2x128xf32, #tpu.memory_space<vmem>>, %arg2: memref<2x128xf32, #tpu.memory_space<vmem>>, %arg3: memref<128x512xf32, #tpu.memory_space<vmem>>, %arg4: memref<128x512xf32, #tpu.memory_space<vmem>>, %arg5: memref<256x512xf32, #tpu.memory_space<vmem>>, %arg6: memref<1x512xf32, #tpu.memory_space<vmem>>, %arg7: memref<1x512xf32, #tpu.memory_space<vmem>>, %arg8: memref<128x128xf32, #tpu.memory_space<vmem>>, %arg9: memref<1x128xf32, #tpu.memory_space<vmem>>, %arg10: memref<8x128xf32, #tpu.memory_space<vmem>>, %arg11: memref<2x128xf32, #tpu.memory_space<vmem>>, %arg12: memref<2x128xf32, #tpu.memory_space<vmem>>, %arg13: memref<2x128xf32, #tpu.memory_space<vmem>>, %arg14: memref<2x128xf32, #tpu.memory_space<vmem>>, %arg15: memref<8x128xf32, #tpu.memory_space<vmem>>, %arg16: memref<8x512xf32, #tpu.memory_space<vmem>>) attributes {dimension_semantics = [], scalar_prefetch = 0 : i64, scratch_operands = 4 : i64, tpu.core_type = #tpu.core_type<tc>} {
    %c0 = arith.constant 0 : index
    %c0_0 = arith.constant 0 : index
    %0 = vector.load %arg1[%c0, %c0_0] : memref<2x128xf32, #tpu.memory_space<vmem>>, vector<2x128xf32>
    %c0_1 = arith.constant 0 : index
    %c0_2 = arith.constant 0 : index
    %1 = vector.load %arg13[%c0_1, %c0_2] : memref<2x128xf32, #tpu.memory_space<vmem>>, vector<2x128xf32>
    tpu.vector_store %arg13[%c0_1, %c0_2], %0 {strides = array<i32>} : memref<2x128xf32, #tpu.memory_space<vmem>>, vector<2x128xf32>,
    %c0_3 = arith.constant 0 : index
    %c0_4 = arith.constant 0 : index
    %2 = vector.load %arg2[%c0_3, %c0_4] : memref<2x128xf32, #tpu.memory_space<vmem>>, vector<2x128xf32>
    %c0_5 = arith.constant 0 : index
    %c0_6 = arith.constant 0 : index
    %3 = vector.load %arg14[%c0_5, %c0_6] : memref<2x128xf32, #tpu.memory_space<vmem>>, vector<2x128xf32>
    tpu.vector_store %arg14[%c0_5, %c0_6], %2 {strides = array<i32>} : memref<2x128xf32, #tpu.memory_space<vmem>>, vector<2x128xf32>,
    %cst = arith.constant 0.000000e+00 : f32
    %4 = vector.broadcast %cst : f32 to vector<8x128xf32>
    %c0_7 = arith.constant 0 : index
    %c0_8 = arith.constant 0 : index
    %5 = vector.load %arg15[%c0_7, %c0_8] : memref<8x128xf32, #tpu.memory_space<vmem>>, vector<8x128xf32>
    tpu.vector_store %arg15[%c0_7, %c0_8], %4 {strides = array<i32>} : memref<8x128xf32, #tpu.memory_space<vmem>>, vector<8x128xf32>,
    %c0_9 = arith.constant 0 : index
    %c0_10 = arith.constant 0 : index
    %6 = vector.load %arg0[%c0_9, %c0_10] : memref<8x128xf32, #tpu.memory_space<vmem>>, vector<8x128xf32>
    %c0_11 = arith.constant 0 : index
    %c0_12 = arith.constant 0 : index
    %7 = vector.load %arg3[%c0_11, %c0_12] : memref<128x512xf32, #tpu.memory_space<vmem>>, vector<128x512xf32>
    %cst_13 = arith.constant dense<0.000000e+00> : vector<8x512xf32>
    %8 = tpu.matmul %6, %7, %cst_13 {dimension_numbers = #tpu.dot_dimension_numbers<[1], [0], [0], [1], [0, 0, 1, 1], [], []>} : vector<8x128xf32>, vector<128x512xf32>, vector<8x512xf32> -> vector<8x512xf32>
    %c0_14 = arith.constant 0 : index
    %c0_15 = arith.constant 0 : index
    %9 = vector.load %arg6[%c0_14, %c0_15] : memref<1x512xf32, #tpu.memory_space<vmem>>, vector<1x512xf32>
    %10 = vector.broadcast %9 : vector<1x512xf32> to vector<8x512xf32>
    %11 = arith.addf %8, %10 : vector<8x512xf32>
    %c0_16 = arith.constant 0 : index
    %c0_17 = arith.constant 0 : index
    %12 = vector.load %arg16[%c0_16, %c0_17] : memref<8x512xf32, #tpu.memory_space<vmem>>, vector<8x512xf32>
    tpu.vector_store %arg16[%c0_16, %c0_17], %11 {strides = array<i32>} : memref<8x512xf32, #tpu.memory_space<vmem>>, vector<8x512xf32>,
    %c0_18 = arith.constant 0 : index
    %c0_19 = arith.constant 0 : index
    %13 = vector.load %arg13[%c0_18, %c0_19] : memref<2x128xf32, #tpu.memory_space<vmem>>, vector<1x128xf32>
    %c0_20 = arith.constant 0 : index
    %c0_21 = arith.constant 0 : index
    %14 = vector.load %arg14[%c0_20, %c0_21] : memref<2x128xf32, #tpu.memory_space<vmem>>, vector<1x128xf32>
    %c0_22 = arith.constant 0 : index
    %c0_23 = arith.constant 0 : index
    %15 = vector.load %arg16[%c0_22, %c0_23] : memref<8x512xf32, #tpu.memory_space<vmem>>, vector<1x512xf32>
    %c0_24 = arith.constant 0 : index
    %c0_25 = arith.constant 0 : index
    %16 = vector.load %arg4[%c0_24, %c0_25] : memref<128x512xf32, #tpu.memory_space<vmem>>, vector<128x512xf32>
    %cst_26 = arith.constant dense<0.000000e+00> : vector<1x512xf32>
    %17 = tpu.matmul %13, %16, %cst_26 {dimension_numbers = #tpu.dot_dimension_numbers<[1], [0], [0], [1], [0, 0, 1, 1], [], []>} : vector<1x128xf32>, vector<128x512xf32>, vector<1x512xf32> -> vector<1x512xf32>
    %18 = arith.addf %15, %17 : vector<1x512xf32>
    %19 = vector.extract_strided_slice %18 {offsets = [0, 0], sizes = [1, 128], strides = [1, 1]} : vector<1x512xf32> to vector<1x128xf32>
    %20 = arith.negf %19 : vector<1x128xf32>
    %21 = math.exp %20 : vector<1x128xf32>
    %cst_27 = arith.constant 1.000000e+00 : f32
    %22 = vector.broadcast %cst_27 : f32 to vector<1x128xf32>
    %23 = arith.addf %22, %21 : vector<1x128xf32>
    %24 = arith.divf %22, %23 : vector<1x128xf32>
    %25 = vector.extract_strided_slice %18 {offsets = [0, 128], sizes = [1, 128], strides = [1, 1]} : vector<1x512xf32> to vector<1x128xf32>
    %26 = arith.negf %25 : vector<1x128xf32>
    %27 = math.exp %26 : vector<1x128xf32>
    %cst_28 = arith.constant 1.000000e+00 : f32
    %28 = vector.broadcast %cst_28 : f32 to vector<1x128xf32>
    %29 = arith.addf %28, %27 : vector<1x128xf32>
    %30 = arith.divf %28, %29 : vector<1x128xf32>
    %31 = vector.extract_strided_slice %18 {offsets = [0, 256], sizes = [1, 128], strides = [1, 1]} : vector<1x512xf32> to vector<1x128xf32>
    %32 = math.tanh %31 : vector<1x128xf32>
    %33 = vector.extract_strided_slice %18 {offsets = [0, 384], sizes = [1, 128], strides = [1, 1]} : vector<1x512xf32> to vector<1x128xf32>
    %34 = arith.negf %33 : vector<1x128xf32>
    %35 = math.exp %34 : vector<1x128xf32>
    %cst_29 = arith.constant 1.000000e+00 : f32
    %36 = vector.broadcast %cst_29 : f32 to vector<1x128xf32>
    %37 = arith.addf %36, %35 : vector<1x128xf32>
    %38 = arith.divf %36, %37 : vector<1x128xf32>
    %39 = arith.mulf %30, %14 : vector<1x128xf32>
    %40 = arith.mulf %24, %32 : vector<1x128xf32>
    %41 = arith.addf %39, %40 : vector<1x128xf32>
    %42 = math.tanh %41 : vector<1x128xf32>
    %43 = arith.mulf %38, %42 : vector<1x128xf32>
    %c0_30 = arith.constant 0 : index
    %c0_31 = arith.constant 0 : index
    %44 = vector.load %arg13[%c0_30, %c0_31] : memref<2x128xf32, #tpu.memory_space<vmem>>, vector<1x128xf32>
    tpu.vector_store %arg13[%c0_30, %c0_31], %43 {strides = array<i32>} : memref<2x128xf32, #tpu.memory_space<vmem>>, vector<1x128xf32>,
    %c0_32 = arith.constant 0 : index
    %c0_33 = arith.constant 0 : index
    %45 = vector.load %arg14[%c0_32, %c0_33] : memref<2x128xf32, #tpu.memory_space<vmem>>, vector<1x128xf32>
    tpu.vector_store %arg14[%c0_32, %c0_33], %41 {strides = array<i32>} : memref<2x128xf32, #tpu.memory_space<vmem>>, vector<1x128xf32>,
    %c1 = arith.constant 1 : index
    %c0_34 = arith.constant 0 : index
    %46 = vector.load %arg13[%c1, %c0_34] : memref<2x128xf32, #tpu.memory_space<vmem>>, vector<1x128xf32>
    %c1_35 = arith.constant 1 : index
    %c0_36 = arith.constant 0 : index
    %47 = vector.load %arg14[%c1_35, %c0_36] : memref<2x128xf32, #tpu.memory_space<vmem>>, vector<1x128xf32>
    %48 = tpu.concatenate %43, %46 in 1 : vector<1x128xf32>, vector<1x128xf32> -> vector<1x256xf32>
    %c0_37 = arith.constant 0 : index
    %c0_38 = arith.constant 0 : index
    %49 = vector.load %arg5[%c0_37, %c0_38] : memref<256x512xf32, #tpu.memory_space<vmem>>, vector<256x512xf32>
    %cst_39 = arith.constant dense<0.000000e+00> : vector<1x512xf32>
    %50 = tpu.matmul %48, %49, %cst_39 {dimension_numbers = #tpu.dot_dimension_numbers<[1], [0], [0], [1], [0, 0, 1, 1], [], []>} : vector<1x256xf32>, vector<256x512xf32>, vector<1x512xf32> -> vector<1x512xf32>
    %c0_40 = arith.constant 0 : index
    %c0_41 = arith.constant 0 : index
    %51 = vector.load %arg7[%c0_40, %c0_41] : memref<1x512xf32, #tpu.memory_space<vmem>>, vector<1x512xf32>
    %52 = arith.addf %50, %51 : vector<1x512xf32>
    %53 = vector.extract_strided_slice %52 {offsets = [0, 0], sizes = [1, 128], strides = [1, 1]} : vector<1x512xf32> to vector<1x128xf32>
    %54 = arith.negf %53 : vector<1x128xf32>
    %55 = math.exp %54 : vector<1x128xf32>
    %cst_42 = arith.constant 1.000000e+00 : f32
    %56 = vector.broadcast %cst_42 : f32 to vector<1x128xf32>
    %57 = arith.addf %56, %55 : vector<1x128xf32>
    %58 = arith.divf %56, %57 : vector<1x128xf32>
    %59 = vector.extract_strided_slice %52 {offsets = [0, 128], sizes = [1, 128], strides = [1, 1]} : vector<1x512xf32> to vector<1x128xf32>
    %60 = arith.negf %59 : vector<1x128xf32>
    %61 = math.exp %60 : vector<1x128xf32>
    %cst_43 = arith.constant 1.000000e+00 : f32
    %62 = vector.broadcast %cst_43 : f32 to vector<1x128xf32>
    %63 = arith.addf %62, %61 : vector<1x128xf32>
    %64 = arith.divf %62, %63 : vector<1x128xf32>
    %65 = vector.extract_strided_slice %52 {offsets = [0, 256], sizes = [1, 128], strides = [1, 1]} : vector<1x512xf32> to vector<1x128xf32>
    %66 = math.tanh %65 : vector<1x128xf32>
    %67 = vector.extract_strided_slice %52 {offsets = [0, 384], sizes = [1, 128], strides = [1, 1]} : vector<1x512xf32> to vector<1x128xf32>
    %68 = arith.negf %67 : vector<1x128xf32>
    %69 = math.exp %68 : vector<1x128xf32>
    %cst_44 = arith.constant 1.000000e+00 : f32
    %70 = vector.broadcast %cst_44 : f32 to vector<1x128xf32>
    %71 = arith.addf %70, %69 : vector<1x128xf32>
    %72 = arith.divf %70, %71 : vector<1x128xf32>
    %73 = arith.mulf %64, %47 : vector<1x128xf32>
    %74 = arith.mulf %58, %66 : vector<1x128xf32>
    %75 = arith.addf %73, %74 : vector<1x128xf32>
    %76 = math.tanh %75 : vector<1x128xf32>
    %77 = arith.mulf %72, %76 : vector<1x128xf32>
    %c1_45 = arith.constant 1 : index
    %c0_46 = arith.constant 0 : index
    %78 = vector.load %arg13[%c1_45, %c0_46] : memref<2x128xf32, #tpu.memory_space<vmem>>, vector<1x128xf32>
    tpu.vector_store %arg13[%c1_45, %c0_46], %77 {strides = array<i32>} : memref<2x128xf32, #tpu.memory_space<vmem>>, vector<1x128xf32>,
    %c1_47 = arith.constant 1 : index
    %c0_48 = arith.constant 0 : index
    %79 = vector.load %arg14[%c1_47, %c0_48] : memref<2x128xf32, #tpu.memory_space<vmem>>, vector<1x128xf32>
    tpu.vector_store %arg14[%c1_47, %c0_48], %75 {strides = array<i32>} : memref<2x128xf32, #tpu.memory_space<vmem>>, vector<1x128xf32>,
    %c0_49 = arith.constant 0 : index
    %c0_50 = arith.constant 0 : index
    %80 = vector.load %arg15[%c0_49, %c0_50] : memref<8x128xf32, #tpu.memory_space<vmem>>, vector<1x128xf32>
    tpu.vector_store %arg15[%c0_49, %c0_50], %77 {strides = array<i32>} : memref<8x128xf32, #tpu.memory_space<vmem>>, vector<1x128xf32>,
    %c0_51 = arith.constant 0 : index
    %c0_52 = arith.constant 0 : index
    %81 = vector.load %arg13[%c0_51, %c0_52] : memref<2x128xf32, #tpu.memory_space<vmem>>, vector<1x128xf32>
    %c0_53 = arith.constant 0 : index
    %c0_54 = arith.constant 0 : index
    %82 = vector.load %arg14[%c0_53, %c0_54] : memref<2x128xf32, #tpu.memory_space<vmem>>, vector<1x128xf32>
    %c1_55 = arith.constant 1 : index
    %c0_56 = arith.constant 0 : index
    %83 = vector.load %arg16[%c1_55, %c0_56] : memref<8x512xf32, #tpu.memory_space<vmem>>, vector<1x512xf32>
    %c0_57 = arith.constant 0 : index
    %c0_58 = arith.constant 0 : index
    %84 = vector.load %arg4[%c0_57, %c0_58] : memref<128x512xf32, #tpu.memory_space<vmem>>, vector<128x512xf32>
    %cst_59 = arith.constant dense<0.000000e+00> : vector<1x512xf32>
    %85 = tpu.matmul %81, %84, %cst_59 {dimension_numbers = #tpu.dot_dimension_numbers<[1], [0], [0], [1], [0, 0, 1, 1], [], []>} : vector<1x128xf32>, vector<128x512xf32>, vector<1x512xf32> -> vector<1x512xf32>
    %86 = arith.addf %83, %85 : vector<1x512xf32>
    %87 = vector.extract_strided_slice %86 {offsets = [0, 0], sizes = [1, 128], strides = [1, 1]} : vector<1x512xf32> to vector<1x128xf32>
    %88 = arith.negf %87 : vector<1x128xf32>
    %89 = math.exp %88 : vector<1x128xf32>
    %cst_60 = arith.constant 1.000000e+00 : f32
    %90 = vector.broadcast %cst_60 : f32 to vector<1x128xf32>
    %91 = arith.addf %90, %89 : vector<1x128xf32>
    %92 = arith.divf %90, %91 : vector<1x128xf32>
    %93 = vector.extract_strided_slice %86 {offsets = [0, 128], sizes = [1, 128], strides = [1, 1]} : vector<1x512xf32> to vector<1x128xf32>
    %94 = arith.negf %93 : vector<1x128xf32>
    %95 = math.exp %94 : vector<1x128xf32>
    %cst_61 = arith.constant 1.000000e+00 : f32
    %96 = vector.broadcast %cst_61 : f32 to vector<1x128xf32>
    %97 = arith.addf %96, %95 : vector<1x128xf32>
    %98 = arith.divf %96, %97 : vector<1x128xf32>
    %99 = vector.extract_strided_slice %86 {offsets = [0, 256], sizes = [1, 128], strides = [1, 1]} : vector<1x512xf32> to vector<1x128xf32>
    %100 = math.tanh %99 : vector<1x128xf32>
    %101 = vector.extract_strided_slice %86 {offsets = [0, 384], sizes = [1, 128], strides = [1, 1]} : vector<1x512xf32> to vector<1x128xf32>
    %102 = arith.negf %101 : vector<1x128xf32>
    %103 = math.exp %102 : vector<1x128xf32>
    %cst_62 = arith.constant 1.000000e+00 : f32
    %104 = vector.broadcast %cst_62 : f32 to vector<1x128xf32>
    %105 = arith.addf %104, %103 : vector<1x128xf32>
    %106 = arith.divf %104, %105 : vector<1x128xf32>
    %107 = arith.mulf %98, %82 : vector<1x128xf32>
    %108 = arith.mulf %92, %100 : vector<1x128xf32>
    %109 = arith.addf %107, %108 : vector<1x128xf32>
    %110 = math.tanh %109 : vector<1x128xf32>
    %111 = arith.mulf %106, %110 : vector<1x128xf32>
    %c0_63 = arith.constant 0 : index
    %c0_64 = arith.constant 0 : index
    %112 = vector.load %arg13[%c0_63, %c0_64] : memref<2x128xf32, #tpu.memory_space<vmem>>, vector<1x128xf32>
    tpu.vector_store %arg13[%c0_63, %c0_64], %111 {strides = array<i32>} : memref<2x128xf32, #tpu.memory_space<vmem>>, vector<1x128xf32>,
    %c0_65 = arith.constant 0 : index
    %c0_66 = arith.constant 0 : index
    %113 = vector.load %arg14[%c0_65, %c0_66] : memref<2x128xf32, #tpu.memory_space<vmem>>, vector<1x128xf32>
    tpu.vector_store %arg14[%c0_65, %c0_66], %109 {strides = array<i32>} : memref<2x128xf32, #tpu.memory_space<vmem>>, vector<1x128xf32>,
    %c1_67 = arith.constant 1 : index
    %c0_68 = arith.constant 0 : index
    %114 = vector.load %arg13[%c1_67, %c0_68] : memref<2x128xf32, #tpu.memory_space<vmem>>, vector<1x128xf32>
    %c1_69 = arith.constant 1 : index
    %c0_70 = arith.constant 0 : index
    %115 = vector.load %arg14[%c1_69, %c0_70] : memref<2x128xf32, #tpu.memory_space<vmem>>, vector<1x128xf32>
    %116 = tpu.concatenate %111, %114 in 1 : vector<1x128xf32>, vector<1x128xf32> -> vector<1x256xf32>
    %c0_71 = arith.constant 0 : index
    %c0_72 = arith.constant 0 : index
    %117 = vector.load %arg5[%c0_71, %c0_72] : memref<256x512xf32, #tpu.memory_space<vmem>>, vector<256x512xf32>
    %cst_73 = arith.constant dense<0.000000e+00> : vector<1x512xf32>
    %118 = tpu.matmul %116, %117, %cst_73 {dimension_numbers = #tpu.dot_dimension_numbers<[1], [0], [0], [1], [0, 0, 1, 1], [], []>} : vector<1x256xf32>, vector<256x512xf32>, vector<1x512xf32> -> vector<1x512xf32>
    %c0_74 = arith.constant 0 : index
    %c0_75 = arith.constant 0 : index
    %119 = vector.load %arg7[%c0_74, %c0_75] : memref<1x512xf32, #tpu.memory_space<vmem>>, vector<1x512xf32>
    %120 = arith.addf %118, %119 : vector<1x512xf32>
    %121 = vector.extract_strided_slice %120 {offsets = [0, 0], sizes = [1, 128], strides = [1, 1]} : vector<1x512xf32> to vector<1x128xf32>
    %122 = arith.negf %121 : vector<1x128xf32>
    %123 = math.exp %122 : vector<1x128xf32>
    %cst_76 = arith.constant 1.000000e+00 : f32
    %124 = vector.broadcast %cst_76 : f32 to vector<1x128xf32>
    %125 = arith.addf %124, %123 : vector<1x128xf32>
    %126 = arith.divf %124, %125 : vector<1x128xf32>
    %127 = vector.extract_strided_slice %120 {offsets = [0, 128], sizes = [1, 128], strides = [1, 1]} : vector<1x512xf32> to vector<1x128xf32>
    %128 = arith.negf %127 : vector<1x128xf32>
    %129 = math.exp %128 : vector<1x128xf32>
    %cst_77 = arith.constant 1.000000e+00 : f32
    %130 = vector.broadcast %cst_77 : f32 to vector<1x128xf32>
    %131 = arith.addf %130, %129 : vector<1x128xf32>
    %132 = arith.divf %130, %131 : vector<1x128xf32>
    %133 = vector.extract_strided_slice %120 {offsets = [0, 256], sizes = [1, 128], strides = [1, 1]} : vector<1x512xf32> to vector<1x128xf32>
    %134 = math.tanh %133 : vector<1x128xf32>
    %135 = vector.extract_strided_slice %120 {offsets = [0, 384], sizes = [1, 128], strides = [1, 1]} : vector<1x512xf32> to vector<1x128xf32>
    %136 = arith.negf %135 : vector<1x128xf32>
    %137 = math.exp %136 : vector<1x128xf32>
    %cst_78 = arith.constant 1.000000e+00 : f32
    %138 = vector.broadcast %cst_78 : f32 to vector<1x128xf32>
    %139 = arith.addf %138, %137 : vector<1x128xf32>
    %140 = arith.divf %138, %139 : vector<1x128xf32>
    %141 = arith.mulf %132, %115 : vector<1x128xf32>
    %142 = arith.mulf %126, %134 : vector<1x128xf32>
    %143 = arith.addf %141, %142 : vector<1x128xf32>
    %144 = math.tanh %143 : vector<1x128xf32>
    %145 = arith.mulf %140, %144 : vector<1x128xf32>
    %c1_79 = arith.constant 1 : index
    %c0_80 = arith.constant 0 : index
    %146 = vector.load %arg13[%c1_79, %c0_80] : memref<2x128xf32, #tpu.memory_space<vmem>>, vector<1x128xf32>
    tpu.vector_store %arg13[%c1_79, %c0_80], %145 {strides = array<i32>} : memref<2x128xf32, #tpu.memory_space<vmem>>, vector<1x128xf32>,
    %c1_81 = arith.constant 1 : index
    %c0_82 = arith.constant 0 : index
    %147 = vector.load %arg14[%c1_81, %c0_82] : memref<2x128xf32, #tpu.memory_space<vmem>>, vector<1x128xf32>
    tpu.vector_store %arg14[%c1_81, %c0_82], %143 {strides = array<i32>} : memref<2x128xf32, #tpu.memory_space<vmem>>, vector<1x128xf32>,
    %c1_83 = arith.constant 1 : index
    %c0_84 = arith.constant 0 : index
    %148 = vector.load %arg15[%c1_83, %c0_84] : memref<8x128xf32, #tpu.memory_space<vmem>>, vector<1x128xf32>
    tpu.vector_store %arg15[%c1_83, %c0_84], %145 {strides = array<i32>} : memref<8x128xf32, #tpu.memory_space<vmem>>, vector<1x128xf32>,
    %c0_85 = arith.constant 0 : index
    %c0_86 = arith.constant 0 : index
    %149 = vector.load %arg13[%c0_85, %c0_86] : memref<2x128xf32, #tpu.memory_space<vmem>>, vector<1x128xf32>
    %c0_87 = arith.constant 0 : index
    %c0_88 = arith.constant 0 : index
    %150 = vector.load %arg14[%c0_87, %c0_88] : memref<2x128xf32, #tpu.memory_space<vmem>>, vector<1x128xf32>
    %c2 = arith.constant 2 : index
    %c0_89 = arith.constant 0 : index
    %151 = vector.load %arg16[%c2, %c0_89] : memref<8x512xf32, #tpu.memory_space<vmem>>, vector<1x512xf32>
    %c0_90 = arith.constant 0 : index
    %c0_91 = arith.constant 0 : index
    %152 = vector.load %arg4[%c0_90, %c0_91] : memref<128x512xf32, #tpu.memory_space<vmem>>, vector<128x512xf32>
    %cst_92 = arith.constant dense<0.000000e+00> : vector<1x512xf32>
    %153 = tpu.matmul %149, %152, %cst_92 {dimension_numbers = #tpu.dot_dimension_numbers<[1], [0], [0], [1], [0, 0, 1, 1], [], []>} : vector<1x128xf32>, vector<128x512xf32>, vector<1x512xf32> -> vector<1x512xf32>
    %154 = arith.addf %151, %153 : vector<1x512xf32>
    %155 = vector.extract_strided_slice %154 {offsets = [0, 0], sizes = [1, 128], strides = [1, 1]} : vector<1x512xf32> to vector<1x128xf32>
    %156 = arith.negf %155 : vector<1x128xf32>
    %157 = math.exp %156 : vector<1x128xf32>
    %cst_93 = arith.constant 1.000000e+00 : f32
    %158 = vector.broadcast %cst_93 : f32 to vector<1x128xf32>
    %159 = arith.addf %158, %157 : vector<1x128xf32>
    %160 = arith.divf %158, %159 : vector<1x128xf32>
    %161 = vector.extract_strided_slice %154 {offsets = [0, 128], sizes = [1, 128], strides = [1, 1]} : vector<1x512xf32> to vector<1x128xf32>
    %162 = arith.negf %161 : vector<1x128xf32>
    %163 = math.exp %162 : vector<1x128xf32>
    %cst_94 = arith.constant 1.000000e+00 : f32
    %164 = vector.broadcast %cst_94 : f32 to vector<1x128xf32>
    %165 = arith.addf %164, %163 : vector<1x128xf32>
    %166 = arith.divf %164, %165 : vector<1x128xf32>
    %167 = vector.extract_strided_slice %154 {offsets = [0, 256], sizes = [1, 128], strides = [1, 1]} : vector<1x512xf32> to vector<1x128xf32>
    %168 = math.tanh %167 : vector<1x128xf32>
    %169 = vector.extract_strided_slice %154 {offsets = [0, 384], sizes = [1, 128], strides = [1, 1]} : vector<1x512xf32> to vector<1x128xf32>
    %170 = arith.negf %169 : vector<1x128xf32>
    %171 = math.exp %170 : vector<1x128xf32>
    %cst_95 = arith.constant 1.000000e+00 : f32
    %172 = vector.broadcast %cst_95 : f32 to vector<1x128xf32>
    %173 = arith.addf %172, %171 : vector<1x128xf32>
    %174 = arith.divf %172, %173 : vector<1x128xf32>
    %175 = arith.mulf %166, %150 : vector<1x128xf32>
    %176 = arith.mulf %160, %168 : vector<1x128xf32>
    %177 = arith.addf %175, %176 : vector<1x128xf32>
    %178 = math.tanh %177 : vector<1x128xf32>
    %179 = arith.mulf %174, %178 : vector<1x128xf32>
    %c0_96 = arith.constant 0 : index
    %c0_97 = arith.constant 0 : index
    %180 = vector.load %arg13[%c0_96, %c0_97] : memref<2x128xf32, #tpu.memory_space<vmem>>, vector<1x128xf32>
    tpu.vector_store %arg13[%c0_96, %c0_97], %179 {strides = array<i32>} : memref<2x128xf32, #tpu.memory_space<vmem>>, vector<1x128xf32>,
    %c0_98 = arith.constant 0 : index
    %c0_99 = arith.constant 0 : index
    %181 = vector.load %arg14[%c0_98, %c0_99] : memref<2x128xf32, #tpu.memory_space<vmem>>, vector<1x128xf32>
    tpu.vector_store %arg14[%c0_98, %c0_99], %177 {strides = array<i32>} : memref<2x128xf32, #tpu.memory_space<vmem>>, vector<1x128xf32>,
    %c1_100 = arith.constant 1 : index
    %c0_101 = arith.constant 0 : index
    %182 = vector.load %arg13[%c1_100, %c0_101] : memref<2x128xf32, #tpu.memory_space<vmem>>, vector<1x128xf32>
    %c1_102 = arith.constant 1 : index
    %c0_103 = arith.constant 0 : index
    %183 = vector.load %arg14[%c1_102, %c0_103] : memref<2x128xf32, #tpu.memory_space<vmem>>, vector<1x128xf32>
    %184 = tpu.concatenate %179, %182 in 1 : vector<1x128xf32>, vector<1x128xf32> -> vector<1x256xf32>
    %c0_104 = arith.constant 0 : index
    %c0_105 = arith.constant 0 : index
    %185 = vector.load %arg5[%c0_104, %c0_105] : memref<256x512xf32, #tpu.memory_space<vmem>>, vector<256x512xf32>
    %cst_106 = arith.constant dense<0.000000e+00> : vector<1x512xf32>
    %186 = tpu.matmul %184, %185, %cst_106 {dimension_numbers = #tpu.dot_dimension_numbers<[1], [0], [0], [1], [0, 0, 1, 1], [], []>} : vector<1x256xf32>, vector<256x512xf32>, vector<1x512xf32> -> vector<1x512xf32>
    %c0_107 = arith.constant 0 : index
    %c0_108 = arith.constant 0 : index
    %187 = vector.load %arg7[%c0_107, %c0_108] : memref<1x512xf32, #tpu.memory_space<vmem>>, vector<1x512xf32>
    %188 = arith.addf %186, %187 : vector<1x512xf32>
    %189 = vector.extract_strided_slice %188 {offsets = [0, 0], sizes = [1, 128], strides = [1, 1]} : vector<1x512xf32> to vector<1x128xf32>
    %190 = arith.negf %189 : vector<1x128xf32>
    %191 = math.exp %190 : vector<1x128xf32>
    %cst_109 = arith.constant 1.000000e+00 : f32
    %192 = vector.broadcast %cst_109 : f32 to vector<1x128xf32>
    %193 = arith.addf %192, %191 : vector<1x128xf32>
    %194 = arith.divf %192, %193 : vector<1x128xf32>
    %195 = vector.extract_strided_slice %188 {offsets = [0, 128], sizes = [1, 128], strides = [1, 1]} : vector<1x512xf32> to vector<1x128xf32>
    %196 = arith.negf %195 : vector<1x128xf32>
    %197 = math.exp %196 : vector<1x128xf32>
    %cst_110 = arith.constant 1.000000e+00 : f32
    %198 = vector.broadcast %cst_110 : f32 to vector<1x128xf32>
    %199 = arith.addf %198, %197 : vector<1x128xf32>
    %200 = arith.divf %198, %199 : vector<1x128xf32>
    %201 = vector.extract_strided_slice %188 {offsets = [0, 256], sizes = [1, 128], strides = [1, 1]} : vector<1x512xf32> to vector<1x128xf32>
    %202 = math.tanh %201 : vector<1x128xf32>
    %203 = vector.extract_strided_slice %188 {offsets = [0, 384], sizes = [1, 128], strides = [1, 1]} : vector<1x512xf32> to vector<1x128xf32>
    %204 = arith.negf %203 : vector<1x128xf32>
    %205 = math.exp %204 : vector<1x128xf32>
    %cst_111 = arith.constant 1.000000e+00 : f32
    %206 = vector.broadcast %cst_111 : f32 to vector<1x128xf32>
    %207 = arith.addf %206, %205 : vector<1x128xf32>
    %208 = arith.divf %206, %207 : vector<1x128xf32>
    %209 = arith.mulf %200, %183 : vector<1x128xf32>
    %210 = arith.mulf %194, %202 : vector<1x128xf32>
    %211 = arith.addf %209, %210 : vector<1x128xf32>
    %212 = math.tanh %211 : vector<1x128xf32>
    %213 = arith.mulf %208, %212 : vector<1x128xf32>
    %c1_112 = arith.constant 1 : index
    %c0_113 = arith.constant 0 : index
    %214 = vector.load %arg13[%c1_112, %c0_113] : memref<2x128xf32, #tpu.memory_space<vmem>>, vector<1x128xf32>
    tpu.vector_store %arg13[%c1_112, %c0_113], %213 {strides = array<i32>} : memref<2x128xf32, #tpu.memory_space<vmem>>, vector<1x128xf32>,
    %c1_114 = arith.constant 1 : index
    %c0_115 = arith.constant 0 : index
    %215 = vector.load %arg14[%c1_114, %c0_115] : memref<2x128xf32, #tpu.memory_space<vmem>>, vector<1x128xf32>
    tpu.vector_store %arg14[%c1_114, %c0_115], %211 {strides = array<i32>} : memref<2x128xf32, #tpu.memory_space<vmem>>, vector<1x128xf32>,
    %c2_116 = arith.constant 2 : index
    %c0_117 = arith.constant 0 : index
    %216 = vector.load %arg15[%c2_116, %c0_117] : memref<8x128xf32, #tpu.memory_space<vmem>>, vector<1x128xf32>
    tpu.vector_store %arg15[%c2_116, %c0_117], %213 {strides = array<i32>} : memref<8x128xf32, #tpu.memory_space<vmem>>, vector<1x128xf32>,
    %c0_118 = arith.constant 0 : index
    %c0_119 = arith.constant 0 : index
    %217 = vector.load %arg13[%c0_118, %c0_119] : memref<2x128xf32, #tpu.memory_space<vmem>>, vector<1x128xf32>
    %c0_120 = arith.constant 0 : index
    %c0_121 = arith.constant 0 : index
    %218 = vector.load %arg14[%c0_120, %c0_121] : memref<2x128xf32, #tpu.memory_space<vmem>>, vector<1x128xf32>
    %c3 = arith.constant 3 : index
    %c0_122 = arith.constant 0 : index
    %219 = vector.load %arg16[%c3, %c0_122] : memref<8x512xf32, #tpu.memory_space<vmem>>, vector<1x512xf32>
    %c0_123 = arith.constant 0 : index
    %c0_124 = arith.constant 0 : index
    %220 = vector.load %arg4[%c0_123, %c0_124] : memref<128x512xf32, #tpu.memory_space<vmem>>, vector<128x512xf32>
    %cst_125 = arith.constant dense<0.000000e+00> : vector<1x512xf32>
    %221 = tpu.matmul %217, %220, %cst_125 {dimension_numbers = #tpu.dot_dimension_numbers<[1], [0], [0], [1], [0, 0, 1, 1], [], []>} : vector<1x128xf32>, vector<128x512xf32>, vector<1x512xf32> -> vector<1x512xf32>
    %222 = arith.addf %219, %221 : vector<1x512xf32>
    %223 = vector.extract_strided_slice %222 {offsets = [0, 0], sizes = [1, 128], strides = [1, 1]} : vector<1x512xf32> to vector<1x128xf32>
    %224 = arith.negf %223 : vector<1x128xf32>
    %225 = math.exp %224 : vector<1x128xf32>
    %cst_126 = arith.constant 1.000000e+00 : f32
    %226 = vector.broadcast %cst_126 : f32 to vector<1x128xf32>
    %227 = arith.addf %226, %225 : vector<1x128xf32>
    %228 = arith.divf %226, %227 : vector<1x128xf32>
    %229 = vector.extract_strided_slice %222 {offsets = [0, 128], sizes = [1, 128], strides = [1, 1]} : vector<1x512xf32> to vector<1x128xf32>
    %230 = arith.negf %229 : vector<1x128xf32>
    %231 = math.exp %230 : vector<1x128xf32>
    %cst_127 = arith.constant 1.000000e+00 : f32
    %232 = vector.broadcast %cst_127 : f32 to vector<1x128xf32>
    %233 = arith.addf %232, %231 : vector<1x128xf32>
    %234 = arith.divf %232, %233 : vector<1x128xf32>
    %235 = vector.extract_strided_slice %222 {offsets = [0, 256], sizes = [1, 128], strides = [1, 1]} : vector<1x512xf32> to vector<1x128xf32>
    %236 = math.tanh %235 : vector<1x128xf32>
    %237 = vector.extract_strided_slice %222 {offsets = [0, 384], sizes = [1, 128], strides = [1, 1]} : vector<1x512xf32> to vector<1x128xf32>
    %238 = arith.negf %237 : vector<1x128xf32>
    %239 = math.exp %238 : vector<1x128xf32>
    %cst_128 = arith.constant 1.000000e+00 : f32
    %240 = vector.broadcast %cst_128 : f32 to vector<1x128xf32>
    %241 = arith.addf %240, %239 : vector<1x128xf32>
    %242 = arith.divf %240, %241 : vector<1x128xf32>
    %243 = arith.mulf %234, %218 : vector<1x128xf32>
    %244 = arith.mulf %228, %236 : vector<1x128xf32>
    %245 = arith.addf %243, %244 : vector<1x128xf32>
    %246 = math.tanh %245 : vector<1x128xf32>
    %247 = arith.mulf %242, %246 : vector<1x128xf32>
    %c0_129 = arith.constant 0 : index
    %c0_130 = arith.constant 0 : index
    %248 = vector.load %arg13[%c0_129, %c0_130] : memref<2x128xf32, #tpu.memory_space<vmem>>, vector<1x128xf32>
    tpu.vector_store %arg13[%c0_129, %c0_130], %247 {strides = array<i32>} : memref<2x128xf32, #tpu.memory_space<vmem>>, vector<1x128xf32>,
    %c0_131 = arith.constant 0 : index
    %c0_132 = arith.constant 0 : index
    %249 = vector.load %arg14[%c0_131, %c0_132] : memref<2x128xf32, #tpu.memory_space<vmem>>, vector<1x128xf32>
    tpu.vector_store %arg14[%c0_131, %c0_132], %245 {strides = array<i32>} : memref<2x128xf32, #tpu.memory_space<vmem>>, vector<1x128xf32>,
    %c1_133 = arith.constant 1 : index
    %c0_134 = arith.constant 0 : index
    %250 = vector.load %arg13[%c1_133, %c0_134] : memref<2x128xf32, #tpu.memory_space<vmem>>, vector<1x128xf32>
    %c1_135 = arith.constant 1 : index
    %c0_136 = arith.constant 0 : index
    %251 = vector.load %arg14[%c1_135, %c0_136] : memref<2x128xf32, #tpu.memory_space<vmem>>, vector<1x128xf32>
    %252 = tpu.concatenate %247, %250 in 1 : vector<1x128xf32>, vector<1x128xf32> -> vector<1x256xf32>
    %c0_137 = arith.constant 0 : index
    %c0_138 = arith.constant 0 : index
    %253 = vector.load %arg5[%c0_137, %c0_138] : memref<256x512xf32, #tpu.memory_space<vmem>>, vector<256x512xf32>
    %cst_139 = arith.constant dense<0.000000e+00> : vector<1x512xf32>
    %254 = tpu.matmul %252, %253, %cst_139 {dimension_numbers = #tpu.dot_dimension_numbers<[1], [0], [0], [1], [0, 0, 1, 1], [], []>} : vector<1x256xf32>, vector<256x512xf32>, vector<1x512xf32> -> vector<1x512xf32>
    %c0_140 = arith.constant 0 : index
    %c0_141 = arith.constant 0 : index
    %255 = vector.load %arg7[%c0_140, %c0_141] : memref<1x512xf32, #tpu.memory_space<vmem>>, vector<1x512xf32>
    %256 = arith.addf %254, %255 : vector<1x512xf32>
    %257 = vector.extract_strided_slice %256 {offsets = [0, 0], sizes = [1, 128], strides = [1, 1]} : vector<1x512xf32> to vector<1x128xf32>
    %258 = arith.negf %257 : vector<1x128xf32>
    %259 = math.exp %258 : vector<1x128xf32>
    %cst_142 = arith.constant 1.000000e+00 : f32
    %260 = vector.broadcast %cst_142 : f32 to vector<1x128xf32>
    %261 = arith.addf %260, %259 : vector<1x128xf32>
    %262 = arith.divf %260, %261 : vector<1x128xf32>
    %263 = vector.extract_strided_slice %256 {offsets = [0, 128], sizes = [1, 128], strides = [1, 1]} : vector<1x512xf32> to vector<1x128xf32>
    %264 = arith.negf %263 : vector<1x128xf32>
    %265 = math.exp %264 : vector<1x128xf32>
    %cst_143 = arith.constant 1.000000e+00 : f32
    %266 = vector.broadcast %cst_143 : f32 to vector<1x128xf32>
    %267 = arith.addf %266, %265 : vector<1x128xf32>
    %268 = arith.divf %266, %267 : vector<1x128xf32>
    %269 = vector.extract_strided_slice %256 {offsets = [0, 256], sizes = [1, 128], strides = [1, 1]} : vector<1x512xf32> to vector<1x128xf32>
    %270 = math.tanh %269 : vector<1x128xf32>
    %271 = vector.extract_strided_slice %256 {offsets = [0, 384], sizes = [1, 128], strides = [1, 1]} : vector<1x512xf32> to vector<1x128xf32>
    %272 = arith.negf %271 : vector<1x128xf32>
    %273 = math.exp %272 : vector<1x128xf32>
    %cst_144 = arith.constant 1.000000e+00 : f32
    %274 = vector.broadcast %cst_144 : f32 to vector<1x128xf32>
    %275 = arith.addf %274, %273 : vector<1x128xf32>
    %276 = arith.divf %274, %275 : vector<1x128xf32>
    %277 = arith.mulf %268, %251 : vector<1x128xf32>
    %278 = arith.mulf %262, %270 : vector<1x128xf32>
    %279 = arith.addf %277, %278 : vector<1x128xf32>
    %280 = math.tanh %279 : vector<1x128xf32>
    %281 = arith.mulf %276, %280 : vector<1x128xf32>
    %c1_145 = arith.constant 1 : index
    %c0_146 = arith.constant 0 : index
    %282 = vector.load %arg13[%c1_145, %c0_146] : memref<2x128xf32, #tpu.memory_space<vmem>>, vector<1x128xf32>
    tpu.vector_store %arg13[%c1_145, %c0_146], %281 {strides = array<i32>} : memref<2x128xf32, #tpu.memory_space<vmem>>, vector<1x128xf32>,
    %c1_147 = arith.constant 1 : index
    %c0_148 = arith.constant 0 : index
    %283 = vector.load %arg14[%c1_147, %c0_148] : memref<2x128xf32, #tpu.memory_space<vmem>>, vector<1x128xf32>
    tpu.vector_store %arg14[%c1_147, %c0_148], %279 {strides = array<i32>} : memref<2x128xf32, #tpu.memory_space<vmem>>, vector<1x128xf32>,
    %c3_149 = arith.constant 3 : index
    %c0_150 = arith.constant 0 : index
    %284 = vector.load %arg15[%c3_149, %c0_150] : memref<8x128xf32, #tpu.memory_space<vmem>>, vector<1x128xf32>
    tpu.vector_store %arg15[%c3_149, %c0_150], %281 {strides = array<i32>} : memref<8x128xf32, #tpu.memory_space<vmem>>, vector<1x128xf32>,
    %c0_151 = arith.constant 0 : index
    %c0_152 = arith.constant 0 : index
    %285 = vector.load %arg13[%c0_151, %c0_152] : memref<2x128xf32, #tpu.memory_space<vmem>>, vector<1x128xf32>
    %c0_153 = arith.constant 0 : index
    %c0_154 = arith.constant 0 : index
    %286 = vector.load %arg14[%c0_153, %c0_154] : memref<2x128xf32, #tpu.memory_space<vmem>>, vector<1x128xf32>
    %c4 = arith.constant 4 : index
    %c0_155 = arith.constant 0 : index
    %287 = vector.load %arg16[%c4, %c0_155] : memref<8x512xf32, #tpu.memory_space<vmem>>, vector<1x512xf32>
    %c0_156 = arith.constant 0 : index
    %c0_157 = arith.constant 0 : index
    %288 = vector.load %arg4[%c0_156, %c0_157] : memref<128x512xf32, #tpu.memory_space<vmem>>, vector<128x512xf32>
    %cst_158 = arith.constant dense<0.000000e+00> : vector<1x512xf32>
    %289 = tpu.matmul %285, %288, %cst_158 {dimension_numbers = #tpu.dot_dimension_numbers<[1], [0], [0], [1], [0, 0, 1, 1], [], []>} : vector<1x128xf32>, vector<128x512xf32>, vector<1x512xf32> -> vector<1x512xf32>
    %290 = arith.addf %287, %289 : vector<1x512xf32>
    %291 = vector.extract_strided_slice %290 {offsets = [0, 0], sizes = [1, 128], strides = [1, 1]} : vector<1x512xf32> to vector<1x128xf32>
    %292 = arith.negf %291 : vector<1x128xf32>
    %293 = math.exp %292 : vector<1x128xf32>
    %cst_159 = arith.constant 1.000000e+00 : f32
    %294 = vector.broadcast %cst_159 : f32 to vector<1x128xf32>
    %295 = arith.addf %294, %293 : vector<1x128xf32>
    %296 = arith.divf %294, %295 : vector<1x128xf32>
    %297 = vector.extract_strided_slice %290 {offsets = [0, 128], sizes = [1, 128], strides = [1, 1]} : vector<1x512xf32> to vector<1x128xf32>
    %298 = arith.negf %297 : vector<1x128xf32>
    %299 = math.exp %298 : vector<1x128xf32>
    %cst_160 = arith.constant 1.000000e+00 : f32
    %300 = vector.broadcast %cst_160 : f32 to vector<1x128xf32>
    %301 = arith.addf %300, %299 : vector<1x128xf32>
    %302 = arith.divf %300, %301 : vector<1x128xf32>
    %303 = vector.extract_strided_slice %290 {offsets = [0, 256], sizes = [1, 128], strides = [1, 1]} : vector<1x512xf32> to vector<1x128xf32>
    %304 = math.tanh %303 : vector<1x128xf32>
    %305 = vector.extract_strided_slice %290 {offsets = [0, 384], sizes = [1, 128], strides = [1, 1]} : vector<1x512xf32> to vector<1x128xf32>
    %306 = arith.negf %305 : vector<1x128xf32>
    %307 = math.exp %306 : vector<1x128xf32>
    %cst_161 = arith.constant 1.000000e+00 : f32
    %308 = vector.broadcast %cst_161 : f32 to vector<1x128xf32>
    %309 = arith.addf %308, %307 : vector<1x128xf32>
    %310 = arith.divf %308, %309 : vector<1x128xf32>
    %311 = arith.mulf %302, %286 : vector<1x128xf32>
    %312 = arith.mulf %296, %304 : vector<1x128xf32>
    %313 = arith.addf %311, %312 : vector<1x128xf32>
    %314 = math.tanh %313 : vector<1x128xf32>
    %315 = arith.mulf %310, %314 : vector<1x128xf32>
    %c0_162 = arith.constant 0 : index
    %c0_163 = arith.constant 0 : index
    %316 = vector.load %arg13[%c0_162, %c0_163] : memref<2x128xf32, #tpu.memory_space<vmem>>, vector<1x128xf32>
    tpu.vector_store %arg13[%c0_162, %c0_163], %315 {strides = array<i32>} : memref<2x128xf32, #tpu.memory_space<vmem>>, vector<1x128xf32>,
    %c0_164 = arith.constant 0 : index
    %c0_165 = arith.constant 0 : index
    %317 = vector.load %arg14[%c0_164, %c0_165] : memref<2x128xf32, #tpu.memory_space<vmem>>, vector<1x128xf32>
    tpu.vector_store %arg14[%c0_164, %c0_165], %313 {strides = array<i32>} : memref<2x128xf32, #tpu.memory_space<vmem>>, vector<1x128xf32>,
    %c1_166 = arith.constant 1 : index
    %c0_167 = arith.constant 0 : index
    %318 = vector.load %arg13[%c1_166, %c0_167] : memref<2x128xf32, #tpu.memory_space<vmem>>, vector<1x128xf32>
    %c1_168 = arith.constant 1 : index
    %c0_169 = arith.constant 0 : index
    %319 = vector.load %arg14[%c1_168, %c0_169] : memref<2x128xf32, #tpu.memory_space<vmem>>, vector<1x128xf32>
    %320 = tpu.concatenate %315, %318 in 1 : vector<1x128xf32>, vector<1x128xf32> -> vector<1x256xf32>
    %c0_170 = arith.constant 0 : index
    %c0_171 = arith.constant 0 : index
    %321 = vector.load %arg5[%c0_170, %c0_171] : memref<256x512xf32, #tpu.memory_space<vmem>>, vector<256x512xf32>
    %cst_172 = arith.constant dense<0.000000e+00> : vector<1x512xf32>
    %322 = tpu.matmul %320, %321, %cst_172 {dimension_numbers = #tpu.dot_dimension_numbers<[1], [0], [0], [1], [0, 0, 1, 1], [], []>} : vector<1x256xf32>, vector<256x512xf32>, vector<1x512xf32> -> vector<1x512xf32>
    %c0_173 = arith.constant 0 : index
    %c0_174 = arith.constant 0 : index
    %323 = vector.load %arg7[%c0_173, %c0_174] : memref<1x512xf32, #tpu.memory_space<vmem>>, vector<1x512xf32>
    %324 = arith.addf %322, %323 : vector<1x512xf32>
    %325 = vector.extract_strided_slice %324 {offsets = [0, 0], sizes = [1, 128], strides = [1, 1]} : vector<1x512xf32> to vector<1x128xf32>
    %326 = arith.negf %325 : vector<1x128xf32>
    %327 = math.exp %326 : vector<1x128xf32>
    %cst_175 = arith.constant 1.000000e+00 : f32
    %328 = vector.broadcast %cst_175 : f32 to vector<1x128xf32>
    %329 = arith.addf %328, %327 : vector<1x128xf32>
    %330 = arith.divf %328, %329 : vector<1x128xf32>
    %331 = vector.extract_strided_slice %324 {offsets = [0, 128], sizes = [1, 128], strides = [1, 1]} : vector<1x512xf32> to vector<1x128xf32>
    %332 = arith.negf %331 : vector<1x128xf32>
    %333 = math.exp %332 : vector<1x128xf32>
    %cst_176 = arith.constant 1.000000e+00 : f32
    %334 = vector.broadcast %cst_176 : f32 to vector<1x128xf32>
    %335 = arith.addf %334, %333 : vector<1x128xf32>
    %336 = arith.divf %334, %335 : vector<1x128xf32>
    %337 = vector.extract_strided_slice %324 {offsets = [0, 256], sizes = [1, 128], strides = [1, 1]} : vector<1x512xf32> to vector<1x128xf32>
    %338 = math.tanh %337 : vector<1x128xf32>
    %339 = vector.extract_strided_slice %324 {offsets = [0, 384], sizes = [1, 128], strides = [1, 1]} : vector<1x512xf32> to vector<1x128xf32>
    %340 = arith.negf %339 : vector<1x128xf32>
    %341 = math.exp %340 : vector<1x128xf32>
    %cst_177 = arith.constant 1.000000e+00 : f32
    %342 = vector.broadcast %cst_177 : f32 to vector<1x128xf32>
    %343 = arith.addf %342, %341 : vector<1x128xf32>
    %344 = arith.divf %342, %343 : vector<1x128xf32>
    %345 = arith.mulf %336, %319 : vector<1x128xf32>
    %346 = arith.mulf %330, %338 : vector<1x128xf32>
    %347 = arith.addf %345, %346 : vector<1x128xf32>
    %348 = math.tanh %347 : vector<1x128xf32>
    %349 = arith.mulf %344, %348 : vector<1x128xf32>
    %c1_178 = arith.constant 1 : index
    %c0_179 = arith.constant 0 : index
    %350 = vector.load %arg13[%c1_178, %c0_179] : memref<2x128xf32, #tpu.memory_space<vmem>>, vector<1x128xf32>
    tpu.vector_store %arg13[%c1_178, %c0_179], %349 {strides = array<i32>} : memref<2x128xf32, #tpu.memory_space<vmem>>, vector<1x128xf32>,
    %c1_180 = arith.constant 1 : index
    %c0_181 = arith.constant 0 : index
    %351 = vector.load %arg14[%c1_180, %c0_181] : memref<2x128xf32, #tpu.memory_space<vmem>>, vector<1x128xf32>
    tpu.vector_store %arg14[%c1_180, %c0_181], %347 {strides = array<i32>} : memref<2x128xf32, #tpu.memory_space<vmem>>, vector<1x128xf32>,
    %c4_182 = arith.constant 4 : index
    %c0_183 = arith.constant 0 : index
    %352 = vector.load %arg15[%c4_182, %c0_183] : memref<8x128xf32, #tpu.memory_space<vmem>>, vector<1x128xf32>
    tpu.vector_store %arg15[%c4_182, %c0_183], %349 {strides = array<i32>} : memref<8x128xf32, #tpu.memory_space<vmem>>, vector<1x128xf32>,
    %c0_184 = arith.constant 0 : index
    %c0_185 = arith.constant 0 : index
    %353 = vector.load %arg13[%c0_184, %c0_185] : memref<2x128xf32, #tpu.memory_space<vmem>>, vector<1x128xf32>
    %c0_186 = arith.constant 0 : index
    %c0_187 = arith.constant 0 : index
    %354 = vector.load %arg14[%c0_186, %c0_187] : memref<2x128xf32, #tpu.memory_space<vmem>>, vector<1x128xf32>
    %c5 = arith.constant 5 : index
    %c0_188 = arith.constant 0 : index
    %355 = vector.load %arg16[%c5, %c0_188] : memref<8x512xf32, #tpu.memory_space<vmem>>, vector<1x512xf32>
    %c0_189 = arith.constant 0 : index
    %c0_190 = arith.constant 0 : index
    %356 = vector.load %arg4[%c0_189, %c0_190] : memref<128x512xf32, #tpu.memory_space<vmem>>, vector<128x512xf32>
    %cst_191 = arith.constant dense<0.000000e+00> : vector<1x512xf32>
    %357 = tpu.matmul %353, %356, %cst_191 {dimension_numbers = #tpu.dot_dimension_numbers<[1], [0], [0], [1], [0, 0, 1, 1], [], []>} : vector<1x128xf32>, vector<128x512xf32>, vector<1x512xf32> -> vector<1x512xf32>
    %358 = arith.addf %355, %357 : vector<1x512xf32>
    %359 = vector.extract_strided_slice %358 {offsets = [0, 0], sizes = [1, 128], strides = [1, 1]} : vector<1x512xf32> to vector<1x128xf32>
    %360 = arith.negf %359 : vector<1x128xf32>
    %361 = math.exp %360 : vector<1x128xf32>
    %cst_192 = arith.constant 1.000000e+00 : f32
    %362 = vector.broadcast %cst_192 : f32 to vector<1x128xf32>
    %363 = arith.addf %362, %361 : vector<1x128xf32>
    %364 = arith.divf %362, %363 : vector<1x128xf32>
    %365 = vector.extract_strided_slice %358 {offsets = [0, 128], sizes = [1, 128], strides = [1, 1]} : vector<1x512xf32> to vector<1x128xf32>
    %366 = arith.negf %365 : vector<1x128xf32>
    %367 = math.exp %366 : vector<1x128xf32>
    %cst_193 = arith.constant 1.000000e+00 : f32
    %368 = vector.broadcast %cst_193 : f32 to vector<1x128xf32>
    %369 = arith.addf %368, %367 : vector<1x128xf32>
    %370 = arith.divf %368, %369 : vector<1x128xf32>
    %371 = vector.extract_strided_slice %358 {offsets = [0, 256], sizes = [1, 128], strides = [1, 1]} : vector<1x512xf32> to vector<1x128xf32>
    %372 = math.tanh %371 : vector<1x128xf32>
    %373 = vector.extract_strided_slice %358 {offsets = [0, 384], sizes = [1, 128], strides = [1, 1]} : vector<1x512xf32> to vector<1x128xf32>
    %374 = arith.negf %373 : vector<1x128xf32>
    %375 = math.exp %374 : vector<1x128xf32>
    %cst_194 = arith.constant 1.000000e+00 : f32
    %376 = vector.broadcast %cst_194 : f32 to vector<1x128xf32>
    %377 = arith.addf %376, %375 : vector<1x128xf32>
    %378 = arith.divf %376, %377 : vector<1x128xf32>
    %379 = arith.mulf %370, %354 : vector<1x128xf32>
    %380 = arith.mulf %364, %372 : vector<1x128xf32>
    %381 = arith.addf %379, %380 : vector<1x128xf32>
    %382 = math.tanh %381 : vector<1x128xf32>
    %383 = arith.mulf %378, %382 : vector<1x128xf32>
    %c0_195 = arith.constant 0 : index
    %c0_196 = arith.constant 0 : index
    %384 = vector.load %arg13[%c0_195, %c0_196] : memref<2x128xf32, #tpu.memory_space<vmem>>, vector<1x128xf32>
    tpu.vector_store %arg13[%c0_195, %c0_196], %383 {strides = array<i32>} : memref<2x128xf32, #tpu.memory_space<vmem>>, vector<1x128xf32>,
    %c0_197 = arith.constant 0 : index
    %c0_198 = arith.constant 0 : index
    %385 = vector.load %arg14[%c0_197, %c0_198] : memref<2x128xf32, #tpu.memory_space<vmem>>, vector<1x128xf32>
    tpu.vector_store %arg14[%c0_197, %c0_198], %381 {strides = array<i32>} : memref<2x128xf32, #tpu.memory_space<vmem>>, vector<1x128xf32>,
    %c1_199 = arith.constant 1 : index
    %c0_200 = arith.constant 0 : index
    %386 = vector.load %arg13[%c1_199, %c0_200] : memref<2x128xf32, #tpu.memory_space<vmem>>, vector<1x128xf32>
    %c1_201 = arith.constant 1 : index
    %c0_202 = arith.constant 0 : index
    %387 = vector.load %arg14[%c1_201, %c0_202] : memref<2x128xf32, #tpu.memory_space<vmem>>, vector<1x128xf32>
    %388 = tpu.concatenate %383, %386 in 1 : vector<1x128xf32>, vector<1x128xf32> -> vector<1x256xf32>
    %c0_203 = arith.constant 0 : index
    %c0_204 = arith.constant 0 : index
    %389 = vector.load %arg5[%c0_203, %c0_204] : memref<256x512xf32, #tpu.memory_space<vmem>>, vector<256x512xf32>
    %cst_205 = arith.constant dense<0.000000e+00> : vector<1x512xf32>
    %390 = tpu.matmul %388, %389, %cst_205 {dimension_numbers = #tpu.dot_dimension_numbers<[1], [0], [0], [1], [0, 0, 1, 1], [], []>} : vector<1x256xf32>, vector<256x512xf32>, vector<1x512xf32> -> vector<1x512xf32>
    %c0_206 = arith.constant 0 : index
    %c0_207 = arith.constant 0 : index
    %391 = vector.load %arg7[%c0_206, %c0_207] : memref<1x512xf32, #tpu.memory_space<vmem>>, vector<1x512xf32>
    %392 = arith.addf %390, %391 : vector<1x512xf32>
    %393 = vector.extract_strided_slice %392 {offsets = [0, 0], sizes = [1, 128], strides = [1, 1]} : vector<1x512xf32> to vector<1x128xf32>
    %394 = arith.negf %393 : vector<1x128xf32>
    %395 = math.exp %394 : vector<1x128xf32>
    %cst_208 = arith.constant 1.000000e+00 : f32
    %396 = vector.broadcast %cst_208 : f32 to vector<1x128xf32>
    %397 = arith.addf %396, %395 : vector<1x128xf32>
    %398 = arith.divf %396, %397 : vector<1x128xf32>
    %399 = vector.extract_strided_slice %392 {offsets = [0, 128], sizes = [1, 128], strides = [1, 1]} : vector<1x512xf32> to vector<1x128xf32>
    %400 = arith.negf %399 : vector<1x128xf32>
    %401 = math.exp %400 : vector<1x128xf32>
    %cst_209 = arith.constant 1.000000e+00 : f32
    %402 = vector.broadcast %cst_209 : f32 to vector<1x128xf32>
    %403 = arith.addf %402, %401 : vector<1x128xf32>
    %404 = arith.divf %402, %403 : vector<1x128xf32>
    %405 = vector.extract_strided_slice %392 {offsets = [0, 256], sizes = [1, 128], strides = [1, 1]} : vector<1x512xf32> to vector<1x128xf32>
    %406 = math.tanh %405 : vector<1x128xf32>
    %407 = vector.extract_strided_slice %392 {offsets = [0, 384], sizes = [1, 128], strides = [1, 1]} : vector<1x512xf32> to vector<1x128xf32>
    %408 = arith.negf %407 : vector<1x128xf32>
    %409 = math.exp %408 : vector<1x128xf32>
    %cst_210 = arith.constant 1.000000e+00 : f32
    %410 = vector.broadcast %cst_210 : f32 to vector<1x128xf32>
    %411 = arith.addf %410, %409 : vector<1x128xf32>
    %412 = arith.divf %410, %411 : vector<1x128xf32>
    %413 = arith.mulf %404, %387 : vector<1x128xf32>
    %414 = arith.mulf %398, %406 : vector<1x128xf32>
    %415 = arith.addf %413, %414 : vector<1x128xf32>
    %416 = math.tanh %415 : vector<1x128xf32>
    %417 = arith.mulf %412, %416 : vector<1x128xf32>
    %c1_211 = arith.constant 1 : index
    %c0_212 = arith.constant 0 : index
    %418 = vector.load %arg13[%c1_211, %c0_212] : memref<2x128xf32, #tpu.memory_space<vmem>>, vector<1x128xf32>
    tpu.vector_store %arg13[%c1_211, %c0_212], %417 {strides = array<i32>} : memref<2x128xf32, #tpu.memory_space<vmem>>, vector<1x128xf32>,
    %c1_213 = arith.constant 1 : index
    %c0_214 = arith.constant 0 : index
    %419 = vector.load %arg14[%c1_213, %c0_214] : memref<2x128xf32, #tpu.memory_space<vmem>>, vector<1x128xf32>
    tpu.vector_store %arg14[%c1_213, %c0_214], %415 {strides = array<i32>} : memref<2x128xf32, #tpu.memory_space<vmem>>, vector<1x128xf32>,
    %c5_215 = arith.constant 5 : index
    %c0_216 = arith.constant 0 : index
    %420 = vector.load %arg15[%c5_215, %c0_216] : memref<8x128xf32, #tpu.memory_space<vmem>>, vector<1x128xf32>
    tpu.vector_store %arg15[%c5_215, %c0_216], %417 {strides = array<i32>} : memref<8x128xf32, #tpu.memory_space<vmem>>, vector<1x128xf32>,
    %c0_217 = arith.constant 0 : index
    %c0_218 = arith.constant 0 : index
    %421 = vector.load %arg13[%c0_217, %c0_218] : memref<2x128xf32, #tpu.memory_space<vmem>>, vector<1x128xf32>
    %c0_219 = arith.constant 0 : index
    %c0_220 = arith.constant 0 : index
    %422 = vector.load %arg14[%c0_219, %c0_220] : memref<2x128xf32, #tpu.memory_space<vmem>>, vector<1x128xf32>
    %c6 = arith.constant 6 : index
    %c0_221 = arith.constant 0 : index
    %423 = vector.load %arg16[%c6, %c0_221] : memref<8x512xf32, #tpu.memory_space<vmem>>, vector<1x512xf32>
    %c0_222 = arith.constant 0 : index
    %c0_223 = arith.constant 0 : index
    %424 = vector.load %arg4[%c0_222, %c0_223] : memref<128x512xf32, #tpu.memory_space<vmem>>, vector<128x512xf32>
    %cst_224 = arith.constant dense<0.000000e+00> : vector<1x512xf32>
    %425 = tpu.matmul %421, %424, %cst_224 {dimension_numbers = #tpu.dot_dimension_numbers<[1], [0], [0], [1], [0, 0, 1, 1], [], []>} : vector<1x128xf32>, vector<128x512xf32>, vector<1x512xf32> -> vector<1x512xf32>
    %426 = arith.addf %423, %425 : vector<1x512xf32>
    %427 = vector.extract_strided_slice %426 {offsets = [0, 0], sizes = [1, 128], strides = [1, 1]} : vector<1x512xf32> to vector<1x128xf32>
    %428 = arith.negf %427 : vector<1x128xf32>
    %429 = math.exp %428 : vector<1x128xf32>
    %cst_225 = arith.constant 1.000000e+00 : f32
    %430 = vector.broadcast %cst_225 : f32 to vector<1x128xf32>
    %431 = arith.addf %430, %429 : vector<1x128xf32>
    %432 = arith.divf %430, %431 : vector<1x128xf32>
    %433 = vector.extract_strided_slice %426 {offsets = [0, 128], sizes = [1, 128], strides = [1, 1]} : vector<1x512xf32> to vector<1x128xf32>
    %434 = arith.negf %433 : vector<1x128xf32>
    %435 = math.exp %434 : vector<1x128xf32>
    %cst_226 = arith.constant 1.000000e+00 : f32
    %436 = vector.broadcast %cst_226 : f32 to vector<1x128xf32>
    %437 = arith.addf %436, %435 : vector<1x128xf32>
    %438 = arith.divf %436, %437 : vector<1x128xf32>
    %439 = vector.extract_strided_slice %426 {offsets = [0, 256], sizes = [1, 128], strides = [1, 1]} : vector<1x512xf32> to vector<1x128xf32>
    %440 = math.tanh %439 : vector<1x128xf32>
    %441 = vector.extract_strided_slice %426 {offsets = [0, 384], sizes = [1, 128], strides = [1, 1]} : vector<1x512xf32> to vector<1x128xf32>
    %442 = arith.negf %441 : vector<1x128xf32>
    %443 = math.exp %442 : vector<1x128xf32>
    %cst_227 = arith.constant 1.000000e+00 : f32
    %444 = vector.broadcast %cst_227 : f32 to vector<1x128xf32>
    %445 = arith.addf %444, %443 : vector<1x128xf32>
    %446 = arith.divf %444, %445 : vector<1x128xf32>
    %447 = arith.mulf %438, %422 : vector<1x128xf32>
    %448 = arith.mulf %432, %440 : vector<1x128xf32>
    %449 = arith.addf %447, %448 : vector<1x128xf32>
    %450 = math.tanh %449 : vector<1x128xf32>
    %451 = arith.mulf %446, %450 : vector<1x128xf32>
    %c0_228 = arith.constant 0 : index
    %c0_229 = arith.constant 0 : index
    %452 = vector.load %arg13[%c0_228, %c0_229] : memref<2x128xf32, #tpu.memory_space<vmem>>, vector<1x128xf32>
    tpu.vector_store %arg13[%c0_228, %c0_229], %451 {strides = array<i32>} : memref<2x128xf32, #tpu.memory_space<vmem>>, vector<1x128xf32>,
    %c0_230 = arith.constant 0 : index
    %c0_231 = arith.constant 0 : index
    %453 = vector.load %arg14[%c0_230, %c0_231] : memref<2x128xf32, #tpu.memory_space<vmem>>, vector<1x128xf32>
    tpu.vector_store %arg14[%c0_230, %c0_231], %449 {strides = array<i32>} : memref<2x128xf32, #tpu.memory_space<vmem>>, vector<1x128xf32>,
    %c1_232 = arith.constant 1 : index
    %c0_233 = arith.constant 0 : index
    %454 = vector.load %arg13[%c1_232, %c0_233] : memref<2x128xf32, #tpu.memory_space<vmem>>, vector<1x128xf32>
    %c1_234 = arith.constant 1 : index
    %c0_235 = arith.constant 0 : index
    %455 = vector.load %arg14[%c1_234, %c0_235] : memref<2x128xf32, #tpu.memory_space<vmem>>, vector<1x128xf32>
    %456 = tpu.concatenate %451, %454 in 1 : vector<1x128xf32>, vector<1x128xf32> -> vector<1x256xf32>
    %c0_236 = arith.constant 0 : index
    %c0_237 = arith.constant 0 : index
    %457 = vector.load %arg5[%c0_236, %c0_237] : memref<256x512xf32, #tpu.memory_space<vmem>>, vector<256x512xf32>
    %cst_238 = arith.constant dense<0.000000e+00> : vector<1x512xf32>
    %458 = tpu.matmul %456, %457, %cst_238 {dimension_numbers = #tpu.dot_dimension_numbers<[1], [0], [0], [1], [0, 0, 1, 1], [], []>} : vector<1x256xf32>, vector<256x512xf32>, vector<1x512xf32> -> vector<1x512xf32>
    %c0_239 = arith.constant 0 : index
    %c0_240 = arith.constant 0 : index
    %459 = vector.load %arg7[%c0_239, %c0_240] : memref<1x512xf32, #tpu.memory_space<vmem>>, vector<1x512xf32>
    %460 = arith.addf %458, %459 : vector<1x512xf32>
    %461 = vector.extract_strided_slice %460 {offsets = [0, 0], sizes = [1, 128], strides = [1, 1]} : vector<1x512xf32> to vector<1x128xf32>
    %462 = arith.negf %461 : vector<1x128xf32>
    %463 = math.exp %462 : vector<1x128xf32>
    %cst_241 = arith.constant 1.000000e+00 : f32
    %464 = vector.broadcast %cst_241 : f32 to vector<1x128xf32>
    %465 = arith.addf %464, %463 : vector<1x128xf32>
    %466 = arith.divf %464, %465 : vector<1x128xf32>
    %467 = vector.extract_strided_slice %460 {offsets = [0, 128], sizes = [1, 128], strides = [1, 1]} : vector<1x512xf32> to vector<1x128xf32>
    %468 = arith.negf %467 : vector<1x128xf32>
    %469 = math.exp %468 : vector<1x128xf32>
    %cst_242 = arith.constant 1.000000e+00 : f32
    %470 = vector.broadcast %cst_242 : f32 to vector<1x128xf32>
    %471 = arith.addf %470, %469 : vector<1x128xf32>
    %472 = arith.divf %470, %471 : vector<1x128xf32>
    %473 = vector.extract_strided_slice %460 {offsets = [0, 256], sizes = [1, 128], strides = [1, 1]} : vector<1x512xf32> to vector<1x128xf32>
    %474 = math.tanh %473 : vector<1x128xf32>
    %475 = vector.extract_strided_slice %460 {offsets = [0, 384], sizes = [1, 128], strides = [1, 1]} : vector<1x512xf32> to vector<1x128xf32>
    %476 = arith.negf %475 : vector<1x128xf32>
    %477 = math.exp %476 : vector<1x128xf32>
    %cst_243 = arith.constant 1.000000e+00 : f32
    %478 = vector.broadcast %cst_243 : f32 to vector<1x128xf32>
    %479 = arith.addf %478, %477 : vector<1x128xf32>
    %480 = arith.divf %478, %479 : vector<1x128xf32>
    %481 = arith.mulf %472, %455 : vector<1x128xf32>
    %482 = arith.mulf %466, %474 : vector<1x128xf32>
    %483 = arith.addf %481, %482 : vector<1x128xf32>
    %484 = math.tanh %483 : vector<1x128xf32>
    %485 = arith.mulf %480, %484 : vector<1x128xf32>
    %c1_244 = arith.constant 1 : index
    %c0_245 = arith.constant 0 : index
    %486 = vector.load %arg13[%c1_244, %c0_245] : memref<2x128xf32, #tpu.memory_space<vmem>>, vector<1x128xf32>
    tpu.vector_store %arg13[%c1_244, %c0_245], %485 {strides = array<i32>} : memref<2x128xf32, #tpu.memory_space<vmem>>, vector<1x128xf32>,
    %c1_246 = arith.constant 1 : index
    %c0_247 = arith.constant 0 : index
    %487 = vector.load %arg14[%c1_246, %c0_247] : memref<2x128xf32, #tpu.memory_space<vmem>>, vector<1x128xf32>
    tpu.vector_store %arg14[%c1_246, %c0_247], %483 {strides = array<i32>} : memref<2x128xf32, #tpu.memory_space<vmem>>, vector<1x128xf32>,
    %c6_248 = arith.constant 6 : index
    %c0_249 = arith.constant 0 : index
    %488 = vector.load %arg15[%c6_248, %c0_249] : memref<8x128xf32, #tpu.memory_space<vmem>>, vector<1x128xf32>
    tpu.vector_store %arg15[%c6_248, %c0_249], %485 {strides = array<i32>} : memref<8x128xf32, #tpu.memory_space<vmem>>, vector<1x128xf32>,
    %c0_250 = arith.constant 0 : index
    %c0_251 = arith.constant 0 : index
    %489 = vector.load %arg13[%c0_250, %c0_251] : memref<2x128xf32, #tpu.memory_space<vmem>>, vector<1x128xf32>
    %c0_252 = arith.constant 0 : index
    %c0_253 = arith.constant 0 : index
    %490 = vector.load %arg14[%c0_252, %c0_253] : memref<2x128xf32, #tpu.memory_space<vmem>>, vector<1x128xf32>
    %c7 = arith.constant 7 : index
    %c0_254 = arith.constant 0 : index
    %491 = vector.load %arg16[%c7, %c0_254] : memref<8x512xf32, #tpu.memory_space<vmem>>, vector<1x512xf32>
    %c0_255 = arith.constant 0 : index
    %c0_256 = arith.constant 0 : index
    %492 = vector.load %arg4[%c0_255, %c0_256] : memref<128x512xf32, #tpu.memory_space<vmem>>, vector<128x512xf32>
    %cst_257 = arith.constant dense<0.000000e+00> : vector<1x512xf32>
    %493 = tpu.matmul %489, %492, %cst_257 {dimension_numbers = #tpu.dot_dimension_numbers<[1], [0], [0], [1], [0, 0, 1, 1], [], []>} : vector<1x128xf32>, vector<128x512xf32>, vector<1x512xf32> -> vector<1x512xf32>
    %494 = arith.addf %491, %493 : vector<1x512xf32>
    %495 = vector.extract_strided_slice %494 {offsets = [0, 0], sizes = [1, 128], strides = [1, 1]} : vector<1x512xf32> to vector<1x128xf32>
    %496 = arith.negf %495 : vector<1x128xf32>
    %497 = math.exp %496 : vector<1x128xf32>
    %cst_258 = arith.constant 1.000000e+00 : f32
    %498 = vector.broadcast %cst_258 : f32 to vector<1x128xf32>
    %499 = arith.addf %498, %497 : vector<1x128xf32>
    %500 = arith.divf %498, %499 : vector<1x128xf32>
    %501 = vector.extract_strided_slice %494 {offsets = [0, 128], sizes = [1, 128], strides = [1, 1]} : vector<1x512xf32> to vector<1x128xf32>
    %502 = arith.negf %501 : vector<1x128xf32>
    %503 = math.exp %502 : vector<1x128xf32>
    %cst_259 = arith.constant 1.000000e+00 : f32
    %504 = vector.broadcast %cst_259 : f32 to vector<1x128xf32>
    %505 = arith.addf %504, %503 : vector<1x128xf32>
    %506 = arith.divf %504, %505 : vector<1x128xf32>
    %507 = vector.extract_strided_slice %494 {offsets = [0, 256], sizes = [1, 128], strides = [1, 1]} : vector<1x512xf32> to vector<1x128xf32>
    %508 = math.tanh %507 : vector<1x128xf32>
    %509 = vector.extract_strided_slice %494 {offsets = [0, 384], sizes = [1, 128], strides = [1, 1]} : vector<1x512xf32> to vector<1x128xf32>
    %510 = arith.negf %509 : vector<1x128xf32>
    %511 = math.exp %510 : vector<1x128xf32>
    %cst_260 = arith.constant 1.000000e+00 : f32
    %512 = vector.broadcast %cst_260 : f32 to vector<1x128xf32>
    %513 = arith.addf %512, %511 : vector<1x128xf32>
    %514 = arith.divf %512, %513 : vector<1x128xf32>
    %515 = arith.mulf %506, %490 : vector<1x128xf32>
    %516 = arith.mulf %500, %508 : vector<1x128xf32>
    %517 = arith.addf %515, %516 : vector<1x128xf32>
    %518 = math.tanh %517 : vector<1x128xf32>
    %519 = arith.mulf %514, %518 : vector<1x128xf32>
    %c0_261 = arith.constant 0 : index
    %c0_262 = arith.constant 0 : index
    %520 = vector.load %arg13[%c0_261, %c0_262] : memref<2x128xf32, #tpu.memory_space<vmem>>, vector<1x128xf32>
    tpu.vector_store %arg13[%c0_261, %c0_262], %519 {strides = array<i32>} : memref<2x128xf32, #tpu.memory_space<vmem>>, vector<1x128xf32>,
    %c0_263 = arith.constant 0 : index
    %c0_264 = arith.constant 0 : index
    %521 = vector.load %arg14[%c0_263, %c0_264] : memref<2x128xf32, #tpu.memory_space<vmem>>, vector<1x128xf32>
    tpu.vector_store %arg14[%c0_263, %c0_264], %517 {strides = array<i32>} : memref<2x128xf32, #tpu.memory_space<vmem>>, vector<1x128xf32>,
    %c1_265 = arith.constant 1 : index
    %c0_266 = arith.constant 0 : index
    %522 = vector.load %arg13[%c1_265, %c0_266] : memref<2x128xf32, #tpu.memory_space<vmem>>, vector<1x128xf32>
    %c1_267 = arith.constant 1 : index
    %c0_268 = arith.constant 0 : index
    %523 = vector.load %arg14[%c1_267, %c0_268] : memref<2x128xf32, #tpu.memory_space<vmem>>, vector<1x128xf32>
    %524 = tpu.concatenate %519, %522 in 1 : vector<1x128xf32>, vector<1x128xf32> -> vector<1x256xf32>
    %c0_269 = arith.constant 0 : index
    %c0_270 = arith.constant 0 : index
    %525 = vector.load %arg5[%c0_269, %c0_270] : memref<256x512xf32, #tpu.memory_space<vmem>>, vector<256x512xf32>
    %cst_271 = arith.constant dense<0.000000e+00> : vector<1x512xf32>
    %526 = tpu.matmul %524, %525, %cst_271 {dimension_numbers = #tpu.dot_dimension_numbers<[1], [0], [0], [1], [0, 0, 1, 1], [], []>} : vector<1x256xf32>, vector<256x512xf32>, vector<1x512xf32> -> vector<1x512xf32>
    %c0_272 = arith.constant 0 : index
    %c0_273 = arith.constant 0 : index
    %527 = vector.load %arg7[%c0_272, %c0_273] : memref<1x512xf32, #tpu.memory_space<vmem>>, vector<1x512xf32>
    %528 = arith.addf %526, %527 : vector<1x512xf32>
    %529 = vector.extract_strided_slice %528 {offsets = [0, 0], sizes = [1, 128], strides = [1, 1]} : vector<1x512xf32> to vector<1x128xf32>
    %530 = arith.negf %529 : vector<1x128xf32>
    %531 = math.exp %530 : vector<1x128xf32>
    %cst_274 = arith.constant 1.000000e+00 : f32
    %532 = vector.broadcast %cst_274 : f32 to vector<1x128xf32>
    %533 = arith.addf %532, %531 : vector<1x128xf32>
    %534 = arith.divf %532, %533 : vector<1x128xf32>
    %535 = vector.extract_strided_slice %528 {offsets = [0, 128], sizes = [1, 128], strides = [1, 1]} : vector<1x512xf32> to vector<1x128xf32>
    %536 = arith.negf %535 : vector<1x128xf32>
    %537 = math.exp %536 : vector<1x128xf32>
    %cst_275 = arith.constant 1.000000e+00 : f32
    %538 = vector.broadcast %cst_275 : f32 to vector<1x128xf32>
    %539 = arith.addf %538, %537 : vector<1x128xf32>
    %540 = arith.divf %538, %539 : vector<1x128xf32>
    %541 = vector.extract_strided_slice %528 {offsets = [0, 256], sizes = [1, 128], strides = [1, 1]} : vector<1x512xf32> to vector<1x128xf32>
    %542 = math.tanh %541 : vector<1x128xf32>
    %543 = vector.extract_strided_slice %528 {offsets = [0, 384], sizes = [1, 128], strides = [1, 1]} : vector<1x512xf32> to vector<1x128xf32>
    %544 = arith.negf %543 : vector<1x128xf32>
    %545 = math.exp %544 : vector<1x128xf32>
    %cst_276 = arith.constant 1.000000e+00 : f32
    %546 = vector.broadcast %cst_276 : f32 to vector<1x128xf32>
    %547 = arith.addf %546, %545 : vector<1x128xf32>
    %548 = arith.divf %546, %547 : vector<1x128xf32>
    %549 = arith.mulf %540, %523 : vector<1x128xf32>
    %550 = arith.mulf %534, %542 : vector<1x128xf32>
    %551 = arith.addf %549, %550 : vector<1x128xf32>
    %552 = math.tanh %551 : vector<1x128xf32>
    %553 = arith.mulf %548, %552 : vector<1x128xf32>
    %c1_277 = arith.constant 1 : index
    %c0_278 = arith.constant 0 : index
    %554 = vector.load %arg13[%c1_277, %c0_278] : memref<2x128xf32, #tpu.memory_space<vmem>>, vector<1x128xf32>
    tpu.vector_store %arg13[%c1_277, %c0_278], %553 {strides = array<i32>} : memref<2x128xf32, #tpu.memory_space<vmem>>, vector<1x128xf32>,
    %c1_279 = arith.constant 1 : index
    %c0_280 = arith.constant 0 : index
    %555 = vector.load %arg14[%c1_279, %c0_280] : memref<2x128xf32, #tpu.memory_space<vmem>>, vector<1x128xf32>
    tpu.vector_store %arg14[%c1_279, %c0_280], %551 {strides = array<i32>} : memref<2x128xf32, #tpu.memory_space<vmem>>, vector<1x128xf32>,
    %c7_281 = arith.constant 7 : index
    %c0_282 = arith.constant 0 : index
    %556 = vector.load %arg15[%c7_281, %c0_282] : memref<8x128xf32, #tpu.memory_space<vmem>>, vector<1x128xf32>
    tpu.vector_store %arg15[%c7_281, %c0_282], %553 {strides = array<i32>} : memref<8x128xf32, #tpu.memory_space<vmem>>, vector<1x128xf32>,
    %c0_283 = arith.constant 0 : index
    %c0_284 = arith.constant 0 : index
    %557 = vector.load %arg15[%c0_283, %c0_284] : memref<8x128xf32, #tpu.memory_space<vmem>>, vector<8x128xf32>
    %c0_285 = arith.constant 0 : index
    %c0_286 = arith.constant 0 : index
    %558 = vector.load %arg8[%c0_285, %c0_286] : memref<128x128xf32, #tpu.memory_space<vmem>>, vector<128x128xf32>
    %cst_287 = arith.constant dense<0.000000e+00> : vector<8x128xf32>
    %559 = tpu.matmul %557, %558, %cst_287 {dimension_numbers = #tpu.dot_dimension_numbers<[1], [0], [0], [1], [0, 0, 1, 1], [], []>} : vector<8x128xf32>, vector<128x128xf32>, vector<8x128xf32> -> vector<8x128xf32>
    %c0_288 = arith.constant 0 : index
    %c0_289 = arith.constant 0 : index
    %560 = vector.load %arg9[%c0_288, %c0_289] : memref<1x128xf32, #tpu.memory_space<vmem>>, vector<1x128xf32>
    %561 = vector.broadcast %560 : vector<1x128xf32> to vector<8x128xf32>
    %562 = arith.addf %559, %561 : vector<8x128xf32>
    %c0_290 = arith.constant 0 : index
    %c0_291 = arith.constant 0 : index
    %563 = vector.load %arg10[%c0_290, %c0_291] : memref<8x128xf32, #tpu.memory_space<vmem>>, vector<8x128xf32>
    tpu.vector_store %arg10[%c0_290, %c0_291], %562 {strides = array<i32>} : memref<8x128xf32, #tpu.memory_space<vmem>>, vector<8x128xf32>,
    %c0_292 = arith.constant 0 : index
    %c0_293 = arith.constant 0 : index
    %564 = vector.load %arg13[%c0_292, %c0_293] : memref<2x128xf32, #tpu.memory_space<vmem>>, vector<2x128xf32>
    %c0_294 = arith.constant 0 : index
    %c0_295 = arith.constant 0 : index
    %565 = vector.load %arg11[%c0_294, %c0_295] : memref<2x128xf32, #tpu.memory_space<vmem>>, vector<2x128xf32>
    tpu.vector_store %arg11[%c0_294, %c0_295], %564 {strides = array<i32>} : memref<2x128xf32, #tpu.memory_space<vmem>>, vector<2x128xf32>,
    %c0_296 = arith.constant 0 : index
    %c0_297 = arith.constant 0 : index
    %566 = vector.load %arg14[%c0_296, %c0_297] : memref<2x128xf32, #tpu.memory_space<vmem>>, vector<2x128xf32>
    %c0_298 = arith.constant 0 : index
    %c0_299 = arith.constant 0 : index
    %567 = vector.load %arg12[%c0_298, %c0_299] : memref<2x128xf32, #tpu.memory_space<vmem>>, vector<2x128xf32>
    tpu.vector_store %arg12[%c0_298, %c0_299], %566 {strides = array<i32>} : memref<2x128xf32, #tpu.memory_space<vmem>>, vector<2x128xf32>,
    return
  }
}

</mosaic_0001>

<bundles_post_ra>
// kernel: tpu_custom_call.1
= control target key start
LH: loop header
LB: loop body
LE: loop exit
PB: predicated region body
PF: predicated region fallthrough
CT: control target
= control target key end

     0   :  { %18 = vsyncpa [#allocation7], 0  ;;  %s9320_s0 = inlined_call_operand.hbm [shape: f32[8,128], index: 0, kind: input, shape index: {}]   ;;  %s9321_s1 = inlined_call_operand.vmem [shape: f32[2,128], index: 1, kind: input, shape index: {}]   ;;  %s9322_s2 = inlined_call_operand.hbm [shape: f32[2,128], index: 2, kind: input, shape index: {}]   ;;  %s9323_s3 = inlined_call_operand.hbm [shape: f32[128,512], index: 3, kind: input, shape index: {}]   ;;  %s9324_s4 = inlined_call_operand.hbm [shape: f32[128,512], index: 4, kind: input, shape index: {}]   ;;  %s9325_s5 = inlined_call_operand.hbm [shape: f32[256,512], index: 5, kind: input, shape index: {}]   ;;  %s9326_s6 = inlined_call_operand.vmem [shape: f32[1,512], index: 6, kind: input, shape index: {}]   ;;  %s9327_s7 = inlined_call_operand.vmem [shape: f32[1,512], index: 7, kind: input, shape index: {}]   ;;  %s9328_s8 = inlined_call_operand.hbm [shape: f32[128,128], index: 8, kind: input, shape index: {}]   ;;  %s9329_s9 = inlined_call_operand.vmem [shape: f32[1,128], index: 9, kind: input, shape index: {}]   ;;  %s9330_s10 = inlined_call_operand.hbm [shape: f32[8,128], index: 10, kind: output, shape index: {0}]   ;;  %s9331_s11 = inlined_call_operand.hbm [shape: f32[2,128], index: 11, kind: output, shape index: {1}]   ;;  %s9332_s12 = inlined_call_operand.hbm [shape: f32[2,128], index: 12, kind: output, shape index: {2}]  }
   0x1   :  { %19 = vsyncpa [#allocation10], 0 }
   0x2   :  { %20 = vsyncpa [#allocation13], 0 }
   0x3   :  { %21 = vsyncpa [#allocation16], 0 }
   0x4   :  { %22 = vsyncpa [#allocation8], 0 }
   0x5   :  { %23 = vsyncpa [#allocation19], 0  ;;  %s7460_s21 = smov [#allocation9]   ;;  %s7250_s25 = scalar_lea.hbm %s9322_s2, 32 }
   0x6   :  { %s42_s22 = sshll.u32 %s7460_s21, 4  ;;  %p7251_p0 = scmp.ne.s32.totalorder %s9322_s2, %s7250_s25  ;;  %s43_s22 = int_to_ptr.vmem [resolvable:$true] %s42_s22 }
   0x7   :  { %p7254_p1 = scmp.lt.u32.totalorder %s7250_s25, %s9322_s2 }
   0x9   :  { %p7256_p2 = pnand %p7254_p1, %p7251_p0 }
   0xb   :  { %7259 = shalt.err (!%p7256_p2)
}
   0xc   :  { %s7260_s30 = scalar_lea.vmem %s43_s22, 32  ;;  %p7265_p4 = scmp.lt.s32.totalorder %s43_s22, %s43_s22 }
   0xd   :  { %p7261_p3 = scmp.ne.s32.totalorder %s43_s22, %s7260_s30  ;;  %p7266_p5 = scmp.lt.s32.totalorder %s7260_s30, %s7260_s30 }
   0xf   :  { %p7267_p6 = por %p7266_p5, %p7265_p4 }
  0x11   :  { %p7268_p7 = pnand %p7267_p6, %p7261_p3 }
  0x13   :  { %7271 = shalt.err (!%p7268_p7)
}
  0x14   :  { %45 = dma.hbm_to_vmem [thread:$0]  %s9322_s2, 32, %s43_s22, [#allocation10]  }
  0x15   :  { %s7461_s15 = smov [#allocation12]   ;;  %s7462_s17 = smov [#allocation6]  }
  0x16   :  { %s63_s16 = sshll.u32 %s7461_s15, 4  ;;  %s30_s18 = sshll.u32 %s7462_s17, 4  ;;  %s64_s16 = int_to_ptr.vmem [resolvable:$true] %s63_s16  ;;  %s31_s18 = int_to_ptr.vmem [resolvable:$true] %s30_s18 }
  0x17   :  { %s7272_s21 = scalar_lea.hbm %s9324_s4, 8192 }
  0x18   :  { %p7273_p8 = scmp.ne.s32.totalorder %s9324_s4, %s7272_s21  ;;  %p7276_p9 = scmp.lt.u32.totalorder %s7272_s21, %s9324_s4 }
  0x1a   :  { %p7278_p10 = pnand %p7276_p9, %p7273_p8 }
  0x1c   :  { %7281 = shalt.err (!%p7278_p10)
}
  0x1d   :  { %s7282_s2 = scalar_lea.vmem %s64_s16, 8192  ;;  %p7287_p12 = scmp.lt.s32.totalorder %s64_s16, %s64_s16 }
  0x1e   :  { %p7283_p11 = scmp.ne.s32.totalorder %s64_s16, %s7282_s2  ;;  %p7288_p13 = scmp.lt.s32.totalorder %s7282_s2, %s7282_s2 }
  0x20   :  { %p7289_p0 = por %p7288_p13, %p7287_p12 }
  0x22   :  { %p7290_p1 = pnand %p7289_p0, %p7283_p11 }
  0x24   :  { %7293 = shalt.err (!%p7290_p1)
}
  0x25   :  { %s7463_s22 = smov 512   ;;  %s7464_s27 = smov 32  }
  0x26   :  { %69 = dma.hbm_to_vmem [thread:$0]  %s9324_s4, 8192, %s64_s16, [#allocation13], %s7463_s22, %s7463_s22, %s7464_s27  }
  0x27   :  { %s7294_s14 = scalar_lea.hbm %s9320_s0, 128 }
  0x28   :  { %p7295_p2 = scmp.ne.s32.totalorder %s9320_s0, %s7294_s14  ;;  %p7298_p3 = scmp.lt.u32.totalorder %s7294_s14, %s9320_s0 }
  0x2a   :  { %p7300_p4 = pnand %p7298_p3, %p7295_p2 }
  0x2c   :  { %7303 = shalt.err (!%p7300_p4)
}
  0x2d   :  { %s7304_s21 = scalar_lea.vmem %s31_s18, 128  ;;  %p7309_p6 = scmp.lt.s32.totalorder %s31_s18, %s31_s18 }
  0x2e   :  { %p7305_p5 = scmp.ne.s32.totalorder %s31_s18, %s7304_s21  ;;  %p7310_p7 = scmp.lt.s32.totalorder %s7304_s21, %s7304_s21 }
  0x30   :  { %p7311_p8 = por %p7310_p7, %p7309_p6 }
  0x32   :  { %p7312_p9 = pnand %p7311_p8, %p7305_p5 }
  0x34   :  { %7315 = shalt.err (!%p7312_p9)
}
  0x35   :  { %33 = dma.hbm_to_vmem [thread:$0]  %s9320_s0, 128, %s31_s18, [#allocation7]  }
  0x36   :  { %s7465_s23 = smov [#allocation11]   ;;  %s7466_s25 = smov [#allocation14]  }
  0x37   :  { %s51_s24 = sshll.u32 %s7465_s23, 4  ;;  %s75_s26 = sshll.u32 %s7466_s25, 4  ;;  %s52_s24 = int_to_ptr.vmem [resolvable:$true] %s51_s24  ;;  %s76_s26 = int_to_ptr.vmem [resolvable:$true] %s75_s26 }
  0x38   :  { %s7316_s29 = scalar_lea.hbm %s9323_s3, 8192 }
  0x39   :  { %p7317_p10 = scmp.ne.s32.totalorder %s9323_s3, %s7316_s29  ;;  %p7320_p11 = scmp.lt.u32.totalorder %s7316_s29, %s9323_s3 }
  0x3b   :  { %p7322_p12 = pnand %p7320_p11, %p7317_p10 }
  0x3d   :  { %7325 = shalt.err (!%p7322_p12)
}
  0x3e   :  { %s7326_s0 = scalar_lea.vmem %s52_s24, 8192  ;;  %p7331_p0 = scmp.lt.s32.totalorder %s52_s24, %s52_s24 }
  0x3f   :  { %p7327_p13 = scmp.ne.s32.totalorder %s52_s24, %s7326_s0  ;;  %p7332_p1 = scmp.lt.s32.totalorder %s7326_s0, %s7326_s0 }
  0x41   :  { %p7333_p2 = por %p7332_p1, %p7331_p0 }
  0x43   :  { %p7334_p3 = pnand %p7333_p2, %p7327_p13 }
  0x45   :  { %7337 = shalt.err (!%p7334_p3)
}
  0x46   :  { %57 = dma.hbm_to_vmem [thread:$0]  %s9323_s3, 8192, %s52_s24, [#allocation10], %s7463_s22, %s7463_s22, %s7464_s27  }
  0x47   :  { %s7338_s21 = scalar_lea.hbm %s9325_s5, 16384 }
  0x48   :  { %p7339_p4 = scmp.ne.s32.totalorder %s9325_s5, %s7338_s21  ;;  %p7342_p5 = scmp.lt.u32.totalorder %s7338_s21, %s9325_s5 }
  0x4a   :  { %p7344_p6 = pnand %p7342_p5, %p7339_p4 }
  0x4c   :  { %7347 = shalt.err (!%p7344_p6)
}
  0x4d   :  { %s7348_s2 = scalar_lea.vmem %s76_s26, 16384  ;;  %p7353_p8 = scmp.lt.s32.totalorder %s76_s26, %s76_s26 }
  0x4e   :  { %p7349_p7 = scmp.ne.s32.totalorder %s76_s26, %s7348_s2  ;;  %p7354_p9 = scmp.lt.s32.totalorder %s7348_s2, %s7348_s2 }
  0x50   :  { %p7355_p10 = por %p7354_p9, %p7353_p8 }
  0x52   :  { %p7356_p11 = pnand %p7355_p10, %p7349_p7 }
  0x54   :  { %7359 = shalt.err (!%p7356_p11)
}
  0x55   :  { %81 = dma.hbm_to_vmem [thread:$0]  %s9325_s5, 16384, %s76_s26, [#allocation13], %s7463_s22, %s7463_s22, %s7464_s27  }
  0x56   :  { %s7467_s28 = smov [#allocation15]   ;;  %s7360_s14 = scalar_lea.hbm %s9328_s8, 2048 }
  0x57   :  { %s91_s29 = sshll.u32 %s7467_s28, 4  ;;  %p7361_p12 = scmp.ne.s32.totalorder %s9328_s8, %s7360_s14  ;;  %s92_s29 = int_to_ptr.vmem [resolvable:$true] %s91_s29 }
  0x58   :  { %p7364_p13 = scmp.lt.u32.totalorder %s7360_s14, %s9328_s8 }
  0x5a   :  { %p7366_p0 = pnand %p7364_p13, %p7361_p12 }
  0x5c   :  { %7369 = shalt.err (!%p7366_p0)
}
  0x5d   :  { %s7370_s19 = scalar_lea.vmem %s92_s29, 2048  ;;  %p7375_p2 = scmp.lt.s32.totalorder %s92_s29, %s92_s29 }
  0x5e   :  { %p7371_p1 = scmp.ne.s32.totalorder %s92_s29, %s7370_s19  ;;  %p7376_p3 = scmp.lt.s32.totalorder %s7370_s19, %s7370_s19 }
  0x60   :  { %p7377_p4 = por %p7376_p3, %p7375_p2 }
  0x62   :  { %p7378_p5 = pnand %p7377_p4, %p7371_p1 }
  0x64   :  { %7381 = shalt.err (!%p7378_p5)
}
  0x65   :  { %s7468_s5 = smov 128   ;;  %s7469_s22 = smov 8  }
  0x66   :  { %97 = dma.hbm_to_vmem [thread:$0]  %s9328_s8, 2048, %s92_s29, [#allocation16], %s7468_s5, %s7468_s5, %s7469_s22  }
  0x67   :  { %7448 = dma.done.wait [#allocation7], 128  }
  0x68   :  { %7449 = vsyncadd [#allocation7], 4294967168 }
  0x69   :  { %7450 = dma.done.wait [#allocation10], 8224  }
  0x6a   :  { %7451 = vsyncadd [#allocation10], 4294959072 }
  0x6b   :  { %7452 = dma.done.wait [#allocation13], 24576  }
  0x6c   :  { %7453 = vsyncadd [#allocation13], 4294942720 }
  0x6d   :  { %7454 = dma.done.wait [#allocation16], 2048  }
  0x6e   :  { %7455 = vsyncadd [#allocation16], 4294965248  ;;  %v7470_v0 = vmov 0.0   ;;  %v125_v1 = vld [vmem:[#allocation11 + $0x8] sm:$0xff]  ;;  %v127_v3 = vld [vmem:[#allocation11 + $0x18] sm:$0xff]  ;;  %vm7473_vm0 = vmmov 0  }
  0x6f   :  { %274 = vmatprep.mubr.f32.mxu0 %v7470_v0  ;;  %122 = vst [vmem:[#allocation4] sm:$0xff] %v7470_v0  ;;  %345 = vmatprep.mubr.f32.mxu1 %v7470_v0  ;;  %v129_v2 = vld [vmem:[#allocation11 + $0x28] sm:$0xff]  ;;  %v131_v5 = vld [vmem:[#allocation11 + $0x38] sm:$0xff]  ;;  %v124_v6 = vld [vmem:[#allocation11] sm:$0xff] }
  0x70   :  { %v5352_v4 = vpack.c.bf16 %v129_v2, %v125_v1  ;;  %v128_v7 = vld [vmem:[#allocation11 + $0x20] sm:$0xff]  ;;  %v5384_v8 = vpack.c.bf16 %v131_v5, %v127_v3  ;;  %v126_v10 = vld [vmem:[#allocation11 + $0x10] sm:$0xff]  ;;  %v133_v12 = vld [vmem:[#allocation11 + $0x48] sm:$0xff] }
  0x71   :  { %v5354_v9 = vpack.c.bf16 %v128_v7, %v124_v6  ;;  %v130_v11 = vld [vmem:[#allocation11 + $0x30] sm:$0xff]  ;;  %v137_v14 = vld [vmem:[#allocation11 + $0x68] sm:$0xff]  ;;  %v135_v15 = vld [vmem:[#allocation11 + $0x58] sm:$0xff] }
  0x72   :  { %5353 = vmatprep.subr.bf16.mxu0 %v5352_v4  ;;  %v5386_v13 = vpack.c.bf16 %v130_v11, %v126_v10  ;;  %v139_v16 = vld [vmem:[#allocation11 + $0x78] sm:$0xff]  ;;  %5385 = vmatprep.subr.bf16.mxu1 %v5384_v8  ;;  %v5356_v17 = vpack.c.bf16 %v137_v14, %v133_v12  ;;  %v132_v19 = vld [vmem:[#allocation11 + $0x40] sm:$0xff]  ;;  %v134_v21 = vld [vmem:[#allocation11 + $0x50] sm:$0xff] }
  0x73   :  { %5355 = vmatpush1.bf16.msra.mxu0 %v5354_v9  ;;  %v5388_v18 = vpack.c.bf16 %v139_v16, %v135_v15  ;;  %v136_v20 = vld [vmem:[#allocation11 + $0x60] sm:$0xff]  ;;  %v138_v23 = vld [vmem:[#allocation11 + $0x70] sm:$0xff]  ;;  %v141_v24 = vld [vmem:[#allocation11 + $0x88] sm:$0xff] }
  0x74   :  { %5387 = vmatpush1.bf16.msra.mxu1 %v5386_v13  ;;  %v5358_v22 = vpack.c.bf16 %v136_v20, %v132_v19  ;;  %v145_v25 = vld [vmem:[#allocation11 + $0xa8] sm:$0xff]  ;;  %5357 = vmatprep.subr.bf16.mxu0 %v5356_v17  ;;  %v5390_v26 = vpack.c.bf16 %v138_v23, %v134_v21  ;;  %v143_v28 = vld [vmem:[#allocation11 + $0x98] sm:$0xff]  ;;  %v140_v30 = vld [vmem:[#allocation11 + $0x80] sm:$0xff] }
  0x75   :  { %5389 = vmatprep.subr.bf16.mxu1 %v5388_v18  ;;  %v5360_v27 = vpack.c.bf16 %v145_v25, %v141_v24  ;;  %v147_v29 = vld [vmem:[#allocation11 + $0xb8] sm:$0xff]  ;;  %v144_v32 = vld [vmem:[#allocation11 + $0xa0] sm:$0xff]  ;;  %v142_v33 = vld [vmem:[#allocation11 + $0x90] sm:$0xff] }
  0x76   :  { %v5392_v31 = vpack.c.bf16 %v147_v29, %v143_v28  ;;  %v146_v34 = vld [vmem:[#allocation11 + $0xb0] sm:$0xff]  ;;  %v5362_v35 = vpack.c.bf16 %v144_v32, %v140_v30  ;;  %v149_v36 = vld [vmem:[#allocation11 + $0xc8] sm:$0xff]  ;;  %v151_v38 = vld [vmem:[#allocation11 + $0xd8] sm:$0xff] }
  0x77   :  { %5359 = vmatpush1.bf16.msra.mxu0 %v5358_v22  ;;  %v153_v37 = vld [vmem:[#allocation11 + $0xe8] sm:$0xff]  ;;  %v5394_v39 = vpack.c.bf16 %v146_v34, %v142_v33  ;;  %v155_v41 = vld [vmem:[#allocation11 + $0xf8] sm:$0xff]  ;;  %v148_v42 = vld [vmem:[#allocation11 + $0xc0] sm:$0xff] }
  0x78   :  { %5391 = vmatpush1.bf16.msra.mxu1 %v5390_v26  ;;  %5361 = vmatprep.subr.bf16.mxu0 %v5360_v27  ;;  %v5364_v40 = vpack.c.bf16 %v153_v37, %v149_v36  ;;  %v152_v43 = vld [vmem:[#allocation11 + $0xe0] sm:$0xff]  ;;  %v5396_v44 = vpack.c.bf16 %v155_v41, %v151_v38  ;;  %v150_v45 = vld [vmem:[#allocation11 + $0xd0] sm:$0xff]  ;;  %v157_v47 = vld [vmem:[#allocation11 + $0x108] sm:$0xff] }
  0x79   :  { %5393 = vmatprep.subr.bf16.mxu1 %v5392_v31  ;;  %v154_v46 = vld [vmem:[#allocation11 + $0xf0] sm:$0xff]  ;;  %v161_v48 = vld [vmem:[#allocation11 + $0x128] sm:$0xff]  ;;  %v159_v49 = vld [vmem:[#allocation11 + $0x118] sm:$0xff]  ;;  %v5366_v51 = vpack.c.bf16 %v152_v43, %v148_v42 }
  0x7a   :  { %v163_v50 = vld [vmem:[#allocation11 + $0x138] sm:$0xff]  ;;  %v5398_v52 = vpack.c.bf16 %v154_v46, %v150_v45  ;;  %v5368_v53 = vpack.c.bf16 %v161_v48, %v157_v47  ;;  %v156_v54 = vld [vmem:[#allocation11 + $0x100] sm:$0xff]  ;;  %v158_v56 = vld [vmem:[#allocation11 + $0x110] sm:$0xff] }
  0x7b   :  { %5363 = vmatpush1.bf16.msra.mxu0 %v5362_v35  ;;  %v160_v55 = vld [vmem:[#allocation11 + $0x120] sm:$0xff]  ;;  %v5400_v57 = vpack.c.bf16 %v163_v50, %v159_v49  ;;  %v162_v58 = vld [vmem:[#allocation11 + $0x130] sm:$0xff]  ;;  %v165_v59 = vld [vmem:[#allocation11 + $0x148] sm:$0xff] }
  0x7c   :  { %5395 = vmatpush1.bf16.msra.mxu1 %v5394_v39  ;;  %5365 = vmatprep.subr.bf16.mxu0 %v5364_v40  ;;  %v169_v60 = vld [vmem:[#allocation11 + $0x168] sm:$0xff]  ;;  %v167_v61 = vld [vmem:[#allocation11 + $0x158] sm:$0xff]  ;;  %v5370_v63 = vpack.c.bf16 %v160_v55, %v156_v54  ;;  %v5402_v1 = vpack.c.bf16 %v162_v58, %v158_v56  ;;  %v164_v3 = vld [vmem:[#allocation11 + $0x140] sm:$0xff] }
  0x7d   :  { %5397 = vmatprep.subr.bf16.mxu1 %v5396_v44  ;;  %v171_v62 = vld [vmem:[#allocation11 + $0x178] sm:$0xff]  ;;  %v5372_v2 = vpack.c.bf16 %v169_v60, %v165_v59  ;;  %v168_v4 = vld [vmem:[#allocation11 + $0x160] sm:$0xff]  ;;  %v166_v5 = vld [vmem:[#allocation11 + $0x150] sm:$0xff] }
  0x7e   :  { %v5404_v6 = vpack.c.bf16 %v171_v62, %v167_v61  ;;  %v170_v7 = vld [vmem:[#allocation11 + $0x170] sm:$0xff]  ;;  %v173_v8 = vld [vmem:[#allocation11 + $0x188] sm:$0xff]  ;;  %v175_v10 = vld [vmem:[#allocation11 + $0x198] sm:$0xff]  ;;  %v5374_v12 = vpack.c.bf16 %v168_v4, %v164_v3 }
  0x7f   :  { %5367 = vmatpush1.bf16.msra.mxu0 %v5366_v51  ;;  %v177_v9 = vld [vmem:[#allocation11 + $0x1a8] sm:$0xff]  ;;  %v179_v11 = vld [vmem:[#allocation11 + $0x1b8] sm:$0xff]  ;;  %v5406_v13 = vpack.c.bf16 %v170_v7, %v166_v5  ;;  %v172_v15 = vld [vmem:[#allocation11 + $0x180] sm:$0xff] }
  0x80   :  { %5399 = vmatpush1.bf16.msra.mxu1 %v5398_v52  ;;  %5369 = vmatprep.subr.bf16.mxu0 %v5368_v53  ;;  %v5376_v14 = vpack.c.bf16 %v177_v9, %v173_v8  ;;  %v176_v16 = vld [vmem:[#allocation11 + $0x1a0] sm:$0xff]  ;;  %v174_v17 = vld [vmem:[#allocation11 + $0x190] sm:$0xff]  ;;  %v5408_v18 = vpack.c.bf16 %v179_v11, %v175_v10  ;;  %v181_v20 = vld [vmem:[#allocation11 + $0x1c8] sm:$0xff] }
  0x81   :  { %5401 = vmatprep.subr.bf16.mxu1 %v5400_v57  ;;  %v178_v19 = vld [vmem:[#allocation11 + $0x1b0] sm:$0xff]  ;;  %v185_v21 = vld [vmem:[#allocation11 + $0x1e8] sm:$0xff]  ;;  %v183_v22 = vld [vmem:[#allocation11 + $0x1d8] sm:$0xff]  ;;  %v5378_v24 = vpack.c.bf16 %v176_v16, %v172_v15 }
  0x82   :  { %v187_v23 = vld [vmem:[#allocation11 + $0x1f8] sm:$0xff]  ;;  %v5410_v25 = vpack.c.bf16 %v178_v19, %v174_v17  ;;  %v5380_v26 = vpack.c.bf16 %v185_v21, %v181_v20  ;;  %v180_v27 = vld [vmem:[#allocation11 + $0x1c0] sm:$0xff]  ;;  %v182_v29 = vld [vmem:[#allocation11 + $0x1d0] sm:$0xff] }
  0x83   :  { %5371 = vmatpush1.bf16.msra.mxu0 %v5370_v63  ;;  %v184_v28 = vld [vmem:[#allocation11 + $0x1e0] sm:$0xff]  ;;  %v5412_v30 = vpack.c.bf16 %v187_v23, %v183_v22  ;;  %v186_v31 = vld [vmem:[#allocation11 + $0x1f0] sm:$0xff]  ;;  %v360_v32 = vld [vmem:[#allocation12 + $0x8] sm:$0xff] }
  0x84   :  { %5403 = vmatpush1.bf16.msra.mxu1 %v5402_v1  ;;  %5373 = vmatprep.subr.bf16.mxu0 %v5372_v2  ;;  %v364_v33 = vld [vmem:[#allocation12 + $0x28] sm:$0xff]  ;;  %v362_v34 = vld [vmem:[#allocation12 + $0x18] sm:$0xff]  ;;  %v5382_v36 = vpack.c.bf16 %v184_v28, %v180_v27  ;;  %v5414_v37 = vpack.c.bf16 %v186_v31, %v182_v29  ;;  %v359_v39 = vld [vmem:[#allocation12] sm:$0xff] }
  0x85   :  { %5405 = vmatprep.subr.bf16.mxu1 %v5404_v6  ;;  %v366_v35 = vld [vmem:[#allocation12 + $0x38] sm:$0xff]  ;;  %v7626_v38 = vpack.c.bf16 %v364_v33, %v360_v32  ;;  %v363_v40 = vld [vmem:[#allocation12 + $0x20] sm:$0xff]  ;;  %v361_v41 = vld [vmem:[#allocation12 + $0x10] sm:$0xff] }
  0x86   :  { %v7628_v42 = vpack.c.bf16 %v366_v35, %v362_v34  ;;  %v365_v43 = vld [vmem:[#allocation12 + $0x30] sm:$0xff]  ;;  %v368_v44 = vld [vmem:[#allocation12 + $0x48] sm:$0xff]  ;;  %v370_v46 = vld [vmem:[#allocation12 + $0x58] sm:$0xff]  ;;  %v7630_v49 = vpack.c.bf16 %v363_v40, %v359_v39 }
  0x87   :  { %5375 = vmatpush1.bf16.msra.mxu0 %v5374_v12  ;;  %v372_v45 = vld [vmem:[#allocation12 + $0x68] sm:$0xff]  ;;  %v374_v47 = vld [vmem:[#allocation12 + $0x78] sm:$0xff]  ;;  %v7633_v50 = vpack.c.bf16 %v365_v43, %v361_v41  ;;  %v367_v52 = vld [vmem:[#allocation12 + $0x40] sm:$0xff] }
  0x88   :  { %5407 = vmatpush1.bf16.msra.mxu1 %v5406_v13  ;;  %5377 = vmatprep.subr.bf16.mxu0 %v5376_v14  ;;  %v123_v48 = vld [vmem:[#allocation6] sm:$0xff]  ;;  %v7635_v51 = vpack.c.bf16 %v372_v45, %v368_v44  ;;  %v371_v53 = vld [vmem:[#allocation12 + $0x60] sm:$0xff]  ;;  %v7638_v55 = vpack.c.bf16 %v374_v47, %v370_v46  ;;  %v376_v57 = vld [vmem:[#allocation12 + $0x88] sm:$0xff] }
  0x89   :  { %5409 = vmatprep.subr.bf16.mxu1 %v5408_v18  ;;  %v369_v54 = vld [vmem:[#allocation12 + $0x50] sm:$0xff]  ;;  %v380_v58 = vld [vmem:[#allocation12 + $0xa8] sm:$0xff]  ;;  %v378_v59 = vld [vmem:[#allocation12 + $0x98] sm:$0xff]  ;;  %v7641_v61 = vpack.c.bf16 %v371_v53, %v367_v52 }
  0x8a   :  { %v373_v56 = vld [vmem:[#allocation12 + $0x70] sm:$0xff]  ;;  %v382_v60 = vld [vmem:[#allocation12 + $0xb8] sm:$0xff]  ;;  %v7647_v63 = vpack.c.bf16 %v380_v58, %v376_v57  ;;  %v375_v1 = vld [vmem:[#allocation12 + $0x80] sm:$0xff] }
  0x8b   :  { %5379 = vmatpush1.bf16.msra.mxu0 %v5378_v24  ;;  %v7645_v62 = vpack.c.bf16 %v373_v56, %v369_v54  ;;  %v379_v2 = vld [vmem:[#allocation12 + $0xa0] sm:$0xff]  ;;  %v377_v3 = vld [vmem:[#allocation12 + $0x90] sm:$0xff]  ;;  %v7650_v4 = vpack.c.bf16 %v382_v60, %v378_v59  ;;  %v384_v6 = vld [vmem:[#allocation12 + $0xc8] sm:$0xff] }
  0x8c   :  { %5411 = vmatpush1.bf16.msra.mxu1 %v5410_v25  ;;  %5381 = vmatprep.subr.bf16.mxu0 %v5380_v26  ;;  %v381_v5 = vld [vmem:[#allocation12 + $0xb0] sm:$0xff]  ;;  %v388_v7 = vld [vmem:[#allocation12 + $0xe8] sm:$0xff]  ;;  %v386_v8 = vld [vmem:[#allocation12 + $0xd8] sm:$0xff]  ;;  %v7655_v10 = vpack.c.bf16 %v379_v2, %v375_v1 }
  0x8d   :  { %5413 = vmatprep.subr.bf16.mxu1 %v5412_v30  ;;  %v390_v9 = vld [vmem:[#allocation12 + $0xf8] sm:$0xff]  ;;  %v7659_v11 = vpack.c.bf16 %v381_v5, %v377_v3  ;;  %v7661_v12 = vpack.c.bf16 %v388_v7, %v384_v6  ;;  %v383_v13 = vld [vmem:[#allocation12 + $0xc0] sm:$0xff]  ;;  %v385_v15 = vld [vmem:[#allocation12 + $0xd0] sm:$0xff] }
  0x8e   :  { %v387_v14 = vld [vmem:[#allocation12 + $0xe0] sm:$0xff]  ;;  %v7664_v16 = vpack.c.bf16 %v390_v9, %v386_v8  ;;  %v392_v17 = vld [vmem:[#allocation12 + $0x108] sm:$0xff]  ;;  %v394_v19 = vld [vmem:[#allocation12 + $0x118] sm:$0xff] }
  0x8f   :  { %5383 = vmatpush1.bf16.msra.mxu0 %v5382_v36  ;;  %v396_v18 = vld [vmem:[#allocation12 + $0x128] sm:$0xff]  ;;  %v398_v20 = vld [vmem:[#allocation12 + $0x138] sm:$0xff]  ;;  %v7670_v22 = vpack.c.bf16 %v387_v14, %v383_v13  ;;  %v391_v25 = vld [vmem:[#allocation12 + $0x100] sm:$0xff] }
  0x90   :  { %5415 = vmatpush1.bf16.msra.mxu1 %v5414_v37  ;;  %5417 = vmatprep.subr.bf16.mxu0 %v7626_v38  ;;  %v118_v21 = vld [vmem:[%s9321_s1] sm:$0x3]  ;;  %v7676_v24 = vpack.c.bf16 %v396_v18, %v392_v17  ;;  %v395_v26 = vld [vmem:[#allocation12 + $0x120] sm:$0xff]  ;;  %v393_v27 = vld [vmem:[#allocation12 + $0x110] sm:$0xff]  ;;  %v7679_v28 = vpack.c.bf16 %v398_v20, %v394_v19 }
  0x91   :  { %5449 = vmatprep.subr.bf16.mxu1 %v7628_v42  ;;  %119 = vst [vmem:[#allocation2] sm:$0x3] %v118_v21  ;;  %v397_v29 = vld [vmem:[#allocation12 + $0x130] sm:$0xff]  ;;  %v400_v30 = vld [vmem:[#allocation12 + $0x148] sm:$0xff]  ;;  %v402_v32 = vld [vmem:[#allocation12 + $0x158] sm:$0xff]  ;;  %v7682_v34 = vpack.c.bf16 %v395_v26, %v391_v25 }
  0x92   :  { %275 = vmatmul.mubr.f32.vlgmr.msra.gmra.mrb[0].mxu0 %v123_v48  ;;  %v404_v31 = vld [vmem:[#allocation12 + $0x168] sm:$0xff]  ;;  %v406_v33 = vld [vmem:[#allocation12 + $0x178] sm:$0xff]  ;;  %v7686_v35 = vpack.c.bf16 %v397_v29, %v393_v27  ;;  %v399_v37 = vld [vmem:[#allocation12 + $0x140] sm:$0xff] }
  0x93   :  { %346 = vmatmul.mubr.f32.vlgmr.msra.gmra.mrb[0].mxu1 %v123_v48  ;;  %5419 = vmatpush1.bf16.msra.mxu0 %v7630_v49  ;;  %v7688_v36 = vpack.c.bf16 %v404_v31, %v400_v30  ;;  %v403_v39 = vld [vmem:[#allocation12 + $0x160] sm:$0xff]  ;;  %v401_v40 = vld [vmem:[#allocation12 + $0x150] sm:$0xff]  ;;  %v7691_v41 = vpack.c.bf16 %v406_v33, %v402_v32  ;;  %v408_v44 = vld [vmem:[#allocation12 + $0x188] sm:$0xff] }
  0x94   :  { %5451 = vmatpush1.bf16.msra.mxu1 %v7633_v50  ;;  %5421 = vmatprep.subr.bf16.mxu0 %v7635_v51  ;;  %v405_v43 = vld [vmem:[#allocation12 + $0x170] sm:$0xff]  ;;  %v412_v45 = vld [vmem:[#allocation12 + $0x1a8] sm:$0xff]  ;;  %v410_v46 = vld [vmem:[#allocation12 + $0x198] sm:$0xff]  ;;  %v7694_v48 = vpack.c.bf16 %v403_v39, %v399_v37 }
  0x95   :  { %5453 = vmatprep.subr.bf16.mxu1 %v7638_v55  ;;  %487 = vmatprep.mubr.f32.mxu0 %v7470_v0  ;;  %v414_v47 = vld [vmem:[#allocation12 + $0x1b8] sm:$0xff]  ;;  %v7698_v52 = vpack.c.bf16 %v405_v43, %v401_v40  ;;  %v7700_v53 = vpack.c.bf16 %v412_v45, %v408_v44  ;;  %v407_v54 = vld [vmem:[#allocation12 + $0x180] sm:$0xff]  ;;  %v409_v57 = vld [vmem:[#allocation12 + $0x190] sm:$0xff] }
  0x96   :  { %558 = vmatprep.mubr.f32.mxu1 %v7470_v0  ;;  %v389_v0 = vld [vmem:[#allocation12 + $0xf0] sm:$0xff]  ;;  %v411_v56 = vld [vmem:[#allocation12 + $0x1a0] sm:$0xff]  ;;  %v7703_v58 = vpack.c.bf16 %v414_v47, %v410_v46  ;;  %v416_v60 = vld [vmem:[#allocation12 + $0x1c8] sm:$0xff] }
  0x97   :  { %5423 = vmatpush1.bf16.msra.mxu0 %v7641_v61  ;;  %v7674_v23 = vpack.c.bf16 %v389_v0, %v385_v15  ;;  %v413_v59 = vld [vmem:[#allocation12 + $0x1b0] sm:$0xff]  ;;  %v420_v1 = vld [vmem:[#allocation12 + $0x1e8] sm:$0xff]  ;;  %v418_v2 = vld [vmem:[#allocation12 + $0x1d8] sm:$0xff]  ;;  %v7706_v5 = vpack.c.bf16 %v411_v56, %v407_v54 }
  0x98   :  { %5455 = vmatpush1.bf16.msra.mxu1 %v7645_v62  ;;  %5425 = vmatprep.subr.bf16.mxu0 %v7647_v63  ;;  %v422_v3 = vld [vmem:[#allocation12 + $0x1f8] sm:$0xff]  ;;  %v7710_v6 = vpack.c.bf16 %v413_v59, %v409_v57  ;;  %v7712_v7 = vpack.c.bf16 %v420_v1, %v416_v60  ;;  %v415_v8 = vld [vmem:[#allocation12 + $0x1c0] sm:$0xff]  ;;  %v417_v14 = vld [vmem:[#allocation12 + $0x1d0] sm:$0xff] }
  0x99   :  { %5457 = vmatprep.subr.bf16.mxu1 %v7650_v4  ;;  %v419_v9 = vld [vmem:[#allocation12 + $0x1e0] sm:$0xff]  ;;  %v7715_v13 = vpack.c.bf16 %v422_v3, %v418_v2  ;;  %v421_v15 = vld [vmem:[#allocation12 + $0x1f0] sm:$0xff]  ;;  %v356_v18 = vld [vmem:[#allocation2] sm:$0x1] }
  0x9a   :  { %v7718_v0 = vpack.c.bf16 %v419_v9, %v415_v8  ;;  %v7722_v17 = vpack.c.bf16 %v421_v15, %v417_v14  ;;  %v631_v19 = vld [vmem:[#allocation14 + $0x8] sm:$0xff]  ;;  %v633_v21 = vld [vmem:[#allocation14 + $0x18] sm:$0xff]  ;;  %v630_v27 = vld [vmem:[#allocation14] sm:$0xff] }
  0x9b   :  { %5427 = vmatpush1.bf16.msra.mxu0 %v7655_v10  ;;  %v635_v20 = vld [vmem:[#allocation14 + $0x28] sm:$0xff]  ;;  %v637_v26 = vld [vmem:[#allocation14 + $0x38] sm:$0xff]  ;;  %v634_v29 = vld [vmem:[#allocation14 + $0x20] sm:$0xff] }
  0x9c   :  { %5459 = vmatpush1.bf16.msra.mxu1 %v7659_v11  ;;  %5429 = vmatprep.subr.bf16.mxu0 %v7661_v12  ;;  %v7727_v25 = vpack.c.bf16 %v635_v20, %v631_v19  ;;  %v7729_v30 = vpack.c.bf16 %v637_v26, %v633_v21  ;;  %v7731_v31 = vpack.c.bf16 %v634_v29, %v630_v27  ;;  %v632_v32 = vld [vmem:[#allocation14 + $0x10] sm:$0xff]  ;;  %v639_v37 = vld [vmem:[#allocation14 + $0x48] sm:$0xff]  ;;  %v641_v43 = vld [vmem:[#allocation14 + $0x58] sm:$0xff] }
  0x9d   :  { %5461 = vmatprep.subr.bf16.mxu1 %v7664_v16  ;;  %v636_v33 = vld [vmem:[#allocation14 + $0x30] sm:$0xff]  ;;  %v643_v40 = vld [vmem:[#allocation14 + $0x68] sm:$0xff]  ;;  %v645_v44 = vld [vmem:[#allocation14 + $0x78] sm:$0xff] }
  0x9e   :  { %v7734_v39 = vpack.c.bf16 %v636_v33, %v632_v32  ;;  %v7738_v45 = vpack.c.bf16 %v643_v40, %v639_v37  ;;  %v7740_v46 = vpack.c.bf16 %v645_v44, %v641_v43  ;;  %v638_v47 = vld [vmem:[#allocation14 + $0x40] sm:$0xff]  ;;  %v640_v56 = vld [vmem:[#allocation14 + $0x50] sm:$0xff]  ;;  %v647_v1 = vld [vmem:[#allocation14 + $0x88] sm:$0xff] }
  0x9f   :  { %5431 = vmatpush1.bf16.msra.mxu0 %v7670_v22  ;;  %v642_v54 = vld [vmem:[#allocation14 + $0x60] sm:$0xff]  ;;  %v644_v59 = vld [vmem:[#allocation14 + $0x70] sm:$0xff]  ;;  %v651_v2 = vld [vmem:[#allocation14 + $0xa8] sm:$0xff] }
  0xa0   :  { %5463 = vmatpush1.bf16.msra.mxu1 %v7674_v23  ;;  %5433 = vmatprep.subr.bf16.mxu0 %v7676_v24  ;;  %v7743_v57 = vpack.c.bf16 %v642_v54, %v638_v47  ;;  %v7747_v60 = vpack.c.bf16 %v644_v59, %v640_v56  ;;  %v649_v3 = vld [vmem:[#allocation14 + $0x98] sm:$0xff]  ;;  %v7751_v8 = vpack.c.bf16 %v651_v2, %v647_v1  ;;  %v646_v15 = vld [vmem:[#allocation14 + $0x80] sm:$0xff]  ;;  %v648_v19 = vld [vmem:[#allocation14 + $0x90] sm:$0xff] }
  0xa1   :  { %5465 = vmatprep.subr.bf16.mxu1 %v7679_v28  ;;  %v653_v9 = vld [vmem:[#allocation14 + $0xb8] sm:$0xff]  ;;  %v652_v21 = vld [vmem:[#allocation14 + $0xb0] sm:$0xff]  ;;  %v655_v27 = vld [vmem:[#allocation14 + $0xc8] sm:$0xff] }
  0xa2   :  { %v7753_v14 = vpack.c.bf16 %v653_v9, %v649_v3  ;;  %v7759_v26 = vpack.c.bf16 %v652_v21, %v648_v19  ;;  %v659_v29 = vld [vmem:[#allocation14 + $0xe8] sm:$0xff]  ;;  %v657_v32 = vld [vmem:[#allocation14 + $0xd8] sm:$0xff]  ;;  %v654_v40 = vld [vmem:[#allocation14 + $0xc0] sm:$0xff] }
  0xa3   :  { %5435 = vmatpush1.bf16.msra.mxu0 %v7682_v34  ;;  %v7763_v33 = vpack.c.bf16 %v659_v29, %v655_v27  ;;  %v661_v37 = vld [vmem:[#allocation14 + $0xf8] sm:$0xff]  ;;  %v658_v43 = vld [vmem:[#allocation14 + $0xe0] sm:$0xff]  ;;  %v656_v54 = vld [vmem:[#allocation14 + $0xd0] sm:$0xff] }
  0xa4   :  { %5467 = vmatpush1.bf16.msra.mxu1 %v7686_v35  ;;  %5437 = vmatprep.subr.bf16.mxu0 %v7688_v36  ;;  %9557 = vst [vmem:[#allocation27_spill] sm:$0xff] %v7753_v14  ;;  %9559 = vst [vmem:[#allocation29_spill] sm:$0xff] %v7759_v26  ;;  %v7765_v44 = vpack.c.bf16 %v661_v37, %v657_v32  ;;  %v7767_v47 = vpack.c.bf16 %v658_v43, %v654_v40  ;;  %v660_v56 = vld [vmem:[#allocation14 + $0xf0] sm:$0xff]  ;;  %v663_v1 = vld [vmem:[#allocation14 + $0x108] sm:$0xff] }
  0xa5   :  { %5469 = vmatprep.subr.bf16.mxu1 %v7691_v41  ;;  %9560 = vst [vmem:[#allocation30_spill] sm:$0xff] %v7763_v33  ;;  %v7770_v59 = vpack.c.bf16 %v660_v56, %v656_v54  ;;  %v667_v2 = vld [vmem:[#allocation14 + $0x128] sm:$0xff]  ;;  %v665_v3 = vld [vmem:[#allocation14 + $0x118] sm:$0xff]  ;;  %v666_v19 = vld [vmem:[#allocation14 + $0x120] sm:$0xff] }
  0xa6   :  { %9561 = vst [vmem:[#allocation31_spill] sm:$0xff] %v7765_v44  ;;  %9562 = vst [vmem:[#allocation32_spill] sm:$0xff] %v7767_v47  ;;  %v7775_v9 = vpack.c.bf16 %v667_v2, %v663_v1  ;;  %v664_v29 = vld [vmem:[#allocation14 + $0x110] sm:$0xff]  ;;  %v671_v40 = vld [vmem:[#allocation14 + $0x148] sm:$0xff] }
  0xa7   :  { %5439 = vmatpush1.bf16.msra.mxu0 %v7694_v48  ;;  %9563 = vst [vmem:[#allocation33_spill] sm:$0xff] %v7770_v59  ;;  %v668_v32 = vld [vmem:[#allocation14 + $0x130] sm:$0xff]  ;;  %v675_v43 = vld [vmem:[#allocation14 + $0x168] sm:$0xff]  ;;  %v673_v54 = vld [vmem:[#allocation14 + $0x158] sm:$0xff] }
  0xa8   :  { %5471 = vmatpush1.bf16.msra.mxu1 %v7698_v52  ;;  %5441 = vmatprep.subr.bf16.mxu0 %v7700_v53  ;;  %9564 = vst [vmem:[#allocation34_spill] sm:$0xff] %v7775_v9  ;;  %v7782_v37 = vpack.c.bf16 %v668_v32, %v664_v29  ;;  %v7787_v56 = vpack.c.bf16 %v675_v43, %v671_v40  ;;  %v677_v1 = vld [vmem:[#allocation14 + $0x178] sm:$0xff]  ;;  %v670_v2 = vld [vmem:[#allocation14 + $0x140] sm:$0xff]  ;;  %v676_v29 = vld [vmem:[#allocation14 + $0x170] sm:$0xff] }
  0xa9   :  { %5473 = vmatprep.subr.bf16.mxu1 %v7703_v58  ;;  %v683_v40 = vld [vmem:[#allocation14 + $0x1a8] sm:$0xff]  ;;  %v681_v43 = vld [vmem:[#allocation14 + $0x198] sm:$0xff] }
  0xaa   :  { %9567 = vst [vmem:[#allocation37_spill] sm:$0xff] %v7782_v37  ;;  %9568 = vst [vmem:[#allocation38_spill] sm:$0xff] %v7787_v56 }
  0xab   :  { %5443 = vmatpush1.bf16.msra.mxu0 %v7706_v5 }
  0xac   :  { %5475 = vmatpush1.bf16.msra.mxu1 %v7710_v6  ;;  %5445 = vmatprep.subr.bf16.mxu0 %v7712_v7 }
  0xad   :  { %5477 = vmatprep.subr.bf16.mxu1 %v7715_v13 }
  0xaf   :  { %5447 = vmatpush1.bf16.msra.mxu0 %v7718_v0 }
  0xb0   :  { %5479 = vmatpush1.bf16.msra.mxu1 %v7722_v17  ;;  %5481 = vmatprep.subr.bf16.mxu0 %v7727_v25 }
  0xb1   :  { %5545 = vmatprep.subr.bf16.mxu1 %v7729_v30 }
  0xb2   :  { %488 = vmatmul.mubr.f32.vlgmr.msra.gmra.mrb[2].mxu0 %v356_v18 }
  0xb3   :  { %559 = vmatmul.mubr.f32.vlgmr.msra.gmra.mrb[2].mxu1 %v356_v18  ;;  %5483 = vmatpush1.bf16.msra.mxu0 %v7731_v31  ;;  %v650_v18 = vld [vmem:[#allocation14 + $0xa0] sm:$0xff] }
  0xb4   :  { %5547 = vmatpush1.bf16.msra.mxu1 %v7734_v39  ;;  %5485 = vmatprep.subr.bf16.mxu0 %v7738_v45  ;;  %v7756_v20 = vpack.c.bf16 %v650_v18, %v646_v15  ;;  %v669_v15 = vld [vmem:[#allocation14 + $0x138] sm:$0xff]  ;;  %v662_v18 = vld [vmem:[#allocation14 + $0x100] sm:$0xff] }
  0xb5   :  { %5549 = vmatprep.subr.bf16.mxu1 %v7740_v46  ;;  %v7777_v21 = vpack.c.bf16 %v669_v15, %v665_v3  ;;  %v7779_v27 = vpack.c.bf16 %v666_v19, %v662_v18  ;;  %v674_v3 = vld [vmem:[#allocation14 + $0x160] sm:$0xff]  ;;  %v7789_v15 = vpack.c.bf16 %v677_v1, %v673_v54  ;;  %v672_v19 = vld [vmem:[#allocation14 + $0x150] sm:$0xff]  ;;  %v685_v54 = vld [vmem:[#allocation14 + $0x1b8] sm:$0xff] }
  0xb6   :  { %9558 = vst [vmem:[#allocation28_spill] sm:$0xff] %v7756_v20  ;;  %v7791_v18 = vpack.c.bf16 %v674_v3, %v670_v2  ;;  %v7794_v32 = vpack.c.bf16 %v676_v29, %v672_v19  ;;  %v678_v1 = vld [vmem:[#allocation14 + $0x180] sm:$0xff]  ;;  %v7801_v3 = vpack.c.bf16 %v685_v54, %v681_v43  ;;  %v680_v19 = vld [vmem:[#allocation14 + $0x190] sm:$0xff]  ;;  %v693_v43 = vld [vmem:[#allocation14 + $0x1f8] sm:$0xff] }
  0xb7   :  { %5487 = vmatpush1.bf16.msra.mxu0 %v7743_v57  ;;  %9565 = vst [vmem:[#allocation35_spill] sm:$0xff] %v7777_v21  ;;  %9566 = vst [vmem:[#allocation36_spill] sm:$0xff] %v7779_v27  ;;  %v682_v2 = vld [vmem:[#allocation14 + $0x1a0] sm:$0xff]  ;;  %v684_v29 = vld [vmem:[#allocation14 + $0x1b0] sm:$0xff] }
  0xb8   :  { %5551 = vmatpush1.bf16.msra.mxu1 %v7747_v60  ;;  %5489 = vmatprep.subr.bf16.mxu0 %v7751_v8  ;;  %9569 = vst [vmem:[#allocation39_spill] sm:$0xff] %v7789_v15  ;;  %9570 = vst [vmem:[#allocation40_spill] sm:$0xff] %v7791_v18  ;;  %v686_v54 = vld [vmem:[#allocation14 + $0x1c0] sm:$0xff] }
  0xb9   :  { %5553 = vmatprep.subr.bf16.mxu1 %v7753_v14  ;;  %9571 = vst [vmem:[#allocation41_spill] sm:$0xff] %v7794_v32  ;;  %9573 = vst [vmem:[#allocation43_spill] sm:$0xff] %v7801_v3  ;;  %v120_v14 = vld [vmem:[#allocation9] sm:$0x3] }
  0xba   :  { %121 = vst [vmem:[#allocation3] sm:$0x3] %v120_v14 }
  0xbb   :  { %5491 = vmatpush1.bf16.msra.mxu0 %v7756_v20  ;;  %v628_v20 = vld [vmem:[#allocation2 + $0x1] sm:$0x1] }
  0xbc   :  { %5555 = vmatpush1.bf16.msra.mxu1 %v7759_v26  ;;  %5493 = vmatprep.subr.bf16.mxu0 %v7763_v33  ;;  %v737_v33 = vld [vmem:[#allocation14 + $0x358] sm:$0xff] }
  0xbd   :  { %5557 = vmatprep.subr.bf16.mxu1 %v7765_v44  ;;  %v739_v44 = vld [vmem:[#allocation14 + $0x368] sm:$0xff]  ;;  %v749_v26 = vld [vmem:[#allocation14 + $0x3b8] sm:$0xff]  ;;  %844 = vmatprep.mubr.f32.mxu0 %v628_v20 }
  0xbe   :  { %915 = vmatprep.mubr.f32.mxu1 %v628_v20  ;;  %v190_v20 = vlaneseq }
  0xbf   :  { %5495 = vmatpush1.bf16.msra.mxu0 %v7767_v47  ;;  %v735_v47 = vld [vmem:[#allocation14 + $0x348] sm:$0xff] }
  0xc0   :  { %5559 = vmatpush1.bf16.msra.mxu1 %v7770_v59  ;;  %5497 = vmatprep.subr.bf16.mxu0 %v7775_v9  ;;  %v713_v9 = vld [vmem:[#allocation14 + $0x298] sm:$0xff] }
  0xc1   :  { %5561 = vmatprep.subr.bf16.mxu1 %v7777_v21  ;;  %v7803_v21 = vpack.c.bf16 %v682_v2, %v678_v1  ;;  %v690_v1 = vld [vmem:[#allocation14 + $0x1e0] sm:$0xff] }
  0xc3   :  { %5499 = vmatpush1.bf16.msra.mxu0 %v7779_v27  ;;  %9574 = vst [vmem:[#allocation44_spill] sm:$0xff] %v7803_v21 }
  0xc4   :  { %5563 = vmatpush1.bf16.msra.mxu1 %v7782_v37  ;;  %5501 = vmatprep.subr.bf16.mxu0 %v7787_v56  ;;  %v679_v37 = vld [vmem:[#allocation14 + $0x188] sm:$0xff]  ;;  %v7815_v56 = vpack.c.bf16 %v690_v1, %v686_v54  ;;  %v698_v54 = vld [vmem:[#allocation14 + $0x220] sm:$0xff] }
  0xc5   :  { %5565 = vmatprep.subr.bf16.mxu1 %v7789_v15  ;;  %v7799_v27 = vpack.c.bf16 %v683_v40, %v679_v37  ;;  %v7806_v15 = vpack.c.bf16 %v684_v29, %v680_v19  ;;  %v691_v37 = vld [vmem:[#allocation14 + $0x1e8] sm:$0xff]  ;;  %v689_v40 = vld [vmem:[#allocation14 + $0x1d8] sm:$0xff]  ;;  %v688_v19 = vld [vmem:[#allocation14 + $0x1d0] sm:$0xff] }
  0xc6   :  { %v7813_v2 = vpack.c.bf16 %v693_v43, %v689_v40  ;;  %9578 = vst [vmem:[#allocation48_spill] sm:$0xff] %v7815_v56  ;;  %v692_v29 = vld [vmem:[#allocation14 + $0x1f0] sm:$0xff]  ;;  %v701_v40 = vld [vmem:[#allocation14 + $0x238] sm:$0xff]  ;;  %v694_v43 = vld [vmem:[#allocation14 + $0x200] sm:$0xff] }
  0xc7   :  { %5503 = vmatpush1.bf16.msra.mxu0 %v7791_v18  ;;  %9572 = vst [vmem:[#allocation42_spill] sm:$0xff] %v7799_v27  ;;  %9575 = vst [vmem:[#allocation45_spill] sm:$0xff] %v7806_v15 }
  0xc8   :  { %5567 = vmatpush1.bf16.msra.mxu1 %v7794_v32  ;;  %5505 = vmatprep.subr.bf16.mxu0 %v7799_v27  ;;  %v687_v32 = vld [vmem:[#allocation14 + $0x1c8] sm:$0xff]  ;;  %9577 = vst [vmem:[#allocation47_spill] sm:$0xff] %v7813_v2  ;;  %v7827_v27 = vpack.c.bf16 %v698_v54, %v694_v43  ;;  %v706_v43 = vld [vmem:[#allocation14 + $0x260] sm:$0xff] }
  0xc9   :  { %5569 = vmatprep.subr.bf16.mxu1 %v7801_v3  ;;  %v7811_v18 = vpack.c.bf16 %v691_v37, %v687_v32  ;;  %v7818_v3 = vpack.c.bf16 %v692_v29, %v688_v19  ;;  %v699_v32 = vld [vmem:[#allocation14 + $0x228] sm:$0xff]  ;;  %v697_v37 = vld [vmem:[#allocation14 + $0x218] sm:$0xff]  ;;  %v696_v19 = vld [vmem:[#allocation14 + $0x210] sm:$0xff] }
  0xca   :  { %v7825_v1 = vpack.c.bf16 %v701_v40, %v697_v37  ;;  %9582 = vst [vmem:[#allocation52_spill] sm:$0xff] %v7827_v27  ;;  %v700_v29 = vld [vmem:[#allocation14 + $0x230] sm:$0xff]  ;;  %v709_v37 = vld [vmem:[#allocation14 + $0x278] sm:$0xff]  ;;  %v702_v40 = vld [vmem:[#allocation14 + $0x240] sm:$0xff] }
  0xcb   :  { %5507 = vmatpush1.bf16.msra.mxu0 %v7803_v21  ;;  %9576 = vst [vmem:[#allocation46_spill] sm:$0xff] %v7811_v18  ;;  %9579 = vst [vmem:[#allocation49_spill] sm:$0xff] %v7818_v3 }
  0xcc   :  { %5571 = vmatpush1.bf16.msra.mxu1 %v7806_v15  ;;  %5509 = vmatprep.subr.bf16.mxu0 %v7811_v18  ;;  %v695_v15 = vld [vmem:[#allocation14 + $0x208] sm:$0xff]  ;;  %9581 = vst [vmem:[#allocation51_spill] sm:$0xff] %v7825_v1  ;;  %v7839_v18 = vpack.c.bf16 %v706_v43, %v702_v40 }
  0xcd   :  { %5573 = vmatprep.subr.bf16.mxu1 %v7813_v2  ;;  %v7823_v21 = vpack.c.bf16 %v699_v32, %v695_v15  ;;  %v7830_v2 = vpack.c.bf16 %v700_v29, %v696_v19  ;;  %v707_v15 = vld [vmem:[#allocation14 + $0x268] sm:$0xff]  ;;  %v705_v32 = vld [vmem:[#allocation14 + $0x258] sm:$0xff]  ;;  %v704_v19 = vld [vmem:[#allocation14 + $0x250] sm:$0xff] }
  0xce   :  { %v7837_v54 = vpack.c.bf16 %v709_v37, %v705_v32  ;;  %9586 = vst [vmem:[#allocation56_spill] sm:$0xff] %v7839_v18  ;;  %v708_v29 = vld [vmem:[#allocation14 + $0x270] sm:$0xff]  ;;  %v710_v32 = vld [vmem:[#allocation14 + $0x280] sm:$0xff] }
  0xcf   :  { %5511 = vmatpush1.bf16.msra.mxu0 %v7815_v56  ;;  %9580 = vst [vmem:[#allocation50_spill] sm:$0xff] %v7823_v21  ;;  %9583 = vst [vmem:[#allocation53_spill] sm:$0xff] %v7830_v2  ;;  %v714_v37 = vld [vmem:[#allocation14 + $0x2a0] sm:$0xff] }
  0xd0   :  { %5575 = vmatpush1.bf16.msra.mxu1 %v7818_v3  ;;  %5513 = vmatprep.subr.bf16.mxu0 %v7823_v21  ;;  %v703_v3 = vld [vmem:[#allocation14 + $0x248] sm:$0xff]  ;;  %9585 = vst [vmem:[#allocation55_spill] sm:$0xff] %v7837_v54  ;;  %v7851_v43 = vpack.c.bf16 %v714_v37, %v710_v32  ;;  %v720_v32 = vld [vmem:[#allocation14 + $0x2d0] sm:$0xff] }
  0xd1   :  { %5577 = vmatprep.subr.bf16.mxu1 %v7825_v1  ;;  %v7835_v56 = vpack.c.bf16 %v707_v15, %v703_v3  ;;  %v7842_v1 = vpack.c.bf16 %v708_v29, %v704_v19  ;;  %v715_v21 = vld [vmem:[#allocation14 + $0x2a8] sm:$0xff]  ;;  %v717_v15 = vld [vmem:[#allocation14 + $0x2b8] sm:$0xff]  ;;  %v712_v19 = vld [vmem:[#allocation14 + $0x290] sm:$0xff] }
  0xd2   :  { %v7849_v40 = vpack.c.bf16 %v717_v15, %v713_v9  ;;  %9590 = vst [vmem:[#allocation60_spill] sm:$0xff] %v7851_v43  ;;  %v716_v29 = vld [vmem:[#allocation14 + $0x2b0] sm:$0xff]  ;;  %v718_v9 = vld [vmem:[#allocation14 + $0x2c0] sm:$0xff] }
  0xd3   :  { %5515 = vmatpush1.bf16.msra.mxu0 %v7827_v27  ;;  %9584 = vst [vmem:[#allocation54_spill] sm:$0xff] %v7835_v56  ;;  %9587 = vst [vmem:[#allocation57_spill] sm:$0xff] %v7842_v1  ;;  %v711_v27 = vld [vmem:[#allocation14 + $0x288] sm:$0xff]  ;;  %v722_v15 = vld [vmem:[#allocation14 + $0x2e0] sm:$0xff] }
  0xd4   :  { %5579 = vmatpush1.bf16.msra.mxu1 %v7830_v2  ;;  %5517 = vmatprep.subr.bf16.mxu0 %v7835_v56  ;;  %v7846_v3 = vpack.c.bf16 %v715_v21, %v711_v27  ;;  %9589 = vst [vmem:[#allocation59_spill] sm:$0xff] %v7849_v40  ;;  %v719_v56 = vld [vmem:[#allocation14 + $0x2c8] sm:$0xff]  ;;  %v7854_v2 = vpack.c.bf16 %v716_v29, %v712_v19  ;;  %v725_v21 = vld [vmem:[#allocation14 + $0x2f8] sm:$0xff] }
  0xd5   :  { %5581 = vmatprep.subr.bf16.mxu1 %v7837_v54  ;;  %v723_v54 = vld [vmem:[#allocation14 + $0x2e8] sm:$0xff]  ;;  %v7862_v37 = vpack.c.bf16 %v722_v15, %v718_v9  ;;  %v730_v9 = vld [vmem:[#allocation14 + $0x320] sm:$0xff]  ;;  %v728_v15 = vld [vmem:[#allocation14 + $0x310] sm:$0xff] }
  0xd6   :  { %9588 = vst [vmem:[#allocation58_spill] sm:$0xff] %v7846_v3  ;;  %9591 = vst [vmem:[#allocation61_spill] sm:$0xff] %v7854_v2  ;;  %v7857_v27 = vpack.c.bf16 %v723_v54, %v719_v56  ;;  %v731_v19 = vld [vmem:[#allocation14 + $0x328] sm:$0xff]  ;;  %v733_v54 = vld [vmem:[#allocation14 + $0x338] sm:$0xff] }
  0xd7   :  { %5519 = vmatpush1.bf16.msra.mxu0 %v7839_v18  ;;  %v721_v18 = vld [vmem:[#allocation14 + $0x2d8] sm:$0xff]  ;;  %9594 = vst [vmem:[#allocation64_spill] sm:$0xff] %v7862_v37 }
  0xd8   :  { %5583 = vmatpush1.bf16.msra.mxu1 %v7842_v1  ;;  %5521 = vmatprep.subr.bf16.mxu0 %v7846_v3  ;;  %9592 = vst [vmem:[#allocation62_spill] sm:$0xff] %v7857_v27  ;;  %v7859_v59 = vpack.c.bf16 %v725_v21, %v721_v18  ;;  %v724_v1 = vld [vmem:[#allocation14 + $0x2f0] sm:$0xff]  ;;  %v727_v3 = vld [vmem:[#allocation14 + $0x308] sm:$0xff]  ;;  %v729_v18 = vld [vmem:[#allocation14 + $0x318] sm:$0xff] }
  0xd9   :  { %5585 = vmatprep.subr.bf16.mxu1 %v7849_v40  ;;  %v7866_v29 = vpack.c.bf16 %v724_v1, %v720_v32  ;;  %v7868_v56 = vpack.c.bf16 %v731_v19, %v727_v3  ;;  %v726_v21 = vld [vmem:[#allocation14 + $0x300] sm:$0xff]  ;;  %v7871_v40 = vpack.c.bf16 %v733_v54, %v729_v18  ;;  %v741_v1 = vld [vmem:[#allocation14 + $0x378] sm:$0xff]  ;;  %v7880_v32 = vpack.c.bf16 %v739_v44, %v735_v47  ;;  %v736_v54 = vld [vmem:[#allocation14 + $0x350] sm:$0xff] }
  0xda   :  { %9593 = vst [vmem:[#allocation63_spill] sm:$0xff] %v7859_v59  ;;  %v734_v19 = vld [vmem:[#allocation14 + $0x340] sm:$0xff] }
  0xdb   :  { %5523 = vmatpush1.bf16.msra.mxu0 %v7851_v43  ;;  %9595 = vst [vmem:[#allocation65_spill] sm:$0xff] %v7866_v29  ;;  %9596 = vst [vmem:[#allocation66_spill] sm:$0xff] %v7868_v56  ;;  %v732_v43 = vld [vmem:[#allocation14 + $0x330] sm:$0xff]  ;;  %v738_v18 = vld [vmem:[#allocation14 + $0x360] sm:$0xff] }
  0xdc   :  { %5587 = vmatpush1.bf16.msra.mxu1 %v7854_v2  ;;  %5525 = vmatprep.subr.bf16.mxu0 %v7857_v27  ;;  %9597 = vst [vmem:[#allocation67_spill] sm:$0xff] %v7871_v40  ;;  %v7874_v27 = vpack.c.bf16 %v730_v9, %v726_v21  ;;  %v7878_v3 = vpack.c.bf16 %v732_v43, %v728_v15  ;;  %9599 = vst [vmem:[#allocation69_spill] sm:$0xff] %v7880_v32  ;;  %v740_v2 = vld [vmem:[#allocation14 + $0x370] sm:$0xff]  ;;  %v747_v21 = vld [vmem:[#allocation14 + $0x3a8] sm:$0xff] }
  0xdd   :  { %5589 = vmatprep.subr.bf16.mxu1 %v7859_v59  ;;  %v7883_v59 = vpack.c.bf16 %v741_v1, %v737_v33  ;;  %v745_v9 = vld [vmem:[#allocation14 + $0x398] sm:$0xff]  ;;  %v742_v43 = vld [vmem:[#allocation14 + $0x380] sm:$0xff]  ;;  %v7890_v44 = vpack.c.bf16 %v740_v2, %v736_v54  ;;  %v744_v15 = vld [vmem:[#allocation14 + $0x390] sm:$0xff] }
  0xde   :  { %9598 = vst [vmem:[#allocation68_spill] sm:$0xff] %v7874_v27  ;;  %v746_v33 = vld [vmem:[#allocation14 + $0x3a0] sm:$0xff]  ;;  %v748_v1 = vld [vmem:[#allocation14 + $0x3b0] sm:$0xff] }
  0xdf   :  { %5527 = vmatpush1.bf16.msra.mxu0 %v7862_v37  ;;  %v743_v37 = vld [vmem:[#allocation14 + $0x388] sm:$0xff]  ;;  %v7902_v2 = vpack.c.bf16 %v748_v1, %v744_v15  ;;  %v754_v54 = vld [vmem:[#allocation14 + $0x3e0] sm:$0xff] }
  0xe0   :  { %5591 = vmatpush1.bf16.msra.mxu1 %v7866_v29  ;;  %5529 = vmatprep.subr.bf16.mxu0 %v7868_v56  ;;  %v7886_v29 = vpack.c.bf16 %v738_v18, %v734_v19  ;;  %v7892_v47 = vpack.c.bf16 %v747_v21, %v743_v37  ;;  %v751_v56 = vld [vmem:[#allocation14 + $0x3c8] sm:$0xff]  ;;  %v753_v19 = vld [vmem:[#allocation14 + $0x3d8] sm:$0xff]  ;;  %v750_v37 = vld [vmem:[#allocation14 + $0x3c0] sm:$0xff] }
  0xe1   :  { %5593 = vmatprep.subr.bf16.mxu1 %v7871_v40  ;;  %v7895_v40 = vpack.c.bf16 %v749_v26, %v745_v9  ;;  %v757_v18 = vld [vmem:[#allocation14 + $0x3f8] sm:$0xff]  ;;  %9603 = vst [vmem:[#allocation73_spill] sm:$0xff] %v7902_v2  ;;  %v752_v9 = vld [vmem:[#allocation14 + $0x3d0] sm:$0xff]  ;;  %v7910_v14 = vpack.c.bf16 %v754_v54, %v750_v37 }
  0xe2   :  { %9600 = vst [vmem:[#allocation70_spill] sm:$0xff] %v7886_v29  ;;  %v7907_v21 = vpack.c.bf16 %v757_v18, %v753_v19 }
  0xe3   :  { %5531 = vmatpush1.bf16.msra.mxu0 %v7874_v27  ;;  %9601 = vst [vmem:[#allocation71_spill] sm:$0xff] %v7895_v40  ;;  %v755_v27 = vld [vmem:[#allocation14 + $0x3e8] sm:$0xff]  ;;  %9606 = vst [vmem:[#allocation76_spill] sm:$0xff] %v7910_v14 }
  0xe4   :  { %5595 = vmatpush1.bf16.msra.mxu1 %v7878_v3  ;;  %5533 = vmatprep.subr.bf16.mxu0 %v7880_v32  ;;  %v7898_v32 = vpack.c.bf16 %v746_v33, %v742_v43  ;;  %v7904_v26 = vpack.c.bf16 %v755_v27, %v751_v56  ;;  %9605 = vst [vmem:[#allocation75_spill] sm:$0xff] %v7907_v21  ;;  %v191_v27 = vshrl.u32 %v190_v20, 7  ;;  %v188_v33 = vld [vmem:[%s9326_s6] sm:$0xf] }
  0xe5   :  { %5597 = vmatprep.subr.bf16.mxu1 %v7883_v59 }
  0xe6   :  { %9602 = vst [vmem:[#allocation72_spill] sm:$0xff] %v7898_v32  ;;  %9604 = vst [vmem:[#allocation74_spill] sm:$0xff] %v7904_v26  ;;  %v7921_v56 = vsub.s32 0, %v191_v27  ;;  %v7928_v15 = vsub.s32 1, %v191_v27  ;;  %v7930_v1 = vsub.s32 3, %v191_v27 }
  0xe7   :  { %5535 = vmatpush1.bf16.msra.mxu0 %v7886_v29  ;;  %v756_v29 = vld [vmem:[#allocation14 + $0x3f0] sm:$0xff] }
  0xe8   :  { %5599 = vmatpush1.bf16.msra.mxu1 %v7890_v44  ;;  %5537 = vmatprep.subr.bf16.mxu0 %v7892_v47  ;;  %v7914_v43 = vpack.c.bf16 %v756_v29, %v752_v9  ;;  %9608 = vst [vmem:[#allocation78_spill] sm:$0xff] %v7921_v56  ;;  %v7926_v29 = vsub.s32 2, %v191_v27  ;;  %9610 = vst [vmem:[#allocation80_spill] sm:$0xff] %v7928_v15  ;;  %v193_v19 = vrot.slane %v188_v33, %v7921_v56 }
  0xe9   :  { %5601 = vmatprep.subr.bf16.mxu1 %v7895_v40  ;;  %9611 = vst [vmem:[#allocation81_spill] sm:$0xff] %v7930_v1  ;;  %v205_v18 = vrot.slane %v188_v33, %v7930_v1 }
  0xea   :  { %9607 = vst [vmem:[#allocation77_spill] sm:$0xff] %v7914_v43  ;;  %9609 = vst [vmem:[#allocation79_spill] sm:$0xff] %v7926_v29 }
  0xeb   :  { %5539 = vmatpush1.bf16.msra.mxu0 %v7898_v32 }
  0xec   :  { %5603 = vmatpush1.bf16.msra.mxu1 %v7902_v2  ;;  %5541 = vmatprep.subr.bf16.mxu0 %v7904_v26  ;;  %v7471_v2 = vmov 1966171168  }
  0xed   :  { %5605 = vmatprep.subr.bf16.mxu1 %v7907_v21  ;;  %v572_v56 = vunpack.c.l.s4 %v7471_v2 }
  0xef   :  { %5543 = vmatpush1.bf16.msra.mxu0 %v7910_v14  ;;  %v573_v32 = vunpack.c.0.s8 %v572_v56 }
  0xf0   :  { %5607 = vmatpush1.bf16.msra.mxu1 %v7914_v43  ;;  %5609 = vmatprep.subr.bf16.mxu0 %v7626_v38  ;;  %v201_v38 = vrot.slane %v188_v33, %v7926_v29 }
  0xf1   :  { %5641 = vmatprep.subr.bf16.mxu1 %v7628_v42  ;;  %v197_v42 = vrot.slane %v188_v33, %v7928_v15  ;;  %v7936_v29 = vsub.s32 %v573_v32, %v191_v27 }
 0x165   :  { %v276_v37 = vpop.f32.mrb[0].mxu0 }
 0x166   :  { %v277_v54 = vadd.f32 %v276_v37, %v193_v19  ;;  %v347_v9 = vpop.f32.mrb[0].mxu1  ;;  %v278_v20 = vpop.f32.mrb[1].mxu0 }
 0x167   :  { %v348_v43 = vadd.f32 %v347_v9, %v201_v38  ;;  %v279_v14 = vadd.f32 %v278_v20, %v197_v42  ;;  %v349_v21 = vpop.f32.mrb[1].mxu1 }
 0x168   :  { %352 = vst [vmem:[#allocation5] sm:$0xff] %v277_v54  ;;  %v350_v26 = vadd.f32 %v349_v21, %v205_v18 }
 0x169   :  { %354 = vst [vmem:[#allocation5 + $0x10] sm:$0xff] %v348_v43  ;;  %353 = vst [vmem:[#allocation5 + $0x8] sm:$0xff] %v279_v14 }
 0x16a   :  { %355 = vst [vmem:[#allocation5 + $0x18] sm:$0xff] %v350_v26 }
 0x171   :  { %v358_v14 = vld [vmem:[#allocation5] ss:$8 sm:$0xf] }
 0x185   :  { %v489_v15 = vpop.f32.mrb[2].mxu0 }
 0x186   :  { %v560_v40 = vpop.f32.mrb[2].mxu1  ;;  %v491_v33 = vpop.f32.mrb[3].mxu0 }
 0x187   :  { %v569_v1 = vcombine.low %v489_v15, %v491_v33  ;;  %v562_v19 = vpop.f32.mrb[3].mxu1 }
 0x188   :  { %v570_v37 = vcombine.low %v560_v40, %v562_v19  ;;  %v357_v19 = vld [vmem:[#allocation3] sm:$0x1] }
 0x189   :  { %v577_v38 = vrot.slane %v569_v1, %v7936_v29 }
 0x18a   :  { %v584_v42 = vrot.slane %v570_v37, %v7936_v29 }
 0x18c   :  { %v585_v54 = vcombine.low %v577_v38, %v584_v42 }
 0x18e   :  { %v592_v21 = vrot.slane %v585_v54, %v7936_v29 }
 0x190   :  { %v594_v26 = vadd.f32 %v592_v21, %v358_v14 }
 0x192   :  { %v5251_v43 = vmul.f32 -1.442695, %v594_v26  ;;  %v602_v2 = vrot.slane %v594_v26, 1  ;;  %v613_v27 = vrot.slane %v594_v26, 3  ;;  %v610_v15 = vrot.slane %v594_v26, 2 }
 0x194   :  { %6993 = vpow2.f32 %v5251_v43  ;;  %v5252_v32 = vmul.f32 -1.442695, %v602_v2  ;;  %v5253_v56 = vmul.f32 -1.442695, %v613_v27  ;;  %v9650_v27 = vld [vmem:[#allocation65_spill] sm:$0xff] }
 0x196   :  { %6995 = vpow2.f32 %v5252_v32  ;;  %v7945_v32 = vld [vmem:[#allocation4] sm:$0xff] }
 0x197   :  { %6997 = vpow2.f32 %v5253_v56  ;;  %v9651_v56 = vld [vmem:[#allocation66_spill] sm:$0xff] }
 0x19e   :  { %v6994_v18 = vpop.eup %6993 }
 0x19f   :  { %v598_v9 = vadd.f32 1.0, %v6994_v18  ;;  %v9652_v18 = vld [vmem:[#allocation67_spill] sm:$0xff] }
 0x1a0   :  { %v6996_v40 = vpop.eup %6995 }
 0x1a1   :  { %6999 = vrcp.f32 %v598_v9  ;;  %v607_v1 = vadd.f32 1.0, %v6996_v40  ;;  %v6998_v20 = vpop.eup %6997  ;;  %v9654_v9 = vld [vmem:[#allocation69_spill] sm:$0xff]  ;;  %v9655_v40 = vld [vmem:[#allocation70_spill] sm:$0xff] }
 0x1a2   :  { %7001 = vtanh.f32 %v610_v15  ;;  %v618_v42 = vadd.f32 1.0, %v6998_v20  ;;  %v9653_v15 = vld [vmem:[#allocation68_spill] sm:$0xff] }
 0x1a3   :  { %7003 = vrcp.f32 %v607_v1  ;;  %v9656_v1 = vld [vmem:[#allocation71_spill] sm:$0xff]  ;;  %v9657_v20 = vld [vmem:[#allocation72_spill] sm:$0xff] }
 0x1a4   :  { %7005 = vrcp.f32 %v618_v42  ;;  %v1552_v42 = vld [vmem:[#allocation12 + $0x28] sm:$0xff] }
 0x1ab   :  { %v7000_v33 = vpop.eup %6999 }
 0x1ac   :  { %v7002_v37 = vpop.eup %7001 }
 0x1ad   :  { %v7004_v38 = vpop.eup %7003  ;;  %v622_v21 = vmul.f32 %v7002_v37, %v7000_v33  ;;  %v9658_v33 = vld [vmem:[#allocation73_spill] sm:$0xff]  ;;  %v9660_v37 = vld [vmem:[#allocation75_spill] sm:$0xff] }
 0x1ae   :  { %v621_v54 = vmul.f32 %v7004_v38, %v357_v19  ;;  %v7006_v26 = vpop.eup %7005  ;;  %v9659_v19 = vld [vmem:[#allocation74_spill] sm:$0xff]  ;;  %v9662_v38 = vld [vmem:[#allocation77_spill] sm:$0xff] }
 0x1b0   :  { %v623_v14 = vadd.f32 %v622_v21, %v621_v54  ;;  %v1550_v54 = vld [vmem:[#allocation12 + $0x18] sm:$0xff] }
 0x1b2   :  { %7007 = vtanh.f32 %v623_v14  ;;  %627 = vst [vmem:[#allocation3] sm:$0x1] %v623_v14  ;;  %v758_v14 = vld [vmem:[%s9327_s7] sm:$0xf] }
 0x1bc   :  { %v7008_v43 = vpop.eup %7007 }
 0x1bd   :  { %v625_v2 = vmul.f32 %v7008_v43, %v7006_v26  ;;  %v9663_v26 = vld [vmem:[#allocation78_spill] sm:$0xff] }
 0x1be   :  { %v763_v43 = vrot.slane %v758_v14, %v9663_v26 }
 0x1bf   :  { %626 = vst [vmem:[#allocation2] sm:$0x1] %v625_v2  ;;  %845 = vmatmul.mubr.f32.vlgmr.msra.gmra.mrb[4].mxu0 %v625_v2  ;;  %916 = vmatmul.mubr.f32.vlgmr.msra.gmra.mrb[4].mxu1 %v625_v2  ;;  %v9664_v2 = vld [vmem:[#allocation80_spill] sm:$0xff] }
 0x1c0   :  { %5611 = vmatpush1.bf16.msra.mxu0 %v7630_v49  ;;  %5643 = vmatpush1.bf16.msra.mxu1 %v7633_v50  ;;  %v9612_v50 = vld [vmem:[#allocation27_spill] sm:$0xff] }
 0x1c1   :  { %5613 = vmatprep.subr.bf16.mxu0 %v7635_v51  ;;  %5645 = vmatprep.subr.bf16.mxu1 %v7638_v55  ;;  %v9613_v51 = vld [vmem:[#allocation28_spill] sm:$0xff]  ;;  %v9614_v55 = vld [vmem:[#allocation29_spill] sm:$0xff] }
 0x1c2   :  { %1081 = vmatprep.mubr.f32.mxu0 %v7945_v32  ;;  %1152 = vmatprep.mubr.f32.mxu1 %v7945_v32 }
 0x1c4   :  { %5615 = vmatpush1.bf16.msra.mxu0 %v7641_v61  ;;  %5647 = vmatpush1.bf16.msra.mxu1 %v7645_v62  ;;  %v9615_v61 = vld [vmem:[#allocation30_spill] sm:$0xff]  ;;  %v9616_v62 = vld [vmem:[#allocation31_spill] sm:$0xff] }
 0x1c5   :  { %5617 = vmatprep.subr.bf16.mxu0 %v7647_v63  ;;  %5649 = vmatprep.subr.bf16.mxu1 %v7650_v4  ;;  %v9617_v63 = vld [vmem:[#allocation32_spill] sm:$0xff]  ;;  %v9618_v4 = vld [vmem:[#allocation33_spill] sm:$0xff] }
 0x1c6   :  { %v949_v49 = vld [vmem:[#allocation2] sm:$0x1] }
 0x1c8   :  { %5619 = vmatpush1.bf16.msra.mxu0 %v7655_v10  ;;  %5651 = vmatpush1.bf16.msra.mxu1 %v7659_v11  ;;  %v9619_v10 = vld [vmem:[#allocation34_spill] sm:$0xff]  ;;  %v9620_v11 = vld [vmem:[#allocation35_spill] sm:$0xff] }
 0x1c9   :  { %5621 = vmatprep.subr.bf16.mxu0 %v7661_v12  ;;  %5653 = vmatprep.subr.bf16.mxu1 %v7664_v16  ;;  %v9621_v12 = vld [vmem:[#allocation36_spill] sm:$0xff]  ;;  %v9622_v16 = vld [vmem:[#allocation37_spill] sm:$0xff] }
 0x1cc   :  { %5623 = vmatpush1.bf16.msra.mxu0 %v7670_v22  ;;  %5655 = vmatpush1.bf16.msra.mxu1 %v7674_v23  ;;  %v9623_v22 = vld [vmem:[#allocation38_spill] sm:$0xff]  ;;  %v9624_v23 = vld [vmem:[#allocation39_spill] sm:$0xff] }
 0x1cd   :  { %5625 = vmatprep.subr.bf16.mxu0 %v7676_v24  ;;  %5657 = vmatprep.subr.bf16.mxu1 %v7679_v28  ;;  %v9625_v24 = vld [vmem:[#allocation40_spill] sm:$0xff]  ;;  %v9626_v28 = vld [vmem:[#allocation41_spill] sm:$0xff] }
 0x1d0   :  { %5627 = vmatpush1.bf16.msra.mxu0 %v7682_v34  ;;  %5659 = vmatpush1.bf16.msra.mxu1 %v7686_v35  ;;  %v9627_v34 = vld [vmem:[#allocation42_spill] sm:$0xff]  ;;  %v9628_v35 = vld [vmem:[#allocation43_spill] sm:$0xff] }
 0x1d1   :  { %5629 = vmatprep.subr.bf16.mxu0 %v7688_v36  ;;  %5661 = vmatprep.subr.bf16.mxu1 %v7691_v41  ;;  %v9629_v36 = vld [vmem:[#allocation44_spill] sm:$0xff]  ;;  %v9630_v41 = vld [vmem:[#allocation45_spill] sm:$0xff] }
 0x1d4   :  { %5631 = vmatpush1.bf16.msra.mxu0 %v7694_v48  ;;  %5663 = vmatpush1.bf16.msra.mxu1 %v7698_v52  ;;  %v9631_v48 = vld [vmem:[#allocation46_spill] sm:$0xff]  ;;  %v9632_v52 = vld [vmem:[#allocation47_spill] sm:$0xff] }
 0x1d5   :  { %5633 = vmatprep.subr.bf16.mxu0 %v7700_v53  ;;  %5665 = vmatprep.subr.bf16.mxu1 %v7703_v58  ;;  %v9633_v53 = vld [vmem:[#allocation48_spill] sm:$0xff]  ;;  %v9634_v58 = vld [vmem:[#allocation49_spill] sm:$0xff] }
 0x1d8   :  { %5635 = vmatpush1.bf16.msra.mxu0 %v7706_v5  ;;  %5667 = vmatpush1.bf16.msra.mxu1 %v7710_v6  ;;  %v9635_v5 = vld [vmem:[#allocation50_spill] sm:$0xff]  ;;  %v9636_v6 = vld [vmem:[#allocation51_spill] sm:$0xff] }
 0x1d9   :  { %5637 = vmatprep.subr.bf16.mxu0 %v7712_v7  ;;  %5669 = vmatprep.subr.bf16.mxu1 %v7715_v13  ;;  %v9637_v7 = vld [vmem:[#allocation52_spill] sm:$0xff]  ;;  %v9638_v13 = vld [vmem:[#allocation53_spill] sm:$0xff] }
 0x1dc   :  { %5639 = vmatpush1.bf16.msra.mxu0 %v7718_v0  ;;  %5671 = vmatpush1.bf16.msra.mxu1 %v7722_v17  ;;  %v9639_v0 = vld [vmem:[#allocation54_spill] sm:$0xff]  ;;  %v9640_v17 = vld [vmem:[#allocation55_spill] sm:$0xff] }
 0x1dd   :  { %5673 = vmatprep.subr.bf16.mxu0 %v7727_v25  ;;  %5737 = vmatprep.subr.bf16.mxu1 %v7729_v30  ;;  %v9641_v25 = vld [vmem:[#allocation56_spill] sm:$0xff]  ;;  %v9642_v30 = vld [vmem:[#allocation57_spill] sm:$0xff] }
 0x1df   :  { %1082 = vmatmul.mubr.f32.vlgmr.msra.gmra.mrb[6].mxu0 %v949_v49  ;;  %1153 = vmatmul.mubr.f32.vlgmr.msra.gmra.mrb[6].mxu1 %v949_v49  ;;  %v767_v49 = vrot.slane %v758_v14, %v9664_v2 }
 0x1e0   :  { %5675 = vmatpush1.bf16.msra.mxu0 %v7731_v31  ;;  %5739 = vmatpush1.bf16.msra.mxu1 %v7734_v39  ;;  %v9643_v31 = vld [vmem:[#allocation58_spill] sm:$0xff]  ;;  %v9644_v39 = vld [vmem:[#allocation59_spill] sm:$0xff] }
 0x1e1   :  { %5677 = vmatprep.subr.bf16.mxu0 %v7738_v45  ;;  %5741 = vmatprep.subr.bf16.mxu1 %v7740_v46  ;;  %v9645_v45 = vld [vmem:[#allocation60_spill] sm:$0xff]  ;;  %v9646_v46 = vld [vmem:[#allocation61_spill] sm:$0xff] }
 0x1e4   :  { %5679 = vmatpush1.bf16.msra.mxu0 %v7743_v57  ;;  %5743 = vmatpush1.bf16.msra.mxu1 %v7747_v60  ;;  %v9647_v57 = vld [vmem:[#allocation62_spill] sm:$0xff]  ;;  %v9648_v60 = vld [vmem:[#allocation63_spill] sm:$0xff] }
 0x1e5   :  { %5681 = vmatprep.subr.bf16.mxu0 %v7751_v8  ;;  %5745 = vmatprep.subr.bf16.mxu1 %v9612_v50  ;;  %v9649_v8 = vld [vmem:[#allocation64_spill] sm:$0xff] }
 0x1e8   :  { %5683 = vmatpush1.bf16.msra.mxu0 %v9613_v51  ;;  %5747 = vmatpush1.bf16.msra.mxu1 %v9614_v55 }
 0x1e9   :  { %5685 = vmatprep.subr.bf16.mxu0 %v9615_v61  ;;  %5749 = vmatprep.subr.bf16.mxu1 %v9616_v62 }
 0x1ec   :  { %5687 = vmatpush1.bf16.msra.mxu0 %v9617_v63  ;;  %5751 = vmatpush1.bf16.msra.mxu1 %v9618_v4 }
 0x1ed   :  { %5689 = vmatprep.subr.bf16.mxu0 %v9619_v10  ;;  %5753 = vmatprep.subr.bf16.mxu1 %v9620_v11  ;;  %v9665_v11 = vld [vmem:[#allocation81_spill] sm:$0xff] }
 0x1f0   :  { %5691 = vmatpush1.bf16.msra.mxu0 %v9621_v12  ;;  %5755 = vmatpush1.bf16.msra.mxu1 %v9622_v16  ;;  %v775_v12 = vrot.slane %v758_v14, %v9665_v11 }
 0x1f1   :  { %5693 = vmatprep.subr.bf16.mxu0 %v9623_v22  ;;  %5757 = vmatprep.subr.bf16.mxu1 %v9624_v23  ;;  %v9666_v22 = vld [vmem:[#allocation79_spill] sm:$0xff] }
 0x1f2   :  { %v771_v23 = vrot.slane %v758_v14, %v9666_v22 }
 0x1f4   :  { %5695 = vmatpush1.bf16.msra.mxu0 %v9625_v24  ;;  %5759 = vmatpush1.bf16.msra.mxu1 %v9626_v28 }
 0x1f5   :  { %5697 = vmatprep.subr.bf16.mxu0 %v9627_v34  ;;  %5761 = vmatprep.subr.bf16.mxu1 %v9628_v35 }
 0x1f8   :  { %5699 = vmatpush1.bf16.msra.mxu0 %v9629_v36  ;;  %5763 = vmatpush1.bf16.msra.mxu1 %v9630_v41 }
 0x1f9   :  { %5701 = vmatprep.subr.bf16.mxu0 %v9631_v48  ;;  %5765 = vmatprep.subr.bf16.mxu1 %v9632_v52 }
 0x1fc   :  { %5703 = vmatpush1.bf16.msra.mxu0 %v9633_v53  ;;  %5767 = vmatpush1.bf16.msra.mxu1 %v9634_v58  ;;  %v629_v53 = vld [vmem:[#allocation3 + $0x1] sm:$0x1] }
 0x1fd   :  { %5705 = vmatprep.subr.bf16.mxu0 %v9635_v5  ;;  %5769 = vmatprep.subr.bf16.mxu1 %v9636_v6 }
 0x200   :  { %5707 = vmatpush1.bf16.msra.mxu0 %v9637_v7  ;;  %5771 = vmatpush1.bf16.msra.mxu1 %v9638_v13 }
 0x201   :  { %5709 = vmatprep.subr.bf16.mxu0 %v9639_v0  ;;  %5773 = vmatprep.subr.bf16.mxu1 %v9640_v17 }
 0x204   :  { %5711 = vmatpush1.bf16.msra.mxu0 %v9641_v25  ;;  %5775 = vmatpush1.bf16.msra.mxu1 %v9642_v30 }
 0x205   :  { %5713 = vmatprep.subr.bf16.mxu0 %v9643_v31  ;;  %5777 = vmatprep.subr.bf16.mxu1 %v9644_v39 }
 0x208   :  { %5715 = vmatpush1.bf16.msra.mxu0 %v9645_v45  ;;  %5779 = vmatpush1.bf16.msra.mxu1 %v9646_v46 }
 0x209   :  { %5717 = vmatprep.subr.bf16.mxu0 %v9647_v57  ;;  %5781 = vmatprep.subr.bf16.mxu1 %v9648_v60 }
 0x20c   :  { %5719 = vmatpush1.bf16.msra.mxu0 %v9649_v8  ;;  %5783 = vmatpush1.bf16.msra.mxu1 %v9650_v27  ;;  %v952_v27 = vld [vmem:[#allocation5 + $0x1] ss:$8 sm:$0xf] }
 0x20d   :  { %5721 = vmatprep.subr.bf16.mxu0 %v9651_v56  ;;  %5785 = vmatprep.subr.bf16.mxu1 %v9652_v18 }
 0x210   :  { %5723 = vmatpush1.bf16.msra.mxu0 %v9653_v15  ;;  %5787 = vmatpush1.bf16.msra.mxu1 %v7878_v3  ;;  %v9661_v3 = vld [vmem:[#allocation76_spill] sm:$0xff] }
 0x211   :  { %5725 = vmatprep.subr.bf16.mxu0 %v9654_v9  ;;  %5789 = vmatprep.subr.bf16.mxu1 %v7883_v59  ;;  %v1548_v59 = vld [vmem:[#allocation12 + $0x8] sm:$0xff] }
 0x214   :  { %5727 = vmatpush1.bf16.msra.mxu0 %v9655_v40  ;;  %5791 = vmatpush1.bf16.msra.mxu1 %v7890_v44  ;;  %v8039_v44 = vpack.c.bf16 %v1552_v42, %v1548_v59 }
 0x215   :  { %5729 = vmatprep.subr.bf16.mxu0 %v7892_v47  ;;  %5793 = vmatprep.subr.bf16.mxu1 %v9656_v1  ;;  %v1554_v47 = vld [vmem:[#allocation12 + $0x38] sm:$0xff] }
 0x216   :  { %v8041_v21 = vpack.c.bf16 %v1554_v47, %v1550_v54 }
 0x218   :  { %5731 = vmatpush1.bf16.msra.mxu0 %v9657_v20  ;;  %5795 = vmatpush1.bf16.msra.mxu1 %v9658_v33 }
 0x219   :  { %5733 = vmatprep.subr.bf16.mxu0 %v9659_v19  ;;  %5797 = vmatprep.subr.bf16.mxu1 %v9660_v37 }
 0x21c   :  { %5735 = vmatpush1.bf16.msra.mxu0 %v9661_v3  ;;  %5799 = vmatpush1.bf16.msra.mxu1 %v9662_v38 }
 0x21d   :  { %5801 = vmatprep.subr.bf16.mxu0 %v8039_v44  ;;  %5833 = vmatprep.subr.bf16.mxu1 %v8041_v21 }
 0x292   :  { %v846_v50 = vpop.f32.mrb[4].mxu0  ;;  %v917_v51 = vpop.f32.mrb[4].mxu1 }
 0x293   :  { %v847_v55 = vadd.f32 %v846_v50, %v763_v43  ;;  %v848_v61 = vpop.f32.mrb[5].mxu0  ;;  %v919_v62 = vpop.f32.mrb[5].mxu1  ;;  %v918_v28 = vadd.f32 %v917_v51, %v771_v23  ;;  %v950_v50 = vld [vmem:[#allocation3] sm:$0x1] }
 0x294   :  { %v849_v63 = vadd.f32 %v848_v61, %v767_v49  ;;  %v920_v16 = vadd.f32 %v919_v62, %v775_v12  ;;  %v1553_v12 = vld [vmem:[#allocation12 + $0x30] sm:$0xff]  ;;  %v1560_v23 = vld [vmem:[#allocation12 + $0x68] sm:$0xff] }
 0x295   :  { %v5254_v4 = vmul.f32 -1.442695, %v847_v55 }
 0x296   :  { %v5255_v10 = vmul.f32 -1.442695, %v849_v63  ;;  %v5256_v24 = vmul.f32 -1.442695, %v920_v16  ;;  %v1547_v63 = vld [vmem:[#allocation12] sm:$0xff]  ;;  %v1556_v16 = vld [vmem:[#allocation12 + $0x48] sm:$0xff] }
 0x297   :  { %7009 = vpow2.f32 %v5254_v4  ;;  %v1551_v4 = vld [vmem:[#allocation12 + $0x20] sm:$0xff] }
 0x298   :  { %7011 = vpow2.f32 %v5255_v10  ;;  %v1549_v10 = vld [vmem:[#allocation12 + $0x10] sm:$0xff] }
 0x299   :  { %7013 = vpow2.f32 %v5256_v24  ;;  %v1558_v24 = vld [vmem:[#allocation12 + $0x58] sm:$0xff] }
 0x29a   :  { %7015 = vtanh.f32 %v918_v28  ;;  %v1562_v28 = vld [vmem:[#allocation12 + $0x78] sm:$0xff] }
 0x2a1   :  { %v7010_v34 = vpop.eup %7009 }
 0x2a2   :  { %v7012_v35 = vpop.eup %7011  ;;  %v925_v36 = vadd.f32 1.0, %v7010_v34 }
 0x2a3   :  { %v931_v41 = vadd.f32 1.0, %v7012_v35  ;;  %v7014_v48 = vpop.eup %7013 }
 0x2a4   :  { %7017 = vrcp.f32 %v925_v36  ;;  %v7016_v52 = vpop.eup %7015  ;;  %v938_v7 = vadd.f32 1.0, %v7014_v48  ;;  %v8055_v36 = vpack.c.bf16 %v1551_v4, %v1547_v63  ;;  %v1555_v48 = vld [vmem:[#allocation12 + $0x40] sm:$0xff]  ;;  %v1592_v63 = vld [vmem:[#allocation12 + $0x168] sm:$0xff]  ;;  %v1590_v4 = vld [vmem:[#allocation12 + $0x158] sm:$0xff] }
 0x2a5   :  { %7019 = vrcp.f32 %v931_v41  ;;  %v8057_v41 = vpack.c.bf16 %v1553_v12, %v1549_v10  ;;  %v1594_v10 = vld [vmem:[#allocation12 + $0x178] sm:$0xff] }
 0x2a6   :  { %7021 = vrcp.f32 %v938_v7  ;;  %v1561_v7 = vld [vmem:[#allocation12 + $0x70] sm:$0xff] }
 0x2ae   :  { %v7018_v58 = vpop.eup %7017 }
 0x2af   :  { %v7020_v5 = vpop.eup %7019  ;;  %v942_v6 = vmul.f32 %v7018_v58, %v7016_v52  ;;  %v1559_v52 = vld [vmem:[#allocation12 + $0x60] sm:$0xff]  ;;  %v8059_v58 = vpack.c.bf16 %v1560_v23, %v1556_v16 }
 0x2b0   :  { %v941_v13 = vmul.f32 %v7020_v5, %v629_v53  ;;  %v7022_v18 = vpop.eup %7021  ;;  %v8061_v5 = vpack.c.bf16 %v1562_v28, %v1558_v24  ;;  %v1587_v23 = vld [vmem:[#allocation12 + $0x140] sm:$0xff] }
 0x2b1   :  { %v1591_v24 = vld [vmem:[#allocation12 + $0x160] sm:$0xff] }
 0x2b2   :  { %v943_v0 = vadd.f32 %v942_v6, %v941_v13  ;;  %v1083_v17 = vpop.f32.mrb[6].mxu0  ;;  %v1154_v25 = vpop.f32.mrb[6].mxu1  ;;  %v1557_v6 = vld [vmem:[#allocation12 + $0x50] sm:$0xff]  ;;  %v1564_v13 = vld [vmem:[#allocation12 + $0x88] sm:$0xff] }
 0x2b3   :  { %v1085_v30 = vpop.f32.mrb[7].mxu0  ;;  %v1156_v31 = vpop.f32.mrb[7].mxu1 }
 0x2b4   :  { %7023 = vtanh.f32 %v943_v0  ;;  %947 = vst [vmem:[#allocation3 + $0x1] sm:$0x1] %v943_v0  ;;  %v1163_v39 = vcombine.low %v1083_v17, %v1085_v30  ;;  %v1164_v45 = vcombine.low %v1154_v25, %v1156_v31  ;;  %v1568_v0 = vld [vmem:[#allocation12 + $0xa8] sm:$0xff]  ;;  %v1566_v17 = vld [vmem:[#allocation12 + $0x98] sm:$0xff]  ;;  %v8065_v30 = vpack.c.bf16 %v1559_v52, %v1555_v48  ;;  %v1593_v48 = vld [vmem:[#allocation12 + $0x170] sm:$0xff] }
 0x2b5   :  { %v1570_v25 = vld [vmem:[#allocation12 + $0xb8] sm:$0xff]  ;;  %v8067_v31 = vpack.c.bf16 %v1561_v7, %v1557_v6  ;;  %v1596_v52 = vld [vmem:[#allocation12 + $0x188] sm:$0xff] }
 0x2b6   :  { %v1171_v46 = vrot.slane %v1163_v39, %v7936_v29  ;;  %v1178_v57 = vrot.slane %v1164_v45, %v7936_v29  ;;  %v1563_v39 = vld [vmem:[#allocation12 + $0x80] sm:$0xff]  ;;  %v1598_v6 = vld [vmem:[#allocation12 + $0x198] sm:$0xff] }
 0x2b7   :  { %v1567_v45 = vld [vmem:[#allocation12 + $0xa0] sm:$0xff]  ;;  %v1602_v7 = vld [vmem:[#allocation12 + $0x1b8] sm:$0xff] }
 0x2b8   :  { %v1179_v60 = vcombine.low %v1171_v46, %v1178_v57  ;;  %v8071_v46 = vpack.c.bf16 %v1568_v0, %v1564_v13  ;;  %v8073_v57 = vpack.c.bf16 %v1570_v25, %v1566_v17  ;;  %v8115_v13 = vpack.c.bf16 %v1591_v24, %v1587_v23  ;;  %v1595_v17 = vld [vmem:[#allocation12 + $0x180] sm:$0xff] }
 0x2b9   :  { %v1599_v25 = vld [vmem:[#allocation12 + $0x1a0] sm:$0xff] }
 0x2ba   :  { %v1186_v8 = vrot.slane %v1179_v60, %v7936_v29  ;;  %v1565_v60 = vld [vmem:[#allocation12 + $0x90] sm:$0xff]  ;;  %v1818_v23 = vld [vmem:[#allocation14] sm:$0xff] }
 0x2bb   :  { %v1822_v24 = vld [vmem:[#allocation14 + $0x20] sm:$0xff] }
 0x2bc   :  { %v1188_v56 = vadd.f32 %v1186_v8, %v952_v27  ;;  %v1569_v8 = vld [vmem:[#allocation12 + $0xb0] sm:$0xff]  ;;  %v1572_v27 = vld [vmem:[#allocation12 + $0xc8] sm:$0xff] }
 0x2be   :  { %v7024_v15 = vpop.eup %7023  ;;  %v5257_v9 = vmul.f32 -1.442695, %v1188_v56  ;;  %v1196_v40 = vrot.slane %v1188_v56, 1  ;;  %v1207_v33 = vrot.slane %v1188_v56, 3  ;;  %v1204_v38 = vrot.slane %v1188_v56, 2  ;;  %v1576_v56 = vld [vmem:[#allocation12 + $0xe8] sm:$0xff] }
 0x2bf   :  { %v945_v1 = vmul.f32 %v7024_v15, %v7022_v18  ;;  %v1574_v18 = vld [vmem:[#allocation12 + $0xd8] sm:$0xff] }
 0x2c0   :  { %7025 = vpow2.f32 %v5257_v9  ;;  %v5258_v20 = vmul.f32 -1.442695, %v1196_v40  ;;  %v5259_v19 = vmul.f32 -1.442695, %v1207_v33  ;;  %v1578_v15 = vld [vmem:[#allocation12 + $0xf8] sm:$0xff]  ;;  %v8079_v9 = vpack.c.bf16 %v1567_v45, %v1563_v39 }
 0x2c1   :  { %946 = vst [vmem:[#allocation2 + $0x1] sm:$0x1] %v945_v1  ;;  %948 = vst [vmem:[#allocation4] sm:$0x1] %v945_v1  ;;  %v8081_v40 = vpack.c.bf16 %v1569_v8, %v1565_v60  ;;  %v1571_v1 = vld [vmem:[#allocation12 + $0xc0] sm:$0xff]  ;;  %v8085_v33 = vpack.c.bf16 %v1576_v56, %v1572_v27  ;;  %v8123_v45 = vpack.c.bf16 %v1602_v7, %v1598_v6  ;;  %v1597_v60 = vld [vmem:[#allocation12 + $0x190] sm:$0xff] }
 0x2c2   :  { %7027 = vpow2.f32 %v5258_v20  ;;  %v1575_v20 = vld [vmem:[#allocation12 + $0xe0] sm:$0xff]  ;;  %v1601_v8 = vld [vmem:[#allocation12 + $0x1b0] sm:$0xff]  ;;  %v1604_v27 = vld [vmem:[#allocation12 + $0x1c8] sm:$0xff] }
 0x2c3   :  { %7029 = vpow2.f32 %v5259_v19  ;;  %v8087_v19 = vpack.c.bf16 %v1578_v15, %v1574_v18  ;;  %v1608_v56 = vld [vmem:[#allocation12 + $0x1e8] sm:$0xff]  ;;  %v1606_v18 = vld [vmem:[#allocation12 + $0x1d8] sm:$0xff] }
 0x2c4   :  { %v1610_v15 = vld [vmem:[#allocation12 + $0x1f8] sm:$0xff]  ;;  %v1827_v7 = vld [vmem:[#allocation14 + $0x48] sm:$0xff] }
 0x2c8   :  { %v1222_v37 = vld [vmem:[#allocation2 + $0x1] sm:$0x1] }
 0x2c9   :  { %1438 = vmatprep.mubr.f32.mxu0 %v1222_v37  ;;  %1509 = vmatprep.mubr.f32.mxu1 %v1222_v37  ;;  %v1573_v37 = vld [vmem:[#allocation12 + $0xd0] sm:$0xff] }
 0x2ca   :  { %v7026_v3 = vpop.eup %7025 }
 0x2cb   :  { %v1192_v59 = vadd.f32 1.0, %v7026_v3  ;;  %v1577_v3 = vld [vmem:[#allocation12 + $0xf0] sm:$0xff] }
 0x2cc   :  { %v7028_v42 = vpop.eup %7027 }
 0x2cd   :  { %7031 = vrcp.f32 %v1192_v59  ;;  %v1201_v54 = vadd.f32 1.0, %v7028_v42  ;;  %v7030_v47 = vpop.eup %7029  ;;  %v1584_v59 = vld [vmem:[#allocation12 + $0x128] sm:$0xff]  ;;  %v1582_v42 = vld [vmem:[#allocation12 + $0x118] sm:$0xff] }
 0x2ce   :  { %7033 = vtanh.f32 %v1204_v38  ;;  %v1212_v51 = vadd.f32 1.0, %v7030_v47  ;;  %v1580_v38 = vld [vmem:[#allocation12 + $0x108] sm:$0xff]  ;;  %v8091_v47 = vpack.c.bf16 %v1575_v20, %v1571_v1  ;;  %v8127_v1 = vpack.c.bf16 %v1599_v25, %v1595_v17  ;;  %v1829_v25 = vld [vmem:[#allocation14 + $0x58] sm:$0xff] }
 0x2cf   :  { %7035 = vrcp.f32 %v1201_v54  ;;  %v1586_v54 = vld [vmem:[#allocation12 + $0x138] sm:$0xff]  ;;  %v8129_v20 = vpack.c.bf16 %v1601_v8, %v1597_v60  ;;  %v1831_v17 = vld [vmem:[#allocation14 + $0x68] sm:$0xff] }
 0x2d0   :  { %7037 = vrcp.f32 %v1212_v51  ;;  %v8099_v51 = vpack.c.bf16 %v1586_v54, %v1582_v42  ;;  %v1605_v42 = vld [vmem:[#allocation12 + $0x1d0] sm:$0xff]  ;;  %v8159_v60 = vpack.c.bf16 %v1831_v17, %v1827_v7  ;;  %v1833_v8 = vld [vmem:[#allocation14 + $0x78] sm:$0xff] }
 0x2d1   :  { %v1609_v54 = vld [vmem:[#allocation12 + $0x1f0] sm:$0xff] }
 0x2d2   :  { %v1840_v7 = vld [vmem:[#allocation14 + $0xb0] sm:$0xff] }
 0x2d7   :  { %v7032_v14 = vpop.eup %7031 }
 0x2d8   :  { %v7034_v43 = vpop.eup %7033 }
 0x2d9   :  { %v7036_v49 = vpop.eup %7035  ;;  %v1216_v61 = vmul.f32 %v7034_v43, %v7032_v14  ;;  %v8093_v14 = vpack.c.bf16 %v1577_v3, %v1573_v37  ;;  %v1579_v43 = vld [vmem:[#allocation12 + $0x100] sm:$0xff]  ;;  %v8133_v3 = vpack.c.bf16 %v1608_v56, %v1604_v27 }
 0x2da   :  { %v1215_v55 = vmul.f32 %v7036_v49, %v950_v50  ;;  %v7038_v34 = vpop.eup %7037  ;;  %v1583_v49 = vld [vmem:[#allocation12 + $0x120] sm:$0xff]  ;;  %v8097_v50 = vpack.c.bf16 %v1584_v59, %v1580_v38  ;;  %v8135_v38 = vpack.c.bf16 %v1610_v15, %v1606_v18  ;;  %v8161_v18 = vpack.c.bf16 %v1833_v8, %v1829_v25  ;;  %v1843_v25 = vld [vmem:[#allocation14 + $0xc8] sm:$0xff] }
 0x2db   :  { %v8103_v12 = vpack.c.bf16 %v1583_v49, %v1579_v43  ;;  %v1603_v37 = vld [vmem:[#allocation12 + $0x1c0] sm:$0xff]  ;;  %v8141_v49 = vpack.c.bf16 %v1609_v54, %v1605_v42  ;;  %v1835_v54 = vld [vmem:[#allocation14 + $0x88] sm:$0xff] }
 0x2dc   :  { %v1217_v62 = vadd.f32 %v1216_v61, %v1215_v55  ;;  %v1581_v55 = vld [vmem:[#allocation12 + $0x110] sm:$0xff]  ;;  %v1607_v59 = vld [vmem:[#allocation12 + $0x1e0] sm:$0xff]  ;;  %9667 = vst [vmem:[#allocation27_spill] sm:$0xff] %v8161_v18  ;;  %v1847_v8 = vld [vmem:[#allocation14 + $0xe8] sm:$0xff] }
 0x2dd   :  { %v1585_v61 = vld [vmem:[#allocation12 + $0x130] sm:$0xff]  ;;  %v8139_v43 = vpack.c.bf16 %v1607_v59, %v1603_v37  ;;  %v1826_v27 = vld [vmem:[#allocation14 + $0x40] sm:$0xff] }
 0x2de   :  { %7039 = vtanh.f32 %v1217_v62  ;;  %1221 = vst [vmem:[#allocation3] sm:$0x1] %v1217_v62  ;;  %v1588_v62 = vld [vmem:[#allocation12 + $0x148] sm:$0xff]  ;;  %v8105_v16 = vpack.c.bf16 %v1585_v61, %v1581_v55  ;;  %v1830_v56 = vld [vmem:[#allocation14 + $0x60] sm:$0xff]  ;;  %v1828_v37 = vld [vmem:[#allocation14 + $0x50] sm:$0xff] }
 0x2df   :  { %v8109_v28 = vpack.c.bf16 %v1592_v63, %v1588_v62  ;;  %v1819_v61 = vld [vmem:[#allocation14 + $0x8] sm:$0xff]  ;;  %v1821_v63 = vld [vmem:[#allocation14 + $0x18] sm:$0xff]  ;;  %v8163_v15 = vpack.c.bf16 %v1830_v56, %v1826_v27  ;;  %v1832_v59 = vld [vmem:[#allocation14 + $0x70] sm:$0xff]  ;;  %v8183_v56 = vpack.c.bf16 %v1847_v8, %v1843_v25 }
 0x2e0   :  { %v1823_v62 = vld [vmem:[#allocation14 + $0x28] sm:$0xff]  ;;  %v8166_v42 = vpack.c.bf16 %v1832_v59, %v1828_v37  ;;  %v1845_v27 = vld [vmem:[#allocation14 + $0xd8] sm:$0xff]  ;;  %v1842_v59 = vld [vmem:[#allocation14 + $0xc0] sm:$0xff] }
 0x2e1   :  { %9668 = vst [vmem:[#allocation28_spill] sm:$0xff] %v8163_v15  ;;  %9674 = vst [vmem:[#allocation34_spill] sm:$0xff] %v8183_v56  ;;  %v1849_v37 = vld [vmem:[#allocation14 + $0xf8] sm:$0xff] }
 0x2e2   :  { %9669 = vst [vmem:[#allocation29_spill] sm:$0xff] %v8166_v42  ;;  %v1853_v25 = vld [vmem:[#allocation14 + $0x118] sm:$0xff] }
 0x2e8   :  { %v7040_v35 = vpop.eup %7039 }
 0x2e9   :  { %v1219_v53 = vmul.f32 %v7040_v35, %v7038_v34  ;;  %v8111_v34 = vpack.c.bf16 %v1594_v10, %v1590_v4  ;;  %v1589_v35 = vld [vmem:[#allocation12 + $0x150] sm:$0xff]  ;;  %v8147_v4 = vpack.c.bf16 %v1823_v62, %v1819_v61  ;;  %v1825_v10 = vld [vmem:[#allocation14 + $0x38] sm:$0xff] }
 0x2ea   :  { %v8117_v0 = vpack.c.bf16 %v1593_v48, %v1589_v35  ;;  %v8149_v35 = vpack.c.bf16 %v1825_v10, %v1821_v63  ;;  %v8151_v48 = vpack.c.bf16 %v1822_v24, %v1818_v23  ;;  %v1837_v61 = vld [vmem:[#allocation14 + $0x98] sm:$0xff]  ;;  %v1834_v23 = vld [vmem:[#allocation14 + $0x80] sm:$0xff] }
 0x2eb   :  { %1220 = vst [vmem:[#allocation2] sm:$0x1] %v1219_v53  ;;  %1439 = vmatmul.mubr.f32.vlgmr.msra.gmra.mrb[8].mxu0 %v1219_v53  ;;  %1510 = vmatmul.mubr.f32.vlgmr.msra.gmra.mrb[8].mxu1 %v1219_v53  ;;  %v1600_v53 = vld [vmem:[#allocation12 + $0x1a8] sm:$0xff]  ;;  %v1841_v63 = vld [vmem:[#allocation14 + $0xb8] sm:$0xff]  ;;  %v1838_v24 = vld [vmem:[#allocation14 + $0xa0] sm:$0xff] }
 0x2ec   :  { %5803 = vmatpush1.bf16.msra.mxu0 %v8055_v36  ;;  %5835 = vmatpush1.bf16.msra.mxu1 %v8057_v41  ;;  %v8121_v39 = vpack.c.bf16 %v1600_v53, %v1596_v52  ;;  %v1820_v52 = vld [vmem:[#allocation14 + $0x10] sm:$0xff]  ;;  %v8173_v10 = vpack.c.bf16 %v1841_v63, %v1837_v61 }
 0x2ed   :  { %5805 = vmatprep.subr.bf16.mxu0 %v8059_v58  ;;  %5837 = vmatprep.subr.bf16.mxu1 %v8061_v5  ;;  %v1824_v53 = vld [vmem:[#allocation14 + $0x30] sm:$0xff] }
 0x2ee   :  { %1675 = vmatprep.mubr.f32.mxu0 %v7945_v32  ;;  %1746 = vmatprep.mubr.f32.mxu1 %v7945_v32  ;;  %v8154_v6 = vpack.c.bf16 %v1824_v53, %v1820_v52  ;;  %9671 = vst [vmem:[#allocation31_spill] sm:$0xff] %v8173_v10  ;;  %v1836_v52 = vld [vmem:[#allocation14 + $0x90] sm:$0xff]  ;;  %v8176_v53 = vpack.c.bf16 %v1838_v24, %v1834_v23 }
 0x2ef   :  { %v8179_v17 = vpack.c.bf16 %v1840_v7, %v1836_v52  ;;  %v1844_v63 = vld [vmem:[#allocation14 + $0xd0] sm:$0xff]  ;;  %v1851_v52 = vld [vmem:[#allocation14 + $0x108] sm:$0xff] }
 0x2f0   :  { %5807 = vmatpush1.bf16.msra.mxu0 %v8065_v30  ;;  %5839 = vmatpush1.bf16.msra.mxu1 %v8067_v31  ;;  %9672 = vst [vmem:[#allocation32_spill] sm:$0xff] %v8176_v53  ;;  %v1848_v23 = vld [vmem:[#allocation14 + $0xf0] sm:$0xff]  ;;  %v1855_v7 = vld [vmem:[#allocation14 + $0x128] sm:$0xff] }
 0x2f1   :  { %5809 = vmatprep.subr.bf16.mxu0 %v8071_v46  ;;  %5841 = vmatprep.subr.bf16.mxu1 %v8073_v57  ;;  %9673 = vst [vmem:[#allocation33_spill] sm:$0xff] %v8179_v17  ;;  %v8190_v24 = vpack.c.bf16 %v1848_v23, %v1844_v63  ;;  %v8195_v8 = vpack.c.bf16 %v1855_v7, %v1851_v52  ;;  %v1852_v63 = vld [vmem:[#allocation14 + $0x110] sm:$0xff]  ;;  %v1863_v52 = vld [vmem:[#allocation14 + $0x168] sm:$0xff]  ;;  %v1861_v7 = vld [vmem:[#allocation14 + $0x158] sm:$0xff] }
 0x2f2   :  { %v1543_v55 = vld [vmem:[#allocation2] sm:$0x1]  ;;  %v1856_v23 = vld [vmem:[#allocation14 + $0x130] sm:$0xff] }
 0x2f3   :  { %9677 = vst [vmem:[#allocation37_spill] sm:$0xff] %v8190_v24  ;;  %9678 = vst [vmem:[#allocation38_spill] sm:$0xff] %v8195_v8 }
 0x2f4   :  { %5811 = vmatpush1.bf16.msra.mxu0 %v8079_v9  ;;  %5843 = vmatpush1.bf16.msra.mxu1 %v8081_v40 }
 0x2f5   :  { %5813 = vmatprep.subr.bf16.mxu0 %v8085_v33  ;;  %5845 = vmatprep.subr.bf16.mxu1 %v8087_v19 }
 0x2f8   :  { %5815 = vmatpush1.bf16.msra.mxu0 %v8091_v47  ;;  %5847 = vmatpush1.bf16.msra.mxu1 %v8093_v14 }
 0x2f9   :  { %5817 = vmatprep.subr.bf16.mxu0 %v8097_v50  ;;  %5849 = vmatprep.subr.bf16.mxu1 %v8099_v51 }
 0x2fc   :  { %5819 = vmatpush1.bf16.msra.mxu0 %v8103_v12  ;;  %5851 = vmatpush1.bf16.msra.mxu1 %v8105_v16 }
 0x2fd   :  { %5821 = vmatprep.subr.bf16.mxu0 %v8109_v28  ;;  %5853 = vmatprep.subr.bf16.mxu1 %v8111_v34 }
 0x300   :  { %5823 = vmatpush1.bf16.msra.mxu0 %v8115_v13  ;;  %5855 = vmatpush1.bf16.msra.mxu1 %v8117_v0 }
 0x301   :  { %5825 = vmatprep.subr.bf16.mxu0 %v8121_v39  ;;  %5857 = vmatprep.subr.bf16.mxu1 %v8123_v45 }
 0x304   :  { %5827 = vmatpush1.bf16.msra.mxu0 %v8127_v1  ;;  %5859 = vmatpush1.bf16.msra.mxu1 %v8129_v20 }
 0x305   :  { %5829 = vmatprep.subr.bf16.mxu0 %v8133_v3  ;;  %5861 = vmatprep.subr.bf16.mxu1 %v8135_v38 }
 0x308   :  { %5831 = vmatpush1.bf16.msra.mxu0 %v8139_v43  ;;  %5863 = vmatpush1.bf16.msra.mxu1 %v8141_v49 }
 0x309   :  { %5865 = vmatprep.subr.bf16.mxu0 %v8147_v4  ;;  %5929 = vmatprep.subr.bf16.mxu1 %v8149_v35 }
 0x30b   :  { %1676 = vmatmul.mubr.f32.vlgmr.msra.gmra.mrb[10].mxu0 %v1543_v55  ;;  %1747 = vmatmul.mubr.f32.vlgmr.msra.gmra.mrb[10].mxu1 %v1543_v55  ;;  %v1839_v55 = vld [vmem:[#allocation14 + $0xa8] sm:$0xff] }
 0x30c   :  { %5867 = vmatpush1.bf16.msra.mxu0 %v8151_v48  ;;  %5931 = vmatpush1.bf16.msra.mxu1 %v8154_v6  ;;  %v8171_v62 = vpack.c.bf16 %v1839_v55, %v1835_v54  ;;  %v1846_v54 = vld [vmem:[#allocation14 + $0xe0] sm:$0xff]  ;;  %v8185_v55 = vpack.c.bf16 %v1849_v37, %v1845_v27  ;;  %v1857_v27 = vld [vmem:[#allocation14 + $0x138] sm:$0xff] }
 0x30d   :  { %5869 = vmatprep.subr.bf16.mxu0 %v8159_v60  ;;  %5933 = vmatprep.subr.bf16.mxu1 %v8161_v18  ;;  %v8187_v61 = vpack.c.bf16 %v1846_v54, %v1842_v59  ;;  %v1850_v37 = vld [vmem:[#allocation14 + $0x100] sm:$0xff]  ;;  %v8197_v54 = vpack.c.bf16 %v1857_v27, %v1853_v25  ;;  %v1865_v25 = vld [vmem:[#allocation14 + $0x178] sm:$0xff] }
 0x30e   :  { %9670 = vst [vmem:[#allocation30_spill] sm:$0xff] %v8171_v62  ;;  %9675 = vst [vmem:[#allocation35_spill] sm:$0xff] %v8185_v55  ;;  %v1854_v59 = vld [vmem:[#allocation14 + $0x120] sm:$0xff]  ;;  %v1937_v18 = vld [vmem:[#allocation14 + $0x3b8] sm:$0xff] }
 0x30f   :  { %9676 = vst [vmem:[#allocation36_spill] sm:$0xff] %v8187_v61  ;;  %9679 = vst [vmem:[#allocation39_spill] sm:$0xff] %v8197_v54  ;;  %v1858_v27 = vld [vmem:[#allocation14 + $0x140] sm:$0xff] }
 0x310   :  { %5871 = vmatpush1.bf16.msra.mxu0 %v8163_v15  ;;  %5935 = vmatpush1.bf16.msra.mxu1 %v8166_v42  ;;  %v1927_v42 = vld [vmem:[#allocation14 + $0x368] sm:$0xff]  ;;  %v1925_v15 = vld [vmem:[#allocation14 + $0x358] sm:$0xff] }
 0x311   :  { %5873 = vmatprep.subr.bf16.mxu0 %v8171_v62  ;;  %5937 = vmatprep.subr.bf16.mxu1 %v8173_v10  ;;  %v1923_v62 = vld [vmem:[#allocation14 + $0x348] sm:$0xff] }
 0x314   :  { %5875 = vmatpush1.bf16.msra.mxu0 %v8176_v53  ;;  %5939 = vmatpush1.bf16.msra.mxu1 %v8179_v17  ;;  %v8199_v17 = vpack.c.bf16 %v1854_v59, %v1850_v37  ;;  %v1862_v37 = vld [vmem:[#allocation14 + $0x160] sm:$0xff]  ;;  %v8209_v59 = vpack.c.bf16 %v1865_v25, %v1861_v7  ;;  %v1873_v7 = vld [vmem:[#allocation14 + $0x1b8] sm:$0xff] }
 0x315   :  { %5877 = vmatprep.subr.bf16.mxu0 %v8183_v56  ;;  %5941 = vmatprep.subr.bf16.mxu1 %v8185_v55  ;;  %v8202_v55 = vpack.c.bf16 %v1856_v23, %v1852_v63  ;;  %v8211_v56 = vpack.c.bf16 %v1862_v37, %v1858_v27  ;;  %v1860_v63 = vld [vmem:[#allocation14 + $0x150] sm:$0xff]  ;;  %v1866_v25 = vld [vmem:[#allocation14 + $0x180] sm:$0xff]  ;;  %v1901_v53 = vld [vmem:[#allocation14 + $0x298] sm:$0xff] }
 0x316   :  { %9680 = vst [vmem:[#allocation40_spill] sm:$0xff] %v8199_v17  ;;  %9683 = vst [vmem:[#allocation43_spill] sm:$0xff] %v8209_v59  ;;  %v1864_v23 = vld [vmem:[#allocation14 + $0x170] sm:$0xff]  ;;  %v1870_v27 = vld [vmem:[#allocation14 + $0x1a0] sm:$0xff] }
 0x317   :  { %9681 = vst [vmem:[#allocation41_spill] sm:$0xff] %v8202_v55  ;;  %9684 = vst [vmem:[#allocation44_spill] sm:$0xff] %v8211_v56 }
 0x318   :  { %5879 = vmatpush1.bf16.msra.mxu0 %v8187_v61  ;;  %5943 = vmatpush1.bf16.msra.mxu1 %v8190_v24  ;;  %v1859_v24 = vld [vmem:[#allocation14 + $0x148] sm:$0xff] }
 0x319   :  { %5881 = vmatprep.subr.bf16.mxu0 %v8195_v8  ;;  %5945 = vmatprep.subr.bf16.mxu1 %v8197_v54  ;;  %v8207_v61 = vpack.c.bf16 %v1863_v52, %v1859_v24  ;;  %v8214_v54 = vpack.c.bf16 %v1864_v23, %v1860_v63  ;;  %v1871_v24 = vld [vmem:[#allocation14 + $0x1a8] sm:$0xff]  ;;  %v1869_v52 = vld [vmem:[#allocation14 + $0x198] sm:$0xff]  ;;  %v8223_v8 = vpack.c.bf16 %v1870_v27, %v1866_v25  ;;  %v1868_v63 = vld [vmem:[#allocation14 + $0x190] sm:$0xff] }
 0x31a   :  { %v8221_v37 = vpack.c.bf16 %v1873_v7, %v1869_v52  ;;  %v1872_v23 = vld [vmem:[#allocation14 + $0x1b0] sm:$0xff]  ;;  %v1881_v52 = vld [vmem:[#allocation14 + $0x1f8] sm:$0xff]  ;;  %v1874_v7 = vld [vmem:[#allocation14 + $0x1c0] sm:$0xff] }
 0x31b   :  { %9682 = vst [vmem:[#allocation42_spill] sm:$0xff] %v8207_v61  ;;  %9685 = vst [vmem:[#allocation45_spill] sm:$0xff] %v8214_v54  ;;  %v1878_v25 = vld [vmem:[#allocation14 + $0x1e0] sm:$0xff] }
 0x31c   :  { %5883 = vmatpush1.bf16.msra.mxu0 %v8199_v17  ;;  %5947 = vmatpush1.bf16.msra.mxu1 %v8202_v55  ;;  %v1867_v55 = vld [vmem:[#allocation14 + $0x188] sm:$0xff]  ;;  %9687 = vst [vmem:[#allocation47_spill] sm:$0xff] %v8221_v37  ;;  %9688 = vst [vmem:[#allocation48_spill] sm:$0xff] %v8223_v8 }
 0x31d   :  { %5885 = vmatprep.subr.bf16.mxu0 %v8207_v61  ;;  %5949 = vmatprep.subr.bf16.mxu1 %v8209_v59  ;;  %v8219_v17 = vpack.c.bf16 %v1871_v24, %v1867_v55  ;;  %v8226_v59 = vpack.c.bf16 %v1872_v23, %v1868_v63  ;;  %v1879_v55 = vld [vmem:[#allocation14 + $0x1e8] sm:$0xff]  ;;  %v1877_v24 = vld [vmem:[#allocation14 + $0x1d8] sm:$0xff]  ;;  %v8235_v61 = vpack.c.bf16 %v1878_v25, %v1874_v7  ;;  %v1876_v63 = vld [vmem:[#allocation14 + $0x1d0] sm:$0xff] }
 0x31e   :  { %v8233_v27 = vpack.c.bf16 %v1881_v52, %v1877_v24  ;;  %v1880_v23 = vld [vmem:[#allocation14 + $0x1f0] sm:$0xff]  ;;  %v1889_v24 = vld [vmem:[#allocation14 + $0x238] sm:$0xff]  ;;  %v1882_v52 = vld [vmem:[#allocation14 + $0x200] sm:$0xff] }
 0x31f   :  { %9686 = vst [vmem:[#allocation46_spill] sm:$0xff] %v8219_v17  ;;  %9689 = vst [vmem:[#allocation49_spill] sm:$0xff] %v8226_v59  ;;  %v1886_v7 = vld [vmem:[#allocation14 + $0x220] sm:$0xff] }
 0x320   :  { %5887 = vmatpush1.bf16.msra.mxu0 %v8211_v56  ;;  %5951 = vmatpush1.bf16.msra.mxu1 %v8214_v54  ;;  %v1875_v54 = vld [vmem:[#allocation14 + $0x1c8] sm:$0xff]  ;;  %9691 = vst [vmem:[#allocation51_spill] sm:$0xff] %v8233_v27  ;;  %9692 = vst [vmem:[#allocation52_spill] sm:$0xff] %v8235_v61 }
 0x321   :  { %5889 = vmatprep.subr.bf16.mxu0 %v8219_v17  ;;  %5953 = vmatprep.subr.bf16.mxu1 %v8221_v37  ;;  %v8231_v56 = vpack.c.bf16 %v1879_v55, %v1875_v54  ;;  %v8238_v37 = vpack.c.bf16 %v1880_v23, %v1876_v63  ;;  %v1887_v54 = vld [vmem:[#allocation14 + $0x228] sm:$0xff]  ;;  %v1885_v55 = vld [vmem:[#allocation14 + $0x218] sm:$0xff]  ;;  %v8247_v17 = vpack.c.bf16 %v1886_v7, %v1882_v52  ;;  %v1884_v63 = vld [vmem:[#allocation14 + $0x210] sm:$0xff] }
 0x322   :  { %v8245_v25 = vpack.c.bf16 %v1889_v24, %v1885_v55  ;;  %v1888_v23 = vld [vmem:[#allocation14 + $0x230] sm:$0xff]  ;;  %v1897_v55 = vld [vmem:[#allocation14 + $0x278] sm:$0xff]  ;;  %v1890_v24 = vld [vmem:[#allocation14 + $0x240] sm:$0xff] }
 0x323   :  { %9690 = vst [vmem:[#allocation50_spill] sm:$0xff] %v8231_v56  ;;  %9693 = vst [vmem:[#allocation53_spill] sm:$0xff] %v8238_v37  ;;  %v1894_v52 = vld [vmem:[#allocation14 + $0x260] sm:$0xff] }
 0x324   :  { %5891 = vmatpush1.bf16.msra.mxu0 %v8223_v8  ;;  %5955 = vmatpush1.bf16.msra.mxu1 %v8226_v59  ;;  %v1883_v59 = vld [vmem:[#allocation14 + $0x208] sm:$0xff]  ;;  %9695 = vst [vmem:[#allocation55_spill] sm:$0xff] %v8245_v25  ;;  %9696 = vst [vmem:[#allocation56_spill] sm:$0xff] %v8247_v17 }
 0x325   :  { %5893 = vmatprep.subr.bf16.mxu0 %v8231_v56  ;;  %5957 = vmatprep.subr.bf16.mxu1 %v8233_v27  ;;  %v8243_v8 = vpack.c.bf16 %v1887_v54, %v1883_v59  ;;  %v8250_v27 = vpack.c.bf16 %v1888_v23, %v1884_v63  ;;  %v1895_v59 = vld [vmem:[#allocation14 + $0x268] sm:$0xff]  ;;  %v1893_v54 = vld [vmem:[#allocation14 + $0x258] sm:$0xff]  ;;  %v8259_v56 = vpack.c.bf16 %v1894_v52, %v1890_v24  ;;  %v1892_v63 = vld [vmem:[#allocation14 + $0x250] sm:$0xff] }
 0x326   :  { %v8257_v7 = vpack.c.bf16 %v1897_v55, %v1893_v54  ;;  %v1896_v23 = vld [vmem:[#allocation14 + $0x270] sm:$0xff]  ;;  %v1898_v54 = vld [vmem:[#allocation14 + $0x280] sm:$0xff] }
 0x327   :  { %9694 = vst [vmem:[#allocation54_spill] sm:$0xff] %v8243_v8  ;;  %9697 = vst [vmem:[#allocation57_spill] sm:$0xff] %v8250_v27  ;;  %v1902_v55 = vld [vmem:[#allocation14 + $0x2a0] sm:$0xff] }
 0x328   :  { %5895 = vmatpush1.bf16.msra.mxu0 %v8235_v61  ;;  %5959 = vmatpush1.bf16.msra.mxu1 %v8238_v37  ;;  %v1891_v37 = vld [vmem:[#allocation14 + $0x248] sm:$0xff]  ;;  %9699 = vst [vmem:[#allocation59_spill] sm:$0xff] %v8257_v7  ;;  %9700 = vst [vmem:[#allocation60_spill] sm:$0xff] %v8259_v56  ;;  %v8271_v52 = vpack.c.bf16 %v1902_v55, %v1898_v54  ;;  %v1908_v54 = vld [vmem:[#allocation14 + $0x2d0] sm:$0xff] }
 0x329   :  { %5897 = vmatprep.subr.bf16.mxu0 %v8243_v8  ;;  %5961 = vmatprep.subr.bf16.mxu1 %v8245_v25  ;;  %v8255_v61 = vpack.c.bf16 %v1895_v59, %v1891_v37  ;;  %v8262_v25 = vpack.c.bf16 %v1896_v23, %v1892_v63  ;;  %v1903_v8 = vld [vmem:[#allocation14 + $0x2a8] sm:$0xff]  ;;  %v1905_v59 = vld [vmem:[#allocation14 + $0x2b8] sm:$0xff]  ;;  %v1900_v63 = vld [vmem:[#allocation14 + $0x290] sm:$0xff] }
 0x32a   :  { %v8269_v24 = vpack.c.bf16 %v1905_v59, %v1901_v53  ;;  %9704 = vst [vmem:[#allocation64_spill] sm:$0xff] %v8271_v52  ;;  %v1904_v23 = vld [vmem:[#allocation14 + $0x2b0] sm:$0xff]  ;;  %v1906_v53 = vld [vmem:[#allocation14 + $0x2c0] sm:$0xff] }
 0x32b   :  { %9698 = vst [vmem:[#allocation58_spill] sm:$0xff] %v8255_v61  ;;  %9701 = vst [vmem:[#allocation61_spill] sm:$0xff] %v8262_v25  ;;  %v1910_v59 = vld [vmem:[#allocation14 + $0x2e0] sm:$0xff] }
 0x32c   :  { %5899 = vmatpush1.bf16.msra.mxu0 %v8247_v17  ;;  %5963 = vmatpush1.bf16.msra.mxu1 %v8250_v27  ;;  %v1899_v17 = vld [vmem:[#allocation14 + $0x288] sm:$0xff]  ;;  %9703 = vst [vmem:[#allocation63_spill] sm:$0xff] %v8269_v24  ;;  %v8274_v27 = vpack.c.bf16 %v1904_v23, %v1900_v63  ;;  %v8282_v55 = vpack.c.bf16 %v1910_v59, %v1906_v53  ;;  %v1918_v53 = vld [vmem:[#allocation14 + $0x320] sm:$0xff]  ;;  %v1916_v59 = vld [vmem:[#allocation14 + $0x310] sm:$0xff] }
 0x32d   :  { %5901 = vmatprep.subr.bf16.mxu0 %v8255_v61  ;;  %5965 = vmatprep.subr.bf16.mxu1 %v8257_v7  ;;  %v8266_v37 = vpack.c.bf16 %v1903_v8, %v1899_v17  ;;  %v1907_v61 = vld [vmem:[#allocation14 + $0x2c8] sm:$0xff]  ;;  %v1913_v17 = vld [vmem:[#allocation14 + $0x2f8] sm:$0xff] }
 0x32e   :  { %9705 = vst [vmem:[#allocation65_spill] sm:$0xff] %v8274_v27  ;;  %v1911_v7 = vld [vmem:[#allocation14 + $0x2e8] sm:$0xff]  ;;  %9708 = vst [vmem:[#allocation68_spill] sm:$0xff] %v8282_v55 }
 0x32f   :  { %9702 = vst [vmem:[#allocation62_spill] sm:$0xff] %v8266_v37  ;;  %v8277_v8 = vpack.c.bf16 %v1911_v7, %v1907_v61  ;;  %v1919_v63 = vld [vmem:[#allocation14 + $0x328] sm:$0xff]  ;;  %v1921_v7 = vld [vmem:[#allocation14 + $0x338] sm:$0xff] }
 0x330   :  { %5903 = vmatpush1.bf16.msra.mxu0 %v8259_v56  ;;  %5967 = vmatpush1.bf16.msra.mxu1 %v8262_v25  ;;  %v1909_v56 = vld [vmem:[#allocation14 + $0x2d8] sm:$0xff]  ;;  %v1912_v25 = vld [vmem:[#allocation14 + $0x2f0] sm:$0xff] }
 0x331   :  { %5905 = vmatprep.subr.bf16.mxu0 %v8266_v37  ;;  %5969 = vmatprep.subr.bf16.mxu1 %v8269_v24  ;;  %9706 = vst [vmem:[#allocation66_spill] sm:$0xff] %v8277_v8  ;;  %v8279_v10 = vpack.c.bf16 %v1913_v17, %v1909_v56  ;;  %v1915_v37 = vld [vmem:[#allocation14 + $0x308] sm:$0xff]  ;;  %v8286_v23 = vpack.c.bf16 %v1912_v25, %v1908_v54  ;;  %v1917_v56 = vld [vmem:[#allocation14 + $0x318] sm:$0xff]  ;;  %v1914_v17 = vld [vmem:[#allocation14 + $0x300] sm:$0xff] }
 0x332   :  { %v8288_v61 = vpack.c.bf16 %v1919_v63, %v1915_v37  ;;  %v8291_v24 = vpack.c.bf16 %v1921_v7, %v1917_v56  ;;  %v1929_v25 = vld [vmem:[#allocation14 + $0x378] sm:$0xff]  ;;  %v8300_v54 = vpack.c.bf16 %v1927_v42, %v1923_v62  ;;  %v1922_v63 = vld [vmem:[#allocation14 + $0x340] sm:$0xff]  ;;  %v1924_v7 = vld [vmem:[#allocation14 + $0x350] sm:$0xff] }
 0x333   :  { %9707 = vst [vmem:[#allocation67_spill] sm:$0xff] %v8279_v10  ;;  %9709 = vst [vmem:[#allocation69_spill] sm:$0xff] %v8286_v23  ;;  %v1926_v56 = vld [vmem:[#allocation14 + $0x360] sm:$0xff] }
 0x334   :  { %5907 = vmatpush1.bf16.msra.mxu0 %v8271_v52  ;;  %5971 = vmatpush1.bf16.msra.mxu1 %v8274_v27  ;;  %9710 = vst [vmem:[#allocation70_spill] sm:$0xff] %v8288_v61  ;;  %9711 = vst [vmem:[#allocation71_spill] sm:$0xff] %v8291_v24  ;;  %v1920_v52 = vld [vmem:[#allocation14 + $0x330] sm:$0xff] }
 0x335   :  { %5909 = vmatprep.subr.bf16.mxu0 %v8277_v8  ;;  %5973 = vmatprep.subr.bf16.mxu1 %v8279_v10  ;;  %v8294_v8 = vpack.c.bf16 %v1918_v53, %v1914_v17  ;;  %v8298_v37 = vpack.c.bf16 %v1920_v52, %v1916_v59  ;;  %v8303_v10 = vpack.c.bf16 %v1929_v25, %v1925_v15  ;;  %v1928_v27 = vld [vmem:[#allocation14 + $0x370] sm:$0xff]  ;;  %v1935_v17 = vld [vmem:[#allocation14 + $0x3a8] sm:$0xff]  ;;  %v1933_v53 = vld [vmem:[#allocation14 + $0x398] sm:$0xff] }
 0x336   :  { %v8310_v42 = vpack.c.bf16 %v1928_v27, %v1924_v7  ;;  %v1930_v52 = vld [vmem:[#allocation14 + $0x380] sm:$0xff]  ;;  %v1932_v59 = vld [vmem:[#allocation14 + $0x390] sm:$0xff]  ;;  %v8315_v25 = vpack.c.bf16 %v1937_v18, %v1933_v53 }
 0x337   :  { %9712 = vst [vmem:[#allocation72_spill] sm:$0xff] %v8294_v8  ;;  %9713 = vst [vmem:[#allocation73_spill] sm:$0xff] %v8298_v37  ;;  %v1934_v15 = vld [vmem:[#allocation14 + $0x3a0] sm:$0xff]  ;;  %v1940_v53 = vld [vmem:[#allocation14 + $0x3d0] sm:$0xff] }
 0x338   :  { %5911 = vmatpush1.bf16.msra.mxu0 %v8282_v55  ;;  %5975 = vmatpush1.bf16.msra.mxu1 %v8286_v23  ;;  %9714 = vst [vmem:[#allocation74_spill] sm:$0xff] %v8303_v10  ;;  %v1931_v55 = vld [vmem:[#allocation14 + $0x388] sm:$0xff]  ;;  %v8306_v23 = vpack.c.bf16 %v1926_v56, %v1922_v63  ;;  %v1941_v63 = vld [vmem:[#allocation14 + $0x3d8] sm:$0xff]  ;;  %v1938_v7 = vld [vmem:[#allocation14 + $0x3c0] sm:$0xff] }
 0x339   :  { %5913 = vmatprep.subr.bf16.mxu0 %v8288_v61  ;;  %5977 = vmatprep.subr.bf16.mxu1 %v8291_v24  ;;  %v8312_v62 = vpack.c.bf16 %v1935_v17, %v1931_v55  ;;  %v1936_v24 = vld [vmem:[#allocation14 + $0x3b0] sm:$0xff]  ;;  %v1939_v61 = vld [vmem:[#allocation14 + $0x3c8] sm:$0xff]  ;;  %v1945_v56 = vld [vmem:[#allocation14 + $0x3f8] sm:$0xff] }
 0x33a   :  { %v8322_v27 = vpack.c.bf16 %v1936_v24, %v1932_v59  ;;  %v1942_v18 = vld [vmem:[#allocation14 + $0x3e0] sm:$0xff]  ;;  %v8327_v17 = vpack.c.bf16 %v1945_v56, %v1941_v63 }
 0x33c   :  { %5915 = vmatpush1.bf16.msra.mxu0 %v8294_v8  ;;  %5979 = vmatpush1.bf16.msra.mxu1 %v8298_v37  ;;  %v1943_v8 = vld [vmem:[#allocation14 + $0x3e8] sm:$0xff]  ;;  %v8318_v37 = vpack.c.bf16 %v1934_v15, %v1930_v52  ;;  %9715 = vst [vmem:[#allocation75_spill] sm:$0xff] %v8322_v27  ;;  %9717 = vst [vmem:[#allocation77_spill] sm:$0xff] %v8327_v17  ;;  %v8330_v52 = vpack.c.bf16 %v1942_v18, %v1938_v7 }
 0x33d   :  { %5917 = vmatprep.subr.bf16.mxu0 %v8300_v54  ;;  %5981 = vmatprep.subr.bf16.mxu1 %v8303_v10  ;;  %v8324_v55 = vpack.c.bf16 %v1943_v8, %v1939_v61  ;;  %v1944_v10 = vld [vmem:[#allocation14 + $0x3f0] sm:$0xff]  ;;  %v1352_v8 = vld [vmem:[%s9327_s7] sm:$0xf] }
 0x33e   :  { %9718 = vst [vmem:[#allocation81_spill] sm:$0xff] %v8330_v52  ;;  %v8334_v24 = vpack.c.bf16 %v1944_v10, %v1940_v53  ;;  %v1357_v61 = vrot.slane %v1352_v8, %v9663_v26  ;;  %v1361_v15 = vrot.slane %v1352_v8, %v9664_v2 }
 0x33f   :  { %9716 = vst [vmem:[#allocation76_spill] sm:$0xff] %v8324_v55 }
 0x340   :  { %5919 = vmatpush1.bf16.msra.mxu0 %v8306_v23  ;;  %5983 = vmatpush1.bf16.msra.mxu1 %v8310_v42  ;;  %9719 = vst [vmem:[#allocation79_spill] sm:$0xff] %v8334_v24 }
 0x341   :  { %5921 = vmatprep.subr.bf16.mxu0 %v8312_v62  ;;  %5985 = vmatprep.subr.bf16.mxu1 %v8315_v25 }
 0x344   :  { %5923 = vmatpush1.bf16.msra.mxu0 %v8318_v37  ;;  %5987 = vmatpush1.bf16.msra.mxu1 %v8322_v27 }
 0x345   :  { %5925 = vmatprep.subr.bf16.mxu0 %v8324_v55  ;;  %5989 = vmatprep.subr.bf16.mxu1 %v8327_v17 }
 0x348   :  { %5927 = vmatpush1.bf16.msra.mxu0 %v8330_v52  ;;  %5991 = vmatpush1.bf16.msra.mxu1 %v8334_v24  ;;  %v1365_v52 = vrot.slane %v1352_v8, %v9666_v22 }
 0x349   :  { %5993 = vmatprep.subr.bf16.mxu0 %v8039_v44  ;;  %6025 = vmatprep.subr.bf16.mxu1 %v8041_v21  ;;  %v1369_v44 = vrot.slane %v1352_v8, %v9665_v11 }
 0x3be   :  { %v1440_v10 = vpop.f32.mrb[8].mxu0  ;;  %v1511_v59 = vpop.f32.mrb[8].mxu1 }
 0x3bf   :  { %v1441_v63 = vadd.f32 %v1440_v10, %v1357_v61  ;;  %v1442_v56 = vpop.f32.mrb[9].mxu0  ;;  %v1513_v7 = vpop.f32.mrb[9].mxu1  ;;  %v1512_v55 = vadd.f32 %v1511_v59, %v1365_v52 }
 0x3c0   :  { %v1443_v18 = vadd.f32 %v1442_v56, %v1361_v15  ;;  %v1514_v21 = vadd.f32 %v1513_v7, %v1369_v44 }
 0x3c1   :  { %v5260_v53 = vmul.f32 -1.442695, %v1441_v63 }
 0x3c2   :  { %v5261_v24 = vmul.f32 -1.442695, %v1443_v18  ;;  %v5262_v17 = vmul.f32 -1.442695, %v1514_v21 }
 0x3c3   :  { %7041 = vpow2.f32 %v5260_v53  ;;  %v1223_v53 = vld [vmem:[#allocation3 + $0x1] sm:$0x1] }
 0x3c4   :  { %7043 = vpow2.f32 %v5261_v24 }
 0x3c5   :  { %7045 = vpow2.f32 %v5262_v17 }
 0x3c6   :  { %7047 = vtanh.f32 %v1512_v55 }
 0x3cd   :  { %v7042_v26 = vpop.eup %7041 }
 0x3ce   :  { %v7044_v27 = vpop.eup %7043  ;;  %v1519_v2 = vadd.f32 1.0, %v7042_v26 }
 0x3cf   :  { %v1525_v61 = vadd.f32 1.0, %v7044_v27  ;;  %v7046_v15 = vpop.eup %7045 }
 0x3d0   :  { %7049 = vrcp.f32 %v1519_v2  ;;  %v7048_v10 = vpop.eup %7047  ;;  %v1532_v24 = vadd.f32 1.0, %v7046_v15 }
 0x3d1   :  { %7051 = vrcp.f32 %v1525_v61 }
 0x3d2   :  { %7053 = vrcp.f32 %v1532_v24 }
 0x3da   :  { %v7050_v63 = vpop.eup %7049 }
 0x3db   :  { %v7052_v56 = vpop.eup %7051  ;;  %v1536_v18 = vmul.f32 %v7050_v63, %v7048_v10  ;;  %v1546_v10 = vld [vmem:[#allocation5 + $0x2] ss:$8 sm:$0xf] }
 0x3dc   :  { %v1535_v7 = vmul.f32 %v7052_v56, %v1223_v53  ;;  %v7054_v63 = vpop.eup %7053 }
 0x3de   :  { %v1537_v44 = vadd.f32 %v1536_v18, %v1535_v7  ;;  %v1677_v8 = vpop.f32.mrb[10].mxu0  ;;  %v1748_v21 = vpop.f32.mrb[10].mxu1 }
 0x3df   :  { %v1679_v52 = vpop.f32.mrb[11].mxu0  ;;  %v1750_v59 = vpop.f32.mrb[11].mxu1 }
 0x3e0   :  { %7055 = vtanh.f32 %v1537_v44  ;;  %1541 = vst [vmem:[#allocation3 + $0x1] sm:$0x1] %v1537_v44  ;;  %v1757_v26 = vcombine.low %v1677_v8, %v1679_v52  ;;  %v1758_v27 = vcombine.low %v1748_v21, %v1750_v59 }
 0x3e2   :  { %v1765_v2 = vrot.slane %v1757_v26, %v7936_v29  ;;  %v1772_v55 = vrot.slane %v1758_v27, %v7936_v29 }
 0x3e4   :  { %v1773_v17 = vcombine.low %v1765_v2, %v1772_v55 }
 0x3e6   :  { %v1780_v61 = vrot.slane %v1773_v17, %v7936_v29 }
 0x3e8   :  { %v1782_v15 = vadd.f32 %v1780_v61, %v1546_v10 }
 0x3ea   :  { %v7056_v56 = vpop.eup %7055  ;;  %v5263_v18 = vmul.f32 -1.442695, %v1782_v15  ;;  %v1790_v53 = vrot.slane %v1782_v15, 1  ;;  %v1801_v44 = vrot.slane %v1782_v15, 3  ;;  %v1798_v59 = vrot.slane %v1782_v15, 2 }
 0x3eb   :  { %v1539_v24 = vmul.f32 %v7056_v56, %v7054_v63  ;;  %v1544_v63 = vld [vmem:[#allocation3] sm:$0x1] }
 0x3ec   :  { %7057 = vpow2.f32 %v5263_v18  ;;  %v5264_v7 = vmul.f32 -1.442695, %v1790_v53  ;;  %v5265_v8 = vmul.f32 -1.442695, %v1801_v44 }
 0x3ed   :  { %1540 = vst [vmem:[#allocation2 + $0x1] sm:$0x1] %v1539_v24  ;;  %1542 = vst [vmem:[#allocation4 + $0x1] sm:$0x1] %v1539_v24 }
 0x3ee   :  { %7059 = vpow2.f32 %v5264_v7 }
 0x3ef   :  { %7061 = vpow2.f32 %v5265_v8  ;;  %v9754_v8 = vld [vmem:[#allocation61_spill] sm:$0xff] }
 0x3f4   :  { %v1816_v21 = vld [vmem:[#allocation2 + $0x1] sm:$0x1] }
 0x3f5   :  { %2032 = vmatprep.mubr.f32.mxu0 %v1816_v21  ;;  %2103 = vmatprep.mubr.f32.mxu1 %v1816_v21  ;;  %v9755_v21 = vld [vmem:[#allocation62_spill] sm:$0xff] }
 0x3f6   :  { %v7058_v52 = vpop.eup %7057 }
 0x3f7   :  { %v1786_v26 = vadd.f32 1.0, %v7058_v52  ;;  %v9756_v52 = vld [vmem:[#allocation63_spill] sm:$0xff] }
 0x3f8   :  { %v7060_v27 = vpop.eup %7059 }
 0x3f9   :  { %7063 = vrcp.f32 %v1786_v26  ;;  %v1795_v2 = vadd.f32 1.0, %v7060_v27  ;;  %v7062_v55 = vpop.eup %7061  ;;  %v9758_v26 = vld [vmem:[#allocation65_spill] sm:$0xff]  ;;  %v9759_v27 = vld [vmem:[#allocation66_spill] sm:$0xff] }
 0x3fa   :  { %7065 = vtanh.f32 %v1798_v59  ;;  %v1806_v56 = vadd.f32 1.0, %v7062_v55  ;;  %v9757_v59 = vld [vmem:[#allocation64_spill] sm:$0xff] }
 0x3fb   :  { %7067 = vrcp.f32 %v1795_v2  ;;  %v9760_v2 = vld [vmem:[#allocation67_spill] sm:$0xff]  ;;  %v9761_v55 = vld [vmem:[#allocation68_spill] sm:$0xff] }
 0x3fc   :  { %7069 = vrcp.f32 %v1806_v56  ;;  %v9766_v56 = vld [vmem:[#allocation73_spill] sm:$0xff] }
 0x403   :  { %v7064_v17 = vpop.eup %7063 }
 0x404   :  { %v7066_v61 = vpop.eup %7065 }
 0x405   :  { %v7068_v10 = vpop.eup %7067  ;;  %v1810_v53 = vmul.f32 %v7066_v61, %v7064_v17  ;;  %v9762_v17 = vld [vmem:[#allocation69_spill] sm:$0xff]  ;;  %v9763_v61 = vld [vmem:[#allocation70_spill] sm:$0xff] }
 0x406   :  { %v1809_v18 = vmul.f32 %v7068_v10, %v1544_v63  ;;  %v7070_v15 = vpop.eup %7069  ;;  %v9764_v10 = vld [vmem:[#allocation71_spill] sm:$0xff]  ;;  %v9765_v63 = vld [vmem:[#allocation72_spill] sm:$0xff] }
 0x408   :  { %v1811_v24 = vadd.f32 %v1810_v53, %v1809_v18  ;;  %v9767_v18 = vld [vmem:[#allocation74_spill] sm:$0xff]  ;;  %v9768_v53 = vld [vmem:[#allocation75_spill] sm:$0xff] }
 0x40a   :  { %7071 = vtanh.f32 %v1811_v24  ;;  %1815 = vst [vmem:[#allocation3] sm:$0x1] %v1811_v24  ;;  %v9769_v24 = vld [vmem:[#allocation76_spill] sm:$0xff] }
 0x414   :  { %v7072_v7 = vpop.eup %7071 }
 0x415   :  { %v1813_v44 = vmul.f32 %v7072_v7, %v7070_v15  ;;  %v9770_v15 = vld [vmem:[#allocation77_spill] sm:$0xff] }
 0x416   :  { %v9771_v7 = vld [vmem:[#allocation81_spill] sm:$0xff] }
 0x417   :  { %1814 = vst [vmem:[#allocation2] sm:$0x1] %v1813_v44  ;;  %2033 = vmatmul.mubr.f32.vlgmr.msra.gmra.mrb[12].mxu0 %v1813_v44  ;;  %2104 = vmatmul.mubr.f32.vlgmr.msra.gmra.mrb[12].mxu1 %v1813_v44  ;;  %v2736_v44 = vld [vmem:[#allocation12 + $0x8] sm:$0xff] }
 0x418   :  { %5995 = vmatpush1.bf16.msra.mxu0 %v8055_v36  ;;  %6027 = vmatpush1.bf16.msra.mxu1 %v8057_v41  ;;  %v9720_v41 = vld [vmem:[#allocation27_spill] sm:$0xff] }
 0x419   :  { %5997 = vmatprep.subr.bf16.mxu0 %v8059_v58  ;;  %6029 = vmatprep.subr.bf16.mxu1 %v8061_v5  ;;  %v9721_v58 = vld [vmem:[#allocation28_spill] sm:$0xff]  ;;  %v9722_v5 = vld [vmem:[#allocation29_spill] sm:$0xff] }
 0x41a   :  { %2269 = vmatprep.mubr.f32.mxu0 %v7945_v32  ;;  %2340 = vmatprep.mubr.f32.mxu1 %v7945_v32 }
 0x41c   :  { %5999 = vmatpush1.bf16.msra.mxu0 %v8065_v30  ;;  %6031 = vmatpush1.bf16.msra.mxu1 %v8067_v31  ;;  %v9723_v30 = vld [vmem:[#allocation30_spill] sm:$0xff]  ;;  %v9724_v31 = vld [vmem:[#allocation31_spill] sm:$0xff] }
 0x41d   :  { %6001 = vmatprep.subr.bf16.mxu0 %v8071_v46  ;;  %6033 = vmatprep.subr.bf16.mxu1 %v8073_v57  ;;  %v9725_v46 = vld [vmem:[#allocation32_spill] sm:$0xff]  ;;  %v9726_v57 = vld [vmem:[#allocation33_spill] sm:$0xff] }
 0x41e   :  { %v2137_v36 = vld [vmem:[#allocation2] sm:$0x1] }
 0x420   :  { %6003 = vmatpush1.bf16.msra.mxu0 %v8079_v9  ;;  %6035 = vmatpush1.bf16.msra.mxu1 %v8081_v40  ;;  %v9727_v9 = vld [vmem:[#allocation34_spill] sm:$0xff]  ;;  %v9728_v40 = vld [vmem:[#allocation35_spill] sm:$0xff] }
 0x421   :  { %6005 = vmatprep.subr.bf16.mxu0 %v8085_v33  ;;  %6037 = vmatprep.subr.bf16.mxu1 %v8087_v19  ;;  %v9729_v33 = vld [vmem:[#allocation36_spill] sm:$0xff]  ;;  %v9730_v19 = vld [vmem:[#allocation37_spill] sm:$0xff] }
 0x424   :  { %6007 = vmatpush1.bf16.msra.mxu0 %v8091_v47  ;;  %6039 = vmatpush1.bf16.msra.mxu1 %v8093_v14  ;;  %v9731_v47 = vld [vmem:[#allocation38_spill] sm:$0xff]  ;;  %v9732_v14 = vld [vmem:[#allocation39_spill] sm:$0xff] }
 0x425   :  { %6009 = vmatprep.subr.bf16.mxu0 %v8097_v50  ;;  %6041 = vmatprep.subr.bf16.mxu1 %v8099_v51  ;;  %v9733_v50 = vld [vmem:[#allocation40_spill] sm:$0xff]  ;;  %v9734_v51 = vld [vmem:[#allocation41_spill] sm:$0xff] }
 0x428   :  { %6011 = vmatpush1.bf16.msra.mxu0 %v8103_v12  ;;  %6043 = vmatpush1.bf16.msra.mxu1 %v8105_v16  ;;  %v9735_v12 = vld [vmem:[#allocation42_spill] sm:$0xff]  ;;  %v9736_v16 = vld [vmem:[#allocation43_spill] sm:$0xff] }
 0x429   :  { %6013 = vmatprep.subr.bf16.mxu0 %v8109_v28  ;;  %6045 = vmatprep.subr.bf16.mxu1 %v8111_v34  ;;  %v9737_v28 = vld [vmem:[#allocation44_spill] sm:$0xff]  ;;  %v9738_v34 = vld [vmem:[#allocation45_spill] sm:$0xff] }
 0x42c   :  { %6015 = vmatpush1.bf16.msra.mxu0 %v8115_v13  ;;  %6047 = vmatpush1.bf16.msra.mxu1 %v8117_v0  ;;  %v9739_v13 = vld [vmem:[#allocation46_spill] sm:$0xff]  ;;  %v9740_v0 = vld [vmem:[#allocation47_spill] sm:$0xff] }
 0x42d   :  { %6017 = vmatprep.subr.bf16.mxu0 %v8121_v39  ;;  %6049 = vmatprep.subr.bf16.mxu1 %v8123_v45  ;;  %v9741_v39 = vld [vmem:[#allocation48_spill] sm:$0xff]  ;;  %v9742_v45 = vld [vmem:[#allocation49_spill] sm:$0xff] }
 0x430   :  { %6019 = vmatpush1.bf16.msra.mxu0 %v8127_v1  ;;  %6051 = vmatpush1.bf16.msra.mxu1 %v8129_v20  ;;  %v9743_v1 = vld [vmem:[#allocation50_spill] sm:$0xff]  ;;  %v9744_v20 = vld [vmem:[#allocation51_spill] sm:$0xff] }
 0x431   :  { %6021 = vmatprep.subr.bf16.mxu0 %v8133_v3  ;;  %6053 = vmatprep.subr.bf16.mxu1 %v8135_v38  ;;  %v9745_v3 = vld [vmem:[#allocation52_spill] sm:$0xff]  ;;  %v9746_v38 = vld [vmem:[#allocation53_spill] sm:$0xff] }
 0x434   :  { %6023 = vmatpush1.bf16.msra.mxu0 %v8139_v43  ;;  %6055 = vmatpush1.bf16.msra.mxu1 %v8141_v49  ;;  %v9747_v43 = vld [vmem:[#allocation54_spill] sm:$0xff]  ;;  %v9748_v49 = vld [vmem:[#allocation55_spill] sm:$0xff] }
 0x435   :  { %6057 = vmatprep.subr.bf16.mxu0 %v8147_v4  ;;  %6121 = vmatprep.subr.bf16.mxu1 %v8149_v35  ;;  %v9749_v4 = vld [vmem:[#allocation56_spill] sm:$0xff]  ;;  %v9750_v35 = vld [vmem:[#allocation57_spill] sm:$0xff] }
 0x437   :  { %2270 = vmatmul.mubr.f32.vlgmr.msra.gmra.mrb[14].mxu0 %v2137_v36  ;;  %2341 = vmatmul.mubr.f32.vlgmr.msra.gmra.mrb[14].mxu1 %v2137_v36  ;;  %v2738_v36 = vld [vmem:[#allocation12 + $0x18] sm:$0xff] }
 0x438   :  { %6059 = vmatpush1.bf16.msra.mxu0 %v8151_v48  ;;  %6123 = vmatpush1.bf16.msra.mxu1 %v8154_v6  ;;  %v9751_v48 = vld [vmem:[#allocation58_spill] sm:$0xff]  ;;  %v9752_v6 = vld [vmem:[#allocation59_spill] sm:$0xff] }
 0x439   :  { %6061 = vmatprep.subr.bf16.mxu0 %v8159_v60  ;;  %6125 = vmatprep.subr.bf16.mxu1 %v9720_v41  ;;  %v9753_v60 = vld [vmem:[#allocation60_spill] sm:$0xff] }
 0x43c   :  { %6063 = vmatpush1.bf16.msra.mxu0 %v9721_v58  ;;  %6127 = vmatpush1.bf16.msra.mxu1 %v9722_v5  ;;  %v9774_v5 = vld [vmem:[#allocation80_spill] sm:$0xff] }
 0x43d   :  { %6065 = vmatprep.subr.bf16.mxu0 %v9723_v30  ;;  %6129 = vmatprep.subr.bf16.mxu1 %v9724_v31 }
 0x440   :  { %6067 = vmatpush1.bf16.msra.mxu0 %v9725_v46  ;;  %6131 = vmatpush1.bf16.msra.mxu1 %v9726_v57 }
 0x441   :  { %6069 = vmatprep.subr.bf16.mxu0 %v9727_v9  ;;  %6133 = vmatprep.subr.bf16.mxu1 %v9728_v40 }
 0x444   :  { %6071 = vmatpush1.bf16.msra.mxu0 %v9729_v33  ;;  %6135 = vmatpush1.bf16.msra.mxu1 %v9730_v19 }
 0x445   :  { %6073 = vmatprep.subr.bf16.mxu0 %v9731_v47  ;;  %6137 = vmatprep.subr.bf16.mxu1 %v9732_v14 }
 0x448   :  { %6075 = vmatpush1.bf16.msra.mxu0 %v9733_v50  ;;  %6139 = vmatpush1.bf16.msra.mxu1 %v9734_v51 }
 0x449   :  { %6077 = vmatprep.subr.bf16.mxu0 %v9735_v12  ;;  %6141 = vmatprep.subr.bf16.mxu1 %v9736_v16 }
 0x44c   :  { %6079 = vmatpush1.bf16.msra.mxu0 %v9737_v28  ;;  %6143 = vmatpush1.bf16.msra.mxu1 %v9738_v34 }
 0x44d   :  { %6081 = vmatprep.subr.bf16.mxu0 %v9739_v13  ;;  %6145 = vmatprep.subr.bf16.mxu1 %v9740_v0 }
 0x450   :  { %6083 = vmatpush1.bf16.msra.mxu0 %v9741_v39  ;;  %6147 = vmatpush1.bf16.msra.mxu1 %v9742_v45 }
 0x451   :  { %6085 = vmatprep.subr.bf16.mxu0 %v9743_v1  ;;  %6149 = vmatprep.subr.bf16.mxu1 %v9744_v20 }
 0x454   :  { %6087 = vmatpush1.bf16.msra.mxu0 %v9745_v3  ;;  %6151 = vmatpush1.bf16.msra.mxu1 %v9746_v38  ;;  %v1817_v38 = vld [vmem:[#allocation3 + $0x1] sm:$0x1] }
 0x455   :  { %6089 = vmatprep.subr.bf16.mxu0 %v9747_v43  ;;  %6153 = vmatprep.subr.bf16.mxu1 %v9748_v49 }
 0x458   :  { %6091 = vmatpush1.bf16.msra.mxu0 %v9749_v4  ;;  %6155 = vmatpush1.bf16.msra.mxu1 %v9750_v35 }
 0x459   :  { %6093 = vmatprep.subr.bf16.mxu0 %v9751_v48  ;;  %6157 = vmatprep.subr.bf16.mxu1 %v9752_v6 }
 0x45c   :  { %6095 = vmatpush1.bf16.msra.mxu0 %v9753_v60  ;;  %6159 = vmatpush1.bf16.msra.mxu1 %v9754_v8 }
 0x45d   :  { %6097 = vmatprep.subr.bf16.mxu0 %v9755_v21  ;;  %6161 = vmatprep.subr.bf16.mxu1 %v9756_v52 }
 0x460   :  { %6099 = vmatpush1.bf16.msra.mxu0 %v9757_v59  ;;  %6163 = vmatpush1.bf16.msra.mxu1 %v9758_v26 }
 0x461   :  { %6101 = vmatprep.subr.bf16.mxu0 %v9759_v27  ;;  %6165 = vmatprep.subr.bf16.mxu1 %v9760_v2  ;;  %v2140_v2 = vld [vmem:[#allocation5 + $0x3] ss:$8 sm:$0xf] }
 0x464   :  { %6103 = vmatpush1.bf16.msra.mxu0 %v9761_v55  ;;  %6167 = vmatpush1.bf16.msra.mxu1 %v9762_v17 }
 0x465   :  { %6105 = vmatprep.subr.bf16.mxu0 %v9763_v61  ;;  %6169 = vmatprep.subr.bf16.mxu1 %v9764_v10 }
 0x468   :  { %6107 = vmatpush1.bf16.msra.mxu0 %v9765_v63  ;;  %6171 = vmatpush1.bf16.msra.mxu1 %v9766_v56 }
 0x469   :  { %6109 = vmatprep.subr.bf16.mxu0 %v8300_v54  ;;  %6173 = vmatprep.subr.bf16.mxu1 %v9767_v18  ;;  %v9772_v54 = vld [vmem:[#allocation79_spill] sm:$0xff] }
 0x46c   :  { %6111 = vmatpush1.bf16.msra.mxu0 %v8306_v23  ;;  %6175 = vmatpush1.bf16.msra.mxu1 %v8310_v42  ;;  %v2740_v23 = vld [vmem:[#allocation12 + $0x28] sm:$0xff] }
 0x46d   :  { %6113 = vmatprep.subr.bf16.mxu0 %v8312_v62  ;;  %6177 = vmatprep.subr.bf16.mxu1 %v8315_v25  ;;  %v8447_v42 = vpack.c.bf16 %v2740_v23, %v2736_v44  ;;  %v2742_v62 = vld [vmem:[#allocation12 + $0x38] sm:$0xff]  ;;  %v9773_v25 = vld [vmem:[#allocation78_spill] sm:$0xff] }
 0x46e   :  { %v8449_v41 = vpack.c.bf16 %v2742_v62, %v2738_v36 }
 0x470   :  { %6115 = vmatpush1.bf16.msra.mxu0 %v8318_v37  ;;  %6179 = vmatpush1.bf16.msra.mxu1 %v9768_v53  ;;  %v1946_v37 = vld [vmem:[%s9327_s7] sm:$0xf] }
 0x471   :  { %6117 = vmatprep.subr.bf16.mxu0 %v9769_v24  ;;  %6181 = vmatprep.subr.bf16.mxu1 %v9770_v15  ;;  %v1951_v58 = vrot.slane %v1946_v37, %v9773_v25  ;;  %v1955_v30 = vrot.slane %v1946_v37, %v9774_v5  ;;  %v1963_v14 = vrot.slane %v1946_v37, %v9665_v11 }
 0x472   :  { %v1959_v51 = vrot.slane %v1946_v37, %v9666_v22 }
 0x474   :  { %6119 = vmatpush1.bf16.msra.mxu0 %v9771_v7  ;;  %6183 = vmatpush1.bf16.msra.mxu1 %v9772_v54 }
 0x475   :  { %6185 = vmatprep.subr.bf16.mxu0 %v8447_v42  ;;  %6217 = vmatprep.subr.bf16.mxu1 %v8449_v41 }
 0x4ea   :  { %v2034_v31 = vpop.f32.mrb[12].mxu0  ;;  %v2105_v46 = vpop.f32.mrb[12].mxu1 }
 0x4eb   :  { %v2035_v57 = vadd.f32 %v2034_v31, %v1951_v58  ;;  %v2036_v9 = vpop.f32.mrb[13].mxu0  ;;  %v2107_v40 = vpop.f32.mrb[13].mxu1  ;;  %v2106_v16 = vadd.f32 %v2105_v46, %v1959_v51  ;;  %v2138_v31 = vld [vmem:[#allocation3] sm:$0x1] }
 0x4ec   :  { %v2037_v33 = vadd.f32 %v2036_v9, %v1955_v30  ;;  %v2108_v50 = vadd.f32 %v2107_v40, %v1963_v14  ;;  %v2741_v14 = vld [vmem:[#allocation12 + $0x30] sm:$0xff]  ;;  %v2748_v51 = vld [vmem:[#allocation12 + $0x68] sm:$0xff] }
 0x4ed   :  { %v5266_v19 = vmul.f32 -1.442695, %v2035_v57 }
 0x4ee   :  { %v5267_v47 = vmul.f32 -1.442695, %v2037_v33  ;;  %v5268_v12 = vmul.f32 -1.442695, %v2108_v50  ;;  %v2735_v33 = vld [vmem:[#allocation12] sm:$0xff]  ;;  %v2744_v50 = vld [vmem:[#allocation12 + $0x48] sm:$0xff] }
 0x4ef   :  { %7073 = vpow2.f32 %v5266_v19  ;;  %v2739_v19 = vld [vmem:[#allocation12 + $0x20] sm:$0xff] }
 0x4f0   :  { %7075 = vpow2.f32 %v5267_v47  ;;  %v2737_v47 = vld [vmem:[#allocation12 + $0x10] sm:$0xff] }
 0x4f1   :  { %7077 = vpow2.f32 %v5268_v12  ;;  %v2746_v12 = vld [vmem:[#allocation12 + $0x58] sm:$0xff] }
 0x4f2   :  { %7079 = vtanh.f32 %v2106_v16  ;;  %v2750_v16 = vld [vmem:[#allocation12 + $0x78] sm:$0xff] }
 0x4f9   :  { %v7074_v28 = vpop.eup %7073 }
 0x4fa   :  { %v7076_v34 = vpop.eup %7075  ;;  %v2113_v13 = vadd.f32 1.0, %v7074_v28 }
 0x4fb   :  { %v2119_v0 = vadd.f32 1.0, %v7076_v34  ;;  %v7078_v39 = vpop.eup %7077 }
 0x4fc   :  { %7081 = vrcp.f32 %v2113_v13  ;;  %v7080_v45 = vpop.eup %7079  ;;  %v2126_v43 = vadd.f32 1.0, %v7078_v39  ;;  %v8463_v13 = vpack.c.bf16 %v2739_v19, %v2735_v33  ;;  %v2743_v39 = vld [vmem:[#allocation12 + $0x40] sm:$0xff]  ;;  %v2780_v33 = vld [vmem:[#allocation12 + $0x168] sm:$0xff]  ;;  %v2778_v19 = vld [vmem:[#allocation12 + $0x158] sm:$0xff] }
 0x4fd   :  { %7083 = vrcp.f32 %v2119_v0  ;;  %v8465_v0 = vpack.c.bf16 %v2741_v14, %v2737_v47  ;;  %v2782_v47 = vld [vmem:[#allocation12 + $0x178] sm:$0xff] }
 0x4fe   :  { %7085 = vrcp.f32 %v2126_v43  ;;  %v2749_v43 = vld [vmem:[#allocation12 + $0x70] sm:$0xff] }
 0x506   :  { %v7082_v1 = vpop.eup %7081 }
 0x507   :  { %v7084_v20 = vpop.eup %7083  ;;  %v2130_v3 = vmul.f32 %v7082_v1, %v7080_v45  ;;  %v2747_v45 = vld [vmem:[#allocation12 + $0x60] sm:$0xff] }
 0x508   :  { %v2129_v49 = vmul.f32 %v7084_v20, %v1817_v38  ;;  %v7086_v17 = vpop.eup %7085  ;;  %v8467_v20 = vpack.c.bf16 %v2748_v51, %v2744_v50  ;;  %v2745_v38 = vld [vmem:[#allocation12 + $0x50] sm:$0xff]  ;;  %v2775_v51 = vld [vmem:[#allocation12 + $0x140] sm:$0xff] }
 0x50a   :  { %v2131_v4 = vadd.f32 %v2130_v3, %v2129_v49  ;;  %v2271_v35 = vpop.f32.mrb[14].mxu0  ;;  %v2342_v48 = vpop.f32.mrb[14].mxu1  ;;  %v8469_v3 = vpack.c.bf16 %v2750_v16, %v2746_v12  ;;  %v2752_v49 = vld [vmem:[#allocation12 + $0x88] sm:$0xff]  ;;  %v2779_v12 = vld [vmem:[#allocation12 + $0x160] sm:$0xff] }
 0x50b   :  { %v2273_v6 = vpop.f32.mrb[15].mxu0  ;;  %v2344_v60 = vpop.f32.mrb[15].mxu1 }
 0x50c   :  { %7087 = vtanh.f32 %v2131_v4  ;;  %2135 = vst [vmem:[#allocation3 + $0x1] sm:$0x1] %v2131_v4  ;;  %v2351_v8 = vcombine.low %v2271_v35, %v2273_v6  ;;  %v2352_v21 = vcombine.low %v2342_v48, %v2344_v60  ;;  %v2756_v4 = vld [vmem:[#allocation12 + $0xa8] sm:$0xff]  ;;  %v2754_v35 = vld [vmem:[#allocation12 + $0x98] sm:$0xff]  ;;  %v8473_v6 = vpack.c.bf16 %v2747_v45, %v2743_v39  ;;  %v2781_v39 = vld [vmem:[#allocation12 + $0x170] sm:$0xff] }
 0x50d   :  { %v2758_v48 = vld [vmem:[#allocation12 + $0xb8] sm:$0xff]  ;;  %v8475_v60 = vpack.c.bf16 %v2749_v43, %v2745_v38  ;;  %v2784_v45 = vld [vmem:[#allocation12 + $0x188] sm:$0xff] }
 0x50e   :  { %v2359_v52 = vrot.slane %v2351_v8, %v7936_v29  ;;  %v2366_v59 = vrot.slane %v2352_v21, %v7936_v29  ;;  %v2751_v8 = vld [vmem:[#allocation12 + $0x80] sm:$0xff]  ;;  %v2786_v38 = vld [vmem:[#allocation12 + $0x198] sm:$0xff] }
 0x50f   :  { %v2755_v21 = vld [vmem:[#allocation12 + $0xa0] sm:$0xff]  ;;  %v2790_v43 = vld [vmem:[#allocation12 + $0x1b8] sm:$0xff] }
 0x510   :  { %v2367_v26 = vcombine.low %v2359_v52, %v2366_v59  ;;  %v8479_v52 = vpack.c.bf16 %v2756_v4, %v2752_v49  ;;  %v8481_v59 = vpack.c.bf16 %v2758_v48, %v2754_v35  ;;  %v8523_v49 = vpack.c.bf16 %v2779_v12, %v2775_v51  ;;  %v2783_v35 = vld [vmem:[#allocation12 + $0x180] sm:$0xff] }
 0x511   :  { %v2787_v48 = vld [vmem:[#allocation12 + $0x1a0] sm:$0xff] }
 0x512   :  { %v2374_v27 = vrot.slane %v2367_v26, %v7936_v29  ;;  %v2753_v26 = vld [vmem:[#allocation12 + $0x90] sm:$0xff]  ;;  %v3006_v51 = vld [vmem:[#allocation14] sm:$0xff] }
 0x513   :  { %v3010_v12 = vld [vmem:[#allocation14 + $0x20] sm:$0xff] }
 0x514   :  { %v2376_v55 = vadd.f32 %v2374_v27, %v2140_v2  ;;  %v2757_v27 = vld [vmem:[#allocation12 + $0xb0] sm:$0xff]  ;;  %v2760_v2 = vld [vmem:[#allocation12 + $0xc8] sm:$0xff] }
 0x516   :  { %v7088_v61 = vpop.eup %7087  ;;  %v5269_v10 = vmul.f32 -1.442695, %v2376_v55  ;;  %v2384_v63 = vrot.slane %v2376_v55, 1  ;;  %v2395_v53 = vrot.slane %v2376_v55, 3  ;;  %v2392_v54 = vrot.slane %v2376_v55, 2  ;;  %v2764_v55 = vld [vmem:[#allocation12 + $0xe8] sm:$0xff] }
 0x517   :  { %v2133_v56 = vmul.f32 %v7088_v61, %v7086_v17  ;;  %v2762_v17 = vld [vmem:[#allocation12 + $0xd8] sm:$0xff] }
 0x518   :  { %7089 = vpow2.f32 %v5269_v10  ;;  %v5270_v18 = vmul.f32 -1.442695, %v2384_v63  ;;  %v5271_v24 = vmul.f32 -1.442695, %v2395_v53  ;;  %v2766_v61 = vld [vmem:[#allocation12 + $0xf8] sm:$0xff]  ;;  %v8487_v10 = vpack.c.bf16 %v2755_v21, %v2751_v8 }
 0x519   :  { %2134 = vst [vmem:[#allocation2 + $0x1] sm:$0x1] %v2133_v56  ;;  %2136 = vst [vmem:[#allocation4 + $0x2] sm:$0x1] %v2133_v56  ;;  %v8489_v63 = vpack.c.bf16 %v2757_v27, %v2753_v26  ;;  %v2759_v56 = vld [vmem:[#allocation12 + $0xc0] sm:$0xff]  ;;  %v8493_v53 = vpack.c.bf16 %v2764_v55, %v2760_v2  ;;  %v8531_v21 = vpack.c.bf16 %v2790_v43, %v2786_v38  ;;  %v2785_v26 = vld [vmem:[#allocation12 + $0x190] sm:$0xff] }
 0x51a   :  { %7091 = vpow2.f32 %v5270_v18  ;;  %v2763_v18 = vld [vmem:[#allocation12 + $0xe0] sm:$0xff]  ;;  %v2789_v27 = vld [vmem:[#allocation12 + $0x1b0] sm:$0xff]  ;;  %v2792_v2 = vld [vmem:[#allocation12 + $0x1c8] sm:$0xff] }
 0x51b   :  { %7093 = vpow2.f32 %v5271_v24  ;;  %v8495_v24 = vpack.c.bf16 %v2766_v61, %v2762_v17  ;;  %v2796_v55 = vld [vmem:[#allocation12 + $0x1e8] sm:$0xff]  ;;  %v2794_v17 = vld [vmem:[#allocation12 + $0x1d8] sm:$0xff] }
 0x51c   :  { %v2798_v61 = vld [vmem:[#allocation12 + $0x1f8] sm:$0xff]  ;;  %v3015_v43 = vld [vmem:[#allocation14 + $0x48] sm:$0xff] }
 0x520   :  { %v2410_v15 = vld [vmem:[#allocation2 + $0x1] sm:$0x1] }
 0x521   :  { %2626 = vmatprep.mubr.f32.mxu0 %v2410_v15  ;;  %2697 = vmatprep.mubr.f32.mxu1 %v2410_v15  ;;  %v2761_v15 = vld [vmem:[#allocation12 + $0xd0] sm:$0xff] }
 0x522   :  { %v7090_v7 = vpop.eup %7089 }
 0x523   :  { %v2380_v44 = vadd.f32 1.0, %v7090_v7  ;;  %v2765_v7 = vld [vmem:[#allocation12 + $0xf0] sm:$0xff] }
 0x524   :  { %v7092_v23 = vpop.eup %7091 }
 0x525   :  { %7095 = vrcp.f32 %v2380_v44  ;;  %v2389_v36 = vadd.f32 1.0, %v7092_v23  ;;  %v7094_v62 = vpop.eup %7093  ;;  %v2772_v44 = vld [vmem:[#allocation12 + $0x128] sm:$0xff]  ;;  %v2770_v23 = vld [vmem:[#allocation12 + $0x118] sm:$0xff] }
 0x526   :  { %7097 = vtanh.f32 %v2392_v54  ;;  %v2400_v46 = vadd.f32 1.0, %v7094_v62  ;;  %v2768_v54 = vld [vmem:[#allocation12 + $0x108] sm:$0xff]  ;;  %v8499_v62 = vpack.c.bf16 %v2763_v18, %v2759_v56  ;;  %v8535_v56 = vpack.c.bf16 %v2787_v48, %v2783_v35  ;;  %v3017_v48 = vld [vmem:[#allocation14 + $0x58] sm:$0xff] }
 0x527   :  { %7099 = vrcp.f32 %v2389_v36  ;;  %v2774_v36 = vld [vmem:[#allocation12 + $0x138] sm:$0xff]  ;;  %v8537_v18 = vpack.c.bf16 %v2789_v27, %v2785_v26  ;;  %v3019_v35 = vld [vmem:[#allocation14 + $0x68] sm:$0xff] }
 0x528   :  { %7101 = vrcp.f32 %v2400_v46  ;;  %v8507_v46 = vpack.c.bf16 %v2774_v36, %v2770_v23  ;;  %v2793_v23 = vld [vmem:[#allocation12 + $0x1d0] sm:$0xff]  ;;  %v8567_v26 = vpack.c.bf16 %v3019_v35, %v3015_v43  ;;  %v3021_v27 = vld [vmem:[#allocation14 + $0x78] sm:$0xff] }
 0x529   :  { %v2797_v36 = vld [vmem:[#allocation12 + $0x1f0] sm:$0xff] }
 0x52a   :  { %v3028_v43 = vld [vmem:[#allocation14 + $0xb0] sm:$0xff] }
 0x52f   :  { %v7096_v37 = vpop.eup %7095 }
 0x530   :  { %v7098_v58 = vpop.eup %7097 }
 0x531   :  { %v7100_v30 = vpop.eup %7099  ;;  %v2404_v9 = vmul.f32 %v7098_v58, %v7096_v37  ;;  %v8501_v37 = vpack.c.bf16 %v2765_v7, %v2761_v15  ;;  %v2767_v58 = vld [vmem:[#allocation12 + $0x100] sm:$0xff]  ;;  %v8541_v7 = vpack.c.bf16 %v2796_v55, %v2792_v2 }
 0x532   :  { %v2403_v57 = vmul.f32 %v7100_v30, %v2138_v31  ;;  %v7102_v28 = vpop.eup %7101  ;;  %v2771_v30 = vld [vmem:[#allocation12 + $0x120] sm:$0xff]  ;;  %v8505_v31 = vpack.c.bf16 %v2772_v44, %v2768_v54  ;;  %v8543_v54 = vpack.c.bf16 %v2798_v61, %v2794_v17  ;;  %v8569_v17 = vpack.c.bf16 %v3021_v27, %v3017_v48  ;;  %v3031_v48 = vld [vmem:[#allocation14 + $0xc8] sm:$0xff] }
 0x533   :  { %v8511_v14 = vpack.c.bf16 %v2771_v30, %v2767_v58  ;;  %v2791_v15 = vld [vmem:[#allocation12 + $0x1c0] sm:$0xff]  ;;  %v8549_v30 = vpack.c.bf16 %v2797_v36, %v2793_v23  ;;  %v3023_v36 = vld [vmem:[#allocation14 + $0x88] sm:$0xff] }
 0x534   :  { %v2405_v40 = vadd.f32 %v2404_v9, %v2403_v57  ;;  %v2769_v57 = vld [vmem:[#allocation12 + $0x110] sm:$0xff]  ;;  %v2795_v44 = vld [vmem:[#allocation12 + $0x1e0] sm:$0xff]  ;;  %9775 = vst [vmem:[#allocation27_spill] sm:$0xff] %v8569_v17  ;;  %v3035_v27 = vld [vmem:[#allocation14 + $0xe8] sm:$0xff] }
 0x535   :  { %v2773_v9 = vld [vmem:[#allocation12 + $0x130] sm:$0xff]  ;;  %v8547_v58 = vpack.c.bf16 %v2795_v44, %v2791_v15  ;;  %v3014_v2 = vld [vmem:[#allocation14 + $0x40] sm:$0xff] }
 0x536   :  { %7103 = vtanh.f32 %v2405_v40  ;;  %2409 = vst [vmem:[#allocation3] sm:$0x1] %v2405_v40  ;;  %v2776_v40 = vld [vmem:[#allocation12 + $0x148] sm:$0xff]  ;;  %v8513_v50 = vpack.c.bf16 %v2773_v9, %v2769_v57  ;;  %v3018_v55 = vld [vmem:[#allocation14 + $0x60] sm:$0xff]  ;;  %v3016_v15 = vld [vmem:[#allocation14 + $0x50] sm:$0xff] }
 0x537   :  { %v8517_v16 = vpack.c.bf16 %v2780_v33, %v2776_v40  ;;  %v3007_v9 = vld [vmem:[#allocation14 + $0x8] sm:$0xff]  ;;  %v3009_v33 = vld [vmem:[#allocation14 + $0x18] sm:$0xff]  ;;  %v8571_v61 = vpack.c.bf16 %v3018_v55, %v3014_v2  ;;  %v3020_v44 = vld [vmem:[#allocation14 + $0x70] sm:$0xff]  ;;  %v8591_v55 = vpack.c.bf16 %v3035_v27, %v3031_v48 }
 0x538   :  { %v3011_v40 = vld [vmem:[#allocation14 + $0x28] sm:$0xff]  ;;  %v8574_v23 = vpack.c.bf16 %v3020_v44, %v3016_v15  ;;  %v3033_v2 = vld [vmem:[#allocation14 + $0xd8] sm:$0xff]  ;;  %v3030_v44 = vld [vmem:[#allocation14 + $0xc0] sm:$0xff] }
 0x539   :  { %9776 = vst [vmem:[#allocation28_spill] sm:$0xff] %v8571_v61  ;;  %9782 = vst [vmem:[#allocation34_spill] sm:$0xff] %v8591_v55  ;;  %v3037_v15 = vld [vmem:[#allocation14 + $0xf8] sm:$0xff] }
 0x53a   :  { %9777 = vst [vmem:[#allocation29_spill] sm:$0xff] %v8574_v23  ;;  %v3041_v48 = vld [vmem:[#allocation14 + $0x118] sm:$0xff] }
 0x540   :  { %v7104_v34 = vpop.eup %7103 }
 0x541   :  { %v2407_v1 = vmul.f32 %v7104_v34, %v7102_v28  ;;  %v8519_v28 = vpack.c.bf16 %v2782_v47, %v2778_v19  ;;  %v2777_v34 = vld [vmem:[#allocation12 + $0x150] sm:$0xff]  ;;  %v8555_v19 = vpack.c.bf16 %v3011_v40, %v3007_v9  ;;  %v3013_v47 = vld [vmem:[#allocation14 + $0x38] sm:$0xff] }
 0x542   :  { %v8525_v4 = vpack.c.bf16 %v2781_v39, %v2777_v34  ;;  %v8557_v34 = vpack.c.bf16 %v3013_v47, %v3009_v33  ;;  %v8559_v39 = vpack.c.bf16 %v3010_v12, %v3006_v51  ;;  %v3025_v9 = vld [vmem:[#allocation14 + $0x98] sm:$0xff]  ;;  %v3022_v51 = vld [vmem:[#allocation14 + $0x80] sm:$0xff] }
 0x543   :  { %2408 = vst [vmem:[#allocation2] sm:$0x1] %v2407_v1  ;;  %2627 = vmatmul.mubr.f32.vlgmr.msra.gmra.mrb[16].mxu0 %v2407_v1  ;;  %2698 = vmatmul.mubr.f32.vlgmr.msra.gmra.mrb[16].mxu1 %v2407_v1  ;;  %v2788_v1 = vld [vmem:[#allocation12 + $0x1a8] sm:$0xff]  ;;  %v3029_v33 = vld [vmem:[#allocation14 + $0xb8] sm:$0xff]  ;;  %v3026_v12 = vld [vmem:[#allocation14 + $0xa0] sm:$0xff] }
 0x544   :  { %6187 = vmatpush1.bf16.msra.mxu0 %v8463_v13  ;;  %6219 = vmatpush1.bf16.msra.mxu1 %v8465_v0  ;;  %v8529_v8 = vpack.c.bf16 %v2788_v1, %v2784_v45  ;;  %v3008_v45 = vld [vmem:[#allocation14 + $0x10] sm:$0xff]  ;;  %v8581_v47 = vpack.c.bf16 %v3029_v33, %v3025_v9 }
 0x545   :  { %6189 = vmatprep.subr.bf16.mxu0 %v8467_v20  ;;  %6221 = vmatprep.subr.bf16.mxu1 %v8469_v3  ;;  %v3012_v1 = vld [vmem:[#allocation14 + $0x30] sm:$0xff] }
 0x546   :  { %2863 = vmatprep.mubr.f32.mxu0 %v7945_v32  ;;  %2934 = vmatprep.mubr.f32.mxu1 %v7945_v32  ;;  %v8562_v38 = vpack.c.bf16 %v3012_v1, %v3008_v45  ;;  %9779 = vst [vmem:[#allocation31_spill] sm:$0xff] %v8581_v47  ;;  %v3024_v45 = vld [vmem:[#allocation14 + $0x90] sm:$0xff]  ;;  %v8584_v1 = vpack.c.bf16 %v3026_v12, %v3022_v51 }
 0x547   :  { %v8587_v35 = vpack.c.bf16 %v3028_v43, %v3024_v45  ;;  %v3032_v33 = vld [vmem:[#allocation14 + $0xd0] sm:$0xff]  ;;  %v3039_v45 = vld [vmem:[#allocation14 + $0x108] sm:$0xff] }
 0x548   :  { %6191 = vmatpush1.bf16.msra.mxu0 %v8473_v6  ;;  %6223 = vmatpush1.bf16.msra.mxu1 %v8475_v60  ;;  %9780 = vst [vmem:[#allocation32_spill] sm:$0xff] %v8584_v1  ;;  %v3036_v51 = vld [vmem:[#allocation14 + $0xf0] sm:$0xff]  ;;  %v3043_v43 = vld [vmem:[#allocation14 + $0x128] sm:$0xff] }
 0x549   :  { %6193 = vmatprep.subr.bf16.mxu0 %v8479_v52  ;;  %6225 = vmatprep.subr.bf16.mxu1 %v8481_v59  ;;  %9781 = vst [vmem:[#allocation33_spill] sm:$0xff] %v8587_v35  ;;  %v8598_v12 = vpack.c.bf16 %v3036_v51, %v3032_v33  ;;  %v8603_v27 = vpack.c.bf16 %v3043_v43, %v3039_v45  ;;  %v3040_v33 = vld [vmem:[#allocation14 + $0x110] sm:$0xff]  ;;  %v3051_v45 = vld [vmem:[#allocation14 + $0x168] sm:$0xff]  ;;  %v3049_v43 = vld [vmem:[#allocation14 + $0x158] sm:$0xff] }
 0x54a   :  { %v2731_v57 = vld [vmem:[#allocation2] sm:$0x1]  ;;  %v3044_v51 = vld [vmem:[#allocation14 + $0x130] sm:$0xff] }
 0x54b   :  { %9785 = vst [vmem:[#allocation37_spill] sm:$0xff] %v8598_v12  ;;  %9786 = vst [vmem:[#allocation38_spill] sm:$0xff] %v8603_v27 }
 0x54c   :  { %6195 = vmatpush1.bf16.msra.mxu0 %v8487_v10  ;;  %6227 = vmatpush1.bf16.msra.mxu1 %v8489_v63 }
 0x54d   :  { %6197 = vmatprep.subr.bf16.mxu0 %v8493_v53  ;;  %6229 = vmatprep.subr.bf16.mxu1 %v8495_v24 }
 0x550   :  { %6199 = vmatpush1.bf16.msra.mxu0 %v8499_v62  ;;  %6231 = vmatpush1.bf16.msra.mxu1 %v8501_v37 }
 0x551   :  { %6201 = vmatprep.subr.bf16.mxu0 %v8505_v31  ;;  %6233 = vmatprep.subr.bf16.mxu1 %v8507_v46 }
 0x554   :  { %6203 = vmatpush1.bf16.msra.mxu0 %v8511_v14  ;;  %6235 = vmatpush1.bf16.msra.mxu1 %v8513_v50 }
 0x555   :  { %6205 = vmatprep.subr.bf16.mxu0 %v8517_v16  ;;  %6237 = vmatprep.subr.bf16.mxu1 %v8519_v28 }
 0x558   :  { %6207 = vmatpush1.bf16.msra.mxu0 %v8523_v49  ;;  %6239 = vmatpush1.bf16.msra.mxu1 %v8525_v4 }
 0x559   :  { %6209 = vmatprep.subr.bf16.mxu0 %v8529_v8  ;;  %6241 = vmatprep.subr.bf16.mxu1 %v8531_v21 }
 0x55c   :  { %6211 = vmatpush1.bf16.msra.mxu0 %v8535_v56  ;;  %6243 = vmatpush1.bf16.msra.mxu1 %v8537_v18 }
 0x55d   :  { %6213 = vmatprep.subr.bf16.mxu0 %v8541_v7  ;;  %6245 = vmatprep.subr.bf16.mxu1 %v8543_v54 }
 0x560   :  { %6215 = vmatpush1.bf16.msra.mxu0 %v8547_v58  ;;  %6247 = vmatpush1.bf16.msra.mxu1 %v8549_v30 }
 0x561   :  { %6249 = vmatprep.subr.bf16.mxu0 %v8555_v19  ;;  %6313 = vmatprep.subr.bf16.mxu1 %v8557_v34 }
 0x563   :  { %2864 = vmatmul.mubr.f32.vlgmr.msra.gmra.mrb[18].mxu0 %v2731_v57  ;;  %2935 = vmatmul.mubr.f32.vlgmr.msra.gmra.mrb[18].mxu1 %v2731_v57  ;;  %v3027_v57 = vld [vmem:[#allocation14 + $0xa8] sm:$0xff] }
 0x564   :  { %6251 = vmatpush1.bf16.msra.mxu0 %v8559_v39  ;;  %6315 = vmatpush1.bf16.msra.mxu1 %v8562_v38  ;;  %v8579_v40 = vpack.c.bf16 %v3027_v57, %v3023_v36  ;;  %v3034_v36 = vld [vmem:[#allocation14 + $0xe0] sm:$0xff]  ;;  %v8593_v57 = vpack.c.bf16 %v3037_v15, %v3033_v2  ;;  %v3045_v2 = vld [vmem:[#allocation14 + $0x138] sm:$0xff] }
 0x565   :  { %6253 = vmatprep.subr.bf16.mxu0 %v8567_v26  ;;  %6317 = vmatprep.subr.bf16.mxu1 %v8569_v17  ;;  %v8595_v9 = vpack.c.bf16 %v3034_v36, %v3030_v44  ;;  %v3038_v15 = vld [vmem:[#allocation14 + $0x100] sm:$0xff]  ;;  %v8605_v36 = vpack.c.bf16 %v3045_v2, %v3041_v48  ;;  %v3053_v48 = vld [vmem:[#allocation14 + $0x178] sm:$0xff] }
 0x566   :  { %9778 = vst [vmem:[#allocation30_spill] sm:$0xff] %v8579_v40  ;;  %9783 = vst [vmem:[#allocation35_spill] sm:$0xff] %v8593_v57  ;;  %v3042_v44 = vld [vmem:[#allocation14 + $0x120] sm:$0xff]  ;;  %v3125_v17 = vld [vmem:[#allocation14 + $0x3b8] sm:$0xff] }
 0x567   :  { %9784 = vst [vmem:[#allocation36_spill] sm:$0xff] %v8595_v9  ;;  %9787 = vst [vmem:[#allocation39_spill] sm:$0xff] %v8605_v36  ;;  %v3046_v2 = vld [vmem:[#allocation14 + $0x140] sm:$0xff] }
 0x568   :  { %6255 = vmatpush1.bf16.msra.mxu0 %v8571_v61  ;;  %6319 = vmatpush1.bf16.msra.mxu1 %v8574_v23  ;;  %v3115_v23 = vld [vmem:[#allocation14 + $0x368] sm:$0xff]  ;;  %v3113_v61 = vld [vmem:[#allocation14 + $0x358] sm:$0xff] }
 0x569   :  { %6257 = vmatprep.subr.bf16.mxu0 %v8579_v40  ;;  %6321 = vmatprep.subr.bf16.mxu1 %v8581_v47  ;;  %v3111_v40 = vld [vmem:[#allocation14 + $0x348] sm:$0xff] }
 0x56c   :  { %6259 = vmatpush1.bf16.msra.mxu0 %v8584_v1  ;;  %6323 = vmatpush1.bf16.msra.mxu1 %v8587_v35  ;;  %v8607_v35 = vpack.c.bf16 %v3042_v44, %v3038_v15  ;;  %v3050_v15 = vld [vmem:[#allocation14 + $0x160] sm:$0xff]  ;;  %v8617_v44 = vpack.c.bf16 %v3053_v48, %v3049_v43  ;;  %v3061_v43 = vld [vmem:[#allocation14 + $0x1b8] sm:$0xff] }
 0x56d   :  { %6261 = vmatprep.subr.bf16.mxu0 %v8591_v55  ;;  %6325 = vmatprep.subr.bf16.mxu1 %v8593_v57  ;;  %v8610_v57 = vpack.c.bf16 %v3044_v51, %v3040_v33  ;;  %v8619_v55 = vpack.c.bf16 %v3050_v15, %v3046_v2  ;;  %v3048_v33 = vld [vmem:[#allocation14 + $0x150] sm:$0xff]  ;;  %v3054_v48 = vld [vmem:[#allocation14 + $0x180] sm:$0xff]  ;;  %v3089_v1 = vld [vmem:[#allocation14 + $0x298] sm:$0xff] }
 0x56e   :  { %9788 = vst [vmem:[#allocation40_spill] sm:$0xff] %v8607_v35  ;;  %9791 = vst [vmem:[#allocation43_spill] sm:$0xff] %v8617_v44  ;;  %v3052_v51 = vld [vmem:[#allocation14 + $0x170] sm:$0xff]  ;;  %v3058_v2 = vld [vmem:[#allocation14 + $0x1a0] sm:$0xff] }
 0x56f   :  { %9789 = vst [vmem:[#allocation41_spill] sm:$0xff] %v8610_v57  ;;  %9792 = vst [vmem:[#allocation44_spill] sm:$0xff] %v8619_v55 }
 0x570   :  { %6263 = vmatpush1.bf16.msra.mxu0 %v8595_v9  ;;  %6327 = vmatpush1.bf16.msra.mxu1 %v8598_v12  ;;  %v3047_v12 = vld [vmem:[#allocation14 + $0x148] sm:$0xff] }
 0x571   :  { %6265 = vmatprep.subr.bf16.mxu0 %v8603_v27  ;;  %6329 = vmatprep.subr.bf16.mxu1 %v8605_v36  ;;  %v8615_v9 = vpack.c.bf16 %v3051_v45, %v3047_v12  ;;  %v8622_v36 = vpack.c.bf16 %v3052_v51, %v3048_v33  ;;  %v3059_v12 = vld [vmem:[#allocation14 + $0x1a8] sm:$0xff]  ;;  %v3057_v45 = vld [vmem:[#allocation14 + $0x198] sm:$0xff]  ;;  %v8631_v27 = vpack.c.bf16 %v3058_v2, %v3054_v48  ;;  %v3056_v33 = vld [vmem:[#allocation14 + $0x190] sm:$0xff] }
 0x572   :  { %v8629_v15 = vpack.c.bf16 %v3061_v43, %v3057_v45  ;;  %v3060_v51 = vld [vmem:[#allocation14 + $0x1b0] sm:$0xff]  ;;  %v3069_v45 = vld [vmem:[#allocation14 + $0x1f8] sm:$0xff]  ;;  %v3062_v43 = vld [vmem:[#allocation14 + $0x1c0] sm:$0xff] }
 0x573   :  { %9790 = vst [vmem:[#allocation42_spill] sm:$0xff] %v8615_v9  ;;  %9793 = vst [vmem:[#allocation45_spill] sm:$0xff] %v8622_v36  ;;  %v3066_v48 = vld [vmem:[#allocation14 + $0x1e0] sm:$0xff] }
 0x574   :  { %6267 = vmatpush1.bf16.msra.mxu0 %v8607_v35  ;;  %6331 = vmatpush1.bf16.msra.mxu1 %v8610_v57  ;;  %v3055_v57 = vld [vmem:[#allocation14 + $0x188] sm:$0xff]  ;;  %9795 = vst [vmem:[#allocation47_spill] sm:$0xff] %v8629_v15  ;;  %9796 = vst [vmem:[#allocation48_spill] sm:$0xff] %v8631_v27 }
 0x575   :  { %6269 = vmatprep.subr.bf16.mxu0 %v8615_v9  ;;  %6333 = vmatprep.subr.bf16.mxu1 %v8617_v44  ;;  %v8627_v35 = vpack.c.bf16 %v3059_v12, %v3055_v57  ;;  %v8634_v44 = vpack.c.bf16 %v3060_v51, %v3056_v33  ;;  %v3067_v57 = vld [vmem:[#allocation14 + $0x1e8] sm:$0xff]  ;;  %v3065_v12 = vld [vmem:[#allocation14 + $0x1d8] sm:$0xff]  ;;  %v8643_v9 = vpack.c.bf16 %v3066_v48, %v3062_v43  ;;  %v3064_v33 = vld [vmem:[#allocation14 + $0x1d0] sm:$0xff] }
 0x576   :  { %v8641_v2 = vpack.c.bf16 %v3069_v45, %v3065_v12  ;;  %v3068_v51 = vld [vmem:[#allocation14 + $0x1f0] sm:$0xff]  ;;  %v3077_v12 = vld [vmem:[#allocation14 + $0x238] sm:$0xff]  ;;  %v3070_v45 = vld [vmem:[#allocation14 + $0x200] sm:$0xff] }
 0x577   :  { %9794 = vst [vmem:[#allocation46_spill] sm:$0xff] %v8627_v35  ;;  %9797 = vst [vmem:[#allocation49_spill] sm:$0xff] %v8634_v44  ;;  %v3074_v43 = vld [vmem:[#allocation14 + $0x220] sm:$0xff] }
 0x578   :  { %6271 = vmatpush1.bf16.msra.mxu0 %v8619_v55  ;;  %6335 = vmatpush1.bf16.msra.mxu1 %v8622_v36  ;;  %v3063_v36 = vld [vmem:[#allocation14 + $0x1c8] sm:$0xff]  ;;  %9799 = vst [vmem:[#allocation51_spill] sm:$0xff] %v8641_v2  ;;  %9800 = vst [vmem:[#allocation52_spill] sm:$0xff] %v8643_v9 }
 0x579   :  { %6273 = vmatprep.subr.bf16.mxu0 %v8627_v35  ;;  %6337 = vmatprep.subr.bf16.mxu1 %v8629_v15  ;;  %v8639_v55 = vpack.c.bf16 %v3067_v57, %v3063_v36  ;;  %v8646_v15 = vpack.c.bf16 %v3068_v51, %v3064_v33  ;;  %v3075_v36 = vld [vmem:[#allocation14 + $0x228] sm:$0xff]  ;;  %v3073_v57 = vld [vmem:[#allocation14 + $0x218] sm:$0xff]  ;;  %v8655_v35 = vpack.c.bf16 %v3074_v43, %v3070_v45  ;;  %v3072_v33 = vld [vmem:[#allocation14 + $0x210] sm:$0xff] }
 0x57a   :  { %v8653_v48 = vpack.c.bf16 %v3077_v12, %v3073_v57  ;;  %v3076_v51 = vld [vmem:[#allocation14 + $0x230] sm:$0xff]  ;;  %v3085_v57 = vld [vmem:[#allocation14 + $0x278] sm:$0xff]  ;;  %v3078_v12 = vld [vmem:[#allocation14 + $0x240] sm:$0xff] }
 0x57b   :  { %9798 = vst [vmem:[#allocation50_spill] sm:$0xff] %v8639_v55  ;;  %9801 = vst [vmem:[#allocation53_spill] sm:$0xff] %v8646_v15  ;;  %v3082_v45 = vld [vmem:[#allocation14 + $0x260] sm:$0xff] }
 0x57c   :  { %6275 = vmatpush1.bf16.msra.mxu0 %v8631_v27  ;;  %6339 = vmatpush1.bf16.msra.mxu1 %v8634_v44  ;;  %v3071_v44 = vld [vmem:[#allocation14 + $0x208] sm:$0xff]  ;;  %9803 = vst [vmem:[#allocation55_spill] sm:$0xff] %v8653_v48  ;;  %9804 = vst [vmem:[#allocation56_spill] sm:$0xff] %v8655_v35 }
 0x57d   :  { %6277 = vmatprep.subr.bf16.mxu0 %v8639_v55  ;;  %6341 = vmatprep.subr.bf16.mxu1 %v8641_v2  ;;  %v8651_v27 = vpack.c.bf16 %v3075_v36, %v3071_v44  ;;  %v8658_v2 = vpack.c.bf16 %v3076_v51, %v3072_v33  ;;  %v3083_v44 = vld [vmem:[#allocation14 + $0x268] sm:$0xff]  ;;  %v3081_v36 = vld [vmem:[#allocation14 + $0x258] sm:$0xff]  ;;  %v8667_v55 = vpack.c.bf16 %v3082_v45, %v3078_v12  ;;  %v3080_v33 = vld [vmem:[#allocation14 + $0x250] sm:$0xff] }
 0x57e   :  { %v8665_v43 = vpack.c.bf16 %v3085_v57, %v3081_v36  ;;  %v3084_v51 = vld [vmem:[#allocation14 + $0x270] sm:$0xff]  ;;  %v3086_v36 = vld [vmem:[#allocation14 + $0x280] sm:$0xff] }
 0x57f   :  { %9802 = vst [vmem:[#allocation54_spill] sm:$0xff] %v8651_v27  ;;  %9805 = vst [vmem:[#allocation57_spill] sm:$0xff] %v8658_v2  ;;  %v3090_v57 = vld [vmem:[#allocation14 + $0x2a0] sm:$0xff] }
 0x580   :  { %6279 = vmatpush1.bf16.msra.mxu0 %v8643_v9  ;;  %6343 = vmatpush1.bf16.msra.mxu1 %v8646_v15  ;;  %v3079_v15 = vld [vmem:[#allocation14 + $0x248] sm:$0xff]  ;;  %9807 = vst [vmem:[#allocation59_spill] sm:$0xff] %v8665_v43  ;;  %9808 = vst [vmem:[#allocation60_spill] sm:$0xff] %v8667_v55  ;;  %v8679_v45 = vpack.c.bf16 %v3090_v57, %v3086_v36  ;;  %v3096_v36 = vld [vmem:[#allocation14 + $0x2d0] sm:$0xff] }
 0x581   :  { %6281 = vmatprep.subr.bf16.mxu0 %v8651_v27  ;;  %6345 = vmatprep.subr.bf16.mxu1 %v8653_v48  ;;  %v8663_v9 = vpack.c.bf16 %v3083_v44, %v3079_v15  ;;  %v8670_v48 = vpack.c.bf16 %v3084_v51, %v3080_v33  ;;  %v3091_v27 = vld [vmem:[#allocation14 + $0x2a8] sm:$0xff]  ;;  %v3093_v44 = vld [vmem:[#allocation14 + $0x2b8] sm:$0xff]  ;;  %v3088_v33 = vld [vmem:[#allocation14 + $0x290] sm:$0xff] }
 0x582   :  { %v8677_v12 = vpack.c.bf16 %v3093_v44, %v3089_v1  ;;  %9812 = vst [vmem:[#allocation64_spill] sm:$0xff] %v8679_v45  ;;  %v3092_v51 = vld [vmem:[#allocation14 + $0x2b0] sm:$0xff]  ;;  %v3094_v1 = vld [vmem:[#allocation14 + $0x2c0] sm:$0xff] }
 0x583   :  { %9806 = vst [vmem:[#allocation58_spill] sm:$0xff] %v8663_v9  ;;  %9809 = vst [vmem:[#allocation61_spill] sm:$0xff] %v8670_v48  ;;  %v3098_v44 = vld [vmem:[#allocation14 + $0x2e0] sm:$0xff] }
 0x584   :  { %6283 = vmatpush1.bf16.msra.mxu0 %v8655_v35  ;;  %6347 = vmatpush1.bf16.msra.mxu1 %v8658_v2  ;;  %v3087_v35 = vld [vmem:[#allocation14 + $0x288] sm:$0xff]  ;;  %9811 = vst [vmem:[#allocation63_spill] sm:$0xff] %v8677_v12  ;;  %v8682_v2 = vpack.c.bf16 %v3092_v51, %v3088_v33  ;;  %v8690_v57 = vpack.c.bf16 %v3098_v44, %v3094_v1  ;;  %v3106_v1 = vld [vmem:[#allocation14 + $0x320] sm:$0xff]  ;;  %v3104_v44 = vld [vmem:[#allocation14 + $0x310] sm:$0xff] }
 0x585   :  { %6285 = vmatprep.subr.bf16.mxu0 %v8663_v9  ;;  %6349 = vmatprep.subr.bf16.mxu1 %v8665_v43  ;;  %v8674_v15 = vpack.c.bf16 %v3091_v27, %v3087_v35  ;;  %v3095_v9 = vld [vmem:[#allocation14 + $0x2c8] sm:$0xff]  ;;  %v3101_v35 = vld [vmem:[#allocation14 + $0x2f8] sm:$0xff] }
 0x586   :  { %9813 = vst [vmem:[#allocation65_spill] sm:$0xff] %v8682_v2  ;;  %v3099_v43 = vld [vmem:[#allocation14 + $0x2e8] sm:$0xff]  ;;  %9816 = vst [vmem:[#allocation68_spill] sm:$0xff] %v8690_v57 }
 0x587   :  { %9810 = vst [vmem:[#allocation62_spill] sm:$0xff] %v8674_v15  ;;  %v8685_v27 = vpack.c.bf16 %v3099_v43, %v3095_v9  ;;  %v3107_v33 = vld [vmem:[#allocation14 + $0x328] sm:$0xff]  ;;  %v3109_v43 = vld [vmem:[#allocation14 + $0x338] sm:$0xff] }
 0x588   :  { %6287 = vmatpush1.bf16.msra.mxu0 %v8667_v55  ;;  %6351 = vmatpush1.bf16.msra.mxu1 %v8670_v48  ;;  %v3097_v55 = vld [vmem:[#allocation14 + $0x2d8] sm:$0xff]  ;;  %v3100_v48 = vld [vmem:[#allocation14 + $0x2f0] sm:$0xff] }
 0x589   :  { %6289 = vmatprep.subr.bf16.mxu0 %v8674_v15  ;;  %6353 = vmatprep.subr.bf16.mxu1 %v8677_v12  ;;  %9814 = vst [vmem:[#allocation66_spill] sm:$0xff] %v8685_v27  ;;  %v8687_v47 = vpack.c.bf16 %v3101_v35, %v3097_v55  ;;  %v3103_v15 = vld [vmem:[#allocation14 + $0x308] sm:$0xff]  ;;  %v8694_v51 = vpack.c.bf16 %v3100_v48, %v3096_v36  ;;  %v3105_v55 = vld [vmem:[#allocation14 + $0x318] sm:$0xff]  ;;  %v3102_v35 = vld [vmem:[#allocation14 + $0x300] sm:$0xff] }
 0x58a   :  { %v8696_v9 = vpack.c.bf16 %v3107_v33, %v3103_v15  ;;  %v8699_v12 = vpack.c.bf16 %v3109_v43, %v3105_v55  ;;  %v3117_v48 = vld [vmem:[#allocation14 + $0x378] sm:$0xff]  ;;  %v8708_v36 = vpack.c.bf16 %v3115_v23, %v3111_v40  ;;  %v3110_v33 = vld [vmem:[#allocation14 + $0x340] sm:$0xff]  ;;  %v3112_v43 = vld [vmem:[#allocation14 + $0x350] sm:$0xff] }
 0x58b   :  { %9815 = vst [vmem:[#allocation67_spill] sm:$0xff] %v8687_v47  ;;  %9817 = vst [vmem:[#allocation69_spill] sm:$0xff] %v8694_v51  ;;  %v3114_v55 = vld [vmem:[#allocation14 + $0x360] sm:$0xff] }
 0x58c   :  { %6291 = vmatpush1.bf16.msra.mxu0 %v8679_v45  ;;  %6355 = vmatpush1.bf16.msra.mxu1 %v8682_v2  ;;  %9818 = vst [vmem:[#allocation70_spill] sm:$0xff] %v8696_v9  ;;  %9819 = vst [vmem:[#allocation71_spill] sm:$0xff] %v8699_v12  ;;  %v3108_v45 = vld [vmem:[#allocation14 + $0x330] sm:$0xff] }
 0x58d   :  { %6293 = vmatprep.subr.bf16.mxu0 %v8685_v27  ;;  %6357 = vmatprep.subr.bf16.mxu1 %v8687_v47  ;;  %v8702_v27 = vpack.c.bf16 %v3106_v1, %v3102_v35  ;;  %v8706_v15 = vpack.c.bf16 %v3108_v45, %v3104_v44  ;;  %v8711_v47 = vpack.c.bf16 %v3117_v48, %v3113_v61  ;;  %v3116_v2 = vld [vmem:[#allocation14 + $0x370] sm:$0xff]  ;;  %v3123_v35 = vld [vmem:[#allocation14 + $0x3a8] sm:$0xff]  ;;  %v3121_v1 = vld [vmem:[#allocation14 + $0x398] sm:$0xff] }
 0x58e   :  { %v8718_v23 = vpack.c.bf16 %v3116_v2, %v3112_v43  ;;  %v3118_v45 = vld [vmem:[#allocation14 + $0x380] sm:$0xff]  ;;  %v3120_v44 = vld [vmem:[#allocation14 + $0x390] sm:$0xff]  ;;  %v8723_v48 = vpack.c.bf16 %v3125_v17, %v3121_v1 }
 0x58f   :  { %9820 = vst [vmem:[#allocation72_spill] sm:$0xff] %v8702_v27  ;;  %9821 = vst [vmem:[#allocation73_spill] sm:$0xff] %v8706_v15  ;;  %v3122_v61 = vld [vmem:[#allocation14 + $0x3a0] sm:$0xff]  ;;  %v3128_v1 = vld [vmem:[#allocation14 + $0x3d0] sm:$0xff] }
 0x590   :  { %6295 = vmatpush1.bf16.msra.mxu0 %v8690_v57  ;;  %6359 = vmatpush1.bf16.msra.mxu1 %v8694_v51  ;;  %9822 = vst [vmem:[#allocation74_spill] sm:$0xff] %v8711_v47  ;;  %v3119_v57 = vld [vmem:[#allocation14 + $0x388] sm:$0xff]  ;;  %v8714_v51 = vpack.c.bf16 %v3114_v55, %v3110_v33  ;;  %v3129_v33 = vld [vmem:[#allocation14 + $0x3d8] sm:$0xff]  ;;  %v3126_v43 = vld [vmem:[#allocation14 + $0x3c0] sm:$0xff] }
 0x591   :  { %6297 = vmatprep.subr.bf16.mxu0 %v8696_v9  ;;  %6361 = vmatprep.subr.bf16.mxu1 %v8699_v12  ;;  %v8720_v40 = vpack.c.bf16 %v3123_v35, %v3119_v57  ;;  %v3124_v12 = vld [vmem:[#allocation14 + $0x3b0] sm:$0xff]  ;;  %v3127_v9 = vld [vmem:[#allocation14 + $0x3c8] sm:$0xff]  ;;  %v3133_v55 = vld [vmem:[#allocation14 + $0x3f8] sm:$0xff] }
 0x592   :  { %v8730_v2 = vpack.c.bf16 %v3124_v12, %v3120_v44  ;;  %v3130_v17 = vld [vmem:[#allocation14 + $0x3e0] sm:$0xff]  ;;  %v8735_v35 = vpack.c.bf16 %v3133_v55, %v3129_v33 }
 0x594   :  { %6299 = vmatpush1.bf16.msra.mxu0 %v8702_v27  ;;  %6363 = vmatpush1.bf16.msra.mxu1 %v8706_v15  ;;  %v3131_v27 = vld [vmem:[#allocation14 + $0x3e8] sm:$0xff]  ;;  %v8726_v15 = vpack.c.bf16 %v3122_v61, %v3118_v45  ;;  %9823 = vst [vmem:[#allocation75_spill] sm:$0xff] %v8730_v2  ;;  %9825 = vst [vmem:[#allocation77_spill] sm:$0xff] %v8735_v35  ;;  %v8738_v45 = vpack.c.bf16 %v3130_v17, %v3126_v43 }
 0x595   :  { %6301 = vmatprep.subr.bf16.mxu0 %v8708_v36  ;;  %6365 = vmatprep.subr.bf16.mxu1 %v8711_v47  ;;  %v8732_v57 = vpack.c.bf16 %v3131_v27, %v3127_v9  ;;  %v3132_v47 = vld [vmem:[#allocation14 + $0x3f0] sm:$0xff]  ;;  %v2540_v27 = vld [vmem:[%s9327_s7] sm:$0xf] }
 0x596   :  { %9826 = vst [vmem:[#allocation81_spill] sm:$0xff] %v8738_v45  ;;  %v8742_v12 = vpack.c.bf16 %v3132_v47, %v3128_v1  ;;  %v2545_v9 = vrot.slane %v2540_v27, %v9773_v25  ;;  %v2549_v61 = vrot.slane %v2540_v27, %v9774_v5 }
 0x597   :  { %9824 = vst [vmem:[#allocation76_spill] sm:$0xff] %v8732_v57 }
 0x598   :  { %6303 = vmatpush1.bf16.msra.mxu0 %v8714_v51  ;;  %6367 = vmatpush1.bf16.msra.mxu1 %v8718_v23  ;;  %9827 = vst [vmem:[#allocation79_spill] sm:$0xff] %v8742_v12 }
 0x599   :  { %6305 = vmatprep.subr.bf16.mxu0 %v8720_v40  ;;  %6369 = vmatprep.subr.bf16.mxu1 %v8723_v48 }
 0x59c   :  { %6307 = vmatpush1.bf16.msra.mxu0 %v8726_v15  ;;  %6371 = vmatpush1.bf16.msra.mxu1 %v8730_v2 }
 0x59d   :  { %6309 = vmatprep.subr.bf16.mxu0 %v8732_v57  ;;  %6373 = vmatprep.subr.bf16.mxu1 %v8735_v35 }
 0x5a0   :  { %6311 = vmatpush1.bf16.msra.mxu0 %v8738_v45  ;;  %6375 = vmatpush1.bf16.msra.mxu1 %v8742_v12  ;;  %v2553_v45 = vrot.slane %v2540_v27, %v9666_v22 }
 0x5a1   :  { %6377 = vmatprep.subr.bf16.mxu0 %v8447_v42  ;;  %6409 = vmatprep.subr.bf16.mxu1 %v8449_v41  ;;  %v2557_v42 = vrot.slane %v2540_v27, %v9665_v11 }
 0x616   :  { %v2628_v47 = vpop.f32.mrb[16].mxu0  ;;  %v2699_v44 = vpop.f32.mrb[16].mxu1 }
 0x617   :  { %v2629_v33 = vadd.f32 %v2628_v47, %v2545_v9  ;;  %v2630_v55 = vpop.f32.mrb[17].mxu0  ;;  %v2701_v43 = vpop.f32.mrb[17].mxu1  ;;  %v2700_v57 = vadd.f32 %v2699_v44, %v2553_v45 }
 0x618   :  { %v2631_v17 = vadd.f32 %v2630_v55, %v2549_v61  ;;  %v2702_v41 = vadd.f32 %v2701_v43, %v2557_v42 }
 0x619   :  { %v5272_v1 = vmul.f32 -1.442695, %v2629_v33 }
 0x61a   :  { %v5273_v12 = vmul.f32 -1.442695, %v2631_v17  ;;  %v5274_v35 = vmul.f32 -1.442695, %v2702_v41 }
 0x61b   :  { %7105 = vpow2.f32 %v5272_v1  ;;  %v2411_v1 = vld [vmem:[#allocation3 + $0x1] sm:$0x1] }
 0x61c   :  { %7107 = vpow2.f32 %v5273_v12 }
 0x61d   :  { %7109 = vpow2.f32 %v5274_v35 }
 0x61e   :  { %7111 = vtanh.f32 %v2700_v57 }
 0x625   :  { %v7106_v25 = vpop.eup %7105 }
 0x626   :  { %v7108_v2 = vpop.eup %7107  ;;  %v2707_v5 = vadd.f32 1.0, %v7106_v25 }
 0x627   :  { %v2713_v9 = vadd.f32 1.0, %v7108_v2  ;;  %v7110_v61 = vpop.eup %7109 }
 0x628   :  { %7113 = vrcp.f32 %v2707_v5  ;;  %v7112_v47 = vpop.eup %7111  ;;  %v2720_v12 = vadd.f32 1.0, %v7110_v61 }
 0x629   :  { %7115 = vrcp.f32 %v2713_v9 }
 0x62a   :  { %7117 = vrcp.f32 %v2720_v12 }
 0x632   :  { %v7114_v33 = vpop.eup %7113 }
 0x633   :  { %v7116_v55 = vpop.eup %7115  ;;  %v2724_v17 = vmul.f32 %v7114_v33, %v7112_v47  ;;  %v2734_v47 = vld [vmem:[#allocation5 + $0x4] ss:$8 sm:$0xf] }
 0x634   :  { %v2723_v43 = vmul.f32 %v7116_v55, %v2411_v1  ;;  %v7118_v33 = vpop.eup %7117 }
 0x636   :  { %v2725_v42 = vadd.f32 %v2724_v17, %v2723_v43  ;;  %v2865_v27 = vpop.f32.mrb[18].mxu0  ;;  %v2936_v41 = vpop.f32.mrb[18].mxu1 }
 0x637   :  { %v2867_v45 = vpop.f32.mrb[19].mxu0  ;;  %v2938_v44 = vpop.f32.mrb[19].mxu1 }
 0x638   :  { %7119 = vtanh.f32 %v2725_v42  ;;  %2729 = vst [vmem:[#allocation3 + $0x1] sm:$0x1] %v2725_v42  ;;  %v2945_v25 = vcombine.low %v2865_v27, %v2867_v45  ;;  %v2946_v2 = vcombine.low %v2936_v41, %v2938_v44 }
 0x63a   :  { %v2953_v5 = vrot.slane %v2945_v25, %v7936_v29  ;;  %v2960_v57 = vrot.slane %v2946_v2, %v7936_v29 }
 0x63c   :  { %v2961_v35 = vcombine.low %v2953_v5, %v2960_v57 }
 0x63e   :  { %v2968_v9 = vrot.slane %v2961_v35, %v7936_v29 }
 0x640   :  { %v2970_v61 = vadd.f32 %v2968_v9, %v2734_v47 }
 0x642   :  { %v7120_v55 = vpop.eup %7119  ;;  %v5275_v17 = vmul.f32 -1.442695, %v2970_v61  ;;  %v2978_v1 = vrot.slane %v2970_v61, 1  ;;  %v2989_v42 = vrot.slane %v2970_v61, 3  ;;  %v2986_v44 = vrot.slane %v2970_v61, 2 }
 0x643   :  { %v2727_v12 = vmul.f32 %v7120_v55, %v7118_v33  ;;  %v2732_v33 = vld [vmem:[#allocation3] sm:$0x1] }
 0x644   :  { %7121 = vpow2.f32 %v5275_v17  ;;  %v5276_v43 = vmul.f32 -1.442695, %v2978_v1  ;;  %v5277_v27 = vmul.f32 -1.442695, %v2989_v42 }
 0x645   :  { %2728 = vst [vmem:[#allocation2 + $0x1] sm:$0x1] %v2727_v12  ;;  %2730 = vst [vmem:[#allocation4 + $0x3] sm:$0x1] %v2727_v12 }
 0x646   :  { %7123 = vpow2.f32 %v5276_v43 }
 0x647   :  { %7125 = vpow2.f32 %v5277_v27  ;;  %v9862_v27 = vld [vmem:[#allocation61_spill] sm:$0xff] }
 0x64c   :  { %v3004_v41 = vld [vmem:[#allocation2 + $0x1] sm:$0x1] }
 0x64d   :  { %3220 = vmatprep.mubr.f32.mxu0 %v3004_v41  ;;  %3291 = vmatprep.mubr.f32.mxu1 %v3004_v41  ;;  %v9863_v41 = vld [vmem:[#allocation62_spill] sm:$0xff] }
 0x64e   :  { %v7122_v45 = vpop.eup %7121 }
 0x64f   :  { %v2974_v25 = vadd.f32 1.0, %v7122_v45  ;;  %v9864_v45 = vld [vmem:[#allocation63_spill] sm:$0xff] }
 0x650   :  { %v7124_v2 = vpop.eup %7123 }
 0x651   :  { %7127 = vrcp.f32 %v2974_v25  ;;  %v2983_v5 = vadd.f32 1.0, %v7124_v2  ;;  %v7126_v57 = vpop.eup %7125  ;;  %v9866_v25 = vld [vmem:[#allocation65_spill] sm:$0xff]  ;;  %v9867_v2 = vld [vmem:[#allocation66_spill] sm:$0xff] }
 0x652   :  { %7129 = vtanh.f32 %v2986_v44  ;;  %v2994_v55 = vadd.f32 1.0, %v7126_v57  ;;  %v9865_v44 = vld [vmem:[#allocation64_spill] sm:$0xff] }
 0x653   :  { %7131 = vrcp.f32 %v2983_v5  ;;  %v9868_v5 = vld [vmem:[#allocation67_spill] sm:$0xff]  ;;  %v9869_v57 = vld [vmem:[#allocation68_spill] sm:$0xff] }
 0x654   :  { %7133 = vrcp.f32 %v2994_v55  ;;  %v9874_v55 = vld [vmem:[#allocation73_spill] sm:$0xff] }
 0x65b   :  { %v7128_v35 = vpop.eup %7127 }
 0x65c   :  { %v7130_v9 = vpop.eup %7129 }
 0x65d   :  { %v7132_v47 = vpop.eup %7131  ;;  %v2998_v1 = vmul.f32 %v7130_v9, %v7128_v35  ;;  %v9870_v35 = vld [vmem:[#allocation69_spill] sm:$0xff]  ;;  %v9871_v9 = vld [vmem:[#allocation70_spill] sm:$0xff] }
 0x65e   :  { %v2997_v17 = vmul.f32 %v7132_v47, %v2732_v33  ;;  %v7134_v61 = vpop.eup %7133  ;;  %v9872_v47 = vld [vmem:[#allocation71_spill] sm:$0xff]  ;;  %v9873_v33 = vld [vmem:[#allocation72_spill] sm:$0xff] }
 0x660   :  { %v2999_v12 = vadd.f32 %v2998_v1, %v2997_v17  ;;  %v9875_v17 = vld [vmem:[#allocation74_spill] sm:$0xff]  ;;  %v9876_v1 = vld [vmem:[#allocation75_spill] sm:$0xff] }
 0x662   :  { %7135 = vtanh.f32 %v2999_v12  ;;  %3003 = vst [vmem:[#allocation3] sm:$0x1] %v2999_v12  ;;  %v9877_v12 = vld [vmem:[#allocation76_spill] sm:$0xff] }
 0x66c   :  { %v7136_v43 = vpop.eup %7135 }
 0x66d   :  { %v3001_v42 = vmul.f32 %v7136_v43, %v7134_v61  ;;  %v9878_v61 = vld [vmem:[#allocation77_spill] sm:$0xff] }
 0x66e   :  { %v9879_v43 = vld [vmem:[#allocation81_spill] sm:$0xff] }
 0x66f   :  { %3221 = vmatmul.mubr.f32.vlgmr.msra.gmra.mrb[20].mxu0 %v3001_v42  ;;  %3002 = vst [vmem:[#allocation2] sm:$0x1] %v3001_v42  ;;  %3292 = vmatmul.mubr.f32.vlgmr.msra.gmra.mrb[20].mxu1 %v3001_v42  ;;  %v3924_v42 = vld [vmem:[#allocation12 + $0x8] sm:$0xff] }
 0x670   :  { %6379 = vmatpush1.bf16.msra.mxu0 %v8463_v13  ;;  %6411 = vmatpush1.bf16.msra.mxu1 %v8465_v0  ;;  %v9828_v0 = vld [vmem:[#allocation27_spill] sm:$0xff] }
 0x671   :  { %6381 = vmatprep.subr.bf16.mxu0 %v8467_v20  ;;  %6413 = vmatprep.subr.bf16.mxu1 %v8469_v3  ;;  %v9829_v20 = vld [vmem:[#allocation28_spill] sm:$0xff]  ;;  %v9830_v3 = vld [vmem:[#allocation29_spill] sm:$0xff] }
 0x672   :  { %3457 = vmatprep.mubr.f32.mxu0 %v7945_v32  ;;  %3528 = vmatprep.mubr.f32.mxu1 %v7945_v32 }
 0x674   :  { %6383 = vmatpush1.bf16.msra.mxu0 %v8473_v6  ;;  %6415 = vmatpush1.bf16.msra.mxu1 %v8475_v60  ;;  %v9831_v6 = vld [vmem:[#allocation30_spill] sm:$0xff]  ;;  %v9832_v60 = vld [vmem:[#allocation31_spill] sm:$0xff] }
 0x675   :  { %6385 = vmatprep.subr.bf16.mxu0 %v8479_v52  ;;  %6417 = vmatprep.subr.bf16.mxu1 %v8481_v59  ;;  %v9833_v52 = vld [vmem:[#allocation32_spill] sm:$0xff]  ;;  %v9834_v59 = vld [vmem:[#allocation33_spill] sm:$0xff] }
 0x676   :  { %v3325_v13 = vld [vmem:[#allocation2] sm:$0x1] }
 0x678   :  { %6387 = vmatpush1.bf16.msra.mxu0 %v8487_v10  ;;  %6419 = vmatpush1.bf16.msra.mxu1 %v8489_v63  ;;  %v9835_v10 = vld [vmem:[#allocation34_spill] sm:$0xff]  ;;  %v9836_v63 = vld [vmem:[#allocation35_spill] sm:$0xff] }
 0x679   :  { %6389 = vmatprep.subr.bf16.mxu0 %v8493_v53  ;;  %6421 = vmatprep.subr.bf16.mxu1 %v8495_v24  ;;  %v9837_v53 = vld [vmem:[#allocation36_spill] sm:$0xff]  ;;  %v9838_v24 = vld [vmem:[#allocation37_spill] sm:$0xff] }
 0x67c   :  { %6391 = vmatpush1.bf16.msra.mxu0 %v8499_v62  ;;  %6423 = vmatpush1.bf16.msra.mxu1 %v8501_v37  ;;  %v9839_v62 = vld [vmem:[#allocation38_spill] sm:$0xff]  ;;  %v9840_v37 = vld [vmem:[#allocation39_spill] sm:$0xff] }
 0x67d   :  { %6393 = vmatprep.subr.bf16.mxu0 %v8505_v31  ;;  %6425 = vmatprep.subr.bf16.mxu1 %v8507_v46  ;;  %v9841_v31 = vld [vmem:[#allocation40_spill] sm:$0xff]  ;;  %v9842_v46 = vld [vmem:[#allocation41_spill] sm:$0xff] }
 0x680   :  { %6395 = vmatpush1.bf16.msra.mxu0 %v8511_v14  ;;  %6427 = vmatpush1.bf16.msra.mxu1 %v8513_v50  ;;  %v9843_v14 = vld [vmem:[#allocation42_spill] sm:$0xff]  ;;  %v9844_v50 = vld [vmem:[#allocation43_spill] sm:$0xff] }
 0x681   :  { %6397 = vmatprep.subr.bf16.mxu0 %v8517_v16  ;;  %6429 = vmatprep.subr.bf16.mxu1 %v8519_v28  ;;  %v9845_v16 = vld [vmem:[#allocation44_spill] sm:$0xff]  ;;  %v9846_v28 = vld [vmem:[#allocation45_spill] sm:$0xff] }
 0x684   :  { %6399 = vmatpush1.bf16.msra.mxu0 %v8523_v49  ;;  %6431 = vmatpush1.bf16.msra.mxu1 %v8525_v4  ;;  %v9847_v49 = vld [vmem:[#allocation46_spill] sm:$0xff]  ;;  %v9848_v4 = vld [vmem:[#allocation47_spill] sm:$0xff] }
 0x685   :  { %6401 = vmatprep.subr.bf16.mxu0 %v8529_v8  ;;  %6433 = vmatprep.subr.bf16.mxu1 %v8531_v21  ;;  %v9849_v8 = vld [vmem:[#allocation48_spill] sm:$0xff]  ;;  %v9850_v21 = vld [vmem:[#allocation49_spill] sm:$0xff] }
 0x688   :  { %6403 = vmatpush1.bf16.msra.mxu0 %v8535_v56  ;;  %6435 = vmatpush1.bf16.msra.mxu1 %v8537_v18  ;;  %v9851_v56 = vld [vmem:[#allocation50_spill] sm:$0xff]  ;;  %v9852_v18 = vld [vmem:[#allocation51_spill] sm:$0xff] }
 0x689   :  { %6405 = vmatprep.subr.bf16.mxu0 %v8541_v7  ;;  %6437 = vmatprep.subr.bf16.mxu1 %v8543_v54  ;;  %v9853_v7 = vld [vmem:[#allocation52_spill] sm:$0xff]  ;;  %v9854_v54 = vld [vmem:[#allocation53_spill] sm:$0xff] }
 0x68c   :  { %6407 = vmatpush1.bf16.msra.mxu0 %v8547_v58  ;;  %6439 = vmatpush1.bf16.msra.mxu1 %v8549_v30  ;;  %v9855_v58 = vld [vmem:[#allocation54_spill] sm:$0xff]  ;;  %v9856_v30 = vld [vmem:[#allocation55_spill] sm:$0xff] }
 0x68d   :  { %6441 = vmatprep.subr.bf16.mxu0 %v8555_v19  ;;  %6505 = vmatprep.subr.bf16.mxu1 %v8557_v34  ;;  %v9857_v19 = vld [vmem:[#allocation56_spill] sm:$0xff]  ;;  %v9858_v34 = vld [vmem:[#allocation57_spill] sm:$0xff] }
 0x68f   :  { %3458 = vmatmul.mubr.f32.vlgmr.msra.gmra.mrb[22].mxu0 %v3325_v13  ;;  %3529 = vmatmul.mubr.f32.vlgmr.msra.gmra.mrb[22].mxu1 %v3325_v13  ;;  %v3926_v13 = vld [vmem:[#allocation12 + $0x18] sm:$0xff] }
 0x690   :  { %6443 = vmatpush1.bf16.msra.mxu0 %v8559_v39  ;;  %6507 = vmatpush1.bf16.msra.mxu1 %v8562_v38  ;;  %v9859_v39 = vld [vmem:[#allocation58_spill] sm:$0xff]  ;;  %v9860_v38 = vld [vmem:[#allocation59_spill] sm:$0xff] }
 0x691   :  { %6445 = vmatprep.subr.bf16.mxu0 %v8567_v26  ;;  %6509 = vmatprep.subr.bf16.mxu1 %v9828_v0  ;;  %v9861_v26 = vld [vmem:[#allocation60_spill] sm:$0xff] }
 0x694   :  { %6447 = vmatpush1.bf16.msra.mxu0 %v9829_v20  ;;  %6511 = vmatpush1.bf16.msra.mxu1 %v9830_v3  ;;  %v9882_v3 = vld [vmem:[#allocation80_spill] sm:$0xff] }
 0x695   :  { %6449 = vmatprep.subr.bf16.mxu0 %v9831_v6  ;;  %6513 = vmatprep.subr.bf16.mxu1 %v9832_v60 }
 0x698   :  { %6451 = vmatpush1.bf16.msra.mxu0 %v9833_v52  ;;  %6515 = vmatpush1.bf16.msra.mxu1 %v9834_v59 }
 0x699   :  { %6453 = vmatprep.subr.bf16.mxu0 %v9835_v10  ;;  %6517 = vmatprep.subr.bf16.mxu1 %v9836_v63 }
 0x69c   :  { %6455 = vmatpush1.bf16.msra.mxu0 %v9837_v53  ;;  %6519 = vmatpush1.bf16.msra.mxu1 %v9838_v24 }
 0x69d   :  { %6457 = vmatprep.subr.bf16.mxu0 %v9839_v62  ;;  %6521 = vmatprep.subr.bf16.mxu1 %v9840_v37 }
 0x6a0   :  { %6459 = vmatpush1.bf16.msra.mxu0 %v9841_v31  ;;  %6523 = vmatpush1.bf16.msra.mxu1 %v9842_v46 }
 0x6a1   :  { %6461 = vmatprep.subr.bf16.mxu0 %v9843_v14  ;;  %6525 = vmatprep.subr.bf16.mxu1 %v9844_v50 }
 0x6a4   :  { %6463 = vmatpush1.bf16.msra.mxu0 %v9845_v16  ;;  %6527 = vmatpush1.bf16.msra.mxu1 %v9846_v28 }
 0x6a5   :  { %6465 = vmatprep.subr.bf16.mxu0 %v9847_v49  ;;  %6529 = vmatprep.subr.bf16.mxu1 %v9848_v4 }
 0x6a8   :  { %6467 = vmatpush1.bf16.msra.mxu0 %v9849_v8  ;;  %6531 = vmatpush1.bf16.msra.mxu1 %v9850_v21 }
 0x6a9   :  { %6469 = vmatprep.subr.bf16.mxu0 %v9851_v56  ;;  %6533 = vmatprep.subr.bf16.mxu1 %v9852_v18 }
 0x6ac   :  { %6471 = vmatpush1.bf16.msra.mxu0 %v9853_v7  ;;  %6535 = vmatpush1.bf16.msra.mxu1 %v9854_v54  ;;  %v3005_v54 = vld [vmem:[#allocation3 + $0x1] sm:$0x1] }
 0x6ad   :  { %6473 = vmatprep.subr.bf16.mxu0 %v9855_v58  ;;  %6537 = vmatprep.subr.bf16.mxu1 %v9856_v30 }
 0x6b0   :  { %6475 = vmatpush1.bf16.msra.mxu0 %v9857_v19  ;;  %6539 = vmatpush1.bf16.msra.mxu1 %v9858_v34 }
 0x6b1   :  { %6477 = vmatprep.subr.bf16.mxu0 %v9859_v39  ;;  %6541 = vmatprep.subr.bf16.mxu1 %v9860_v38 }
 0x6b4   :  { %6479 = vmatpush1.bf16.msra.mxu0 %v9861_v26  ;;  %6543 = vmatpush1.bf16.msra.mxu1 %v9862_v27 }
 0x6b5   :  { %6481 = vmatprep.subr.bf16.mxu0 %v9863_v41  ;;  %6545 = vmatprep.subr.bf16.mxu1 %v9864_v45 }
 0x6b8   :  { %6483 = vmatpush1.bf16.msra.mxu0 %v9865_v44  ;;  %6547 = vmatpush1.bf16.msra.mxu1 %v9866_v25 }
 0x6b9   :  { %6485 = vmatprep.subr.bf16.mxu0 %v9867_v2  ;;  %6549 = vmatprep.subr.bf16.mxu1 %v9868_v5  ;;  %v3328_v5 = vld [vmem:[#allocation5 + $0x5] ss:$8 sm:$0xf] }
 0x6bc   :  { %6487 = vmatpush1.bf16.msra.mxu0 %v9869_v57  ;;  %6551 = vmatpush1.bf16.msra.mxu1 %v9870_v35 }
 0x6bd   :  { %6489 = vmatprep.subr.bf16.mxu0 %v9871_v9  ;;  %6553 = vmatprep.subr.bf16.mxu1 %v9872_v47 }
 0x6c0   :  { %6491 = vmatpush1.bf16.msra.mxu0 %v9873_v33  ;;  %6555 = vmatpush1.bf16.msra.mxu1 %v9874_v55 }
 0x6c1   :  { %6493 = vmatprep.subr.bf16.mxu0 %v8708_v36  ;;  %6557 = vmatprep.subr.bf16.mxu1 %v9875_v17  ;;  %v9880_v36 = vld [vmem:[#allocation79_spill] sm:$0xff] }
 0x6c4   :  { %6495 = vmatpush1.bf16.msra.mxu0 %v8714_v51  ;;  %6559 = vmatpush1.bf16.msra.mxu1 %v8718_v23  ;;  %v3928_v51 = vld [vmem:[#allocation12 + $0x28] sm:$0xff] }
 0x6c5   :  { %6497 = vmatprep.subr.bf16.mxu0 %v8720_v40  ;;  %6561 = vmatprep.subr.bf16.mxu1 %v8723_v48  ;;  %v8855_v23 = vpack.c.bf16 %v3928_v51, %v3924_v42  ;;  %v3930_v40 = vld [vmem:[#allocation12 + $0x38] sm:$0xff]  ;;  %v9881_v48 = vld [vmem:[#allocation78_spill] sm:$0xff] }
 0x6c6   :  { %v8857_v0 = vpack.c.bf16 %v3930_v40, %v3926_v13 }
 0x6c8   :  { %6499 = vmatpush1.bf16.msra.mxu0 %v8726_v15  ;;  %6563 = vmatpush1.bf16.msra.mxu1 %v9876_v1  ;;  %v3134_v15 = vld [vmem:[%s9327_s7] sm:$0xf] }
 0x6c9   :  { %6501 = vmatprep.subr.bf16.mxu0 %v9877_v12  ;;  %6565 = vmatprep.subr.bf16.mxu1 %v9878_v61  ;;  %v3139_v20 = vrot.slane %v3134_v15, %v9881_v48  ;;  %v3143_v6 = vrot.slane %v3134_v15, %v9882_v3  ;;  %v3151_v37 = vrot.slane %v3134_v15, %v9665_v11 }
 0x6ca   :  { %v3147_v46 = vrot.slane %v3134_v15, %v9666_v22 }
 0x6cc   :  { %6503 = vmatpush1.bf16.msra.mxu0 %v9879_v43  ;;  %6567 = vmatpush1.bf16.msra.mxu1 %v9880_v36 }
 0x6cd   :  { %6569 = vmatprep.subr.bf16.mxu0 %v8855_v23  ;;  %6601 = vmatprep.subr.bf16.mxu1 %v8857_v0 }
 0x742   :  { %v3222_v60 = vpop.f32.mrb[20].mxu0  ;;  %v3293_v52 = vpop.f32.mrb[20].mxu1 }
 0x743   :  { %v3223_v59 = vadd.f32 %v3222_v60, %v3139_v20  ;;  %v3224_v10 = vpop.f32.mrb[21].mxu0  ;;  %v3295_v63 = vpop.f32.mrb[21].mxu1  ;;  %v3294_v50 = vadd.f32 %v3293_v52, %v3147_v46  ;;  %v3326_v60 = vld [vmem:[#allocation3] sm:$0x1] }
 0x744   :  { %v3225_v53 = vadd.f32 %v3224_v10, %v3143_v6  ;;  %v3296_v31 = vadd.f32 %v3295_v63, %v3151_v37  ;;  %v3929_v37 = vld [vmem:[#allocation12 + $0x30] sm:$0xff]  ;;  %v3936_v46 = vld [vmem:[#allocation12 + $0x68] sm:$0xff] }
 0x745   :  { %v5278_v24 = vmul.f32 -1.442695, %v3223_v59 }
 0x746   :  { %v5279_v62 = vmul.f32 -1.442695, %v3225_v53  ;;  %v5280_v14 = vmul.f32 -1.442695, %v3296_v31  ;;  %v3923_v53 = vld [vmem:[#allocation12] sm:$0xff]  ;;  %v3932_v31 = vld [vmem:[#allocation12 + $0x48] sm:$0xff] }
 0x747   :  { %7137 = vpow2.f32 %v5278_v24  ;;  %v3927_v24 = vld [vmem:[#allocation12 + $0x20] sm:$0xff] }
 0x748   :  { %7139 = vpow2.f32 %v5279_v62  ;;  %v3925_v62 = vld [vmem:[#allocation12 + $0x10] sm:$0xff] }
 0x749   :  { %7141 = vpow2.f32 %v5280_v14  ;;  %v3934_v14 = vld [vmem:[#allocation12 + $0x58] sm:$0xff] }
 0x74a   :  { %7143 = vtanh.f32 %v3294_v50  ;;  %v3938_v50 = vld [vmem:[#allocation12 + $0x78] sm:$0xff] }
 0x751   :  { %v7138_v16 = vpop.eup %7137 }
 0x752   :  { %v7140_v28 = vpop.eup %7139  ;;  %v3301_v49 = vadd.f32 1.0, %v7138_v16 }
 0x753   :  { %v3307_v4 = vadd.f32 1.0, %v7140_v28  ;;  %v7142_v8 = vpop.eup %7141 }
 0x754   :  { %7145 = vrcp.f32 %v3301_v49  ;;  %v7144_v21 = vpop.eup %7143  ;;  %v3314_v58 = vadd.f32 1.0, %v7142_v8  ;;  %v8871_v49 = vpack.c.bf16 %v3927_v24, %v3923_v53  ;;  %v3931_v8 = vld [vmem:[#allocation12 + $0x40] sm:$0xff]  ;;  %v3968_v53 = vld [vmem:[#allocation12 + $0x168] sm:$0xff]  ;;  %v3966_v24 = vld [vmem:[#allocation12 + $0x158] sm:$0xff] }
 0x755   :  { %7147 = vrcp.f32 %v3307_v4  ;;  %v8873_v4 = vpack.c.bf16 %v3929_v37, %v3925_v62  ;;  %v3970_v62 = vld [vmem:[#allocation12 + $0x178] sm:$0xff] }
 0x756   :  { %7149 = vrcp.f32 %v3314_v58  ;;  %v3937_v58 = vld [vmem:[#allocation12 + $0x70] sm:$0xff] }
 0x75e   :  { %v7146_v56 = vpop.eup %7145 }
 0x75f   :  { %v7148_v18 = vpop.eup %7147  ;;  %v3318_v7 = vmul.f32 %v7146_v56, %v7144_v21  ;;  %v3935_v21 = vld [vmem:[#allocation12 + $0x60] sm:$0xff] }
 0x760   :  { %v3317_v30 = vmul.f32 %v7148_v18, %v3005_v54  ;;  %v7150_v35 = vpop.eup %7149  ;;  %v8875_v18 = vpack.c.bf16 %v3936_v46, %v3932_v31  ;;  %v3933_v54 = vld [vmem:[#allocation12 + $0x50] sm:$0xff]  ;;  %v3963_v46 = vld [vmem:[#allocation12 + $0x140] sm:$0xff] }
 0x762   :  { %v3319_v19 = vadd.f32 %v3318_v7, %v3317_v30  ;;  %v3459_v34 = vpop.f32.mrb[22].mxu0  ;;  %v3530_v39 = vpop.f32.mrb[22].mxu1  ;;  %v8877_v7 = vpack.c.bf16 %v3938_v50, %v3934_v14  ;;  %v3940_v30 = vld [vmem:[#allocation12 + $0x88] sm:$0xff]  ;;  %v3967_v14 = vld [vmem:[#allocation12 + $0x160] sm:$0xff] }
 0x763   :  { %v3461_v38 = vpop.f32.mrb[23].mxu0  ;;  %v3532_v26 = vpop.f32.mrb[23].mxu1 }
 0x764   :  { %7151 = vtanh.f32 %v3319_v19  ;;  %3323 = vst [vmem:[#allocation3 + $0x1] sm:$0x1] %v3319_v19  ;;  %v3539_v27 = vcombine.low %v3459_v34, %v3461_v38  ;;  %v3540_v41 = vcombine.low %v3530_v39, %v3532_v26  ;;  %v3944_v19 = vld [vmem:[#allocation12 + $0xa8] sm:$0xff]  ;;  %v3942_v34 = vld [vmem:[#allocation12 + $0x98] sm:$0xff]  ;;  %v8881_v38 = vpack.c.bf16 %v3935_v21, %v3931_v8  ;;  %v3969_v8 = vld [vmem:[#allocation12 + $0x170] sm:$0xff] }
 0x765   :  { %v3946_v39 = vld [vmem:[#allocation12 + $0xb8] sm:$0xff]  ;;  %v8883_v26 = vpack.c.bf16 %v3937_v58, %v3933_v54  ;;  %v3972_v21 = vld [vmem:[#allocation12 + $0x188] sm:$0xff] }
 0x766   :  { %v3547_v45 = vrot.slane %v3539_v27, %v7936_v29  ;;  %v3554_v44 = vrot.slane %v3540_v41, %v7936_v29  ;;  %v3939_v27 = vld [vmem:[#allocation12 + $0x80] sm:$0xff]  ;;  %v3974_v54 = vld [vmem:[#allocation12 + $0x198] sm:$0xff] }
 0x767   :  { %v3943_v41 = vld [vmem:[#allocation12 + $0xa0] sm:$0xff]  ;;  %v3978_v58 = vld [vmem:[#allocation12 + $0x1b8] sm:$0xff] }
 0x768   :  { %v3555_v25 = vcombine.low %v3547_v45, %v3554_v44  ;;  %v8887_v45 = vpack.c.bf16 %v3944_v19, %v3940_v30  ;;  %v8889_v44 = vpack.c.bf16 %v3946_v39, %v3942_v34  ;;  %v8931_v30 = vpack.c.bf16 %v3967_v14, %v3963_v46  ;;  %v3971_v34 = vld [vmem:[#allocation12 + $0x180] sm:$0xff] }
 0x769   :  { %v3975_v39 = vld [vmem:[#allocation12 + $0x1a0] sm:$0xff] }
 0x76a   :  { %v3562_v2 = vrot.slane %v3555_v25, %v7936_v29  ;;  %v3941_v25 = vld [vmem:[#allocation12 + $0x90] sm:$0xff]  ;;  %v4194_v46 = vld [vmem:[#allocation14] sm:$0xff] }
 0x76b   :  { %v4198_v14 = vld [vmem:[#allocation14 + $0x20] sm:$0xff] }
 0x76c   :  { %v3564_v57 = vadd.f32 %v3562_v2, %v3328_v5  ;;  %v3945_v2 = vld [vmem:[#allocation12 + $0xb0] sm:$0xff]  ;;  %v3948_v5 = vld [vmem:[#allocation12 + $0xc8] sm:$0xff] }
 0x76e   :  { %v7152_v9 = vpop.eup %7151  ;;  %v5281_v47 = vmul.f32 -1.442695, %v3564_v57  ;;  %v3572_v33 = vrot.slane %v3564_v57, 1  ;;  %v3583_v1 = vrot.slane %v3564_v57, 3  ;;  %v3580_v36 = vrot.slane %v3564_v57, 2  ;;  %v3952_v57 = vld [vmem:[#allocation12 + $0xe8] sm:$0xff] }
 0x76f   :  { %v3321_v55 = vmul.f32 %v7152_v9, %v7150_v35  ;;  %v3950_v35 = vld [vmem:[#allocation12 + $0xd8] sm:$0xff] }
 0x770   :  { %7153 = vpow2.f32 %v5281_v47  ;;  %v5282_v17 = vmul.f32 -1.442695, %v3572_v33  ;;  %v5283_v12 = vmul.f32 -1.442695, %v3583_v1  ;;  %v3954_v9 = vld [vmem:[#allocation12 + $0xf8] sm:$0xff]  ;;  %v8895_v47 = vpack.c.bf16 %v3943_v41, %v3939_v27 }
 0x771   :  { %3324 = vst [vmem:[#allocation4 + $0x4] sm:$0x1] %v3321_v55  ;;  %3322 = vst [vmem:[#allocation2 + $0x1] sm:$0x1] %v3321_v55  ;;  %v8897_v33 = vpack.c.bf16 %v3945_v2, %v3941_v25  ;;  %v3947_v55 = vld [vmem:[#allocation12 + $0xc0] sm:$0xff]  ;;  %v8901_v1 = vpack.c.bf16 %v3952_v57, %v3948_v5  ;;  %v8939_v41 = vpack.c.bf16 %v3978_v58, %v3974_v54  ;;  %v3973_v25 = vld [vmem:[#allocation12 + $0x190] sm:$0xff] }
 0x772   :  { %7155 = vpow2.f32 %v5282_v17  ;;  %v3951_v17 = vld [vmem:[#allocation12 + $0xe0] sm:$0xff]  ;;  %v3977_v2 = vld [vmem:[#allocation12 + $0x1b0] sm:$0xff]  ;;  %v3980_v5 = vld [vmem:[#allocation12 + $0x1c8] sm:$0xff] }
 0x773   :  { %7157 = vpow2.f32 %v5283_v12  ;;  %v8903_v12 = vpack.c.bf16 %v3954_v9, %v3950_v35  ;;  %v3984_v57 = vld [vmem:[#allocation12 + $0x1e8] sm:$0xff]  ;;  %v3982_v35 = vld [vmem:[#allocation12 + $0x1d8] sm:$0xff] }
 0x774   :  { %v3986_v9 = vld [vmem:[#allocation12 + $0x1f8] sm:$0xff]  ;;  %v4203_v58 = vld [vmem:[#allocation14 + $0x48] sm:$0xff] }
 0x778   :  { %v3598_v61 = vld [vmem:[#allocation2 + $0x1] sm:$0x1] }
 0x779   :  { %3814 = vmatprep.mubr.f32.mxu0 %v3598_v61  ;;  %3885 = vmatprep.mubr.f32.mxu1 %v3598_v61  ;;  %v3949_v61 = vld [vmem:[#allocation12 + $0xd0] sm:$0xff] }
 0x77a   :  { %v7154_v43 = vpop.eup %7153 }
 0x77b   :  { %v3568_v42 = vadd.f32 1.0, %v7154_v43  ;;  %v3953_v43 = vld [vmem:[#allocation12 + $0xf0] sm:$0xff] }
 0x77c   :  { %v7156_v51 = vpop.eup %7155 }
 0x77d   :  { %7159 = vrcp.f32 %v3568_v42  ;;  %v3577_v13 = vadd.f32 1.0, %v7156_v51  ;;  %v7158_v40 = vpop.eup %7157  ;;  %v3960_v42 = vld [vmem:[#allocation12 + $0x128] sm:$0xff]  ;;  %v3958_v51 = vld [vmem:[#allocation12 + $0x118] sm:$0xff] }
 0x77e   :  { %7161 = vtanh.f32 %v3580_v36  ;;  %v3588_v52 = vadd.f32 1.0, %v7158_v40  ;;  %v3956_v36 = vld [vmem:[#allocation12 + $0x108] sm:$0xff]  ;;  %v8907_v40 = vpack.c.bf16 %v3951_v17, %v3947_v55  ;;  %v8943_v55 = vpack.c.bf16 %v3975_v39, %v3971_v34  ;;  %v4205_v39 = vld [vmem:[#allocation14 + $0x58] sm:$0xff] }
 0x77f   :  { %7163 = vrcp.f32 %v3577_v13  ;;  %v3962_v13 = vld [vmem:[#allocation12 + $0x138] sm:$0xff]  ;;  %v8945_v17 = vpack.c.bf16 %v3977_v2, %v3973_v25  ;;  %v4207_v34 = vld [vmem:[#allocation14 + $0x68] sm:$0xff] }
 0x780   :  { %7165 = vrcp.f32 %v3588_v52  ;;  %v8915_v52 = vpack.c.bf16 %v3962_v13, %v3958_v51  ;;  %v3981_v51 = vld [vmem:[#allocation12 + $0x1d0] sm:$0xff]  ;;  %v8975_v25 = vpack.c.bf16 %v4207_v34, %v4203_v58  ;;  %v4209_v2 = vld [vmem:[#allocation14 + $0x78] sm:$0xff] }
 0x781   :  { %v3985_v13 = vld [vmem:[#allocation12 + $0x1f0] sm:$0xff] }
 0x782   :  { %v4216_v58 = vld [vmem:[#allocation14 + $0xb0] sm:$0xff] }
 0x787   :  { %v7160_v15 = vpop.eup %7159 }
 0x788   :  { %v7162_v20 = vpop.eup %7161 }
 0x789   :  { %v7164_v6 = vpop.eup %7163  ;;  %v3592_v10 = vmul.f32 %v7162_v20, %v7160_v15  ;;  %v8909_v15 = vpack.c.bf16 %v3953_v43, %v3949_v61  ;;  %v3955_v20 = vld [vmem:[#allocation12 + $0x100] sm:$0xff]  ;;  %v8949_v43 = vpack.c.bf16 %v3984_v57, %v3980_v5 }
 0x78a   :  { %v3591_v59 = vmul.f32 %v7164_v6, %v3326_v60  ;;  %v7166_v16 = vpop.eup %7165  ;;  %v3959_v6 = vld [vmem:[#allocation12 + $0x120] sm:$0xff]  ;;  %v8913_v60 = vpack.c.bf16 %v3960_v42, %v3956_v36  ;;  %v8951_v36 = vpack.c.bf16 %v3986_v9, %v3982_v35  ;;  %v8977_v35 = vpack.c.bf16 %v4209_v2, %v4205_v39  ;;  %v4219_v39 = vld [vmem:[#allocation14 + $0xc8] sm:$0xff] }
 0x78b   :  { %v8919_v37 = vpack.c.bf16 %v3959_v6, %v3955_v20  ;;  %v3979_v61 = vld [vmem:[#allocation12 + $0x1c0] sm:$0xff]  ;;  %v8957_v6 = vpack.c.bf16 %v3985_v13, %v3981_v51  ;;  %v4211_v13 = vld [vmem:[#allocation14 + $0x88] sm:$0xff] }
 0x78c   :  { %v3593_v63 = vadd.f32 %v3592_v10, %v3591_v59  ;;  %v3957_v59 = vld [vmem:[#allocation12 + $0x110] sm:$0xff]  ;;  %v3983_v42 = vld [vmem:[#allocation12 + $0x1e0] sm:$0xff]  ;;  %9883 = vst [vmem:[#allocation27_spill] sm:$0xff] %v8977_v35  ;;  %v4223_v2 = vld [vmem:[#allocation14 + $0xe8] sm:$0xff] }
 0x78d   :  { %v3961_v10 = vld [vmem:[#allocation12 + $0x130] sm:$0xff]  ;;  %v8955_v20 = vpack.c.bf16 %v3983_v42, %v3979_v61  ;;  %v4202_v5 = vld [vmem:[#allocation14 + $0x40] sm:$0xff] }
 0x78e   :  { %7167 = vtanh.f32 %v3593_v63  ;;  %3597 = vst [vmem:[#allocation3] sm:$0x1] %v3593_v63  ;;  %v3964_v63 = vld [vmem:[#allocation12 + $0x148] sm:$0xff]  ;;  %v8921_v31 = vpack.c.bf16 %v3961_v10, %v3957_v59  ;;  %v4206_v57 = vld [vmem:[#allocation14 + $0x60] sm:$0xff]  ;;  %v4204_v61 = vld [vmem:[#allocation14 + $0x50] sm:$0xff] }
 0x78f   :  { %v8925_v50 = vpack.c.bf16 %v3968_v53, %v3964_v63  ;;  %v4195_v10 = vld [vmem:[#allocation14 + $0x8] sm:$0xff]  ;;  %v4197_v53 = vld [vmem:[#allocation14 + $0x18] sm:$0xff]  ;;  %v8979_v9 = vpack.c.bf16 %v4206_v57, %v4202_v5  ;;  %v4208_v42 = vld [vmem:[#allocation14 + $0x70] sm:$0xff]  ;;  %v8999_v57 = vpack.c.bf16 %v4223_v2, %v4219_v39 }
 0x790   :  { %v4199_v63 = vld [vmem:[#allocation14 + $0x28] sm:$0xff]  ;;  %v8982_v51 = vpack.c.bf16 %v4208_v42, %v4204_v61  ;;  %v4221_v5 = vld [vmem:[#allocation14 + $0xd8] sm:$0xff]  ;;  %v4218_v42 = vld [vmem:[#allocation14 + $0xc0] sm:$0xff] }
 0x791   :  { %9884 = vst [vmem:[#allocation28_spill] sm:$0xff] %v8979_v9  ;;  %9890 = vst [vmem:[#allocation34_spill] sm:$0xff] %v8999_v57  ;;  %v4225_v61 = vld [vmem:[#allocation14 + $0xf8] sm:$0xff] }
 0x792   :  { %9885 = vst [vmem:[#allocation29_spill] sm:$0xff] %v8982_v51  ;;  %v4229_v39 = vld [vmem:[#allocation14 + $0x118] sm:$0xff] }
 0x798   :  { %v7168_v28 = vpop.eup %7167 }
 0x799   :  { %v3595_v56 = vmul.f32 %v7168_v28, %v7166_v16  ;;  %v8927_v16 = vpack.c.bf16 %v3970_v62, %v3966_v24  ;;  %v3965_v28 = vld [vmem:[#allocation12 + $0x150] sm:$0xff]  ;;  %v8963_v24 = vpack.c.bf16 %v4199_v63, %v4195_v10  ;;  %v4201_v62 = vld [vmem:[#allocation14 + $0x38] sm:$0xff] }
 0x79a   :  { %v8933_v19 = vpack.c.bf16 %v3969_v8, %v3965_v28  ;;  %v8965_v28 = vpack.c.bf16 %v4201_v62, %v4197_v53  ;;  %v8967_v8 = vpack.c.bf16 %v4198_v14, %v4194_v46  ;;  %v4213_v10 = vld [vmem:[#allocation14 + $0x98] sm:$0xff]  ;;  %v4210_v46 = vld [vmem:[#allocation14 + $0x80] sm:$0xff] }
 0x79b   :  { %3815 = vmatmul.mubr.f32.vlgmr.msra.gmra.mrb[24].mxu0 %v3595_v56  ;;  %3596 = vst [vmem:[#allocation2] sm:$0x1] %v3595_v56  ;;  %3886 = vmatmul.mubr.f32.vlgmr.msra.gmra.mrb[24].mxu1 %v3595_v56  ;;  %v3976_v56 = vld [vmem:[#allocation12 + $0x1a8] sm:$0xff]  ;;  %v4217_v53 = vld [vmem:[#allocation14 + $0xb8] sm:$0xff]  ;;  %v4214_v14 = vld [vmem:[#allocation14 + $0xa0] sm:$0xff] }
 0x79c   :  { %6571 = vmatpush1.bf16.msra.mxu0 %v8871_v49  ;;  %6603 = vmatpush1.bf16.msra.mxu1 %v8873_v4  ;;  %v8937_v27 = vpack.c.bf16 %v3976_v56, %v3972_v21  ;;  %v4196_v21 = vld [vmem:[#allocation14 + $0x10] sm:$0xff]  ;;  %v8989_v62 = vpack.c.bf16 %v4217_v53, %v4213_v10 }
 0x79d   :  { %6573 = vmatprep.subr.bf16.mxu0 %v8875_v18  ;;  %6605 = vmatprep.subr.bf16.mxu1 %v8877_v7  ;;  %v4200_v56 = vld [vmem:[#allocation14 + $0x30] sm:$0xff] }
 0x79e   :  { %4051 = vmatprep.mubr.f32.mxu0 %v7945_v32  ;;  %4122 = vmatprep.mubr.f32.mxu1 %v7945_v32  ;;  %v8970_v54 = vpack.c.bf16 %v4200_v56, %v4196_v21  ;;  %9887 = vst [vmem:[#allocation31_spill] sm:$0xff] %v8989_v62  ;;  %v4212_v21 = vld [vmem:[#allocation14 + $0x90] sm:$0xff]  ;;  %v8992_v56 = vpack.c.bf16 %v4214_v14, %v4210_v46 }
 0x79f   :  { %v8995_v34 = vpack.c.bf16 %v4216_v58, %v4212_v21  ;;  %v4220_v53 = vld [vmem:[#allocation14 + $0xd0] sm:$0xff]  ;;  %v4227_v21 = vld [vmem:[#allocation14 + $0x108] sm:$0xff] }
 0x7a0   :  { %6575 = vmatpush1.bf16.msra.mxu0 %v8881_v38  ;;  %6607 = vmatpush1.bf16.msra.mxu1 %v8883_v26  ;;  %9888 = vst [vmem:[#allocation32_spill] sm:$0xff] %v8992_v56  ;;  %v4224_v46 = vld [vmem:[#allocation14 + $0xf0] sm:$0xff]  ;;  %v4231_v58 = vld [vmem:[#allocation14 + $0x128] sm:$0xff] }
 0x7a1   :  { %6577 = vmatprep.subr.bf16.mxu0 %v8887_v45  ;;  %6609 = vmatprep.subr.bf16.mxu1 %v8889_v44  ;;  %9889 = vst [vmem:[#allocation33_spill] sm:$0xff] %v8995_v34  ;;  %v9006_v14 = vpack.c.bf16 %v4224_v46, %v4220_v53  ;;  %v9011_v2 = vpack.c.bf16 %v4231_v58, %v4227_v21  ;;  %v4228_v53 = vld [vmem:[#allocation14 + $0x110] sm:$0xff]  ;;  %v4239_v21 = vld [vmem:[#allocation14 + $0x168] sm:$0xff]  ;;  %v4237_v58 = vld [vmem:[#allocation14 + $0x158] sm:$0xff] }
 0x7a2   :  { %v3919_v59 = vld [vmem:[#allocation2] sm:$0x1]  ;;  %v4232_v46 = vld [vmem:[#allocation14 + $0x130] sm:$0xff] }
 0x7a3   :  { %9893 = vst [vmem:[#allocation37_spill] sm:$0xff] %v9006_v14  ;;  %9894 = vst [vmem:[#allocation38_spill] sm:$0xff] %v9011_v2 }
 0x7a4   :  { %6579 = vmatpush1.bf16.msra.mxu0 %v8895_v47  ;;  %6611 = vmatpush1.bf16.msra.mxu1 %v8897_v33 }
 0x7a5   :  { %6581 = vmatprep.subr.bf16.mxu0 %v8901_v1  ;;  %6613 = vmatprep.subr.bf16.mxu1 %v8903_v12 }
 0x7a8   :  { %6583 = vmatpush1.bf16.msra.mxu0 %v8907_v40  ;;  %6615 = vmatpush1.bf16.msra.mxu1 %v8909_v15 }
 0x7a9   :  { %6585 = vmatprep.subr.bf16.mxu0 %v8913_v60  ;;  %6617 = vmatprep.subr.bf16.mxu1 %v8915_v52 }
 0x7ac   :  { %6587 = vmatpush1.bf16.msra.mxu0 %v8919_v37  ;;  %6619 = vmatpush1.bf16.msra.mxu1 %v8921_v31 }
 0x7ad   :  { %6589 = vmatprep.subr.bf16.mxu0 %v8925_v50  ;;  %6621 = vmatprep.subr.bf16.mxu1 %v8927_v16 }
 0x7b0   :  { %6591 = vmatpush1.bf16.msra.mxu0 %v8931_v30  ;;  %6623 = vmatpush1.bf16.msra.mxu1 %v8933_v19 }
 0x7b1   :  { %6593 = vmatprep.subr.bf16.mxu0 %v8937_v27  ;;  %6625 = vmatprep.subr.bf16.mxu1 %v8939_v41 }
 0x7b4   :  { %6595 = vmatpush1.bf16.msra.mxu0 %v8943_v55  ;;  %6627 = vmatpush1.bf16.msra.mxu1 %v8945_v17 }
 0x7b5   :  { %6597 = vmatprep.subr.bf16.mxu0 %v8949_v43  ;;  %6629 = vmatprep.subr.bf16.mxu1 %v8951_v36 }
 0x7b8   :  { %6599 = vmatpush1.bf16.msra.mxu0 %v8955_v20  ;;  %6631 = vmatpush1.bf16.msra.mxu1 %v8957_v6 }
 0x7b9   :  { %6633 = vmatprep.subr.bf16.mxu0 %v8963_v24  ;;  %6697 = vmatprep.subr.bf16.mxu1 %v8965_v28 }
 0x7bb   :  { %4052 = vmatmul.mubr.f32.vlgmr.msra.gmra.mrb[26].mxu0 %v3919_v59  ;;  %4123 = vmatmul.mubr.f32.vlgmr.msra.gmra.mrb[26].mxu1 %v3919_v59  ;;  %v4215_v59 = vld [vmem:[#allocation14 + $0xa8] sm:$0xff] }
 0x7bc   :  { %6635 = vmatpush1.bf16.msra.mxu0 %v8967_v8  ;;  %6699 = vmatpush1.bf16.msra.mxu1 %v8970_v54  ;;  %v8987_v63 = vpack.c.bf16 %v4215_v59, %v4211_v13  ;;  %v4222_v13 = vld [vmem:[#allocation14 + $0xe0] sm:$0xff]  ;;  %v9001_v59 = vpack.c.bf16 %v4225_v61, %v4221_v5  ;;  %v4233_v5 = vld [vmem:[#allocation14 + $0x138] sm:$0xff] }
 0x7bd   :  { %6637 = vmatprep.subr.bf16.mxu0 %v8975_v25  ;;  %6701 = vmatprep.subr.bf16.mxu1 %v8977_v35  ;;  %v9003_v10 = vpack.c.bf16 %v4222_v13, %v4218_v42  ;;  %v4226_v61 = vld [vmem:[#allocation14 + $0x100] sm:$0xff]  ;;  %v9013_v13 = vpack.c.bf16 %v4233_v5, %v4229_v39  ;;  %v4241_v39 = vld [vmem:[#allocation14 + $0x178] sm:$0xff] }
 0x7be   :  { %9886 = vst [vmem:[#allocation30_spill] sm:$0xff] %v8987_v63  ;;  %9891 = vst [vmem:[#allocation35_spill] sm:$0xff] %v9001_v59  ;;  %v4230_v42 = vld [vmem:[#allocation14 + $0x120] sm:$0xff]  ;;  %v4313_v35 = vld [vmem:[#allocation14 + $0x3b8] sm:$0xff] }
 0x7bf   :  { %9892 = vst [vmem:[#allocation36_spill] sm:$0xff] %v9003_v10  ;;  %9895 = vst [vmem:[#allocation39_spill] sm:$0xff] %v9013_v13  ;;  %v4234_v5 = vld [vmem:[#allocation14 + $0x140] sm:$0xff] }
 0x7c0   :  { %6639 = vmatpush1.bf16.msra.mxu0 %v8979_v9  ;;  %6703 = vmatpush1.bf16.msra.mxu1 %v8982_v51  ;;  %v4303_v51 = vld [vmem:[#allocation14 + $0x368] sm:$0xff]  ;;  %v4301_v9 = vld [vmem:[#allocation14 + $0x358] sm:$0xff] }
 0x7c1   :  { %6641 = vmatprep.subr.bf16.mxu0 %v8987_v63  ;;  %6705 = vmatprep.subr.bf16.mxu1 %v8989_v62  ;;  %v4299_v63 = vld [vmem:[#allocation14 + $0x348] sm:$0xff] }
 0x7c4   :  { %6643 = vmatpush1.bf16.msra.mxu0 %v8992_v56  ;;  %6707 = vmatpush1.bf16.msra.mxu1 %v8995_v34  ;;  %v9015_v34 = vpack.c.bf16 %v4230_v42, %v4226_v61  ;;  %v4238_v61 = vld [vmem:[#allocation14 + $0x160] sm:$0xff]  ;;  %v9025_v42 = vpack.c.bf16 %v4241_v39, %v4237_v58  ;;  %v4249_v58 = vld [vmem:[#allocation14 + $0x1b8] sm:$0xff] }
 0x7c5   :  { %6645 = vmatprep.subr.bf16.mxu0 %v8999_v57  ;;  %6709 = vmatprep.subr.bf16.mxu1 %v9001_v59  ;;  %v9018_v59 = vpack.c.bf16 %v4232_v46, %v4228_v53  ;;  %v9027_v57 = vpack.c.bf16 %v4238_v61, %v4234_v5  ;;  %v4236_v53 = vld [vmem:[#allocation14 + $0x150] sm:$0xff]  ;;  %v4242_v39 = vld [vmem:[#allocation14 + $0x180] sm:$0xff]  ;;  %v4277_v56 = vld [vmem:[#allocation14 + $0x298] sm:$0xff] }
 0x7c6   :  { %9896 = vst [vmem:[#allocation40_spill] sm:$0xff] %v9015_v34  ;;  %9899 = vst [vmem:[#allocation43_spill] sm:$0xff] %v9025_v42  ;;  %v4240_v46 = vld [vmem:[#allocation14 + $0x170] sm:$0xff]  ;;  %v4246_v5 = vld [vmem:[#allocation14 + $0x1a0] sm:$0xff] }
 0x7c7   :  { %9897 = vst [vmem:[#allocation41_spill] sm:$0xff] %v9018_v59  ;;  %9900 = vst [vmem:[#allocation44_spill] sm:$0xff] %v9027_v57 }
 0x7c8   :  { %6647 = vmatpush1.bf16.msra.mxu0 %v9003_v10  ;;  %6711 = vmatpush1.bf16.msra.mxu1 %v9006_v14  ;;  %v4235_v14 = vld [vmem:[#allocation14 + $0x148] sm:$0xff] }
 0x7c9   :  { %6649 = vmatprep.subr.bf16.mxu0 %v9011_v2  ;;  %6713 = vmatprep.subr.bf16.mxu1 %v9013_v13  ;;  %v9023_v10 = vpack.c.bf16 %v4239_v21, %v4235_v14  ;;  %v9030_v13 = vpack.c.bf16 %v4240_v46, %v4236_v53  ;;  %v4247_v14 = vld [vmem:[#allocation14 + $0x1a8] sm:$0xff]  ;;  %v4245_v21 = vld [vmem:[#allocation14 + $0x198] sm:$0xff]  ;;  %v9039_v2 = vpack.c.bf16 %v4246_v5, %v4242_v39  ;;  %v4244_v53 = vld [vmem:[#allocation14 + $0x190] sm:$0xff] }
 0x7ca   :  { %v9037_v61 = vpack.c.bf16 %v4249_v58, %v4245_v21  ;;  %v4248_v46 = vld [vmem:[#allocation14 + $0x1b0] sm:$0xff]  ;;  %v4257_v21 = vld [vmem:[#allocation14 + $0x1f8] sm:$0xff]  ;;  %v4250_v58 = vld [vmem:[#allocation14 + $0x1c0] sm:$0xff] }
 0x7cb   :  { %9898 = vst [vmem:[#allocation42_spill] sm:$0xff] %v9023_v10  ;;  %9901 = vst [vmem:[#allocation45_spill] sm:$0xff] %v9030_v13  ;;  %v4254_v39 = vld [vmem:[#allocation14 + $0x1e0] sm:$0xff] }
 0x7cc   :  { %6651 = vmatpush1.bf16.msra.mxu0 %v9015_v34  ;;  %6715 = vmatpush1.bf16.msra.mxu1 %v9018_v59  ;;  %v4243_v59 = vld [vmem:[#allocation14 + $0x188] sm:$0xff]  ;;  %9903 = vst [vmem:[#allocation47_spill] sm:$0xff] %v9037_v61  ;;  %9904 = vst [vmem:[#allocation48_spill] sm:$0xff] %v9039_v2 }
 0x7cd   :  { %6653 = vmatprep.subr.bf16.mxu0 %v9023_v10  ;;  %6717 = vmatprep.subr.bf16.mxu1 %v9025_v42  ;;  %v9035_v34 = vpack.c.bf16 %v4247_v14, %v4243_v59  ;;  %v9042_v42 = vpack.c.bf16 %v4248_v46, %v4244_v53  ;;  %v4255_v59 = vld [vmem:[#allocation14 + $0x1e8] sm:$0xff]  ;;  %v4253_v14 = vld [vmem:[#allocation14 + $0x1d8] sm:$0xff]  ;;  %v9051_v10 = vpack.c.bf16 %v4254_v39, %v4250_v58  ;;  %v4252_v53 = vld [vmem:[#allocation14 + $0x1d0] sm:$0xff] }
 0x7ce   :  { %v9049_v5 = vpack.c.bf16 %v4257_v21, %v4253_v14  ;;  %v4256_v46 = vld [vmem:[#allocation14 + $0x1f0] sm:$0xff]  ;;  %v4265_v14 = vld [vmem:[#allocation14 + $0x238] sm:$0xff]  ;;  %v4258_v21 = vld [vmem:[#allocation14 + $0x200] sm:$0xff] }
 0x7cf   :  { %9902 = vst [vmem:[#allocation46_spill] sm:$0xff] %v9035_v34  ;;  %9905 = vst [vmem:[#allocation49_spill] sm:$0xff] %v9042_v42  ;;  %v4262_v58 = vld [vmem:[#allocation14 + $0x220] sm:$0xff] }
 0x7d0   :  { %6655 = vmatpush1.bf16.msra.mxu0 %v9027_v57  ;;  %6719 = vmatpush1.bf16.msra.mxu1 %v9030_v13  ;;  %v4251_v13 = vld [vmem:[#allocation14 + $0x1c8] sm:$0xff]  ;;  %9907 = vst [vmem:[#allocation51_spill] sm:$0xff] %v9049_v5  ;;  %9908 = vst [vmem:[#allocation52_spill] sm:$0xff] %v9051_v10 }
 0x7d1   :  { %6657 = vmatprep.subr.bf16.mxu0 %v9035_v34  ;;  %6721 = vmatprep.subr.bf16.mxu1 %v9037_v61  ;;  %v9047_v57 = vpack.c.bf16 %v4255_v59, %v4251_v13  ;;  %v9054_v61 = vpack.c.bf16 %v4256_v46, %v4252_v53  ;;  %v4263_v13 = vld [vmem:[#allocation14 + $0x228] sm:$0xff]  ;;  %v4261_v59 = vld [vmem:[#allocation14 + $0x218] sm:$0xff]  ;;  %v9063_v34 = vpack.c.bf16 %v4262_v58, %v4258_v21  ;;  %v4260_v53 = vld [vmem:[#allocation14 + $0x210] sm:$0xff] }
 0x7d2   :  { %v9061_v39 = vpack.c.bf16 %v4265_v14, %v4261_v59  ;;  %v4264_v46 = vld [vmem:[#allocation14 + $0x230] sm:$0xff]  ;;  %v4273_v59 = vld [vmem:[#allocation14 + $0x278] sm:$0xff]  ;;  %v4266_v14 = vld [vmem:[#allocation14 + $0x240] sm:$0xff] }
 0x7d3   :  { %9906 = vst [vmem:[#allocation50_spill] sm:$0xff] %v9047_v57  ;;  %9909 = vst [vmem:[#allocation53_spill] sm:$0xff] %v9054_v61  ;;  %v4270_v21 = vld [vmem:[#allocation14 + $0x260] sm:$0xff] }
 0x7d4   :  { %6659 = vmatpush1.bf16.msra.mxu0 %v9039_v2  ;;  %6723 = vmatpush1.bf16.msra.mxu1 %v9042_v42  ;;  %v4259_v42 = vld [vmem:[#allocation14 + $0x208] sm:$0xff]  ;;  %9911 = vst [vmem:[#allocation55_spill] sm:$0xff] %v9061_v39  ;;  %9912 = vst [vmem:[#allocation56_spill] sm:$0xff] %v9063_v34 }
 0x7d5   :  { %6661 = vmatprep.subr.bf16.mxu0 %v9047_v57  ;;  %6725 = vmatprep.subr.bf16.mxu1 %v9049_v5  ;;  %v9059_v2 = vpack.c.bf16 %v4263_v13, %v4259_v42  ;;  %v9066_v5 = vpack.c.bf16 %v4264_v46, %v4260_v53  ;;  %v4271_v42 = vld [vmem:[#allocation14 + $0x268] sm:$0xff]  ;;  %v4269_v13 = vld [vmem:[#allocation14 + $0x258] sm:$0xff]  ;;  %v9075_v57 = vpack.c.bf16 %v4270_v21, %v4266_v14  ;;  %v4268_v53 = vld [vmem:[#allocation14 + $0x250] sm:$0xff] }
 0x7d6   :  { %v9073_v58 = vpack.c.bf16 %v4273_v59, %v4269_v13  ;;  %v4272_v46 = vld [vmem:[#allocation14 + $0x270] sm:$0xff]  ;;  %v4274_v13 = vld [vmem:[#allocation14 + $0x280] sm:$0xff] }
 0x7d7   :  { %9910 = vst [vmem:[#allocation54_spill] sm:$0xff] %v9059_v2  ;;  %9913 = vst [vmem:[#allocation57_spill] sm:$0xff] %v9066_v5  ;;  %v4278_v59 = vld [vmem:[#allocation14 + $0x2a0] sm:$0xff] }
 0x7d8   :  { %6663 = vmatpush1.bf16.msra.mxu0 %v9051_v10  ;;  %6727 = vmatpush1.bf16.msra.mxu1 %v9054_v61  ;;  %v4267_v61 = vld [vmem:[#allocation14 + $0x248] sm:$0xff]  ;;  %9915 = vst [vmem:[#allocation59_spill] sm:$0xff] %v9073_v58  ;;  %9916 = vst [vmem:[#allocation60_spill] sm:$0xff] %v9075_v57  ;;  %v9087_v21 = vpack.c.bf16 %v4278_v59, %v4274_v13  ;;  %v4284_v13 = vld [vmem:[#allocation14 + $0x2d0] sm:$0xff] }
 0x7d9   :  { %6665 = vmatprep.subr.bf16.mxu0 %v9059_v2  ;;  %6729 = vmatprep.subr.bf16.mxu1 %v9061_v39  ;;  %v9071_v10 = vpack.c.bf16 %v4271_v42, %v4267_v61  ;;  %v9078_v39 = vpack.c.bf16 %v4272_v46, %v4268_v53  ;;  %v4279_v2 = vld [vmem:[#allocation14 + $0x2a8] sm:$0xff]  ;;  %v4281_v42 = vld [vmem:[#allocation14 + $0x2b8] sm:$0xff]  ;;  %v4276_v53 = vld [vmem:[#allocation14 + $0x290] sm:$0xff] }
 0x7da   :  { %v9085_v14 = vpack.c.bf16 %v4281_v42, %v4277_v56  ;;  %9920 = vst [vmem:[#allocation64_spill] sm:$0xff] %v9087_v21  ;;  %v4280_v46 = vld [vmem:[#allocation14 + $0x2b0] sm:$0xff]  ;;  %v4282_v56 = vld [vmem:[#allocation14 + $0x2c0] sm:$0xff] }
 0x7db   :  { %9914 = vst [vmem:[#allocation58_spill] sm:$0xff] %v9071_v10  ;;  %9917 = vst [vmem:[#allocation61_spill] sm:$0xff] %v9078_v39  ;;  %v4286_v42 = vld [vmem:[#allocation14 + $0x2e0] sm:$0xff] }
 0x7dc   :  { %6667 = vmatpush1.bf16.msra.mxu0 %v9063_v34  ;;  %6731 = vmatpush1.bf16.msra.mxu1 %v9066_v5  ;;  %v4275_v34 = vld [vmem:[#allocation14 + $0x288] sm:$0xff]  ;;  %9919 = vst [vmem:[#allocation63_spill] sm:$0xff] %v9085_v14  ;;  %v9090_v5 = vpack.c.bf16 %v4280_v46, %v4276_v53  ;;  %v9098_v59 = vpack.c.bf16 %v4286_v42, %v4282_v56  ;;  %v4294_v56 = vld [vmem:[#allocation14 + $0x320] sm:$0xff]  ;;  %v4292_v42 = vld [vmem:[#allocation14 + $0x310] sm:$0xff] }
 0x7dd   :  { %6669 = vmatprep.subr.bf16.mxu0 %v9071_v10  ;;  %6733 = vmatprep.subr.bf16.mxu1 %v9073_v58  ;;  %v9082_v61 = vpack.c.bf16 %v4279_v2, %v4275_v34  ;;  %v4283_v10 = vld [vmem:[#allocation14 + $0x2c8] sm:$0xff]  ;;  %v4289_v34 = vld [vmem:[#allocation14 + $0x2f8] sm:$0xff] }
 0x7de   :  { %9921 = vst [vmem:[#allocation65_spill] sm:$0xff] %v9090_v5  ;;  %v4287_v58 = vld [vmem:[#allocation14 + $0x2e8] sm:$0xff]  ;;  %9924 = vst [vmem:[#allocation68_spill] sm:$0xff] %v9098_v59 }
 0x7df   :  { %9918 = vst [vmem:[#allocation62_spill] sm:$0xff] %v9082_v61  ;;  %v9093_v2 = vpack.c.bf16 %v4287_v58, %v4283_v10  ;;  %v4295_v53 = vld [vmem:[#allocation14 + $0x328] sm:$0xff]  ;;  %v4297_v58 = vld [vmem:[#allocation14 + $0x338] sm:$0xff] }
 0x7e0   :  { %6671 = vmatpush1.bf16.msra.mxu0 %v9075_v57  ;;  %6735 = vmatpush1.bf16.msra.mxu1 %v9078_v39  ;;  %v4285_v57 = vld [vmem:[#allocation14 + $0x2d8] sm:$0xff]  ;;  %v4288_v39 = vld [vmem:[#allocation14 + $0x2f0] sm:$0xff] }
 0x7e1   :  { %6673 = vmatprep.subr.bf16.mxu0 %v9082_v61  ;;  %6737 = vmatprep.subr.bf16.mxu1 %v9085_v14  ;;  %9922 = vst [vmem:[#allocation66_spill] sm:$0xff] %v9093_v2  ;;  %v9095_v62 = vpack.c.bf16 %v4289_v34, %v4285_v57  ;;  %v4291_v61 = vld [vmem:[#allocation14 + $0x308] sm:$0xff]  ;;  %v9102_v46 = vpack.c.bf16 %v4288_v39, %v4284_v13  ;;  %v4293_v57 = vld [vmem:[#allocation14 + $0x318] sm:$0xff]  ;;  %v4290_v34 = vld [vmem:[#allocation14 + $0x300] sm:$0xff] }
 0x7e2   :  { %v9104_v10 = vpack.c.bf16 %v4295_v53, %v4291_v61  ;;  %v9107_v14 = vpack.c.bf16 %v4297_v58, %v4293_v57  ;;  %v4305_v39 = vld [vmem:[#allocation14 + $0x378] sm:$0xff]  ;;  %v9116_v13 = vpack.c.bf16 %v4303_v51, %v4299_v63  ;;  %v4298_v53 = vld [vmem:[#allocation14 + $0x340] sm:$0xff]  ;;  %v4300_v58 = vld [vmem:[#allocation14 + $0x350] sm:$0xff] }
 0x7e3   :  { %9923 = vst [vmem:[#allocation67_spill] sm:$0xff] %v9095_v62  ;;  %9925 = vst [vmem:[#allocation69_spill] sm:$0xff] %v9102_v46  ;;  %v4302_v57 = vld [vmem:[#allocation14 + $0x360] sm:$0xff] }
 0x7e4   :  { %6675 = vmatpush1.bf16.msra.mxu0 %v9087_v21  ;;  %6739 = vmatpush1.bf16.msra.mxu1 %v9090_v5  ;;  %9926 = vst [vmem:[#allocation70_spill] sm:$0xff] %v9104_v10  ;;  %9927 = vst [vmem:[#allocation71_spill] sm:$0xff] %v9107_v14  ;;  %v4296_v21 = vld [vmem:[#allocation14 + $0x330] sm:$0xff] }
 0x7e5   :  { %6677 = vmatprep.subr.bf16.mxu0 %v9093_v2  ;;  %6741 = vmatprep.subr.bf16.mxu1 %v9095_v62  ;;  %v9110_v2 = vpack.c.bf16 %v4294_v56, %v4290_v34  ;;  %v9114_v61 = vpack.c.bf16 %v4296_v21, %v4292_v42  ;;  %v9119_v62 = vpack.c.bf16 %v4305_v39, %v4301_v9  ;;  %v4304_v5 = vld [vmem:[#allocation14 + $0x370] sm:$0xff]  ;;  %v4311_v34 = vld [vmem:[#allocation14 + $0x3a8] sm:$0xff]  ;;  %v4309_v56 = vld [vmem:[#allocation14 + $0x398] sm:$0xff] }
 0x7e6   :  { %v9126_v51 = vpack.c.bf16 %v4304_v5, %v4300_v58  ;;  %v4306_v21 = vld [vmem:[#allocation14 + $0x380] sm:$0xff]  ;;  %v4308_v42 = vld [vmem:[#allocation14 + $0x390] sm:$0xff]  ;;  %v9131_v39 = vpack.c.bf16 %v4313_v35, %v4309_v56 }
 0x7e7   :  { %9928 = vst [vmem:[#allocation72_spill] sm:$0xff] %v9110_v2  ;;  %9929 = vst [vmem:[#allocation73_spill] sm:$0xff] %v9114_v61  ;;  %v4310_v9 = vld [vmem:[#allocation14 + $0x3a0] sm:$0xff]  ;;  %v4316_v56 = vld [vmem:[#allocation14 + $0x3d0] sm:$0xff] }
 0x7e8   :  { %6679 = vmatpush1.bf16.msra.mxu0 %v9098_v59  ;;  %6743 = vmatpush1.bf16.msra.mxu1 %v9102_v46  ;;  %9930 = vst [vmem:[#allocation74_spill] sm:$0xff] %v9119_v62  ;;  %v4307_v59 = vld [vmem:[#allocation14 + $0x388] sm:$0xff]  ;;  %v9122_v46 = vpack.c.bf16 %v4302_v57, %v4298_v53  ;;  %v4317_v53 = vld [vmem:[#allocation14 + $0x3d8] sm:$0xff]  ;;  %v4314_v58 = vld [vmem:[#allocation14 + $0x3c0] sm:$0xff] }
 0x7e9   :  { %6681 = vmatprep.subr.bf16.mxu0 %v9104_v10  ;;  %6745 = vmatprep.subr.bf16.mxu1 %v9107_v14  ;;  %v9128_v63 = vpack.c.bf16 %v4311_v34, %v4307_v59  ;;  %v4312_v14 = vld [vmem:[#allocation14 + $0x3b0] sm:$0xff]  ;;  %v4315_v10 = vld [vmem:[#allocation14 + $0x3c8] sm:$0xff]  ;;  %v4321_v57 = vld [vmem:[#allocation14 + $0x3f8] sm:$0xff] }
 0x7ea   :  { %v9138_v5 = vpack.c.bf16 %v4312_v14, %v4308_v42  ;;  %v4318_v35 = vld [vmem:[#allocation14 + $0x3e0] sm:$0xff]  ;;  %v9143_v34 = vpack.c.bf16 %v4321_v57, %v4317_v53 }
 0x7ec   :  { %6683 = vmatpush1.bf16.msra.mxu0 %v9110_v2  ;;  %6747 = vmatpush1.bf16.msra.mxu1 %v9114_v61  ;;  %v4319_v2 = vld [vmem:[#allocation14 + $0x3e8] sm:$0xff]  ;;  %v9134_v61 = vpack.c.bf16 %v4310_v9, %v4306_v21  ;;  %9931 = vst [vmem:[#allocation75_spill] sm:$0xff] %v9138_v5  ;;  %9933 = vst [vmem:[#allocation77_spill] sm:$0xff] %v9143_v34  ;;  %v9146_v21 = vpack.c.bf16 %v4318_v35, %v4314_v58 }
 0x7ed   :  { %6685 = vmatprep.subr.bf16.mxu0 %v9116_v13  ;;  %6749 = vmatprep.subr.bf16.mxu1 %v9119_v62  ;;  %v9140_v59 = vpack.c.bf16 %v4319_v2, %v4315_v10  ;;  %v4320_v62 = vld [vmem:[#allocation14 + $0x3f0] sm:$0xff]  ;;  %v3728_v2 = vld [vmem:[%s9327_s7] sm:$0xf] }
 0x7ee   :  { %9934 = vst [vmem:[#allocation81_spill] sm:$0xff] %v9146_v21  ;;  %v9150_v14 = vpack.c.bf16 %v4320_v62, %v4316_v56  ;;  %v3733_v10 = vrot.slane %v3728_v2, %v9881_v48  ;;  %v3737_v9 = vrot.slane %v3728_v2, %v9882_v3 }
 0x7ef   :  { %9932 = vst [vmem:[#allocation76_spill] sm:$0xff] %v9140_v59 }
 0x7f0   :  { %6687 = vmatpush1.bf16.msra.mxu0 %v9122_v46  ;;  %6751 = vmatpush1.bf16.msra.mxu1 %v9126_v51  ;;  %9935 = vst [vmem:[#allocation79_spill] sm:$0xff] %v9150_v14 }
 0x7f1   :  { %6689 = vmatprep.subr.bf16.mxu0 %v9128_v63  ;;  %6753 = vmatprep.subr.bf16.mxu1 %v9131_v39 }
 0x7f4   :  { %6691 = vmatpush1.bf16.msra.mxu0 %v9134_v61  ;;  %6755 = vmatpush1.bf16.msra.mxu1 %v9138_v5 }
 0x7f5   :  { %6693 = vmatprep.subr.bf16.mxu0 %v9140_v59  ;;  %6757 = vmatprep.subr.bf16.mxu1 %v9143_v34 }
 0x7f8   :  { %6695 = vmatpush1.bf16.msra.mxu0 %v9146_v21  ;;  %6759 = vmatpush1.bf16.msra.mxu1 %v9150_v14  ;;  %v3741_v21 = vrot.slane %v3728_v2, %v9666_v22 }
 0x7f9   :  { %6761 = vmatprep.subr.bf16.mxu0 %v8855_v23  ;;  %6793 = vmatprep.subr.bf16.mxu1 %v8857_v0  ;;  %v3745_v23 = vrot.slane %v3728_v2, %v9665_v11 }
 0x86e   :  { %v3816_v62 = vpop.f32.mrb[24].mxu0  ;;  %v3887_v42 = vpop.f32.mrb[24].mxu1 }
 0x86f   :  { %v3817_v53 = vadd.f32 %v3816_v62, %v3733_v10  ;;  %v3818_v57 = vpop.f32.mrb[25].mxu0  ;;  %v3889_v58 = vpop.f32.mrb[25].mxu1  ;;  %v3888_v59 = vadd.f32 %v3887_v42, %v3741_v21 }
 0x870   :  { %v3819_v35 = vadd.f32 %v3818_v57, %v3737_v9  ;;  %v3890_v0 = vadd.f32 %v3889_v58, %v3745_v23 }
 0x871   :  { %v5284_v56 = vmul.f32 -1.442695, %v3817_v53 }
 0x872   :  { %v5285_v14 = vmul.f32 -1.442695, %v3819_v35  ;;  %v5286_v34 = vmul.f32 -1.442695, %v3890_v0 }
 0x873   :  { %7169 = vpow2.f32 %v5284_v56  ;;  %v3599_v56 = vld [vmem:[#allocation3 + $0x1] sm:$0x1] }
 0x874   :  { %7171 = vpow2.f32 %v5285_v14 }
 0x875   :  { %7173 = vpow2.f32 %v5286_v34 }
 0x876   :  { %7175 = vtanh.f32 %v3888_v59 }
 0x87d   :  { %v7170_v48 = vpop.eup %7169 }
 0x87e   :  { %v7172_v5 = vpop.eup %7171  ;;  %v3895_v3 = vadd.f32 1.0, %v7170_v48 }
 0x87f   :  { %v3901_v10 = vadd.f32 1.0, %v7172_v5  ;;  %v7174_v9 = vpop.eup %7173 }
 0x880   :  { %7177 = vrcp.f32 %v3895_v3  ;;  %v7176_v62 = vpop.eup %7175  ;;  %v3908_v14 = vadd.f32 1.0, %v7174_v9 }
 0x881   :  { %7179 = vrcp.f32 %v3901_v10 }
 0x882   :  { %7181 = vrcp.f32 %v3908_v14 }
 0x88a   :  { %v7178_v53 = vpop.eup %7177 }
 0x88b   :  { %v7180_v57 = vpop.eup %7179  ;;  %v3912_v35 = vmul.f32 %v7178_v53, %v7176_v62  ;;  %v3922_v62 = vld [vmem:[#allocation5 + $0x6] ss:$8 sm:$0xf] }
 0x88c   :  { %v3911_v58 = vmul.f32 %v7180_v57, %v3599_v56  ;;  %v7182_v53 = vpop.eup %7181 }
 0x88e   :  { %v3913_v23 = vadd.f32 %v3912_v35, %v3911_v58  ;;  %v4053_v2 = vpop.f32.mrb[26].mxu0  ;;  %v4124_v0 = vpop.f32.mrb[26].mxu1 }
 0x88f   :  { %v4055_v21 = vpop.f32.mrb[27].mxu0  ;;  %v4126_v42 = vpop.f32.mrb[27].mxu1 }
 0x890   :  { %7183 = vtanh.f32 %v3913_v23  ;;  %3917 = vst [vmem:[#allocation3 + $0x1] sm:$0x1] %v3913_v23  ;;  %v4133_v48 = vcombine.low %v4053_v2, %v4055_v21  ;;  %v4134_v5 = vcombine.low %v4124_v0, %v4126_v42 }
 0x892   :  { %v4141_v3 = vrot.slane %v4133_v48, %v7936_v29  ;;  %v4148_v59 = vrot.slane %v4134_v5, %v7936_v29 }
 0x894   :  { %v4149_v34 = vcombine.low %v4141_v3, %v4148_v59 }
 0x896   :  { %v4156_v10 = vrot.slane %v4149_v34, %v7936_v29 }
 0x898   :  { %v4158_v9 = vadd.f32 %v4156_v10, %v3922_v62 }
 0x89a   :  { %v7184_v57 = vpop.eup %7183  ;;  %v5287_v35 = vmul.f32 -1.442695, %v4158_v9  ;;  %v4166_v56 = vrot.slane %v4158_v9, 1  ;;  %v4177_v23 = vrot.slane %v4158_v9, 3  ;;  %v4174_v42 = vrot.slane %v4158_v9, 2 }
 0x89b   :  { %v3915_v14 = vmul.f32 %v7184_v57, %v7182_v53  ;;  %v3920_v53 = vld [vmem:[#allocation3] sm:$0x1] }
 0x89c   :  { %7185 = vpow2.f32 %v5287_v35  ;;  %v5288_v58 = vmul.f32 -1.442695, %v4166_v56  ;;  %v5289_v2 = vmul.f32 -1.442695, %v4177_v23 }
 0x89d   :  { %3918 = vst [vmem:[#allocation4 + $0x5] sm:$0x1] %v3915_v14  ;;  %3916 = vst [vmem:[#allocation2 + $0x1] sm:$0x1] %v3915_v14 }
 0x89e   :  { %7187 = vpow2.f32 %v5288_v58 }
 0x89f   :  { %7189 = vpow2.f32 %v5289_v2  ;;  %v9970_v2 = vld [vmem:[#allocation61_spill] sm:$0xff] }
 0x8a4   :  { %v4192_v0 = vld [vmem:[#allocation2 + $0x1] sm:$0x1] }
 0x8a5   :  { %4408 = vmatprep.mubr.f32.mxu0 %v4192_v0  ;;  %4479 = vmatprep.mubr.f32.mxu1 %v4192_v0  ;;  %v9971_v0 = vld [vmem:[#allocation62_spill] sm:$0xff] }
 0x8a6   :  { %v7186_v21 = vpop.eup %7185 }
 0x8a7   :  { %v4162_v48 = vadd.f32 1.0, %v7186_v21  ;;  %v9972_v21 = vld [vmem:[#allocation63_spill] sm:$0xff] }
 0x8a8   :  { %v7188_v5 = vpop.eup %7187 }
 0x8a9   :  { %7191 = vrcp.f32 %v4162_v48  ;;  %v4171_v3 = vadd.f32 1.0, %v7188_v5  ;;  %v7190_v59 = vpop.eup %7189  ;;  %v9974_v48 = vld [vmem:[#allocation65_spill] sm:$0xff]  ;;  %v9975_v5 = vld [vmem:[#allocation66_spill] sm:$0xff] }
 0x8aa   :  { %7193 = vtanh.f32 %v4174_v42  ;;  %v4182_v57 = vadd.f32 1.0, %v7190_v59  ;;  %v9973_v42 = vld [vmem:[#allocation64_spill] sm:$0xff] }
 0x8ab   :  { %7195 = vrcp.f32 %v4171_v3  ;;  %v9976_v3 = vld [vmem:[#allocation67_spill] sm:$0xff]  ;;  %v9977_v59 = vld [vmem:[#allocation68_spill] sm:$0xff] }
 0x8ac   :  { %7197 = vrcp.f32 %v4182_v57  ;;  %v9982_v57 = vld [vmem:[#allocation73_spill] sm:$0xff] }
 0x8b3   :  { %v7192_v34 = vpop.eup %7191 }
 0x8b4   :  { %v7194_v10 = vpop.eup %7193 }
 0x8b5   :  { %v7196_v62 = vpop.eup %7195  ;;  %v4186_v56 = vmul.f32 %v7194_v10, %v7192_v34  ;;  %v9978_v34 = vld [vmem:[#allocation69_spill] sm:$0xff]  ;;  %v9979_v10 = vld [vmem:[#allocation70_spill] sm:$0xff] }
 0x8b6   :  { %v4185_v35 = vmul.f32 %v7196_v62, %v3920_v53  ;;  %v7198_v9 = vpop.eup %7197  ;;  %v9980_v62 = vld [vmem:[#allocation71_spill] sm:$0xff]  ;;  %v9981_v53 = vld [vmem:[#allocation72_spill] sm:$0xff] }
 0x8b8   :  { %v4187_v14 = vadd.f32 %v4186_v56, %v4185_v35  ;;  %v9983_v35 = vld [vmem:[#allocation74_spill] sm:$0xff]  ;;  %v9984_v56 = vld [vmem:[#allocation75_spill] sm:$0xff] }
 0x8ba   :  { %7199 = vtanh.f32 %v4187_v14  ;;  %4191 = vst [vmem:[#allocation3] sm:$0x1] %v4187_v14  ;;  %v9985_v14 = vld [vmem:[#allocation76_spill] sm:$0xff] }
 0x8c4   :  { %v7200_v58 = vpop.eup %7199 }
 0x8c5   :  { %v4189_v23 = vmul.f32 %v7200_v58, %v7198_v9  ;;  %v9986_v9 = vld [vmem:[#allocation77_spill] sm:$0xff] }
 0x8c6   :  { %v9987_v58 = vld [vmem:[#allocation81_spill] sm:$0xff] }
 0x8c7   :  { %4409 = vmatmul.mubr.f32.vlgmr.msra.gmra.mrb[28].mxu0 %v4189_v23  ;;  %4190 = vst [vmem:[#allocation2] sm:$0x1] %v4189_v23  ;;  %4480 = vmatmul.mubr.f32.vlgmr.msra.gmra.mrb[28].mxu1 %v4189_v23  ;;  %v9990_v23 = vld [vmem:[#allocation80_spill] sm:$0xff] }
 0x8c8   :  { %6763 = vmatpush1.bf16.msra.mxu0 %v8871_v49  ;;  %6795 = vmatpush1.bf16.msra.mxu1 %v8873_v4  ;;  %v9936_v4 = vld [vmem:[#allocation27_spill] sm:$0xff] }
 0x8c9   :  { %6765 = vmatprep.subr.bf16.mxu0 %v8875_v18  ;;  %6797 = vmatprep.subr.bf16.mxu1 %v8877_v7  ;;  %v9937_v18 = vld [vmem:[#allocation28_spill] sm:$0xff]  ;;  %v9938_v7 = vld [vmem:[#allocation29_spill] sm:$0xff] }
 0x8ca   :  { %4645 = vmatprep.mubr.f32.mxu0 %v7945_v32  ;;  %4716 = vmatprep.mubr.f32.mxu1 %v7945_v32 }
 0x8cc   :  { %6767 = vmatpush1.bf16.msra.mxu0 %v8881_v38  ;;  %6799 = vmatpush1.bf16.msra.mxu1 %v8883_v26  ;;  %v9939_v38 = vld [vmem:[#allocation30_spill] sm:$0xff]  ;;  %v9940_v26 = vld [vmem:[#allocation31_spill] sm:$0xff] }
 0x8cd   :  { %6769 = vmatprep.subr.bf16.mxu0 %v8887_v45  ;;  %6801 = vmatprep.subr.bf16.mxu1 %v8889_v44  ;;  %v9941_v45 = vld [vmem:[#allocation32_spill] sm:$0xff]  ;;  %v9942_v44 = vld [vmem:[#allocation33_spill] sm:$0xff] }
 0x8ce   :  { %v4513_v49 = vld [vmem:[#allocation2] sm:$0x1] }
 0x8d0   :  { %6771 = vmatpush1.bf16.msra.mxu0 %v8895_v47  ;;  %6803 = vmatpush1.bf16.msra.mxu1 %v8897_v33  ;;  %v9943_v47 = vld [vmem:[#allocation34_spill] sm:$0xff]  ;;  %v9944_v33 = vld [vmem:[#allocation35_spill] sm:$0xff] }
 0x8d1   :  { %6773 = vmatprep.subr.bf16.mxu0 %v8901_v1  ;;  %6805 = vmatprep.subr.bf16.mxu1 %v8903_v12  ;;  %v9945_v1 = vld [vmem:[#allocation36_spill] sm:$0xff]  ;;  %v9946_v12 = vld [vmem:[#allocation37_spill] sm:$0xff] }
 0x8d4   :  { %6775 = vmatpush1.bf16.msra.mxu0 %v8907_v40  ;;  %6807 = vmatpush1.bf16.msra.mxu1 %v8909_v15  ;;  %v9947_v40 = vld [vmem:[#allocation38_spill] sm:$0xff]  ;;  %v9948_v15 = vld [vmem:[#allocation39_spill] sm:$0xff] }
 0x8d5   :  { %6777 = vmatprep.subr.bf16.mxu0 %v8913_v60  ;;  %6809 = vmatprep.subr.bf16.mxu1 %v8915_v52  ;;  %v9949_v60 = vld [vmem:[#allocation40_spill] sm:$0xff]  ;;  %v9950_v52 = vld [vmem:[#allocation41_spill] sm:$0xff] }
 0x8d8   :  { %6779 = vmatpush1.bf16.msra.mxu0 %v8919_v37  ;;  %6811 = vmatpush1.bf16.msra.mxu1 %v8921_v31  ;;  %v9951_v37 = vld [vmem:[#allocation42_spill] sm:$0xff]  ;;  %v9952_v31 = vld [vmem:[#allocation43_spill] sm:$0xff] }
 0x8d9   :  { %6781 = vmatprep.subr.bf16.mxu0 %v8925_v50  ;;  %6813 = vmatprep.subr.bf16.mxu1 %v8927_v16  ;;  %v9953_v50 = vld [vmem:[#allocation44_spill] sm:$0xff]  ;;  %v9954_v16 = vld [vmem:[#allocation45_spill] sm:$0xff] }
 0x8dc   :  { %6783 = vmatpush1.bf16.msra.mxu0 %v8931_v30  ;;  %6815 = vmatpush1.bf16.msra.mxu1 %v8933_v19  ;;  %v9955_v30 = vld [vmem:[#allocation46_spill] sm:$0xff]  ;;  %v9956_v19 = vld [vmem:[#allocation47_spill] sm:$0xff] }
 0x8dd   :  { %6785 = vmatprep.subr.bf16.mxu0 %v8937_v27  ;;  %6817 = vmatprep.subr.bf16.mxu1 %v8939_v41  ;;  %v9957_v27 = vld [vmem:[#allocation48_spill] sm:$0xff]  ;;  %v9958_v41 = vld [vmem:[#allocation49_spill] sm:$0xff] }
 0x8e0   :  { %6787 = vmatpush1.bf16.msra.mxu0 %v8943_v55  ;;  %6819 = vmatpush1.bf16.msra.mxu1 %v8945_v17  ;;  %v9959_v55 = vld [vmem:[#allocation50_spill] sm:$0xff]  ;;  %v9960_v17 = vld [vmem:[#allocation51_spill] sm:$0xff] }
 0x8e1   :  { %6789 = vmatprep.subr.bf16.mxu0 %v8949_v43  ;;  %6821 = vmatprep.subr.bf16.mxu1 %v8951_v36  ;;  %v9961_v43 = vld [vmem:[#allocation52_spill] sm:$0xff]  ;;  %v9962_v36 = vld [vmem:[#allocation53_spill] sm:$0xff] }
 0x8e4   :  { %6791 = vmatpush1.bf16.msra.mxu0 %v8955_v20  ;;  %6823 = vmatpush1.bf16.msra.mxu1 %v8957_v6  ;;  %v9963_v20 = vld [vmem:[#allocation54_spill] sm:$0xff]  ;;  %v9964_v6 = vld [vmem:[#allocation55_spill] sm:$0xff] }
 0x8e5   :  { %6825 = vmatprep.subr.bf16.mxu0 %v8963_v24  ;;  %6889 = vmatprep.subr.bf16.mxu1 %v8965_v28  ;;  %v9965_v24 = vld [vmem:[#allocation56_spill] sm:$0xff]  ;;  %v9966_v28 = vld [vmem:[#allocation57_spill] sm:$0xff] }
 0x8e7   :  { %4646 = vmatmul.mubr.f32.vlgmr.msra.gmra.mrb[30].mxu0 %v4513_v49  ;;  %4717 = vmatmul.mubr.f32.vlgmr.msra.gmra.mrb[30].mxu1 %v4513_v49 }
 0x8e8   :  { %6827 = vmatpush1.bf16.msra.mxu0 %v8967_v8  ;;  %6891 = vmatpush1.bf16.msra.mxu1 %v8970_v54  ;;  %v9967_v8 = vld [vmem:[#allocation58_spill] sm:$0xff]  ;;  %v9968_v54 = vld [vmem:[#allocation59_spill] sm:$0xff] }
 0x8e9   :  { %6829 = vmatprep.subr.bf16.mxu0 %v8975_v25  ;;  %6893 = vmatprep.subr.bf16.mxu1 %v9936_v4  ;;  %v9969_v25 = vld [vmem:[#allocation60_spill] sm:$0xff] }
 0x8ec   :  { %6831 = vmatpush1.bf16.msra.mxu0 %v9937_v18  ;;  %6895 = vmatpush1.bf16.msra.mxu1 %v9938_v7 }
 0x8ed   :  { %6833 = vmatprep.subr.bf16.mxu0 %v9939_v38  ;;  %6897 = vmatprep.subr.bf16.mxu1 %v9940_v26 }
 0x8f0   :  { %6835 = vmatpush1.bf16.msra.mxu0 %v9941_v45  ;;  %6899 = vmatpush1.bf16.msra.mxu1 %v9942_v44 }
 0x8f1   :  { %6837 = vmatprep.subr.bf16.mxu0 %v9943_v47  ;;  %6901 = vmatprep.subr.bf16.mxu1 %v9944_v33 }
 0x8f4   :  { %6839 = vmatpush1.bf16.msra.mxu0 %v9945_v1  ;;  %6903 = vmatpush1.bf16.msra.mxu1 %v9946_v12 }
 0x8f5   :  { %6841 = vmatprep.subr.bf16.mxu0 %v9947_v40  ;;  %6905 = vmatprep.subr.bf16.mxu1 %v9948_v15 }
 0x8f8   :  { %6843 = vmatpush1.bf16.msra.mxu0 %v9949_v60  ;;  %6907 = vmatpush1.bf16.msra.mxu1 %v9950_v52 }
 0x8f9   :  { %6845 = vmatprep.subr.bf16.mxu0 %v9951_v37  ;;  %6909 = vmatprep.subr.bf16.mxu1 %v9952_v31 }
 0x8fc   :  { %6847 = vmatpush1.bf16.msra.mxu0 %v9953_v50  ;;  %6911 = vmatpush1.bf16.msra.mxu1 %v9954_v16 }
 0x8fd   :  { %6849 = vmatprep.subr.bf16.mxu0 %v9955_v30  ;;  %6913 = vmatprep.subr.bf16.mxu1 %v9956_v19  ;;  %v4193_v19 = vld [vmem:[#allocation3 + $0x1] sm:$0x1] }
 0x900   :  { %6851 = vmatpush1.bf16.msra.mxu0 %v9957_v27  ;;  %6915 = vmatpush1.bf16.msra.mxu1 %v9958_v41 }
 0x901   :  { %6853 = vmatprep.subr.bf16.mxu0 %v9959_v55  ;;  %6917 = vmatprep.subr.bf16.mxu1 %v9960_v17 }
 0x904   :  { %6855 = vmatpush1.bf16.msra.mxu0 %v9961_v43  ;;  %6919 = vmatpush1.bf16.msra.mxu1 %v9962_v36 }
 0x905   :  { %6857 = vmatprep.subr.bf16.mxu0 %v9963_v20  ;;  %6921 = vmatprep.subr.bf16.mxu1 %v9964_v6 }
 0x908   :  { %6859 = vmatpush1.bf16.msra.mxu0 %v9965_v24  ;;  %6923 = vmatpush1.bf16.msra.mxu1 %v9966_v28 }
 0x909   :  { %6861 = vmatprep.subr.bf16.mxu0 %v9967_v8  ;;  %6925 = vmatprep.subr.bf16.mxu1 %v9968_v54 }
 0x90c   :  { %6863 = vmatpush1.bf16.msra.mxu0 %v9969_v25  ;;  %6927 = vmatpush1.bf16.msra.mxu1 %v9970_v2  ;;  %v4516_v2 = vld [vmem:[#allocation5 + $0x7] ss:$8 sm:$0xf] }
 0x90d   :  { %6865 = vmatprep.subr.bf16.mxu0 %v9971_v0  ;;  %6929 = vmatprep.subr.bf16.mxu1 %v9972_v21 }
 0x910   :  { %6867 = vmatpush1.bf16.msra.mxu0 %v9973_v42  ;;  %6931 = vmatpush1.bf16.msra.mxu1 %v9974_v48 }
 0x911   :  { %6869 = vmatprep.subr.bf16.mxu0 %v9975_v5  ;;  %6933 = vmatprep.subr.bf16.mxu1 %v9976_v3 }
 0x914   :  { %6871 = vmatpush1.bf16.msra.mxu0 %v9977_v59  ;;  %6935 = vmatpush1.bf16.msra.mxu1 %v9978_v34 }
 0x915   :  { %6873 = vmatprep.subr.bf16.mxu0 %v9979_v10  ;;  %6937 = vmatprep.subr.bf16.mxu1 %v9980_v62 }
 0x918   :  { %6875 = vmatpush1.bf16.msra.mxu0 %v9981_v53  ;;  %6939 = vmatpush1.bf16.msra.mxu1 %v9982_v57 }
 0x919   :  { %6877 = vmatprep.subr.bf16.mxu0 %v9116_v13  ;;  %6941 = vmatprep.subr.bf16.mxu1 %v9983_v35  ;;  %v9988_v13 = vld [vmem:[#allocation79_spill] sm:$0xff] }
 0x91c   :  { %6879 = vmatpush1.bf16.msra.mxu0 %v9122_v46  ;;  %6943 = vmatpush1.bf16.msra.mxu1 %v9126_v51  ;;  %v4322_v46 = vld [vmem:[%s9327_s7] sm:$0xf] }
 0x91d   :  { %6881 = vmatprep.subr.bf16.mxu0 %v9128_v63  ;;  %6945 = vmatprep.subr.bf16.mxu1 %v9131_v39  ;;  %v9989_v51 = vld [vmem:[#allocation78_spill] sm:$0xff]  ;;  %v4331_v39 = vrot.slane %v4322_v46, %v9990_v23  ;;  %v4339_v44 = vrot.slane %v4322_v46, %v9665_v11  ;;  %v4335_v33 = vrot.slane %v4322_v46, %v9666_v22 }
 0x91e   :  { %v4327_v63 = vrot.slane %v4322_v46, %v9989_v51  ;;  %v4514_v46 = vld [vmem:[#allocation3] sm:$0x1] }
 0x920   :  { %6883 = vmatpush1.bf16.msra.mxu0 %v9134_v61  ;;  %6947 = vmatpush1.bf16.msra.mxu1 %v9984_v56 }
 0x921   :  { %6885 = vmatprep.subr.bf16.mxu0 %v9985_v14  ;;  %6949 = vmatprep.subr.bf16.mxu1 %v9986_v9 }
 0x924   :  { %6887 = vmatpush1.bf16.msra.mxu0 %v9987_v58  ;;  %6951 = vmatpush1.bf16.msra.mxu1 %v9988_v13 }
 0x99a   :  { %v4410_v49 = vpop.f32.mrb[28].mxu0  ;;  %v4481_v61 = vpop.f32.mrb[28].mxu1 }
 0x99b   :  { %v4411_v4 = vadd.f32 %v4410_v49, %v4327_v63  ;;  %v4412_v18 = vpop.f32.mrb[29].mxu0  ;;  %v4483_v7 = vpop.f32.mrb[29].mxu1  ;;  %v4482_v12 = vadd.f32 %v4481_v61, %v4335_v33  ;;  %v5111_v33 = vld [vmem:[#allocation15 + $0x18] sm:$0xff] }
 0x99c   :  { %v4413_v38 = vadd.f32 %v4412_v18, %v4331_v39  ;;  %v4484_v47 = vadd.f32 %v4483_v7, %v4339_v44  ;;  %v7472_v44 = vmov 0.0|0.0  }
 0x99d   :  { %v5290_v26 = vmul.f32 -1.442695, %v4411_v4  ;;  %6952 = vmatprep.subr.bf16.mxu0 %v7472_v44 }
 0x99e   :  { %v5291_v45 = vmul.f32 -1.442695, %v4413_v38  ;;  %v5292_v1 = vmul.f32 -1.442695, %v4484_v47  ;;  %v5108_v38 = vld [vmem:[#allocation15] sm:$0xff]  ;;  %v5110_v47 = vld [vmem:[#allocation15 + $0x10] sm:$0xff] }
 0x99f   :  { %7201 = vpow2.f32 %v5290_v26  ;;  %v5109_v26 = vld [vmem:[#allocation15 + $0x8] sm:$0xff] }
 0x9a0   :  { %7203 = vpow2.f32 %v5291_v45  ;;  %v6953_v45 = vpack.c.bf16 %v5109_v26, %v5108_v38 }
 0x9a1   :  { %7205 = vpow2.f32 %v5292_v1  ;;  %v6956_v1 = vpack.c.bf16 %v5111_v33, %v5110_v47 }
 0x9a2   :  { %7207 = vtanh.f32 %v4482_v12  ;;  %v5112_v12 = vld [vmem:[#allocation15 + $0x20] sm:$0xff] }
 0x9a9   :  { %v7202_v40 = vpop.eup %7201 }
 0x9aa   :  { %v7204_v15 = vpop.eup %7203  ;;  %v4489_v60 = vadd.f32 1.0, %v7202_v40  ;;  %v5113_v40 = vld [vmem:[#allocation15 + $0x28] sm:$0xff] }
 0x9ab   :  { %v4495_v52 = vadd.f32 1.0, %v7204_v15  ;;  %v7206_v37 = vpop.eup %7205  ;;  %v6959_v15 = vpack.c.bf16 %v5113_v40, %v5112_v12 }
 0x9ac   :  { %7209 = vrcp.f32 %v4489_v60  ;;  %v7208_v31 = vpop.eup %7207  ;;  %v4502_v27 = vadd.f32 1.0, %v7206_v37  ;;  %v5114_v60 = vld [vmem:[#allocation15 + $0x30] sm:$0xff] }
 0x9ad   :  { %7211 = vrcp.f32 %v4495_v52  ;;  %v5115_v52 = vld [vmem:[#allocation15 + $0x38] sm:$0xff] }
 0x9ae   :  { %7213 = vrcp.f32 %v4502_v27  ;;  %v6962_v37 = vpack.c.bf16 %v5115_v52, %v5114_v60 }
 0x9b6   :  { %v7210_v50 = vpop.eup %7209 }
 0x9b7   :  { %v7212_v16 = vpop.eup %7211  ;;  %v4506_v30 = vmul.f32 %v7210_v50, %v7208_v31  ;;  %v5116_v31 = vld [vmem:[#allocation15 + $0x40] sm:$0xff]  ;;  %v5117_v50 = vld [vmem:[#allocation15 + $0x48] sm:$0xff] }
 0x9b8   :  { %v4505_v41 = vmul.f32 %v7212_v16, %v4193_v19  ;;  %v7214_v21 = vpop.eup %7213  ;;  %v6965_v16 = vpack.c.bf16 %v5117_v50, %v5116_v31  ;;  %v5119_v19 = vld [vmem:[#allocation15 + $0x58] sm:$0xff] }
 0x9ba   :  { %v4507_v55 = vadd.f32 %v4506_v30, %v4505_v41  ;;  %v4647_v17 = vpop.f32.mrb[30].mxu0  ;;  %v4718_v43 = vpop.f32.mrb[30].mxu1  ;;  %v5118_v30 = vld [vmem:[#allocation15 + $0x50] sm:$0xff]  ;;  %v5120_v41 = vld [vmem:[#allocation15 + $0x60] sm:$0xff] }
 0x9bb   :  { %v4649_v36 = vpop.f32.mrb[31].mxu0  ;;  %v4720_v20 = vpop.f32.mrb[31].mxu1  ;;  %v6968_v27 = vpack.c.bf16 %v5119_v19, %v5118_v30 }
 0x9bc   :  { %7215 = vtanh.f32 %v4507_v55  ;;  %4511 = vst [vmem:[#allocation3 + $0x1] sm:$0x1] %v4507_v55  ;;  %v4727_v6 = vcombine.low %v4647_v17, %v4649_v36  ;;  %v4728_v24 = vcombine.low %v4718_v43, %v4720_v20  ;;  %v5121_v55 = vld [vmem:[#allocation15 + $0x68] sm:$0xff]  ;;  %v5122_v43 = vld [vmem:[#allocation15 + $0x70] sm:$0xff]  ;;  %v5123_v36 = vld [vmem:[#allocation15 + $0x78] sm:$0xff] }
 0x9bd   :  { %v6971_v17 = vpack.c.bf16 %v5121_v55, %v5120_v41  ;;  %v6974_v20 = vpack.c.bf16 %v5123_v36, %v5122_v43 }
 0x9be   :  { %v4735_v28 = vrot.slane %v4727_v6, %v7936_v29  ;;  %v4742_v8 = vrot.slane %v4728_v24, %v7936_v29  ;;  %v4916_v6 = vld [vmem:[%s9327_s7] sm:$0xf]  ;;  %s7474_s7 = smov [#allocation18]  }
 0x9bf   :  { %v4921_v24 = vrot.slane %v4916_v6, %v9989_v51  ;;  %s5222_s17 = sshll.u32 %s7474_s7, 4  ;;  %s5223_s17 = int_to_ptr.vmem [resolvable:$true] %s5222_s17 }
 0x9c0   :  { %v4743_v54 = vcombine.low %v4735_v28, %v4742_v8  ;;  %v4925_v28 = vrot.slane %v4916_v6, %v9990_v23  ;;  %s7382_s19 = scalar_lea.vmem %s5223_s17, 32  ;;  %p7387_p7 = scmp.lt.s32.totalorder %s5223_s17, %s5223_s17 }
 0x9c1   :  { %p7383_p6 = scmp.ne.s32.totalorder %s5223_s17, %s7382_s19  ;;  %p7388_p8 = scmp.lt.s32.totalorder %s7382_s19, %s7382_s19 }
 0x9c2   :  { %v4750_v25 = vrot.slane %v4743_v54, %v7936_v29 }
 0x9c3   :  { %p7389_p9 = por %p7388_p8, %p7387_p7 }
 0x9c4   :  { %v4752_v0 = vadd.f32 %v4750_v25, %v4516_v2 }
 0x9c5   :  { %p7390_p10 = pnand %p7389_p9, %p7383_p6 }
 0x9c6   :  { %v7216_v42 = vpop.eup %7215  ;;  %v5293_v48 = vmul.f32 -1.442695, %v4752_v0  ;;  %v4760_v5 = vrot.slane %v4752_v0, 1  ;;  %v4771_v34 = vrot.slane %v4752_v0, 3  ;;  %v4768_v57 = vrot.slane %v4752_v0, 2 }
 0x9c7   :  { %v4509_v3 = vmul.f32 %v7216_v42, %v7214_v21 }
 0x9c8   :  { %7217 = vpow2.f32 %v5293_v48  ;;  %v5294_v59 = vmul.f32 -1.442695, %v4760_v5  ;;  %v5295_v10 = vmul.f32 -1.442695, %v4771_v34  ;;  %v4933_v48 = vrot.slane %v4916_v6, %v9665_v11 }
 0x9c9   :  { %4512 = vst [vmem:[#allocation4 + $0x6] sm:$0x1] %v4509_v3  ;;  %4510 = vst [vmem:[#allocation2 + $0x1] sm:$0x1] %v4509_v3  ;;  %v4929_v3 = vrot.slane %v4916_v6, %v9666_v22 }
 0x9ca   :  { %7219 = vpow2.f32 %v5294_v59 }
 0x9cb   :  { %7221 = vpow2.f32 %v5295_v10 }
 0x9d0   :  { %v4786_v62 = vld [vmem:[#allocation2 + $0x1] sm:$0x1] }
 0x9d1   :  { %5002 = vmatprep.mubr.f32.mxu0 %v4786_v62  ;;  %5073 = vmatprep.mubr.f32.mxu1 %v4786_v62 }
 0x9d2   :  { %v7218_v53 = vpop.eup %7217 }
 0x9d3   :  { %v4756_v29 = vadd.f32 1.0, %v7218_v53 }
 0x9d4   :  { %v7220_v35 = vpop.eup %7219 }
 0x9d5   :  { %7223 = vrcp.f32 %v4756_v29  ;;  %v4765_v56 = vadd.f32 1.0, %v7220_v35  ;;  %v7222_v14 = vpop.eup %7221 }
 0x9d6   :  { %7225 = vtanh.f32 %v4768_v57  ;;  %v4776_v63 = vadd.f32 1.0, %v7222_v14 }
 0x9d7   :  { %7227 = vrcp.f32 %v4765_v56  ;;  %v4787_v56 = vld [vmem:[#allocation3 + $0x1] sm:$0x1] }
 0x9d8   :  { %7229 = vrcp.f32 %v4776_v63 }
 0x9df   :  { %v7224_v9 = vpop.eup %7223 }
 0x9e0   :  { %v7226_v58 = vpop.eup %7225 }
 0x9e1   :  { %v7228_v13 = vpop.eup %7227  ;;  %v4780_v49 = vmul.f32 %v7226_v58, %v7224_v9 }
 0x9e2   :  { %v4779_v39 = vmul.f32 %v7228_v13, %v4514_v46  ;;  %v7230_v4 = vpop.eup %7229 }
 0x9e4   :  { %v4781_v61 = vadd.f32 %v4780_v49, %v4779_v39 }
 0x9e6   :  { %7231 = vtanh.f32 %v4781_v61  ;;  %4785 = vst [vmem:[#allocation3] sm:$0x1] %v4781_v61 }
 0x9f0   :  { %v7232_v18 = vpop.eup %7231 }
 0x9f1   :  { %v4783_v7 = vmul.f32 %v7232_v18, %v7230_v4 }
 0x9f3   :  { %5003 = vmatmul.mubr.f32.vlgmr.msra.gmra.mrb[32].mxu0 %v4783_v7  ;;  %4784 = vst [vmem:[#allocation2] sm:$0x1] %v4783_v7  ;;  %5074 = vmatmul.mubr.f32.vlgmr.msra.gmra.mrb[32].mxu1 %v4783_v7 }
 0x9f4   :  { %6954 = vmatpush3.bf16.msra.mxu0 %v6953_v45  ;;  %5349 = vmatprep.mubr.msk.f32.mxu0 %vm7473_vm0, %v7945_v32 }
 0x9f5   :  { %6955 = vmatprep.subr.bf16.mxu0 %v7472_v44 }
 0x9f8   :  { %6957 = vmatpush3.bf16.msra.mxu0 %v6956_v1 }
 0x9f9   :  { %6958 = vmatprep.subr.bf16.mxu0 %v7472_v44 }
 0x9fc   :  { %6960 = vmatpush3.bf16.msra.mxu0 %v6959_v15 }
 0x9fd   :  { %6961 = vmatprep.subr.bf16.mxu0 %v7472_v44 }
 0xa00   :  { %6963 = vmatpush3.bf16.msra.mxu0 %v6962_v37 }
 0xa01   :  { %6964 = vmatprep.subr.bf16.mxu0 %v7472_v44 }
 0xa04   :  { %6966 = vmatpush3.bf16.msra.mxu0 %v6965_v16 }
 0xa05   :  { %6967 = vmatprep.subr.bf16.mxu0 %v7472_v44 }
 0xa08   :  { %6969 = vmatpush3.bf16.msra.mxu0 %v6968_v27 }
 0xa09   :  { %6970 = vmatprep.subr.bf16.mxu0 %v7472_v44 }
 0xa0c   :  { %6972 = vmatpush3.bf16.msra.mxu0 %v6971_v17 }
 0xa0d   :  { %6973 = vmatprep.subr.bf16.mxu0 %v7472_v44 }
 0xa10   :  { %6975 = vmatpush3.bf16.msra.mxu0 %v6974_v20 }
 0xac6   :  { %v5004_v8 = vpop.f32.mrb[32].mxu0  ;;  %v5075_v54 = vpop.f32.mrb[32].mxu1 }
 0xac7   :  { %v5005_v25 = vadd.f32 %v5004_v8, %v4921_v24  ;;  %v5006_v2 = vpop.f32.mrb[33].mxu0  ;;  %v5077_v0 = vpop.f32.mrb[33].mxu1  ;;  %v5076_v34 = vadd.f32 %v5075_v54, %v4929_v3 }
 0xac8   :  { %v5007_v21 = vadd.f32 %v5006_v2, %v4925_v28  ;;  %v5078_v5 = vadd.f32 %v5077_v0, %v4933_v48 }
 0xac9   :  { %v5296_v42 = vmul.f32 -1.442695, %v5005_v25 }
 0xaca   :  { %v5297_v32 = vmul.f32 -1.442695, %v5007_v21  ;;  %v5298_v59 = vmul.f32 -1.442695, %v5078_v5 }
 0xacb   :  { %7233 = vpow2.f32 %v5296_v42 }
 0xacc   :  { %7235 = vpow2.f32 %v5297_v32 }
 0xacd   :  { %7237 = vpow2.f32 %v5298_v59 }
 0xace   :  { %7239 = vtanh.f32 %v5076_v34 }
 0xad5   :  { %v7234_v51 = vpop.eup %7233 }
 0xad6   :  { %v7236_v10 = vpop.eup %7235  ;;  %v5083_v23 = vadd.f32 1.0, %v7234_v51 }
 0xad7   :  { %v5089_v62 = vadd.f32 1.0, %v7236_v10  ;;  %v7238_v53 = vpop.eup %7237 }
 0xad8   :  { %7241 = vrcp.f32 %v5083_v23  ;;  %v7240_v57 = vpop.eup %7239  ;;  %v5096_v14 = vadd.f32 1.0, %v7238_v53 }
 0xad9   :  { %7243 = vrcp.f32 %v5089_v62 }
 0xada   :  { %7245 = vrcp.f32 %v5096_v14 }
 0xae2   :  { %v7242_v29 = vpop.eup %7241 }
 0xae3   :  { %v7244_v35 = vpop.eup %7243  ;;  %v5100_v11 = vmul.f32 %v7242_v29, %v7240_v57 }
 0xae4   :  { %v5099_v9 = vmul.f32 %v7244_v35, %v4787_v56  ;;  %v7246_v13 = vpop.eup %7245 }
 0xae6   :  { %v5101_v58 = vadd.f32 %v5100_v11, %v5099_v9 }
 0xae8   :  { %7247 = vtanh.f32 %v5101_v58  ;;  %5105 = vst [vmem:[#allocation3 + $0x1] sm:$0x1] %v5101_v58 }
 0xaef   :  { %v5204_v22 = vld [vmem:[#allocation3] sm:$0x3] }
 0xaf0   :  { %5205 = vst [vmem:[#allocation20] sm:$0x3] %v5204_v22 }
 0xaf2   :  { %v7248_v46 = vpop.eup %7247 }
 0xaf3   :  { %v5103_v63 = vmul.f32 %v7248_v46, %v7246_v13 }
 0xaf5   :  { %5106 = vst [vmem:[#allocation4 + $0x7] sm:$0x1] %v5103_v63  ;;  %5104 = vst [vmem:[#allocation2 + $0x1] sm:$0x1] %v5103_v63 }
 0xafc   :  { %v5107_v39 = vld [vmem:[#allocation4] sm:$0xff]  ;;  %v5202_v49 = vld [vmem:[#allocation2] sm:$0x3] }
 0xafd   :  { %5350 = vmatmul.mubr.f32.vlgmr.msra.gmra.mrb[34].mxu0 %v5107_v39  ;;  %5203 = vst [vmem:[#allocation18] sm:$0x3] %v5202_v49 }
 0xafe   :  { %7393 = shalt.err (!%p7390_p10)
}
 0xaff   :  { %s7394_s27 = scalar_lea.hbm %s9331_s11, 32 }
 0xb00   :  { %p7395_p11 = scmp.ne.s32.totalorder %s9331_s11, %s7394_s27  ;;  %p7398_p12 = scmp.lt.u32.totalorder %s7394_s27, %s9331_s11 }
 0xb02   :  { %p7400_p13 = pnand %p7398_p12, %p7395_p11 }
 0xb04   :  { %7403 = shalt.err (!%p7400_p13)
}
 0xb05   :  { %5225 = dma.vmem_to_hbm [thread:$0]  %s5223_s17, 32, %s9331_s11, [#allocation19]  }
 0xb06   :  { %s7475_s4 = smov [#allocation20]  }
 0xb07   :  { %s5232_s16 = sshll.u32 %s7475_s4, 4  ;;  %s5233_s16 = int_to_ptr.vmem [resolvable:$true] %s5232_s16 }
 0xb08   :  { %s7404_s23 = scalar_lea.vmem %s5233_s16, 32  ;;  %p7409_p1 = scmp.lt.s32.totalorder %s5233_s16, %s5233_s16 }
 0xb09   :  { %p7405_p0 = scmp.ne.s32.totalorder %s5233_s16, %s7404_s23  ;;  %p7410_p2 = scmp.lt.s32.totalorder %s7404_s23, %s7404_s23 }
 0xb0b   :  { %p7411_p3 = por %p7410_p2, %p7409_p1 }
 0xb0d   :  { %p7412_p4 = pnand %p7411_p3, %p7405_p0 }
 0xb0f   :  { %7415 = shalt.err (!%p7412_p4)
}
 0xb10   :  { %s7416_s3 = scalar_lea.hbm %s9332_s12, 32 }
 0xb11   :  { %p7417_p5 = scmp.ne.s32.totalorder %s9332_s12, %s7416_s3  ;;  %p7420_p6 = scmp.lt.u32.totalorder %s7416_s3, %s9332_s12 }
 0xb13   :  { %p7422_p7 = pnand %p7420_p6, %p7417_p5 }
 0xb15   :  { %7425 = shalt.err (!%p7422_p7)
}
 0xb16   :  { %5235 = dma.vmem_to_hbm [thread:$0]  %s5233_s16, 32, %s9332_s12, [#allocation19]   ;;  %v5299_v61 = vld [vmem:[%s9329_s9] ss:$0 sm:$0xff] }
 0xb17   :  { %s7476_s0 = smov [#allocation17]  }
 0xb18   :  { %s5212_s18 = sshll.u32 %s7476_s0, 4  ;;  %s5213_s18 = int_to_ptr.vmem [resolvable:$true] %s5212_s18 }
 0xb19   :  { %s7426_s7 = scalar_lea.vmem %s5213_s18, 128  ;;  %p7431_p9 = scmp.lt.s32.totalorder %s5213_s18, %s5213_s18 }
 0xb1a   :  { %p7427_p8 = scmp.ne.s32.totalorder %s5213_s18, %s7426_s7  ;;  %p7432_p10 = scmp.lt.s32.totalorder %s7426_s7, %s7426_s7 }
 0xb1c   :  { %p7433_p11 = por %p7432_p10, %p7431_p9 }
 0xb1e   :  { %p7434_p12 = pnand %p7433_p11, %p7427_p8 }
 0xbd0   :  { %v5197_v4 = vpop.f32.mrb[34].mxu0 }
 0xbd1   :  { %v5198_v18 = vadd.f32 %v5299_v61, %v5197_v4  ;;  %v5351_v7 = vpop.f32.mrb[35].mxu0 }
 0xbd3   :  { %5201 = vst [vmem:[#allocation17] sm:$0xff] %v5198_v18 }
 0xbd4   :  { %7437 = shalt.err (!%p7434_p12)
}
 0xbd5   :  { %s7438_s19 = scalar_lea.hbm %s9330_s10, 128 }
 0xbd6   :  { %p7439_p13 = scmp.ne.s32.totalorder %s9330_s10, %s7438_s19  ;;  %p7442_p0 = scmp.lt.u32.totalorder %s7438_s19, %s9330_s10 }
 0xbd8   :  { %p7444_p1 = pnand %p7442_p0, %p7439_p13 }
 0xbda   :  { %7447 = shalt.err (!%p7444_p1)
}
 0xbdb   :  { %5215 = dma.vmem_to_hbm [thread:$0]  %s5213_s18, 128, %s9330_s10, [#allocation8]  }
 0xbdc   :  { %7456 = dma.done.wait [#allocation8], 128  }
 0xbdd   :  { %7457 = vsyncadd [#allocation8], 4294967168 }
 0xbde   :  { %7458 = dma.done.wait [#allocation19], 64  }
 0xbdf   :  { %7459 = vsyncadd [#allocation19], 4294967232 }
 0xbe0   :  { %5245 = vsyncpa [#allocation7], 1 }
 0xbe1   :  { %5246 = vsyncpa [#allocation10], 1 }
 0xbe2   :  { %5247 = vsyncpa [#allocation13], 1 }
 0xbe3   :  { %5248 = vsyncpa [#allocation16], 1 }
 0xbe4   :  { %5249 = vsyncpa [#allocation8], 1 }
 0xbe5   :  { %5250 = vsyncpa [#allocation19], 1 }

</bundles_post_ra>
